<compile_context>
chip_gen: v5e
topology: v5e:2x2
jax: 0.10.0
libtpu: 0.0.40
codegen_flags: <defaults>
</compile_context>

<pallas_src>
import jax
import jax.numpy as jnp
from jax import lax
from jax.experimental import pallas as pl
from jax.experimental.pallas import tpu as pltpu


# ----------------------------- Fused kernel ---------------------------------

def _fused_expand_norm_kernel(x_ref, w_ref, perm_ref, avg_ref, g_ref, b_ref,
                              o_ref, y_ref):
    # x_ref   : (C, TH*W)     input channels x (h, w) columns of this tile
    # w_ref   : (16C, C)      1x1-conv weight, (p1 p2 c)-major rows (resident)
    # perm_ref: (16W, 16W)    0/1 block-diag perm  (p1, p2*W+w) -> (p1, 4w+p2)
    # avg_ref : (16W, 16W)    block-diag 1/(4W): per-4W-segment mean via MXU
    # g_ref   : (1, 16W)      LayerNorm gamma tiled 4x (post-perm lane positions)
    # b_ref   : (1, 16W)      LayerNorm beta  tiled 4x
    # o_ref   : (C, TH, 16W)  output slab  out[b*C:(b+1)*C, h tile, :]
    # y_ref   : (16C, TH*W)   VMEM scratch holding the conv result
    C, THW = x_ref.shape
    TH = o_ref.shape[1]
    W = THW // TH
    Wn16 = o_ref.shape[2]                               # 16*W = 4*dim

    # (1) 1x1 conv as ONE wide MXU matmul (N = TH*W lanes), f32 accumulation.
    #     Park the 16x-expanded intermediate in VMEM scratch so only small
    #     (C, 16W) slabs are ever live in registers.
    y_ref[...] = jnp.dot(w_ref[...], x_ref[...],
                         preferred_element_type=jnp.float32)

    perm = perm_ref[...]
    avg = avg_ref[...]
    # Hoist the sublane broadcast of gamma / beta out of the per-h loop.
    gamma = jnp.broadcast_to(g_ref[...], (C, Wn16))
    beta = jnp.broadcast_to(b_ref[...], (C, Wn16))

    for t in range(TH):                                 # static unroll
        # (2) Gather the 16 output-channel groups of this h column onto lanes.
        #     Column order (p1, p2, w): each p1's LayerNorm group is a
        #     contiguous 4W segment, so statistics can be taken pre-perm.
        m = jnp.concatenate(
            [y_ref[g * C:(g + 1) * C, t * W:(t + 1) * W] for g in range(16)],
            axis=-1)                                    # (C, 16W) f32
        # (3) Segmented LayerNorm (biased variance, eps=1e-5) via block-diag
        #     averaging matmuls: reductions ride the idle MXU, no relayout.
        mu = jnp.dot(m, avg, preferred_element_type=jnp.float32)
        d = m - mu
        var = jnp.dot(d * d, avg, preferred_element_type=jnp.float32)
        zn = d * lax.rsqrt(var + 1e-5)
        # (4) In-register einops rearrange: exact 0/1 permutation matmul
        #     mapping (p1, p2*W + w) -> (p1, 4w + p2), the final '(w p2)' order.
        v = jnp.dot(zn, perm, preferred_element_type=jnp.float32)   # (C, 16W)
        # (5) One lane-dense (C, 128-lane) store for all 4 p1 rows of this h.
        o_ref[:, t, :] = (v * gamma + beta).astype(o_ref.dtype)


# ----------------------------- Module forward --------------------------------

def final_patch_expand_x4(x, conv_w, gamma, beta, *, dim_scale=4, h_tile=None):
    """x: (B, C, H, W); conv_w: (16*C, C) (Conv2d weight squeezed); gamma/beta: (C,)."""
    B, C, H, W = x.shape
    p = dim_scale
    assert p == 4, "module uses 16*dim output channels => dim_scale == 4"
    assert conv_w.shape == (16 * C, C)
    assert p * W == C, "nn.LayerNorm(dim) on the NCHW output requires dim_scale * W == dim"
    Wn = p * W                      # == dim : LayerNorm width
    Wn16 = p * Wn                   # == 16W : lanes per h row-group in the output

    TH = H if h_tile is None else h_tile
    assert H % TH == 0
    assert TH == H or (TH % 8 == 0 and (TH * W) % 128 == 0), \
        "h tile must keep the last-two block dims (8,128)-legal"

    # Free row-major reshape of the (16x smaller) input: no wrapper transpose.
    x2 = x.reshape(B, C, H * W).astype(jnp.float32)
    w = conv_w.astype(jnp.float32)

    # 0/1 permutation, block-diagonal over the 4 p1 segments:
    # source col p1*4W + (p2*W + w)  ->  dest col p1*4W + (4*w + p2).
    src = jnp.arange(Wn16)
    p1 = src // Wn
    s = src % Wn
    dst = p1 * Wn + (s % W) * p + s // W
    perm = (dst[:, None] == jnp.arange(Wn16)[None, :]).astype(jnp.float32)   # (16W,16W)
    # Block-diagonal per-4W-segment averaging matrix (LayerNorm statistics).
    seg = jnp.arange(Wn16) // Wn
    avg = (seg[:, None] == seg[None, :]).astype(jnp.float32) / Wn            # (16W,16W)

    g_t = jnp.tile(gamma.astype(jnp.float32), p).reshape(1, Wn16)
    b_t = jnp.tile(beta.astype(jnp.float32), p).reshape(1, Wn16)

    out = pl.pallas_call(
        _fused_expand_norm_kernel,
        out_shape=jax.ShapeDtypeStruct((B * C, H, Wn16), x.dtype),
        grid_spec=pltpu.PrefetchScalarGridSpec(
            num_scalar_prefetch=0,
            grid=(B, H // TH),
            in_specs=[
                pl.BlockSpec((None, C, TH * W), lambda b, ht: (b, 0, ht)),   # x tile
                pl.BlockSpec((16 * C, C), lambda b, ht: (0, 0)),             # weight (resident)
                pl.BlockSpec((Wn16, Wn16), lambda b, ht: (0, 0)),            # permutation (resident)
                pl.BlockSpec((Wn16, Wn16), lambda b, ht: (0, 0)),            # averaging (resident)
                pl.BlockSpec((1, Wn16), lambda b, ht: (0, 0)),               # gamma (tiled)
                pl.BlockSpec((1, Wn16), lambda b, ht: (0, 0)),               # beta  (tiled)
            ],
            out_specs=pl.BlockSpec((C, TH, Wn16), lambda b, ht: (b, ht, 0)),
            scratch_shapes=[pltpu.VMEM((16 * C, TH * W), jnp.float32)],
        ),
        compiler_params=pltpu.CompilerParams(
            dimension_semantics=("parallel", "parallel")),
    )(x2, w, perm, avg, g_t, b_t)

    # (B*C, H, 16W) is row-major identical to (B, C, 4H, 4W): free reshape.
    return out.reshape(B, C, p * H, p * W)


# ----------------------------- Pure-JAX reference ----------------------------

def reference(x, conv_w, gamma, beta, p=4):
    B, C, H, W = x.shape
    y = jnp.einsum('bchw,oc->bohw', x, conv_w)         # 1x1 conv, no bias
    y = y.reshape(B, p, p, C, H, W)                    # (b, p1, p2, c, h, w)
    y = jnp.transpose(y, (0, 3, 4, 1, 5, 2)).reshape(B, C, H * p, W * p)
    mean = y.mean(-1, keepdims=True)
    var = ((y - mean) ** 2).mean(-1, keepdims=True)
    return (y - mean) / jnp.sqrt(var + 1e-5) * gamma + beta


# ----------------------------- Main -------------------------------------------

if __name__ == "__main__":
    dim = 32
    B, H, W = 2, 8, 8          # 4*W == dim so the module's LayerNorm is valid
    key = jax.random.PRNGKey(0)
    k_x, k_w, k_g, k_b = jax.random.split(key, 4)

    x = jax.random.normal(k_x, (B, dim, H, W), dtype=jnp.float32)
    # Conv2d(dim, 16*dim, 1, bias=False) weight is (16*dim, dim, 1, 1) -> squeeze.
    conv_w = 0.05 * jax.random.normal(k_w, (16 * dim, dim), dtype=jnp.float32)
    gamma = 1.0 + 0.1 * jax.random.normal(k_g, (dim,), dtype=jnp.float32)
    beta = 0.1 * jax.random.normal(k_b, (dim,), dtype=jnp.float32)

    fwd = jax.jit(final_patch_expand_x4)
    out = jax.block_until_ready(fwd(x, conv_w, gamma, beta))

    ref = jax.block_until_ready(reference(x, conv_w, gamma, beta, p=4))
    assert out.shape == (B, dim, 4 * H, 4 * W)
    assert jnp.allclose(out, ref, atol=1e-4, rtol=1e-4)

    print("KERNEL_OK")
</pallas_src>

<mosaic_0001>
module attributes {stable_mosaic.version = 11 : i64} {
  func.func @_fused_expand_norm_kernel(%arg0: i32, %arg1: i32, %arg2: memref<1x32x64xf32, #tpu.memory_space<vmem>>, %arg3: memref<512x32xf32, #tpu.memory_space<vmem>>, %arg4: memref<128x128xf32, #tpu.memory_space<vmem>>, %arg5: memref<128x128xf32, #tpu.memory_space<vmem>>, %arg6: memref<1x128xf32, #tpu.memory_space<vmem>>, %arg7: memref<1x128xf32, #tpu.memory_space<vmem>>, %arg8: memref<32x8x128xf32, #tpu.memory_space<vmem>>, %arg9: memref<512x64xf32, #tpu.memory_space<vmem>>) attributes {dimension_semantics = [#tpu.dimension_semantics<parallel>, #tpu.dimension_semantics<parallel>], iteration_bounds = array<i64: 2, 1>, scalar_prefetch = 0 : i64, scratch_operands = 1 : i64, tpu.core_type = #tpu.core_type<tc>, window_params = [{transform_indices = @transform_0, window_bounds = array<i64: 1, 32, 64>}, {pipeline_mode = #tpu.pipeline_mode<synchronous>, transform_indices = @transform_1, window_bounds = array<i64: 512, 32>}, {pipeline_mode = #tpu.pipeline_mode<synchronous>, transform_indices = @transform_2, window_bounds = array<i64: 128, 128>}, {pipeline_mode = #tpu.pipeline_mode<synchronous>, transform_indices = @transform_3, window_bounds = array<i64: 128, 128>}, {pipeline_mode = #tpu.pipeline_mode<synchronous>, transform_indices = @transform_4, window_bounds = array<i64: 1, 128>}, {pipeline_mode = #tpu.pipeline_mode<synchronous>, transform_indices = @transform_5, window_bounds = array<i64: 1, 128>}, {transform_indices = @transform_6, window_bounds = array<i64: 32, 8, 128>}]} {
    %c0 = arith.constant 0 : index
    %c0_0 = arith.constant 0 : index
    %0 = vector.load %arg3[%c0, %c0_0] : memref<512x32xf32, #tpu.memory_space<vmem>>, vector<512x32xf32>
    %c0_1 = arith.constant 0 : index
    %c0_2 = arith.constant 0 : index
    %c0_3 = arith.constant 0 : index
    %1 = vector.load %arg2[%c0_1, %c0_2, %c0_3] : memref<1x32x64xf32, #tpu.memory_space<vmem>>, vector<1x32x64xf32>
    %2 = vector.shape_cast %1 : vector<1x32x64xf32> to vector<32x64xf32>
    %cst = arith.constant dense<0.000000e+00> : vector<512x64xf32>
    %3 = tpu.matmul %0, %2, %cst {dimension_numbers = #tpu.dot_dimension_numbers<[1], [0], [0], [1], [0, 0, 1, 1], [], []>} : vector<512x32xf32>, vector<32x64xf32>, vector<512x64xf32> -> vector<512x64xf32>
    %c0_4 = arith.constant 0 : index
    %c0_5 = arith.constant 0 : index
    %4 = vector.load %arg9[%c0_4, %c0_5] : memref<512x64xf32, #tpu.memory_space<vmem>>, vector<512x64xf32>
    tpu.vector_store %arg9[%c0_4, %c0_5], %3 {strides = array<i32>} : memref<512x64xf32, #tpu.memory_space<vmem>>, vector<512x64xf32>,
    %c0_6 = arith.constant 0 : index
    %c0_7 = arith.constant 0 : index
    %5 = vector.load %arg4[%c0_6, %c0_7] : memref<128x128xf32, #tpu.memory_space<vmem>>, vector<128x128xf32>
    %c0_8 = arith.constant 0 : index
    %c0_9 = arith.constant 0 : index
    %6 = vector.load %arg5[%c0_8, %c0_9] : memref<128x128xf32, #tpu.memory_space<vmem>>, vector<128x128xf32>
    %c0_10 = arith.constant 0 : index
    %c0_11 = arith.constant 0 : index
    %7 = vector.load %arg6[%c0_10, %c0_11] : memref<1x128xf32, #tpu.memory_space<vmem>>, vector<1x128xf32>
    %8 = vector.shape_cast %7 : vector<1x128xf32> to vector<1x128xf32>
    %9 = vector.broadcast %8 : vector<1x128xf32> to vector<32x128xf32>
    %c0_12 = arith.constant 0 : index
    %c0_13 = arith.constant 0 : index
    %10 = vector.load %arg7[%c0_12, %c0_13] : memref<1x128xf32, #tpu.memory_space<vmem>>, vector<1x128xf32>
    %11 = vector.shape_cast %10 : vector<1x128xf32> to vector<1x128xf32>
    %12 = vector.broadcast %11 : vector<1x128xf32> to vector<32x128xf32>
    %c0_14 = arith.constant 0 : index
    %c0_15 = arith.constant 0 : index
    %13 = vector.load %arg9[%c0_14, %c0_15] : memref<512x64xf32, #tpu.memory_space<vmem>>, vector<32x8xf32>
    %c32 = arith.constant 32 : index
    %c0_16 = arith.constant 0 : index
    %14 = vector.load %arg9[%c32, %c0_16] : memref<512x64xf32, #tpu.memory_space<vmem>>, vector<32x8xf32>
    %c64 = arith.constant 64 : index
    %c0_17 = arith.constant 0 : index
    %15 = vector.load %arg9[%c64, %c0_17] : memref<512x64xf32, #tpu.memory_space<vmem>>, vector<32x8xf32>
    %c96 = arith.constant 96 : index
    %c0_18 = arith.constant 0 : index
    %16 = vector.load %arg9[%c96, %c0_18] : memref<512x64xf32, #tpu.memory_space<vmem>>, vector<32x8xf32>
    %c128 = arith.constant 128 : index
    %c0_19 = arith.constant 0 : index
    %17 = vector.load %arg9[%c128, %c0_19] : memref<512x64xf32, #tpu.memory_space<vmem>>, vector<32x8xf32>
    %c160 = arith.constant 160 : index
    %c0_20 = arith.constant 0 : index
    %18 = vector.load %arg9[%c160, %c0_20] : memref<512x64xf32, #tpu.memory_space<vmem>>, vector<32x8xf32>
    %c192 = arith.constant 192 : index
    %c0_21 = arith.constant 0 : index
    %19 = vector.load %arg9[%c192, %c0_21] : memref<512x64xf32, #tpu.memory_space<vmem>>, vector<32x8xf32>
    %c224 = arith.constant 224 : index
    %c0_22 = arith.constant 0 : index
    %20 = vector.load %arg9[%c224, %c0_22] : memref<512x64xf32, #tpu.memory_space<vmem>>, vector<32x8xf32>
    %c256 = arith.constant 256 : index
    %c0_23 = arith.constant 0 : index
    %21 = vector.load %arg9[%c256, %c0_23] : memref<512x64xf32, #tpu.memory_space<vmem>>, vector<32x8xf32>
    %c288 = arith.constant 288 : index
    %c0_24 = arith.constant 0 : index
    %22 = vector.load %arg9[%c288, %c0_24] : memref<512x64xf32, #tpu.memory_space<vmem>>, vector<32x8xf32>
    %c320 = arith.constant 320 : index
    %c0_25 = arith.constant 0 : index
    %23 = vector.load %arg9[%c320, %c0_25] : memref<512x64xf32, #tpu.memory_space<vmem>>, vector<32x8xf32>
    %c352 = arith.constant 352 : index
    %c0_26 = arith.constant 0 : index
    %24 = vector.load %arg9[%c352, %c0_26] : memref<512x64xf32, #tpu.memory_space<vmem>>, vector<32x8xf32>
    %c384 = arith.constant 384 : index
    %c0_27 = arith.constant 0 : index
    %25 = vector.load %arg9[%c384, %c0_27] : memref<512x64xf32, #tpu.memory_space<vmem>>, vector<32x8xf32>
    %c416 = arith.constant 416 : index
    %c0_28 = arith.constant 0 : index
    %26 = vector.load %arg9[%c416, %c0_28] : memref<512x64xf32, #tpu.memory_space<vmem>>, vector<32x8xf32>
    %c448 = arith.constant 448 : index
    %c0_29 = arith.constant 0 : index
    %27 = vector.load %arg9[%c448, %c0_29] : memref<512x64xf32, #tpu.memory_space<vmem>>, vector<32x8xf32>
    %c480 = arith.constant 480 : index
    %c0_30 = arith.constant 0 : index
    %28 = vector.load %arg9[%c480, %c0_30] : memref<512x64xf32, #tpu.memory_space<vmem>>, vector<32x8xf32>
    %29 = tpu.concatenate %13, %14, %15, %16, %17, %18, %19, %20, %21, %22, %23, %24, %25, %26, %27, %28 in 1 : vector<32x8xf32>, vector<32x8xf32>, vector<32x8xf32>, vector<32x8xf32>, vector<32x8xf32>, vector<32x8xf32>, vector<32x8xf32>, vector<32x8xf32>, vector<32x8xf32>, vector<32x8xf32>, vector<32x8xf32>, vector<32x8xf32>, vector<32x8xf32>, vector<32x8xf32>, vector<32x8xf32>, vector<32x8xf32> -> vector<32x128xf32>
    %cst_31 = arith.constant dense<0.000000e+00> : vector<32x128xf32>
    %30 = tpu.matmul %29, %6, %cst_31 {dimension_numbers = #tpu.dot_dimension_numbers<[1], [0], [0], [1], [0, 0, 1, 1], [], []>} : vector<32x128xf32>, vector<128x128xf32>, vector<32x128xf32> -> vector<32x128xf32>
    %31 = arith.subf %29, %30 : vector<32x128xf32>
    %32 = arith.mulf %31, %31 : vector<32x128xf32>
    %cst_32 = arith.constant dense<0.000000e+00> : vector<32x128xf32>
    %33 = tpu.matmul %32, %6, %cst_32 {dimension_numbers = #tpu.dot_dimension_numbers<[1], [0], [0], [1], [0, 0, 1, 1], [], []>} : vector<32x128xf32>, vector<128x128xf32>, vector<32x128xf32> -> vector<32x128xf32>
    %cst_33 = arith.constant 9.99999974E-6 : f32
    %34 = vector.broadcast %cst_33 : f32 to vector<32x128xf32>
    %35 = arith.addf %33, %34 : vector<32x128xf32>
    %36 = math.rsqrt %35 : vector<32x128xf32>
    %37 = arith.mulf %31, %36 : vector<32x128xf32>
    %cst_34 = arith.constant dense<0.000000e+00> : vector<32x128xf32>
    %38 = tpu.matmul %37, %5, %cst_34 {dimension_numbers = #tpu.dot_dimension_numbers<[1], [0], [0], [1], [0, 0, 1, 1], [], []>} : vector<32x128xf32>, vector<128x128xf32>, vector<32x128xf32> -> vector<32x128xf32>
    %39 = arith.mulf %38, %9 : vector<32x128xf32>
    %40 = arith.addf %39, %12 : vector<32x128xf32>
    %c0_35 = arith.constant 0 : index
    %c0_36 = arith.constant 0 : index
    %c0_37 = arith.constant 0 : index
    %41 = vector.load %arg8[%c0_35, %c0_36, %c0_37] : memref<32x8x128xf32, #tpu.memory_space<vmem>>, vector<32x1x128xf32>
    %42 = vector.shape_cast %41 : vector<32x1x128xf32> to vector<32x128xf32>
    %43 = vector.shape_cast %40 : vector<32x128xf32> to vector<32x1x128xf32>
    tpu.vector_store %arg8[%c0_35, %c0_36, %c0_37], %43 {strides = array<i32>} : memref<32x8x128xf32, #tpu.memory_space<vmem>>, vector<32x1x128xf32>,
    %c0_38 = arith.constant 0 : index
    %c8 = arith.constant 8 : index
    %44 = vector.load %arg9[%c0_38, %c8] : memref<512x64xf32, #tpu.memory_space<vmem>>, vector<32x8xf32>
    %c32_39 = arith.constant 32 : index
    %c8_40 = arith.constant 8 : index
    %45 = vector.load %arg9[%c32_39, %c8_40] : memref<512x64xf32, #tpu.memory_space<vmem>>, vector<32x8xf32>
    %c64_41 = arith.constant 64 : index
    %c8_42 = arith.constant 8 : index
    %46 = vector.load %arg9[%c64_41, %c8_42] : memref<512x64xf32, #tpu.memory_space<vmem>>, vector<32x8xf32>
    %c96_43 = arith.constant 96 : index
    %c8_44 = arith.constant 8 : index
    %47 = vector.load %arg9[%c96_43, %c8_44] : memref<512x64xf32, #tpu.memory_space<vmem>>, vector<32x8xf32>
    %c128_45 = arith.constant 128 : index
    %c8_46 = arith.constant 8 : index
    %48 = vector.load %arg9[%c128_45, %c8_46] : memref<512x64xf32, #tpu.memory_space<vmem>>, vector<32x8xf32>
    %c160_47 = arith.constant 160 : index
    %c8_48 = arith.constant 8 : index
    %49 = vector.load %arg9[%c160_47, %c8_48] : memref<512x64xf32, #tpu.memory_space<vmem>>, vector<32x8xf32>
    %c192_49 = arith.constant 192 : index
    %c8_50 = arith.constant 8 : index
    %50 = vector.load %arg9[%c192_49, %c8_50] : memref<512x64xf32, #tpu.memory_space<vmem>>, vector<32x8xf32>
    %c224_51 = arith.constant 224 : index
    %c8_52 = arith.constant 8 : index
    %51 = vector.load %arg9[%c224_51, %c8_52] : memref<512x64xf32, #tpu.memory_space<vmem>>, vector<32x8xf32>
    %c256_53 = arith.constant 256 : index
    %c8_54 = arith.constant 8 : index
    %52 = vector.load %arg9[%c256_53, %c8_54] : memref<512x64xf32, #tpu.memory_space<vmem>>, vector<32x8xf32>
    %c288_55 = arith.constant 288 : index
    %c8_56 = arith.constant 8 : index
    %53 = vector.load %arg9[%c288_55, %c8_56] : memref<512x64xf32, #tpu.memory_space<vmem>>, vector<32x8xf32>
    %c320_57 = arith.constant 320 : index
    %c8_58 = arith.constant 8 : index
    %54 = vector.load %arg9[%c320_57, %c8_58] : memref<512x64xf32, #tpu.memory_space<vmem>>, vector<32x8xf32>
    %c352_59 = arith.constant 352 : index
    %c8_60 = arith.constant 8 : index
    %55 = vector.load %arg9[%c352_59, %c8_60] : memref<512x64xf32, #tpu.memory_space<vmem>>, vector<32x8xf32>
    %c384_61 = arith.constant 384 : index
    %c8_62 = arith.constant 8 : index
    %56 = vector.load %arg9[%c384_61, %c8_62] : memref<512x64xf32, #tpu.memory_space<vmem>>, vector<32x8xf32>
    %c416_63 = arith.constant 416 : index
    %c8_64 = arith.constant 8 : index
    %57 = vector.load %arg9[%c416_63, %c8_64] : memref<512x64xf32, #tpu.memory_space<vmem>>, vector<32x8xf32>
    %c448_65 = arith.constant 448 : index
    %c8_66 = arith.constant 8 : index
    %58 = vector.load %arg9[%c448_65, %c8_66] : memref<512x64xf32, #tpu.memory_space<vmem>>, vector<32x8xf32>
    %c480_67 = arith.constant 480 : index
    %c8_68 = arith.constant 8 : index
    %59 = vector.load %arg9[%c480_67, %c8_68] : memref<512x64xf32, #tpu.memory_space<vmem>>, vector<32x8xf32>
    %60 = tpu.concatenate %44, %45, %46, %47, %48, %49, %50, %51, %52, %53, %54, %55, %56, %57, %58, %59 in 1 : vector<32x8xf32>, vector<32x8xf32>, vector<32x8xf32>, vector<32x8xf32>, vector<32x8xf32>, vector<32x8xf32>, vector<32x8xf32>, vector<32x8xf32>, vector<32x8xf32>, vector<32x8xf32>, vector<32x8xf32>, vector<32x8xf32>, vector<32x8xf32>, vector<32x8xf32>, vector<32x8xf32>, vector<32x8xf32> -> vector<32x128xf32>
    %cst_69 = arith.constant dense<0.000000e+00> : vector<32x128xf32>
    %61 = tpu.matmul %60, %6, %cst_69 {dimension_numbers = #tpu.dot_dimension_numbers<[1], [0], [0], [1], [0, 0, 1, 1], [], []>} : vector<32x128xf32>, vector<128x128xf32>, vector<32x128xf32> -> vector<32x128xf32>
    %62 = arith.subf %60, %61 : vector<32x128xf32>
    %63 = arith.mulf %62, %62 : vector<32x128xf32>
    %cst_70 = arith.constant dense<0.000000e+00> : vector<32x128xf32>
    %64 = tpu.matmul %63, %6, %cst_70 {dimension_numbers = #tpu.dot_dimension_numbers<[1], [0], [0], [1], [0, 0, 1, 1], [], []>} : vector<32x128xf32>, vector<128x128xf32>, vector<32x128xf32> -> vector<32x128xf32>
    %cst_71 = arith.constant 9.99999974E-6 : f32
    %65 = vector.broadcast %cst_71 : f32 to vector<32x128xf32>
    %66 = arith.addf %64, %65 : vector<32x128xf32>
    %67 = math.rsqrt %66 : vector<32x128xf32>
    %68 = arith.mulf %62, %67 : vector<32x128xf32>
    %cst_72 = arith.constant dense<0.000000e+00> : vector<32x128xf32>
    %69 = tpu.matmul %68, %5, %cst_72 {dimension_numbers = #tpu.dot_dimension_numbers<[1], [0], [0], [1], [0, 0, 1, 1], [], []>} : vector<32x128xf32>, vector<128x128xf32>, vector<32x128xf32> -> vector<32x128xf32>
    %70 = arith.mulf %69, %9 : vector<32x128xf32>
    %71 = arith.addf %70, %12 : vector<32x128xf32>
    %c0_73 = arith.constant 0 : index
    %c1 = arith.constant 1 : index
    %c0_74 = arith.constant 0 : index
    %72 = vector.load %arg8[%c0_73, %c1, %c0_74] : memref<32x8x128xf32, #tpu.memory_space<vmem>>, vector<32x1x128xf32>
    %73 = vector.shape_cast %72 : vector<32x1x128xf32> to vector<32x128xf32>
    %74 = vector.shape_cast %71 : vector<32x128xf32> to vector<32x1x128xf32>
    tpu.vector_store %arg8[%c0_73, %c1, %c0_74], %74 {strides = array<i32>} : memref<32x8x128xf32, #tpu.memory_space<vmem>>, vector<32x1x128xf32>,
    %c0_75 = arith.constant 0 : index
    %c16 = arith.constant 16 : index
    %75 = vector.load %arg9[%c0_75, %c16] : memref<512x64xf32, #tpu.memory_space<vmem>>, vector<32x8xf32>
    %c32_76 = arith.constant 32 : index
    %c16_77 = arith.constant 16 : index
    %76 = vector.load %arg9[%c32_76, %c16_77] : memref<512x64xf32, #tpu.memory_space<vmem>>, vector<32x8xf32>
    %c64_78 = arith.constant 64 : index
    %c16_79 = arith.constant 16 : index
    %77 = vector.load %arg9[%c64_78, %c16_79] : memref<512x64xf32, #tpu.memory_space<vmem>>, vector<32x8xf32>
    %c96_80 = arith.constant 96 : index
    %c16_81 = arith.constant 16 : index
    %78 = vector.load %arg9[%c96_80, %c16_81] : memref<512x64xf32, #tpu.memory_space<vmem>>, vector<32x8xf32>
    %c128_82 = arith.constant 128 : index
    %c16_83 = arith.constant 16 : index
    %79 = vector.load %arg9[%c128_82, %c16_83] : memref<512x64xf32, #tpu.memory_space<vmem>>, vector<32x8xf32>
    %c160_84 = arith.constant 160 : index
    %c16_85 = arith.constant 16 : index
    %80 = vector.load %arg9[%c160_84, %c16_85] : memref<512x64xf32, #tpu.memory_space<vmem>>, vector<32x8xf32>
    %c192_86 = arith.constant 192 : index
    %c16_87 = arith.constant 16 : index
    %81 = vector.load %arg9[%c192_86, %c16_87] : memref<512x64xf32, #tpu.memory_space<vmem>>, vector<32x8xf32>
    %c224_88 = arith.constant 224 : index
    %c16_89 = arith.constant 16 : index
    %82 = vector.load %arg9[%c224_88, %c16_89] : memref<512x64xf32, #tpu.memory_space<vmem>>, vector<32x8xf32>
    %c256_90 = arith.constant 256 : index
    %c16_91 = arith.constant 16 : index
    %83 = vector.load %arg9[%c256_90, %c16_91] : memref<512x64xf32, #tpu.memory_space<vmem>>, vector<32x8xf32>
    %c288_92 = arith.constant 288 : index
    %c16_93 = arith.constant 16 : index
    %84 = vector.load %arg9[%c288_92, %c16_93] : memref<512x64xf32, #tpu.memory_space<vmem>>, vector<32x8xf32>
    %c320_94 = arith.constant 320 : index
    %c16_95 = arith.constant 16 : index
    %85 = vector.load %arg9[%c320_94, %c16_95] : memref<512x64xf32, #tpu.memory_space<vmem>>, vector<32x8xf32>
    %c352_96 = arith.constant 352 : index
    %c16_97 = arith.constant 16 : index
    %86 = vector.load %arg9[%c352_96, %c16_97] : memref<512x64xf32, #tpu.memory_space<vmem>>, vector<32x8xf32>
    %c384_98 = arith.constant 384 : index
    %c16_99 = arith.constant 16 : index
    %87 = vector.load %arg9[%c384_98, %c16_99] : memref<512x64xf32, #tpu.memory_space<vmem>>, vector<32x8xf32>
    %c416_100 = arith.constant 416 : index
    %c16_101 = arith.constant 16 : index
    %88 = vector.load %arg9[%c416_100, %c16_101] : memref<512x64xf32, #tpu.memory_space<vmem>>, vector<32x8xf32>
    %c448_102 = arith.constant 448 : index
    %c16_103 = arith.constant 16 : index
    %89 = vector.load %arg9[%c448_102, %c16_103] : memref<512x64xf32, #tpu.memory_space<vmem>>, vector<32x8xf32>
    %c480_104 = arith.constant 480 : index
    %c16_105 = arith.constant 16 : index
    %90 = vector.load %arg9[%c480_104, %c16_105] : memref<512x64xf32, #tpu.memory_space<vmem>>, vector<32x8xf32>
    %91 = tpu.concatenate %75, %76, %77, %78, %79, %80, %81, %82, %83, %84, %85, %86, %87, %88, %89, %90 in 1 : vector<32x8xf32>, vector<32x8xf32>, vector<32x8xf32>, vector<32x8xf32>, vector<32x8xf32>, vector<32x8xf32>, vector<32x8xf32>, vector<32x8xf32>, vector<32x8xf32>, vector<32x8xf32>, vector<32x8xf32>, vector<32x8xf32>, vector<32x8xf32>, vector<32x8xf32>, vector<32x8xf32>, vector<32x8xf32> -> vector<32x128xf32>
    %cst_106 = arith.constant dense<0.000000e+00> : vector<32x128xf32>
    %92 = tpu.matmul %91, %6, %cst_106 {dimension_numbers = #tpu.dot_dimension_numbers<[1], [0], [0], [1], [0, 0, 1, 1], [], []>} : vector<32x128xf32>, vector<128x128xf32>, vector<32x128xf32> -> vector<32x128xf32>
    %93 = arith.subf %91, %92 : vector<32x128xf32>
    %94 = arith.mulf %93, %93 : vector<32x128xf32>
    %cst_107 = arith.constant dense<0.000000e+00> : vector<32x128xf32>
    %95 = tpu.matmul %94, %6, %cst_107 {dimension_numbers = #tpu.dot_dimension_numbers<[1], [0], [0], [1], [0, 0, 1, 1], [], []>} : vector<32x128xf32>, vector<128x128xf32>, vector<32x128xf32> -> vector<32x128xf32>
    %cst_108 = arith.constant 9.99999974E-6 : f32
    %96 = vector.broadcast %cst_108 : f32 to vector<32x128xf32>
    %97 = arith.addf %95, %96 : vector<32x128xf32>
    %98 = math.rsqrt %97 : vector<32x128xf32>
    %99 = arith.mulf %93, %98 : vector<32x128xf32>
    %cst_109 = arith.constant dense<0.000000e+00> : vector<32x128xf32>
    %100 = tpu.matmul %99, %5, %cst_109 {dimension_numbers = #tpu.dot_dimension_numbers<[1], [0], [0], [1], [0, 0, 1, 1], [], []>} : vector<32x128xf32>, vector<128x128xf32>, vector<32x128xf32> -> vector<32x128xf32>
    %101 = arith.mulf %100, %9 : vector<32x128xf32>
    %102 = arith.addf %101, %12 : vector<32x128xf32>
    %c0_110 = arith.constant 0 : index
    %c2 = arith.constant 2 : index
    %c0_111 = arith.constant 0 : index
    %103 = vector.load %arg8[%c0_110, %c2, %c0_111] : memref<32x8x128xf32, #tpu.memory_space<vmem>>, vector<32x1x128xf32>
    %104 = vector.shape_cast %103 : vector<32x1x128xf32> to vector<32x128xf32>
    %105 = vector.shape_cast %102 : vector<32x128xf32> to vector<32x1x128xf32>
    tpu.vector_store %arg8[%c0_110, %c2, %c0_111], %105 {strides = array<i32>} : memref<32x8x128xf32, #tpu.memory_space<vmem>>, vector<32x1x128xf32>,
    %c0_112 = arith.constant 0 : index
    %c24 = arith.constant 24 : index
    %106 = vector.load %arg9[%c0_112, %c24] : memref<512x64xf32, #tpu.memory_space<vmem>>, vector<32x8xf32>
    %c32_113 = arith.constant 32 : index
    %c24_114 = arith.constant 24 : index
    %107 = vector.load %arg9[%c32_113, %c24_114] : memref<512x64xf32, #tpu.memory_space<vmem>>, vector<32x8xf32>
    %c64_115 = arith.constant 64 : index
    %c24_116 = arith.constant 24 : index
    %108 = vector.load %arg9[%c64_115, %c24_116] : memref<512x64xf32, #tpu.memory_space<vmem>>, vector<32x8xf32>
    %c96_117 = arith.constant 96 : index
    %c24_118 = arith.constant 24 : index
    %109 = vector.load %arg9[%c96_117, %c24_118] : memref<512x64xf32, #tpu.memory_space<vmem>>, vector<32x8xf32>
    %c128_119 = arith.constant 128 : index
    %c24_120 = arith.constant 24 : index
    %110 = vector.load %arg9[%c128_119, %c24_120] : memref<512x64xf32, #tpu.memory_space<vmem>>, vector<32x8xf32>
    %c160_121 = arith.constant 160 : index
    %c24_122 = arith.constant 24 : index
    %111 = vector.load %arg9[%c160_121, %c24_122] : memref<512x64xf32, #tpu.memory_space<vmem>>, vector<32x8xf32>
    %c192_123 = arith.constant 192 : index
    %c24_124 = arith.constant 24 : index
    %112 = vector.load %arg9[%c192_123, %c24_124] : memref<512x64xf32, #tpu.memory_space<vmem>>, vector<32x8xf32>
    %c224_125 = arith.constant 224 : index
    %c24_126 = arith.constant 24 : index
    %113 = vector.load %arg9[%c224_125, %c24_126] : memref<512x64xf32, #tpu.memory_space<vmem>>, vector<32x8xf32>
    %c256_127 = arith.constant 256 : index
    %c24_128 = arith.constant 24 : index
    %114 = vector.load %arg9[%c256_127, %c24_128] : memref<512x64xf32, #tpu.memory_space<vmem>>, vector<32x8xf32>
    %c288_129 = arith.constant 288 : index
    %c24_130 = arith.constant 24 : index
    %115 = vector.load %arg9[%c288_129, %c24_130] : memref<512x64xf32, #tpu.memory_space<vmem>>, vector<32x8xf32>
    %c320_131 = arith.constant 320 : index
    %c24_132 = arith.constant 24 : index
    %116 = vector.load %arg9[%c320_131, %c24_132] : memref<512x64xf32, #tpu.memory_space<vmem>>, vector<32x8xf32>
    %c352_133 = arith.constant 352 : index
    %c24_134 = arith.constant 24 : index
    %117 = vector.load %arg9[%c352_133, %c24_134] : memref<512x64xf32, #tpu.memory_space<vmem>>, vector<32x8xf32>
    %c384_135 = arith.constant 384 : index
    %c24_136 = arith.constant 24 : index
    %118 = vector.load %arg9[%c384_135, %c24_136] : memref<512x64xf32, #tpu.memory_space<vmem>>, vector<32x8xf32>
    %c416_137 = arith.constant 416 : index
    %c24_138 = arith.constant 24 : index
    %119 = vector.load %arg9[%c416_137, %c24_138] : memref<512x64xf32, #tpu.memory_space<vmem>>, vector<32x8xf32>
    %c448_139 = arith.constant 448 : index
    %c24_140 = arith.constant 24 : index
    %120 = vector.load %arg9[%c448_139, %c24_140] : memref<512x64xf32, #tpu.memory_space<vmem>>, vector<32x8xf32>
    %c480_141 = arith.constant 480 : index
    %c24_142 = arith.constant 24 : index
    %121 = vector.load %arg9[%c480_141, %c24_142] : memref<512x64xf32, #tpu.memory_space<vmem>>, vector<32x8xf32>
    %122 = tpu.concatenate %106, %107, %108, %109, %110, %111, %112, %113, %114, %115, %116, %117, %118, %119, %120, %121 in 1 : vector<32x8xf32>, vector<32x8xf32>, vector<32x8xf32>, vector<32x8xf32>, vector<32x8xf32>, vector<32x8xf32>, vector<32x8xf32>, vector<32x8xf32>, vector<32x8xf32>, vector<32x8xf32>, vector<32x8xf32>, vector<32x8xf32>, vector<32x8xf32>, vector<32x8xf32>, vector<32x8xf32>, vector<32x8xf32> -> vector<32x128xf32>
    %cst_143 = arith.constant dense<0.000000e+00> : vector<32x128xf32>
    %123 = tpu.matmul %122, %6, %cst_143 {dimension_numbers = #tpu.dot_dimension_numbers<[1], [0], [0], [1], [0, 0, 1, 1], [], []>} : vector<32x128xf32>, vector<128x128xf32>, vector<32x128xf32> -> vector<32x128xf32>
    %124 = arith.subf %122, %123 : vector<32x128xf32>
    %125 = arith.mulf %124, %124 : vector<32x128xf32>
    %cst_144 = arith.constant dense<0.000000e+00> : vector<32x128xf32>
    %126 = tpu.matmul %125, %6, %cst_144 {dimension_numbers = #tpu.dot_dimension_numbers<[1], [0], [0], [1], [0, 0, 1, 1], [], []>} : vector<32x128xf32>, vector<128x128xf32>, vector<32x128xf32> -> vector<32x128xf32>
    %cst_145 = arith.constant 9.99999974E-6 : f32
    %127 = vector.broadcast %cst_145 : f32 to vector<32x128xf32>
    %128 = arith.addf %126, %127 : vector<32x128xf32>
    %129 = math.rsqrt %128 : vector<32x128xf32>
    %130 = arith.mulf %124, %129 : vector<32x128xf32>
    %cst_146 = arith.constant dense<0.000000e+00> : vector<32x128xf32>
    %131 = tpu.matmul %130, %5, %cst_146 {dimension_numbers = #tpu.dot_dimension_numbers<[1], [0], [0], [1], [0, 0, 1, 1], [], []>} : vector<32x128xf32>, vector<128x128xf32>, vector<32x128xf32> -> vector<32x128xf32>
    %132 = arith.mulf %131, %9 : vector<32x128xf32>
    %133 = arith.addf %132, %12 : vector<32x128xf32>
    %c0_147 = arith.constant 0 : index
    %c3 = arith.constant 3 : index
    %c0_148 = arith.constant 0 : index
    %134 = vector.load %arg8[%c0_147, %c3, %c0_148] : memref<32x8x128xf32, #tpu.memory_space<vmem>>, vector<32x1x128xf32>
    %135 = vector.shape_cast %134 : vector<32x1x128xf32> to vector<32x128xf32>
    %136 = vector.shape_cast %133 : vector<32x128xf32> to vector<32x1x128xf32>
    tpu.vector_store %arg8[%c0_147, %c3, %c0_148], %136 {strides = array<i32>} : memref<32x8x128xf32, #tpu.memory_space<vmem>>, vector<32x1x128xf32>,
    %c0_149 = arith.constant 0 : index
    %c32_150 = arith.constant 32 : index
    %137 = vector.load %arg9[%c0_149, %c32_150] : memref<512x64xf32, #tpu.memory_space<vmem>>, vector<32x8xf32>
    %c32_151 = arith.constant 32 : index
    %c32_152 = arith.constant 32 : index
    %138 = vector.load %arg9[%c32_151, %c32_152] : memref<512x64xf32, #tpu.memory_space<vmem>>, vector<32x8xf32>
    %c64_153 = arith.constant 64 : index
    %c32_154 = arith.constant 32 : index
    %139 = vector.load %arg9[%c64_153, %c32_154] : memref<512x64xf32, #tpu.memory_space<vmem>>, vector<32x8xf32>
    %c96_155 = arith.constant 96 : index
    %c32_156 = arith.constant 32 : index
    %140 = vector.load %arg9[%c96_155, %c32_156] : memref<512x64xf32, #tpu.memory_space<vmem>>, vector<32x8xf32>
    %c128_157 = arith.constant 128 : index
    %c32_158 = arith.constant 32 : index
    %141 = vector.load %arg9[%c128_157, %c32_158] : memref<512x64xf32, #tpu.memory_space<vmem>>, vector<32x8xf32>
    %c160_159 = arith.constant 160 : index
    %c32_160 = arith.constant 32 : index
    %142 = vector.load %arg9[%c160_159, %c32_160] : memref<512x64xf32, #tpu.memory_space<vmem>>, vector<32x8xf32>
    %c192_161 = arith.constant 192 : index
    %c32_162 = arith.constant 32 : index
    %143 = vector.load %arg9[%c192_161, %c32_162] : memref<512x64xf32, #tpu.memory_space<vmem>>, vector<32x8xf32>
    %c224_163 = arith.constant 224 : index
    %c32_164 = arith.constant 32 : index
    %144 = vector.load %arg9[%c224_163, %c32_164] : memref<512x64xf32, #tpu.memory_space<vmem>>, vector<32x8xf32>
    %c256_165 = arith.constant 256 : index
    %c32_166 = arith.constant 32 : index
    %145 = vector.load %arg9[%c256_165, %c32_166] : memref<512x64xf32, #tpu.memory_space<vmem>>, vector<32x8xf32>
    %c288_167 = arith.constant 288 : index
    %c32_168 = arith.constant 32 : index
    %146 = vector.load %arg9[%c288_167, %c32_168] : memref<512x64xf32, #tpu.memory_space<vmem>>, vector<32x8xf32>
    %c320_169 = arith.constant 320 : index
    %c32_170 = arith.constant 32 : index
    %147 = vector.load %arg9[%c320_169, %c32_170] : memref<512x64xf32, #tpu.memory_space<vmem>>, vector<32x8xf32>
    %c352_171 = arith.constant 352 : index
    %c32_172 = arith.constant 32 : index
    %148 = vector.load %arg9[%c352_171, %c32_172] : memref<512x64xf32, #tpu.memory_space<vmem>>, vector<32x8xf32>
    %c384_173 = arith.constant 384 : index
    %c32_174 = arith.constant 32 : index
    %149 = vector.load %arg9[%c384_173, %c32_174] : memref<512x64xf32, #tpu.memory_space<vmem>>, vector<32x8xf32>
    %c416_175 = arith.constant 416 : index
    %c32_176 = arith.constant 32 : index
    %150 = vector.load %arg9[%c416_175, %c32_176] : memref<512x64xf32, #tpu.memory_space<vmem>>, vector<32x8xf32>
    %c448_177 = arith.constant 448 : index
    %c32_178 = arith.constant 32 : index
    %151 = vector.load %arg9[%c448_177, %c32_178] : memref<512x64xf32, #tpu.memory_space<vmem>>, vector<32x8xf32>
    %c480_179 = arith.constant 480 : index
    %c32_180 = arith.constant 32 : index
    %152 = vector.load %arg9[%c480_179, %c32_180] : memref<512x64xf32, #tpu.memory_space<vmem>>, vector<32x8xf32>
    %153 = tpu.concatenate %137, %138, %139, %140, %141, %142, %143, %144, %145, %146, %147, %148, %149, %150, %151, %152 in 1 : vector<32x8xf32>, vector<32x8xf32>, vector<32x8xf32>, vector<32x8xf32>, vector<32x8xf32>, vector<32x8xf32>, vector<32x8xf32>, vector<32x8xf32>, vector<32x8xf32>, vector<32x8xf32>, vector<32x8xf32>, vector<32x8xf32>, vector<32x8xf32>, vector<32x8xf32>, vector<32x8xf32>, vector<32x8xf32> -> vector<32x128xf32>
    %cst_181 = arith.constant dense<0.000000e+00> : vector<32x128xf32>
    %154 = tpu.matmul %153, %6, %cst_181 {dimension_numbers = #tpu.dot_dimension_numbers<[1], [0], [0], [1], [0, 0, 1, 1], [], []>} : vector<32x128xf32>, vector<128x128xf32>, vector<32x128xf32> -> vector<32x128xf32>
    %155 = arith.subf %153, %154 : vector<32x128xf32>
    %156 = arith.mulf %155, %155 : vector<32x128xf32>
    %cst_182 = arith.constant dense<0.000000e+00> : vector<32x128xf32>
    %157 = tpu.matmul %156, %6, %cst_182 {dimension_numbers = #tpu.dot_dimension_numbers<[1], [0], [0], [1], [0, 0, 1, 1], [], []>} : vector<32x128xf32>, vector<128x128xf32>, vector<32x128xf32> -> vector<32x128xf32>
    %cst_183 = arith.constant 9.99999974E-6 : f32
    %158 = vector.broadcast %cst_183 : f32 to vector<32x128xf32>
    %159 = arith.addf %157, %158 : vector<32x128xf32>
    %160 = math.rsqrt %159 : vector<32x128xf32>
    %161 = arith.mulf %155, %160 : vector<32x128xf32>
    %cst_184 = arith.constant dense<0.000000e+00> : vector<32x128xf32>
    %162 = tpu.matmul %161, %5, %cst_184 {dimension_numbers = #tpu.dot_dimension_numbers<[1], [0], [0], [1], [0, 0, 1, 1], [], []>} : vector<32x128xf32>, vector<128x128xf32>, vector<32x128xf32> -> vector<32x128xf32>
    %163 = arith.mulf %162, %9 : vector<32x128xf32>
    %164 = arith.addf %163, %12 : vector<32x128xf32>
    %c0_185 = arith.constant 0 : index
    %c4 = arith.constant 4 : index
    %c0_186 = arith.constant 0 : index
    %165 = vector.load %arg8[%c0_185, %c4, %c0_186] : memref<32x8x128xf32, #tpu.memory_space<vmem>>, vector<32x1x128xf32>
    %166 = vector.shape_cast %165 : vector<32x1x128xf32> to vector<32x128xf32>
    %167 = vector.shape_cast %164 : vector<32x128xf32> to vector<32x1x128xf32>
    tpu.vector_store %arg8[%c0_185, %c4, %c0_186], %167 {strides = array<i32>} : memref<32x8x128xf32, #tpu.memory_space<vmem>>, vector<32x1x128xf32>,
    %c0_187 = arith.constant 0 : index
    %c40 = arith.constant 40 : index
    %168 = vector.load %arg9[%c0_187, %c40] : memref<512x64xf32, #tpu.memory_space<vmem>>, vector<32x8xf32>
    %c32_188 = arith.constant 32 : index
    %c40_189 = arith.constant 40 : index
    %169 = vector.load %arg9[%c32_188, %c40_189] : memref<512x64xf32, #tpu.memory_space<vmem>>, vector<32x8xf32>
    %c64_190 = arith.constant 64 : index
    %c40_191 = arith.constant 40 : index
    %170 = vector.load %arg9[%c64_190, %c40_191] : memref<512x64xf32, #tpu.memory_space<vmem>>, vector<32x8xf32>
    %c96_192 = arith.constant 96 : index
    %c40_193 = arith.constant 40 : index
    %171 = vector.load %arg9[%c96_192, %c40_193] : memref<512x64xf32, #tpu.memory_space<vmem>>, vector<32x8xf32>
    %c128_194 = arith.constant 128 : index
    %c40_195 = arith.constant 40 : index
    %172 = vector.load %arg9[%c128_194, %c40_195] : memref<512x64xf32, #tpu.memory_space<vmem>>, vector<32x8xf32>
    %c160_196 = arith.constant 160 : index
    %c40_197 = arith.constant 40 : index
    %173 = vector.load %arg9[%c160_196, %c40_197] : memref<512x64xf32, #tpu.memory_space<vmem>>, vector<32x8xf32>
    %c192_198 = arith.constant 192 : index
    %c40_199 = arith.constant 40 : index
    %174 = vector.load %arg9[%c192_198, %c40_199] : memref<512x64xf32, #tpu.memory_space<vmem>>, vector<32x8xf32>
    %c224_200 = arith.constant 224 : index
    %c40_201 = arith.constant 40 : index
    %175 = vector.load %arg9[%c224_200, %c40_201] : memref<512x64xf32, #tpu.memory_space<vmem>>, vector<32x8xf32>
    %c256_202 = arith.constant 256 : index
    %c40_203 = arith.constant 40 : index
    %176 = vector.load %arg9[%c256_202, %c40_203] : memref<512x64xf32, #tpu.memory_space<vmem>>, vector<32x8xf32>
    %c288_204 = arith.constant 288 : index
    %c40_205 = arith.constant 40 : index
    %177 = vector.load %arg9[%c288_204, %c40_205] : memref<512x64xf32, #tpu.memory_space<vmem>>, vector<32x8xf32>
    %c320_206 = arith.constant 320 : index
    %c40_207 = arith.constant 40 : index
    %178 = vector.load %arg9[%c320_206, %c40_207] : memref<512x64xf32, #tpu.memory_space<vmem>>, vector<32x8xf32>
    %c352_208 = arith.constant 352 : index
    %c40_209 = arith.constant 40 : index
    %179 = vector.load %arg9[%c352_208, %c40_209] : memref<512x64xf32, #tpu.memory_space<vmem>>, vector<32x8xf32>
    %c384_210 = arith.constant 384 : index
    %c40_211 = arith.constant 40 : index
    %180 = vector.load %arg9[%c384_210, %c40_211] : memref<512x64xf32, #tpu.memory_space<vmem>>, vector<32x8xf32>
    %c416_212 = arith.constant 416 : index
    %c40_213 = arith.constant 40 : index
    %181 = vector.load %arg9[%c416_212, %c40_213] : memref<512x64xf32, #tpu.memory_space<vmem>>, vector<32x8xf32>
    %c448_214 = arith.constant 448 : index
    %c40_215 = arith.constant 40 : index
    %182 = vector.load %arg9[%c448_214, %c40_215] : memref<512x64xf32, #tpu.memory_space<vmem>>, vector<32x8xf32>
    %c480_216 = arith.constant 480 : index
    %c40_217 = arith.constant 40 : index
    %183 = vector.load %arg9[%c480_216, %c40_217] : memref<512x64xf32, #tpu.memory_space<vmem>>, vector<32x8xf32>
    %184 = tpu.concatenate %168, %169, %170, %171, %172, %173, %174, %175, %176, %177, %178, %179, %180, %181, %182, %183 in 1 : vector<32x8xf32>, vector<32x8xf32>, vector<32x8xf32>, vector<32x8xf32>, vector<32x8xf32>, vector<32x8xf32>, vector<32x8xf32>, vector<32x8xf32>, vector<32x8xf32>, vector<32x8xf32>, vector<32x8xf32>, vector<32x8xf32>, vector<32x8xf32>, vector<32x8xf32>, vector<32x8xf32>, vector<32x8xf32> -> vector<32x128xf32>
    %cst_218 = arith.constant dense<0.000000e+00> : vector<32x128xf32>
    %185 = tpu.matmul %184, %6, %cst_218 {dimension_numbers = #tpu.dot_dimension_numbers<[1], [0], [0], [1], [0, 0, 1, 1], [], []>} : vector<32x128xf32>, vector<128x128xf32>, vector<32x128xf32> -> vector<32x128xf32>
    %186 = arith.subf %184, %185 : vector<32x128xf32>
    %187 = arith.mulf %186, %186 : vector<32x128xf32>
    %cst_219 = arith.constant dense<0.000000e+00> : vector<32x128xf32>
    %188 = tpu.matmul %187, %6, %cst_219 {dimension_numbers = #tpu.dot_dimension_numbers<[1], [0], [0], [1], [0, 0, 1, 1], [], []>} : vector<32x128xf32>, vector<128x128xf32>, vector<32x128xf32> -> vector<32x128xf32>
    %cst_220 = arith.constant 9.99999974E-6 : f32
    %189 = vector.broadcast %cst_220 : f32 to vector<32x128xf32>
    %190 = arith.addf %188, %189 : vector<32x128xf32>
    %191 = math.rsqrt %190 : vector<32x128xf32>
    %192 = arith.mulf %186, %191 : vector<32x128xf32>
    %cst_221 = arith.constant dense<0.000000e+00> : vector<32x128xf32>
    %193 = tpu.matmul %192, %5, %cst_221 {dimension_numbers = #tpu.dot_dimension_numbers<[1], [0], [0], [1], [0, 0, 1, 1], [], []>} : vector<32x128xf32>, vector<128x128xf32>, vector<32x128xf32> -> vector<32x128xf32>
    %194 = arith.mulf %193, %9 : vector<32x128xf32>
    %195 = arith.addf %194, %12 : vector<32x128xf32>
    %c0_222 = arith.constant 0 : index
    %c5 = arith.constant 5 : index
    %c0_223 = arith.constant 0 : index
    %196 = vector.load %arg8[%c0_222, %c5, %c0_223] : memref<32x8x128xf32, #tpu.memory_space<vmem>>, vector<32x1x128xf32>
    %197 = vector.shape_cast %196 : vector<32x1x128xf32> to vector<32x128xf32>
    %198 = vector.shape_cast %195 : vector<32x128xf32> to vector<32x1x128xf32>
    tpu.vector_store %arg8[%c0_222, %c5, %c0_223], %198 {strides = array<i32>} : memref<32x8x128xf32, #tpu.memory_space<vmem>>, vector<32x1x128xf32>,
    %c0_224 = arith.constant 0 : index
    %c48 = arith.constant 48 : index
    %199 = vector.load %arg9[%c0_224, %c48] : memref<512x64xf32, #tpu.memory_space<vmem>>, vector<32x8xf32>
    %c32_225 = arith.constant 32 : index
    %c48_226 = arith.constant 48 : index
    %200 = vector.load %arg9[%c32_225, %c48_226] : memref<512x64xf32, #tpu.memory_space<vmem>>, vector<32x8xf32>
    %c64_227 = arith.constant 64 : index
    %c48_228 = arith.constant 48 : index
    %201 = vector.load %arg9[%c64_227, %c48_228] : memref<512x64xf32, #tpu.memory_space<vmem>>, vector<32x8xf32>
    %c96_229 = arith.constant 96 : index
    %c48_230 = arith.constant 48 : index
    %202 = vector.load %arg9[%c96_229, %c48_230] : memref<512x64xf32, #tpu.memory_space<vmem>>, vector<32x8xf32>
    %c128_231 = arith.constant 128 : index
    %c48_232 = arith.constant 48 : index
    %203 = vector.load %arg9[%c128_231, %c48_232] : memref<512x64xf32, #tpu.memory_space<vmem>>, vector<32x8xf32>
    %c160_233 = arith.constant 160 : index
    %c48_234 = arith.constant 48 : index
    %204 = vector.load %arg9[%c160_233, %c48_234] : memref<512x64xf32, #tpu.memory_space<vmem>>, vector<32x8xf32>
    %c192_235 = arith.constant 192 : index
    %c48_236 = arith.constant 48 : index
    %205 = vector.load %arg9[%c192_235, %c48_236] : memref<512x64xf32, #tpu.memory_space<vmem>>, vector<32x8xf32>
    %c224_237 = arith.constant 224 : index
    %c48_238 = arith.constant 48 : index
    %206 = vector.load %arg9[%c224_237, %c48_238] : memref<512x64xf32, #tpu.memory_space<vmem>>, vector<32x8xf32>
    %c256_239 = arith.constant 256 : index
    %c48_240 = arith.constant 48 : index
    %207 = vector.load %arg9[%c256_239, %c48_240] : memref<512x64xf32, #tpu.memory_space<vmem>>, vector<32x8xf32>
    %c288_241 = arith.constant 288 : index
    %c48_242 = arith.constant 48 : index
    %208 = vector.load %arg9[%c288_241, %c48_242] : memref<512x64xf32, #tpu.memory_space<vmem>>, vector<32x8xf32>
    %c320_243 = arith.constant 320 : index
    %c48_244 = arith.constant 48 : index
    %209 = vector.load %arg9[%c320_243, %c48_244] : memref<512x64xf32, #tpu.memory_space<vmem>>, vector<32x8xf32>
    %c352_245 = arith.constant 352 : index
    %c48_246 = arith.constant 48 : index
    %210 = vector.load %arg9[%c352_245, %c48_246] : memref<512x64xf32, #tpu.memory_space<vmem>>, vector<32x8xf32>
    %c384_247 = arith.constant 384 : index
    %c48_248 = arith.constant 48 : index
    %211 = vector.load %arg9[%c384_247, %c48_248] : memref<512x64xf32, #tpu.memory_space<vmem>>, vector<32x8xf32>
    %c416_249 = arith.constant 416 : index
    %c48_250 = arith.constant 48 : index
    %212 = vector.load %arg9[%c416_249, %c48_250] : memref<512x64xf32, #tpu.memory_space<vmem>>, vector<32x8xf32>
    %c448_251 = arith.constant 448 : index
    %c48_252 = arith.constant 48 : index
    %213 = vector.load %arg9[%c448_251, %c48_252] : memref<512x64xf32, #tpu.memory_space<vmem>>, vector<32x8xf32>
    %c480_253 = arith.constant 480 : index
    %c48_254 = arith.constant 48 : index
    %214 = vector.load %arg9[%c480_253, %c48_254] : memref<512x64xf32, #tpu.memory_space<vmem>>, vector<32x8xf32>
    %215 = tpu.concatenate %199, %200, %201, %202, %203, %204, %205, %206, %207, %208, %209, %210, %211, %212, %213, %214 in 1 : vector<32x8xf32>, vector<32x8xf32>, vector<32x8xf32>, vector<32x8xf32>, vector<32x8xf32>, vector<32x8xf32>, vector<32x8xf32>, vector<32x8xf32>, vector<32x8xf32>, vector<32x8xf32>, vector<32x8xf32>, vector<32x8xf32>, vector<32x8xf32>, vector<32x8xf32>, vector<32x8xf32>, vector<32x8xf32> -> vector<32x128xf32>
    %cst_255 = arith.constant dense<0.000000e+00> : vector<32x128xf32>
    %216 = tpu.matmul %215, %6, %cst_255 {dimension_numbers = #tpu.dot_dimension_numbers<[1], [0], [0], [1], [0, 0, 1, 1], [], []>} : vector<32x128xf32>, vector<128x128xf32>, vector<32x128xf32> -> vector<32x128xf32>
    %217 = arith.subf %215, %216 : vector<32x128xf32>
    %218 = arith.mulf %217, %217 : vector<32x128xf32>
    %cst_256 = arith.constant dense<0.000000e+00> : vector<32x128xf32>
    %219 = tpu.matmul %218, %6, %cst_256 {dimension_numbers = #tpu.dot_dimension_numbers<[1], [0], [0], [1], [0, 0, 1, 1], [], []>} : vector<32x128xf32>, vector<128x128xf32>, vector<32x128xf32> -> vector<32x128xf32>
    %cst_257 = arith.constant 9.99999974E-6 : f32
    %220 = vector.broadcast %cst_257 : f32 to vector<32x128xf32>
    %221 = arith.addf %219, %220 : vector<32x128xf32>
    %222 = math.rsqrt %221 : vector<32x128xf32>
    %223 = arith.mulf %217, %222 : vector<32x128xf32>
    %cst_258 = arith.constant dense<0.000000e+00> : vector<32x128xf32>
    %224 = tpu.matmul %223, %5, %cst_258 {dimension_numbers = #tpu.dot_dimension_numbers<[1], [0], [0], [1], [0, 0, 1, 1], [], []>} : vector<32x128xf32>, vector<128x128xf32>, vector<32x128xf32> -> vector<32x128xf32>
    %225 = arith.mulf %224, %9 : vector<32x128xf32>
    %226 = arith.addf %225, %12 : vector<32x128xf32>
    %c0_259 = arith.constant 0 : index
    %c6 = arith.constant 6 : index
    %c0_260 = arith.constant 0 : index
    %227 = vector.load %arg8[%c0_259, %c6, %c0_260] : memref<32x8x128xf32, #tpu.memory_space<vmem>>, vector<32x1x128xf32>
    %228 = vector.shape_cast %227 : vector<32x1x128xf32> to vector<32x128xf32>
    %229 = vector.shape_cast %226 : vector<32x128xf32> to vector<32x1x128xf32>
    tpu.vector_store %arg8[%c0_259, %c6, %c0_260], %229 {strides = array<i32>} : memref<32x8x128xf32, #tpu.memory_space<vmem>>, vector<32x1x128xf32>,
    %c0_261 = arith.constant 0 : index
    %c56 = arith.constant 56 : index
    %230 = vector.load %arg9[%c0_261, %c56] : memref<512x64xf32, #tpu.memory_space<vmem>>, vector<32x8xf32>
    %c32_262 = arith.constant 32 : index
    %c56_263 = arith.constant 56 : index
    %231 = vector.load %arg9[%c32_262, %c56_263] : memref<512x64xf32, #tpu.memory_space<vmem>>, vector<32x8xf32>
    %c64_264 = arith.constant 64 : index
    %c56_265 = arith.constant 56 : index
    %232 = vector.load %arg9[%c64_264, %c56_265] : memref<512x64xf32, #tpu.memory_space<vmem>>, vector<32x8xf32>
    %c96_266 = arith.constant 96 : index
    %c56_267 = arith.constant 56 : index
    %233 = vector.load %arg9[%c96_266, %c56_267] : memref<512x64xf32, #tpu.memory_space<vmem>>, vector<32x8xf32>
    %c128_268 = arith.constant 128 : index
    %c56_269 = arith.constant 56 : index
    %234 = vector.load %arg9[%c128_268, %c56_269] : memref<512x64xf32, #tpu.memory_space<vmem>>, vector<32x8xf32>
    %c160_270 = arith.constant 160 : index
    %c56_271 = arith.constant 56 : index
    %235 = vector.load %arg9[%c160_270, %c56_271] : memref<512x64xf32, #tpu.memory_space<vmem>>, vector<32x8xf32>
    %c192_272 = arith.constant 192 : index
    %c56_273 = arith.constant 56 : index
    %236 = vector.load %arg9[%c192_272, %c56_273] : memref<512x64xf32, #tpu.memory_space<vmem>>, vector<32x8xf32>
    %c224_274 = arith.constant 224 : index
    %c56_275 = arith.constant 56 : index
    %237 = vector.load %arg9[%c224_274, %c56_275] : memref<512x64xf32, #tpu.memory_space<vmem>>, vector<32x8xf32>
    %c256_276 = arith.constant 256 : index
    %c56_277 = arith.constant 56 : index
    %238 = vector.load %arg9[%c256_276, %c56_277] : memref<512x64xf32, #tpu.memory_space<vmem>>, vector<32x8xf32>
    %c288_278 = arith.constant 288 : index
    %c56_279 = arith.constant 56 : index
    %239 = vector.load %arg9[%c288_278, %c56_279] : memref<512x64xf32, #tpu.memory_space<vmem>>, vector<32x8xf32>
    %c320_280 = arith.constant 320 : index
    %c56_281 = arith.constant 56 : index
    %240 = vector.load %arg9[%c320_280, %c56_281] : memref<512x64xf32, #tpu.memory_space<vmem>>, vector<32x8xf32>
    %c352_282 = arith.constant 352 : index
    %c56_283 = arith.constant 56 : index
    %241 = vector.load %arg9[%c352_282, %c56_283] : memref<512x64xf32, #tpu.memory_space<vmem>>, vector<32x8xf32>
    %c384_284 = arith.constant 384 : index
    %c56_285 = arith.constant 56 : index
    %242 = vector.load %arg9[%c384_284, %c56_285] : memref<512x64xf32, #tpu.memory_space<vmem>>, vector<32x8xf32>
    %c416_286 = arith.constant 416 : index
    %c56_287 = arith.constant 56 : index
    %243 = vector.load %arg9[%c416_286, %c56_287] : memref<512x64xf32, #tpu.memory_space<vmem>>, vector<32x8xf32>
    %c448_288 = arith.constant 448 : index
    %c56_289 = arith.constant 56 : index
    %244 = vector.load %arg9[%c448_288, %c56_289] : memref<512x64xf32, #tpu.memory_space<vmem>>, vector<32x8xf32>
    %c480_290 = arith.constant 480 : index
    %c56_291 = arith.constant 56 : index
    %245 = vector.load %arg9[%c480_290, %c56_291] : memref<512x64xf32, #tpu.memory_space<vmem>>, vector<32x8xf32>
    %246 = tpu.concatenate %230, %231, %232, %233, %234, %235, %236, %237, %238, %239, %240, %241, %242, %243, %244, %245 in 1 : vector<32x8xf32>, vector<32x8xf32>, vector<32x8xf32>, vector<32x8xf32>, vector<32x8xf32>, vector<32x8xf32>, vector<32x8xf32>, vector<32x8xf32>, vector<32x8xf32>, vector<32x8xf32>, vector<32x8xf32>, vector<32x8xf32>, vector<32x8xf32>, vector<32x8xf32>, vector<32x8xf32>, vector<32x8xf32> -> vector<32x128xf32>
    %cst_292 = arith.constant dense<0.000000e+00> : vector<32x128xf32>
    %247 = tpu.matmul %246, %6, %cst_292 {dimension_numbers = #tpu.dot_dimension_numbers<[1], [0], [0], [1], [0, 0, 1, 1], [], []>} : vector<32x128xf32>, vector<128x128xf32>, vector<32x128xf32> -> vector<32x128xf32>
    %248 = arith.subf %246, %247 : vector<32x128xf32>
    %249 = arith.mulf %248, %248 : vector<32x128xf32>
    %cst_293 = arith.constant dense<0.000000e+00> : vector<32x128xf32>
    %250 = tpu.matmul %249, %6, %cst_293 {dimension_numbers = #tpu.dot_dimension_numbers<[1], [0], [0], [1], [0, 0, 1, 1], [], []>} : vector<32x128xf32>, vector<128x128xf32>, vector<32x128xf32> -> vector<32x128xf32>
    %cst_294 = arith.constant 9.99999974E-6 : f32
    %251 = vector.broadcast %cst_294 : f32 to vector<32x128xf32>
    %252 = arith.addf %250, %251 : vector<32x128xf32>
    %253 = math.rsqrt %252 : vector<32x128xf32>
    %254 = arith.mulf %248, %253 : vector<32x128xf32>
    %cst_295 = arith.constant dense<0.000000e+00> : vector<32x128xf32>
    %255 = tpu.matmul %254, %5, %cst_295 {dimension_numbers = #tpu.dot_dimension_numbers<[1], [0], [0], [1], [0, 0, 1, 1], [], []>} : vector<32x128xf32>, vector<128x128xf32>, vector<32x128xf32> -> vector<32x128xf32>
    %256 = arith.mulf %255, %9 : vector<32x128xf32>
    %257 = arith.addf %256, %12 : vector<32x128xf32>
    %c0_296 = arith.constant 0 : index
    %c7 = arith.constant 7 : index
    %c0_297 = arith.constant 0 : index
    %258 = vector.load %arg8[%c0_296, %c7, %c0_297] : memref<32x8x128xf32, #tpu.memory_space<vmem>>, vector<32x1x128xf32>
    %259 = vector.shape_cast %258 : vector<32x1x128xf32> to vector<32x128xf32>
    %260 = vector.shape_cast %257 : vector<32x128xf32> to vector<32x1x128xf32>
    tpu.vector_store %arg8[%c0_296, %c7, %c0_297], %260 {strides = array<i32>} : memref<32x8x128xf32, #tpu.memory_space<vmem>>, vector<32x1x128xf32>,
    return
  }
  func.func @transform_0(%arg0: i32, %arg1: i32) -> (i32, i32, i32) {
    %c0_i32 = arith.constant 0 : i32
    %c0_i32_0 = arith.constant 0 : i32
    return %arg0, %c0_i32, %arg1 : i32, i32, i32
  }
  func.func @transform_1(%arg0: i32, %arg1: i32) -> (i32, i32) {
    %c0_i32 = arith.constant 0 : i32
    %c0_i32_0 = arith.constant 0 : i32
    %c0_i32_1 = arith.constant 0 : i32
    return %c0_i32, %c0_i32_0 : i32, i32
  }
  func.func @transform_2(%arg0: i32, %arg1: i32) -> (i32, i32) {
    %c0_i32 = arith.constant 0 : i32
    %c0_i32_0 = arith.constant 0 : i32
    %c0_i32_1 = arith.constant 0 : i32
    return %c0_i32, %c0_i32_0 : i32, i32
  }
  func.func @transform_3(%arg0: i32, %arg1: i32) -> (i32, i32) {
    %c0_i32 = arith.constant 0 : i32
    %c0_i32_0 = arith.constant 0 : i32
    %c0_i32_1 = arith.constant 0 : i32
    return %c0_i32, %c0_i32_0 : i32, i32
  }
  func.func @transform_4(%arg0: i32, %arg1: i32) -> (i32, i32) {
    %c0_i32 = arith.constant 0 : i32
    %c0_i32_0 = arith.constant 0 : i32
    %c0_i32_1 = arith.constant 0 : i32
    return %c0_i32, %c0_i32_0 : i32, i32
  }
  func.func @transform_5(%arg0: i32, %arg1: i32) -> (i32, i32) {
    %c0_i32 = arith.constant 0 : i32
    %c0_i32_0 = arith.constant 0 : i32
    %c0_i32_1 = arith.constant 0 : i32
    return %c0_i32, %c0_i32_0 : i32, i32
  }
  func.func @transform_6(%arg0: i32, %arg1: i32) -> (i32, i32, i32) {
    %c0_i32 = arith.constant 0 : i32
    %c0_i32_0 = arith.constant 0 : i32
    return %arg0, %arg1, %c0_i32 : i32, i32, i32
  }
}

</mosaic_0001>

<bundles_post_ra>
// kernel: tile.13
= control target key start
LH: loop header
LB: loop body
LE: loop exit
PB: predicated region body
PF: predicated region fallthrough
CT: control target
= control target key end

     0   :  { %s22_s0 = inlined_call_operand.vmem [shape: f32[32], index: 0, kind: input, shape index: {}]   ;;  %s23_s1 = inlined_call_operand.vmem [shape: f32[4,32], index: 1, kind: output, shape index: {}]  }
   0x1   :  { %v4_v0 = vld [vmem:[%s22_s0] ss:$0 sm:$0xff] }
   0x2   :  { %5 = vst [vmem:[%s23_s1] sm:$0xf] %v4_v0 }

// kernel: tile.14
= control target key start
LH: loop header
LB: loop body
LE: loop exit
PB: predicated region body
PF: predicated region fallthrough
CT: control target
= control target key end

     0   :  { %s37_s8 = smov 32   ;;  %s38_s9 = smov 64   ;;  %vm7_vm0 = vcmask 261120   ;;  %vm13_vm1 = vcmask 1048320   ;;  %vm19_vm2 = vcmask 785920   ;;  %vm25_vm3 = vcmask 523520   ;;  %s55_s0 = inlined_call_operand.vmem [shape: f32[4,32], index: 0, kind: input, shape index: {}]   ;;  %s56_s1 = inlined_call_operand.vmem [shape: f32[1,128], index: 1, kind: output, shape index: {}]  }
   0x1   :  { %v4_v0 = vld [vmem:[%s55_s0] sm:$0xf]  ;;  %s36_s0 = smov 96  }
   0x2   :  { %5 = vst [vmem:[#allocation1] sm:$0xf] %v4_v0 }
   0x9   :  { %v10_v1 = vld [vmem:[#allocation1 + $0x3] sm:$0x1]   ;;  %v22_v2 = vld [vmem:[#allocation1 + $0x1] sm:$0x1]   ;;  %v16_v3 = vld [vmem:[#allocation1 + $0x2] sm:$0x1]  }
   0xa   :  { %11 = vrot.lane.b32.xlu0 %v10_v1, %s36_s0  ;;  %23 = vrot.lane.b32.xlu1 %v22_v2, %s37_s8  ;;  %v6_v4 = vld [vmem:[#allocation1] sm:$0x1]  }
   0xb   :  { %8 = vst.msk [vmem:[#allocation0] sm:$0x1] %vm7_vm0, %v6_v4  }
  0x12   :  { %17 = vrot.lane.b32.xlu0 %v16_v3, %s38_s9 }
  0x7c   :  { %v12_v5 = vpop.permute.xlu0 %11   ;;  %v24_v6 = vpop.permute.xlu1 %23  }
  0x7d   :  { %14 = vst.msk [vmem:[#allocation0] sm:$0x1] %vm13_vm1, %v12_v5  }
  0x84   :  { %v18_v7 = vpop.permute.xlu0 %17  }
  0x85   :  { %20 = vst.msk [vmem:[#allocation0] sm:$0x1] %vm19_vm2, %v18_v7  }
  0x86   :  { %26 = vst.msk [vmem:[#allocation0] sm:$0x1] %vm25_vm3, %v24_v6  }
  0x8d   :  { %v29_v8 = vld [vmem:[#allocation0] sm:$0x1] }
  0x8e   :  { %32 = vst [vmem:[%s56_s1] sm:$0x1] %v29_v8 }

// kernel: final_patch_expand_x4.1
= control target key start
LH: loop header
LB: loop body
LE: loop exit
PB: predicated region body
PF: predicated region fallthrough
CT: control target
= control target key end

     0   :  { %s6142_s21 = smov 0   ;;  %s6144_s22 = smov 0   ;;  %s10794_s0 = inlined_call_operand.vmem [shape: f32[2,32,64], index: 0, kind: input, shape index: {}]   ;;  %s10795_s1 = inlined_call_operand.vmem [shape: f32[512,32], index: 1, kind: input, shape index: {}]   ;;  %s10796_s2 = inlined_call_operand.vmem [shape: f32[128,128], index: 2, kind: input, shape index: {}]   ;;  %s10797_s3 = inlined_call_operand.vmem [shape: f32[128,128], index: 3, kind: input, shape index: {}]   ;;  %s10798_s4 = inlined_call_operand.vmem [shape: f32[1,128], index: 4, kind: input, shape index: {}]   ;;  %s10799_s5 = inlined_call_operand.vmem [shape: f32[1,128], index: 5, kind: input, shape index: {}]   ;;  %s10800_s6 = inlined_call_operand.vmem [shape: f32[64,8,128], index: 6, kind: output, shape index: {}]  }
   0x1   :  { %s6146_s23 = smov 0  }
   0x2 LB: > { %s28_s24 = sadd.s32 1, %s6086_s22  ;;  %p5781_p0 = scmp.ge.s32.totalorder %s6090_s23, 1  ;;  %s6090_s23 = sphi %s6146_s23, %s16_s23   ;;  %s6086_s22 = sphi %s6144_s22, %s11461_s22   ;;  %s6082_s21 = sphi %s6142_s21, %s11460_s21  }
   0x3   : > { %p30_p1 = scmp.ge.s32.totalorder %s28_s24, 2  ;;  %p231_p2 = scmp.lt.s32.totalorder %s6090_s23, 3 }
   0x5   : > { %s11463_s24 = smov (%p30_p1, %s28_s24), 0  ;;  %p232_p3 = pnand %p5781_p0, %p231_p2 }
   0x7   : > { %235 = sbr.rel (%p232_p3) target bundleno = 1985 (0x7c1), region = 44 }
   0xc   : > { %p267_p4 = scmp.lt.s32.totalorder %s6082_s21, 1  ;;  %v284_v4 = vld [vmem:[%s10795_s1] sm:$0xff]  ;;  %vm352_vm0 = vcmask 261120   ;;  %v326_v5 = vld [vmem:[%s10795_s1 + $0x150] sm:$0xff]  ;;  %v343_v6 = vld [vmem:[%s10795_s1 + $0x1d8] sm:$0xff]  ;;  %vm754_vm1 = vcmask 523264  }
   0xd   : > { %v335_v7 = vld [vmem:[%s10795_s1 + $0x198] sm:$0xff]  ;;  %v285_v8 = vld [vmem:[%s10795_s1 + $0x8] sm:$0xff]  ;;  %v344_v10 = vld [vmem:[%s10795_s1 + $0x1e0] sm:$0xff]  ;;  %s10818_s16 = smov 120   ;;  %s10884_s17 = smov 80   ;;  %vm1163_vm2 = vcmask 64512  }
   0xe   : > { %s268_s25 = scalar_select %p267_p4, %s6082_s21, 1  ;;  %v327_v9 = vld [vmem:[%s10795_s1 + $0x158] sm:$0xff]  ;;  %v336_v11 = vld [vmem:[%s10795_s1 + $0x1a0] sm:$0xff]  ;;  %v286_v12 = vld [vmem:[%s10795_s1 + $0x10] sm:$0xff]  ;;  %vm1173_vm3 = vcmask 195584   ;;  %vm10883_vm4 = vcmask 130048  }
   0xf   : > { %v328_v13 = vld [vmem:[%s10795_s1 + $0x160] sm:$0xff]  ;;  %v345_v14 = vld [vmem:[%s10795_s1 + $0x1e8] sm:$0xff]  ;;  %v287_v16 = vld [vmem:[%s10795_s1 + $0x18] sm:$0xff]  ;;  %s6096_s30 = smov 104   ;;  %s10886_s7 = smov 64   ;;  %vm1187_vm5 = vcmask 392192  }
  0x10   : > { %s5852_s26 = sshll.u32 %s268_s25, 5  ;;  %v337_v15 = vld [vmem:[%s10795_s1 + $0x1a8] sm:$0xff]  ;;  %v346_v18 = vld [vmem:[%s10795_s1 + $0x1f0] sm:$0xff]  ;;  %v288_v20 = vld [vmem:[%s10795_s1 + $0x20] sm:$0xff]  ;;  %s6098_s10 = smov 96   ;;  %vm1182_vm6 = vcmask 326656  }
  0x11   : > { %s274_s29 = scalar_lea.vmem %s10794_s0, %s5852_s26  ;;  %v329_v17 = vld [vmem:[%s10795_s1 + $0x168] sm:$0xff]  ;;  %v338_v19 = vld [vmem:[%s10795_s1 + $0x1b0] sm:$0xff]  ;;  %v347_v22 = vld [vmem:[%s10795_s1 + $0x1f8] sm:$0xff]  ;;  %s6094_s26 = smov 112   ;;  %vm1192_vm7 = vcmask 457728   ;;  %vm1201_vm8 = vcmask 588800  }
  0x12   : > { %v351_v0 = vld [vmem:[%s274_s29 + $0x18] sm:$0xff]  ;;  %v350_v1 = vld [vmem:[%s274_s29 + $0x10] sm:$0xff]  ;;  %v349_v2 = vld [vmem:[%s274_s29 + $0x8] sm:$0xff]  ;;  %s6099_s19 = smov 88   ;;  %s6100_s27 = smov 8   ;;  %vm1206_vm9 = vcmask 654336  }
  0x13   : > { %557 = vmatpush.msra.mxu0 %v351_v0  ;;  %5853 = vmatpush.msra.mxu1 %v351_v0  ;;  %v348_v3 = vld [vmem:[%s274_s29] sm:$0xff]  ;;  %v330_v21 = vld [vmem:[%s10795_s1 + $0x170] sm:$0xff]  ;;  %v339_v23 = vld [vmem:[%s10795_s1 + $0x1b8] sm:$0xff]  ;;  %s10851_s29 = smov 72   ;;  %s6101_s14 = smov 16   ;;  %vm1211_vm10 = vcmask 719872  }
  0x14   : > { %5855 = vmatpush.msra.mxu3 %v351_v0  ;;  %5854 = vmatpush.msra.mxu2 %v351_v0  ;;  %v331_v24 = vld [vmem:[%s10795_s1 + $0x178] sm:$0xff]  ;;  %v340_v25 = vld [vmem:[%s10795_s1 + $0x1c0] sm:$0xff]  ;;  %v289_v26 = vld [vmem:[%s10795_s1 + $0x28] sm:$0xff]  ;;  %s6102_s9 = smov 24   ;;  %s10894_s25 = smov 32   ;;  %vm10909_vm11 = vcmask 785408  }
  0x15   : > { %558 = vmatpush.msra.mxu0 %v350_v1  ;;  %5856 = vmatpush.msra.mxu1 %v350_v1  ;;  %v332_v27 = vld [vmem:[%s10795_s1 + $0x180] sm:$0xff]  ;;  %v290_v30 = vld [vmem:[%s10795_s1 + $0x30] sm:$0xff]  ;;  %v333_v37 = vld [vmem:[%s10795_s1 + $0x188] sm:$0xff]  ;;  %s6104_s28 = smov 40   ;;  %s6105_s12 = smov 48   ;;  %vm1221_vm12 = vcmask 850944  }
  0x16   : > { %5858 = vmatpush.msra.mxu3 %v350_v1  ;;  %5857 = vmatpush.msra.mxu2 %v350_v1  ;;  %v341_v38 = vld [vmem:[%s10795_s1 + $0x1c8] sm:$0xff]  ;;  %v291_v43 = vld [vmem:[%s10795_s1 + $0x38] sm:$0xff]  ;;  %v342_v45 = vld [vmem:[%s10795_s1 + $0x1d0] sm:$0xff]  ;;  %s6106_s13 = smov 56   ;;  %vm10872_vm13 = vcmask 916480   ;;  %vm10871_vm14 = vcmask 982016  }
  0x17   : > { %559 = vmatpush.msra.mxu0 %v349_v2  ;;  %5859 = vmatpush.msra.mxu1 %v349_v2  ;;  %v334_v49 = vld [vmem:[%s10795_s1 + $0x190] sm:$0xff]  ;;  %v292_v50 = vld [vmem:[%s10795_s1 + $0x40] sm:$0xff]  ;;  %v293_v53 = vld [vmem:[%s10795_s1 + $0x48] sm:$0xff]  ;;  %s11234_s8 = smov 120  }
  0x18   : > { %5861 = vmatpush.msra.mxu3 %v349_v2  ;;  %5860 = vmatpush.msra.mxu2 %v349_v2  ;;  %v294_v57 = vld [vmem:[%s10795_s1 + $0x50] sm:$0xff]  ;;  %v295_v60 = vld [vmem:[%s10795_s1 + $0x58] sm:$0xff]  ;;  %v296_v63 = vld [vmem:[%s10795_s1 + $0x60] sm:$0xff] }
  0x19   : > { %560 = vmatpush.msra.mxu0 %v348_v3  ;;  %5862 = vmatpush.msra.mxu1 %v348_v3 }
  0x1a   : > { %5864 = vmatpush.msra.mxu3 %v348_v3  ;;  %5786 = vmatmul.msk.f32.vlgmr.msra.gmra.mxu0 %vm352_vm0, %v284_v4  ;;  %v297_v4 = vld [vmem:[%s10795_s1 + $0x68] sm:$0xff] }
  0x1b   : > { %5828 = vmatmul.msk.f32.vlgmr.msra.gmra.mxu1 %vm352_vm0, %v326_v5  ;;  %5845 = vmatmul.msk.f32.vlgmr.msra.gmra.mxu3 %vm352_vm0, %v343_v6  ;;  %v298_v6 = vld [vmem:[%s10795_s1 + $0x70] sm:$0xff] }
  0x1c   : > { %5863 = vmatpush.msra.mxu2 %v348_v3 }
  0x1d   : > { %5837 = vmatmul.msk.f32.vlgmr.msra.gmra.mxu2 %vm352_vm0, %v335_v7 }
  0x22   : > { %5787 = vmatmul.msk.f32.gmra.mxu0 %vm352_vm0, %v285_v8 }
  0x23   : > { %5829 = vmatmul.msk.f32.gmra.mxu1 %vm352_vm0, %v327_v9  ;;  %5846 = vmatmul.msk.f32.gmra.mxu3 %vm352_vm0, %v344_v10  ;;  %v299_v10 = vld [vmem:[%s10795_s1 + $0x78] sm:$0xff] }
  0x25   : > { %5838 = vmatmul.msk.f32.gmra.mxu2 %vm352_vm0, %v336_v11 }
  0x2a   : > { %5788 = vmatmul.msk.f32.gmra.mxu0 %vm352_vm0, %v286_v12 }
  0x2b   : > { %5830 = vmatmul.msk.f32.gmra.mxu1 %vm352_vm0, %v328_v13  ;;  %5847 = vmatmul.msk.f32.gmra.mxu3 %vm352_vm0, %v345_v14  ;;  %v300_v13 = vld [vmem:[%s10795_s1 + $0x80] sm:$0xff] }
  0x2d   : > { %5839 = vmatmul.msk.f32.gmra.mxu2 %vm352_vm0, %v337_v15 }
  0x32   : > { %5789 = vmatmul.msk.f32.gmra.mxu0 %vm352_vm0, %v287_v16 }
  0x33   : > { %5831 = vmatmul.msk.f32.gmra.mxu1 %vm352_vm0, %v329_v17  ;;  %5848 = vmatmul.msk.f32.gmra.mxu3 %vm352_vm0, %v346_v18  ;;  %v301_v17 = vld [vmem:[%s10795_s1 + $0x88] sm:$0xff] }
  0x35   : > { %5840 = vmatmul.msk.f32.gmra.mxu2 %vm352_vm0, %v338_v19 }
  0x3a   : > { %5790 = vmatmul.msk.f32.gmra.mxu0 %vm352_vm0, %v288_v20 }
  0x3b   : > { %5832 = vmatmul.msk.f32.gmra.mxu1 %vm352_vm0, %v330_v21  ;;  %5849 = vmatmul.msk.f32.gmra.mxu3 %vm352_vm0, %v347_v22 }
  0x3d   : > { %5841 = vmatmul.msk.f32.gmra.mxu2 %vm352_vm0, %v339_v23  ;;  %v302_v23 = vld [vmem:[%s10795_s1 + $0x90] sm:$0xff] }
  0x42   : > { %5791 = vmatmul.msk.f32.gmra.mxu0 %vm352_vm0, %v289_v26  ;;  %v303_v26 = vld [vmem:[%s10795_s1 + $0x98] sm:$0xff] }
  0x43   : > { %5833 = vmatmul.msk.f32.gmra.mxu1 %vm352_vm0, %v331_v24 }
  0x45   : > { %5842 = vmatmul.msk.f32.gmra.mxu2 %vm352_vm0, %v340_v25 }
  0x4a   : > { %5792 = vmatmul.msk.f32.gmra.mxu0 %vm352_vm0, %v290_v30 }
  0x4b   : > { %5834 = vmatmul.msk.f32.gmra.mxu1 %vm352_vm0, %v332_v27 }
  0x4d   : > { %5843 = vmatmul.msk.f32.gmra.mxu2 %vm352_vm0, %v341_v38  ;;  %v305_v38 = vld [vmem:[%s10795_s1 + $0xa8] sm:$0xff] }
  0x52   : > { %5793 = vmatmul.msk.f32.gmra.mxu0 %vm352_vm0, %v291_v43 }
  0x53   : > { %5835 = vmatmul.msk.f32.gmra.mxu1 %vm352_vm0, %v333_v37 }
  0x55   : > { %5844 = vmatmul.msk.f32.gmra.mxu2 %vm352_vm0, %v342_v45 }
  0x5a   : > { %5794 = vmatmul.msk.f32.gmra.mxu0 %vm352_vm0, %v292_v50  ;;  %v307_v50 = vld [vmem:[%s10795_s1 + $0xb8] sm:$0xff] }
  0x5b   : > { %5836 = vmatmul.msk.f32.gmra.mxu1 %vm352_vm0, %v334_v49 }
  0x62   : > { %5795 = vmatmul.msk.f32.gmra.mxu0 %vm352_vm0, %v293_v53 }
  0x6a   : > { %5796 = vmatmul.msk.f32.gmra.mxu0 %vm352_vm0, %v294_v57 }
  0x72   : > { %5797 = vmatmul.msk.f32.gmra.mxu0 %vm352_vm0, %v295_v60 }
  0x7a   : > { %5798 = vmatmul.msk.f32.gmra.mxu0 %vm352_vm0, %v296_v63 }
  0x82   : > { %5799 = vmatmul.msk.f32.gmra.mxu0 %vm352_vm0, %v297_v4 }
  0x8a   : > { %5800 = vmatmul.msk.f32.gmra.mxu0 %vm352_vm0, %v298_v6  ;;  %v310_v6 = vld [vmem:[%s10795_s1 + $0xd0] sm:$0xff] }
  0x92   : > { %5801 = vmatmul.msk.f32.gmra.mxu0 %vm352_vm0, %v299_v10 }
  0x97   : > { %v562_v28 = vpop.f32.mrf.mxu0 }
  0x98   : > { %755 = vst.msk [vmem:[#allocation2] sm:$0xff] %vm754_vm1, %v562_v28  ;;  %v688_v29 = vpop.f32.mrf.mxu1 }
  0x99   : > { %797 = vst.msk [vmem:[#allocation2 + $0x150] sm:$0xff] %vm754_vm1, %v688_v29 }
  0x9a   : > { %5802 = vmatmul.msk.f32.gmra.mxu0 %vm352_vm0, %v300_v13  ;;  %v311_v13 = vld [vmem:[%s10795_s1 + $0xd8] sm:$0xff] }
  0x9e   : > { %v739_v31 = vpop.f32.mrf.mxu3 }
  0x9f   : > { %814 = vst.msk [vmem:[#allocation2 + $0x1d8] sm:$0xff] %vm754_vm1, %v739_v31  ;;  %v1475_v32 = vld [vmem:[#allocation2] sm:$0xff]  ;;  %v565_v33 = vpop.f32.mrf.mxu0 }
  0xa0   : > { %v901_v34 = vld [vmem:[#allocation2 + $0x150] sm:$0xff]  ;;  %1543 = vrot.lane.b32.xlu0 %v1475_v32, %s10818_s16  ;;  %v691_v35 = vpop.f32.mrf.mxu1  ;;  %v715_v36 = vpop.f32.mrf.mxu2  ;;  %756 = vst.msk [vmem:[#allocation2 + $0x8] sm:$0xff] %vm754_vm1, %v565_v33  ;;  %v304_v31 = vld [vmem:[%s10795_s1 + $0xa0] sm:$0xff] }
  0xa1   : > { %1075 = vrot.lane.b32.xlu2 %v901_v34, %s10884_s17  ;;  %798 = vst.msk [vmem:[#allocation2 + $0x158] sm:$0xff] %vm754_vm1, %v691_v35 }
  0xa2   : > { %806 = vst.msk [vmem:[#allocation2 + $0x198] sm:$0xff] %vm754_vm1, %v715_v36  ;;  %5803 = vmatmul.msk.f32.gmra.mxu0 %vm352_vm0, %v301_v17 }
  0xa6   : > { %v918_v39 = vld [vmem:[#allocation2 + $0x1d8] sm:$0xff]  ;;  %v742_v40 = vpop.f32.mrf.mxu3 }
  0xa7   : > { %1141 = vrot.lane.b32.xlu1 %v918_v39, %s6094_s26  ;;  %815 = vst.msk [vmem:[#allocation2 + $0x1e0] sm:$0xff] %vm754_vm1, %v742_v40  ;;  %v568_v47 = vpop.f32.mrf.mxu0  ;;  %v1476_v52 = vld [vmem:[#allocation2 + $0x8] sm:$0xff] }
  0xa8   : > { %2146 = vrot.lane.b32.xlu0 %v1475_v32, %s6094_s26  ;;  %v718_v41 = vpop.f32.mrf.mxu2  ;;  %v694_v42 = vpop.f32.mrf.mxu1  ;;  %v902_v44 = vld [vmem:[#allocation2 + $0x158] sm:$0xff]  ;;  %757 = vst.msk [vmem:[#allocation2 + $0x10] sm:$0xff] %vm754_vm1, %v568_v47 }
  0xa9   : > { %1691 = vrot.lane.b32.xlu2 %v901_v34, %s10851_s29  ;;  %807 = vst.msk [vmem:[#allocation2 + $0x1a0] sm:$0xff] %vm754_vm1, %v718_v41  ;;  %v910_v46 = vld [vmem:[#allocation2 + $0x198] sm:$0xff] }
  0xaa   : > { %799 = vst.msk [vmem:[#allocation2 + $0x160] sm:$0xff] %vm754_vm1, %v694_v42  ;;  %5804 = vmatmul.msk.f32.gmra.mxu0 %vm352_vm0, %v302_v23 }
  0xae   : > { %v745_v48 = vpop.f32.mrf.mxu3  ;;  %v919_v59 = vld [vmem:[#allocation2 + $0x1e0] sm:$0xff] }
  0xaf   : > { %1757 = vrot.lane.b32.xlu1 %v918_v39, %s6096_s30  ;;  %816 = vst.msk [vmem:[#allocation2 + $0x1e8] sm:$0xff] %vm754_vm1, %v745_v48  ;;  %v571_v55 = vpop.f32.mrf.mxu0  ;;  %v1477_v1 = vld [vmem:[#allocation2 + $0x10] sm:$0xff] }
  0xb0   : > { %1077 = vrot.lane.b32.xlu0 %v902_v44, %s10884_s17  ;;  %v721_v51 = vpop.f32.mrf.mxu2  ;;  %v911_v54 = vld [vmem:[#allocation2 + $0x1a0] sm:$0xff]  ;;  %v697_v56 = vpop.f32.mrf.mxu1  ;;  %758 = vst.msk [vmem:[#allocation2 + $0x18] sm:$0xff] %vm754_vm1, %v571_v55 }
  0xb1   : > { %2294 = vrot.lane.b32.xlu2 %v901_v34, %s10886_s7  ;;  %808 = vst.msk [vmem:[#allocation2 + $0x1a8] sm:$0xff] %vm754_vm1, %v721_v51  ;;  %v903_v58 = vld [vmem:[#allocation2 + $0x160] sm:$0xff] }
  0xb2   : > { %800 = vst.msk [vmem:[#allocation2 + $0x168] sm:$0xff] %vm754_vm1, %v697_v56  ;;  %5805 = vmatmul.msk.f32.gmra.mxu0 %vm352_vm0, %v303_v26 }
  0xb6   : > { %v748_v61 = vpop.f32.mrf.mxu3  ;;  %v920_v0 = vld [vmem:[#allocation2 + $0x1e8] sm:$0xff] }
  0xb7   : > { %2360 = vrot.lane.b32.xlu1 %v918_v39, %s6098_s10  ;;  %817 = vst.msk [vmem:[#allocation2 + $0x1f0] sm:$0xff] %vm754_vm1, %v748_v61  ;;  %v574_v62 = vpop.f32.mrf.mxu0  ;;  %v1478_v8 = vld [vmem:[#allocation2 + $0x18] sm:$0xff] }
  0xb8   : > { %1693 = vrot.lane.b32.xlu0 %v902_v44, %s10851_s29  ;;  %759 = vst.msk [vmem:[#allocation2 + $0x20] sm:$0xff] %vm754_vm1, %v574_v62  ;;  %v700_v2 = vpop.f32.mrf.mxu1  ;;  %v724_v3 = vpop.f32.mrf.mxu2  ;;  %v912_v5 = vld [vmem:[#allocation2 + $0x1a8] sm:$0xff] }
  0xb9   : > { %1109 = vrot.lane.b32.xlu2 %v910_v46, %s6098_s10  ;;  %801 = vst.msk [vmem:[#allocation2 + $0x170] sm:$0xff] %vm754_vm1, %v700_v2  ;;  %v904_v9 = vld [vmem:[#allocation2 + $0x168] sm:$0xff] }
  0xba   : > { %809 = vst.msk [vmem:[#allocation2 + $0x1b0] sm:$0xff] %vm754_vm1, %v724_v3  ;;  %5806 = vmatmul.msk.f32.gmra.mxu0 %vm352_vm0, %v304_v31 }
  0xbe   : > { %v751_v12 = vpop.f32.mrf.mxu3  ;;  %v921_v15 = vld [vmem:[#allocation2 + $0x1f0] sm:$0xff] }
  0xbf   : > { %1545 = vrot.lane.b32.xlu1 %v1476_v52, %s10818_s16  ;;  %818 = vst.msk [vmem:[#allocation2 + $0x1f8] sm:$0xff] %vm754_vm1, %v751_v12  ;;  %v863_v16 = vld [vmem:[#allocation2 + $0x20] sm:$0xff]  ;;  %v577_v22 = vpop.f32.mrf.mxu0 }
  0xc0   : > { %2296 = vrot.lane.b32.xlu0 %v902_v44, %s10886_s7  ;;  %v703_v7 = vpop.f32.mrf.mxu1  ;;  %v727_v11 = vpop.f32.mrf.mxu2  ;;  %v905_v19 = vld [vmem:[#allocation2 + $0x170] sm:$0xff]  ;;  %760 = vst.msk [vmem:[#allocation2 + $0x28] sm:$0xff] %vm754_vm1, %v577_v22 }
  0xc1   : > { %1725 = vrot.lane.b32.xlu2 %v910_v46, %s6099_s19  ;;  %802 = vst.msk [vmem:[#allocation2 + $0x178] sm:$0xff] %vm754_vm1, %v703_v7  ;;  %v913_v21 = vld [vmem:[#allocation2 + $0x1b0] sm:$0xff] }
  0xc2   : > { %810 = vst.msk [vmem:[#allocation2 + $0x1b8] sm:$0xff] %vm754_vm1, %v727_v11  ;;  %5807 = vmatmul.msk.f32.gmra.mxu0 %vm352_vm0, %v305_v38  ;;  %v306_v44 = vld [vmem:[%s10795_s1 + $0xb0] sm:$0xff] }
  0xc6   : > { %v922_v36 = vld [vmem:[#allocation2 + $0x1f8] sm:$0xff] }
  0xc7   : > { %2148 = vrot.lane.b32.xlu1 %v1476_v52, %s6094_s26  ;;  %v580_v30 = vpop.f32.mrf.mxu0  ;;  %v1480_v49 = vld [vmem:[#allocation2 + $0x28] sm:$0xff] }
  0xc8   : > { %1119 = vrot.lane.b32.xlu0 %v911_v54, %s6096_s30  ;;  %v730_v20 = vpop.f32.mrf.mxu2  ;;  %v706_v25 = vpop.f32.mrf.mxu1  ;;  %v906_v29 = vld [vmem:[#allocation2 + $0x178] sm:$0xff]  ;;  %761 = vst.msk [vmem:[#allocation2 + $0x30] sm:$0xff] %vm754_vm1, %v580_v30  ;;  %v313_v30 = vld [vmem:[%s10795_s1 + $0xe8] sm:$0xff] }
  0xc9   : > { %2328 = vrot.lane.b32.xlu2 %v910_v46, %s10884_s17  ;;  %811 = vst.msk [vmem:[#allocation2 + $0x1c0] sm:$0xff] %vm754_vm1, %v730_v20  ;;  %v914_v35 = vld [vmem:[#allocation2 + $0x1b8] sm:$0xff]  ;;  %v312_v20 = vld [vmem:[%s10795_s1 + $0xe0] sm:$0xff] }
  0xca   : > { %803 = vst.msk [vmem:[#allocation2 + $0x180] sm:$0xff] %vm754_vm1, %v706_v25  ;;  %5808 = vmatmul.msk.f32.gmra.mxu0 %vm352_vm0, %v306_v44 }
  0xcf   : > { %1087 = vrot.lane.b32.xlu1 %v903_v58, %s6099_s19  ;;  %v583_v42 = vpop.f32.mrf.mxu0  ;;  %v1481_v62 = vld [vmem:[#allocation2 + $0x30] sm:$0xff] }
  0xd0   : > { %1735 = vrot.lane.b32.xlu0 %v911_v54, %s6098_s10  ;;  %v709_v37 = vpop.f32.mrf.mxu1  ;;  %762 = vst.msk [vmem:[#allocation2 + $0x38] sm:$0xff] %vm754_vm1, %v583_v42  ;;  %v733_v43 = vpop.f32.mrf.mxu2  ;;  %v915_v48 = vld [vmem:[#allocation2 + $0x1c0] sm:$0xff]  ;;  %v314_v42 = vld [vmem:[%s10795_s1 + $0xf0] sm:$0xff] }
  0xd1   : > { %1151 = vrot.lane.b32.xlu2 %v919_v59, %s10818_s16  ;;  %804 = vst.msk [vmem:[#allocation2 + $0x188] sm:$0xff] %vm754_vm1, %v709_v37  ;;  %v907_v55 = vld [vmem:[#allocation2 + $0x180] sm:$0xff] }
  0xd2   : > { %812 = vst.msk [vmem:[#allocation2 + $0x1c8] sm:$0xff] %vm754_vm1, %v733_v43  ;;  %5809 = vmatmul.msk.f32.gmra.mxu0 %vm352_vm0, %v307_v50 }
  0xd7   : > { %1703 = vrot.lane.b32.xlu1 %v903_v58, %s10884_s17  ;;  %v586_v56 = vpop.f32.mrf.mxu0  ;;  %v866_v10 = vld [vmem:[#allocation2 + $0x38] sm:$0xff] }
  0xd8   : > { %2338 = vrot.lane.b32.xlu0 %v911_v54, %s6099_s19  ;;  %v712_v54 = vpop.f32.mrf.mxu1  ;;  %763 = vst.msk [vmem:[#allocation2 + $0x40] sm:$0xff] %vm754_vm1, %v586_v56  ;;  %v736_v57 = vpop.f32.mrf.mxu2  ;;  %v908_v4 = vld [vmem:[#allocation2 + $0x188] sm:$0xff] }
  0xd9   : > { %1767 = vrot.lane.b32.xlu2 %v919_v59, %s6094_s26  ;;  %805 = vst.msk [vmem:[#allocation2 + $0x190] sm:$0xff] %vm754_vm1, %v712_v54  ;;  %v916_v11 = vld [vmem:[#allocation2 + $0x1c8] sm:$0xff]  ;;  %v315_v54 = vld [vmem:[%s10795_s1 + $0xf8] sm:$0xff] }
  0xda   : > { %813 = vst.msk [vmem:[#allocation2 + $0x1d0] sm:$0xff] %vm754_vm1, %v736_v57 }
  0xdf   : > { %2306 = vrot.lane.b32.xlu1 %v903_v58, %s10851_s29  ;;  %v308_v58 = vld [vmem:[%s10795_s1 + $0xc0] sm:$0xff]  ;;  %v589_v63 = vpop.f32.mrf.mxu0 }
  0xe0   : > { %1153 = vrot.lane.b32.xlu0 %v920_v0, %s10818_s16  ;;  %5810 = vmatmul.msk.f32.gmra.mxu0 %vm352_vm0, %v308_v58  ;;  %764 = vst.msk [vmem:[#allocation2 + $0x48] sm:$0xff] %vm754_vm1, %v589_v63  ;;  %v909_v25 = vld [vmem:[#allocation2 + $0x190] sm:$0xff]  ;;  %v1483_v37 = vld [vmem:[#allocation2 + $0x40] sm:$0xff] }
  0xe1   : > { %1547 = vrot.lane.b32.xlu2 %v1477_v1, %s10818_s16  ;;  %v917_v26 = vld [vmem:[#allocation2 + $0x1d0] sm:$0xff]  ;;  %v316_v63 = vld [vmem:[%s10795_s1 + $0x100] sm:$0xff] }
  0xe7   : > { %1121 = vrot.lane.b32.xlu1 %v912_v5, %s6096_s30  ;;  %v868_v50 = vld [vmem:[#allocation2 + $0x48] sm:$0xff] }
  0xe8   : > { %1769 = vrot.lane.b32.xlu0 %v920_v0, %s6094_s26  ;;  %v309_v0 = vld [vmem:[%s10795_s1 + $0xc8] sm:$0xff] }
  0xe9   : > { %2150 = vrot.lane.b32.xlu2 %v1477_v1, %s6094_s26  ;;  %5811 = vmatmul.msk.f32.gmra.mxu0 %vm352_vm0, %v309_v0 }
  0xef   : > { %1737 = vrot.lane.b32.xlu1 %v912_v5, %s6098_s10 }
  0xf0   : > { %1549 = vrot.lane.b32.xlu0 %v1478_v8, %s10818_s16 }
  0xf1   : > { %1089 = vrot.lane.b32.xlu2 %v904_v9, %s6099_s19  ;;  %5812 = vmatmul.msk.f32.gmra.mxu0 %vm352_vm0, %v310_v6 }
  0xf7   : > { %2340 = vrot.lane.b32.xlu1 %v912_v5, %s6099_s19  ;;  %v592_v5 = vpop.f32.mrf.mxu0 }
  0xf8   : > { %2152 = vrot.lane.b32.xlu0 %v1478_v8, %s6094_s26  ;;  %765 = vst.msk [vmem:[#allocation2 + $0x50] sm:$0xff] %vm754_vm1, %v592_v5 }
  0xf9   : > { %1705 = vrot.lane.b32.xlu2 %v904_v9, %s10884_s17  ;;  %5813 = vmatmul.msk.f32.gmra.mxu0 %vm352_vm0, %v311_v13 }
  0xfb   : > { %v6379_v14 = vpop.permute.xlu2 %1075 }
  0xfc   : > { %10910 = vst [vmem:[#allocation3_spill] sm:$0xff] %v6379_v14  ;;  %v7131_v14 = vld [vmem:[#allocation2 + $0x40] sm:$0xff] }
  0xfd   : > { %11042 = vst [vmem:[#allocation135_spill] sm:$0xff] %v7131_v14 }
  0xff   : > { %1155 = vrot.lane.b32.xlu1 %v921_v15, %s10818_s16  ;;  %v595_v12 = vpop.f32.mrf.mxu0 }
 0x100   : > { %927 = vrot.lane.b32.xlu0 %v863_v16, %s6100_s27  ;;  %766 = vst.msk [vmem:[#allocation2 + $0x58] sm:$0xff] %vm754_vm1, %v595_v12  ;;  %v317_v12 = vld [vmem:[%s10795_s1 + $0x108] sm:$0xff] }
 0x101   : > { %2308 = vrot.lane.b32.xlu2 %v904_v9, %s10851_s29  ;;  %5814 = vmatmul.msk.f32.gmra.mxu0 %vm352_vm0, %v312_v20 }
 0x103   : > { %v6388_v18 = vpop.permute.xlu2 %1691 }
 0x104   : > { %10911 = vst [vmem:[#allocation4_spill] sm:$0xff] %v6388_v18 }
 0x107   : > { %1771 = vrot.lane.b32.xlu1 %v921_v15, %s6094_s26  ;;  %v6597_v6 = vld [vmem:[#allocation2 + $0x58] sm:$0xff] }
 0x108   : > { %1091 = vrot.lane.b32.xlu0 %v905_v19, %s6099_s19 }
 0x109   : > { %1123 = vrot.lane.b32.xlu2 %v913_v21, %s6096_s30  ;;  %5815 = vmatmul.msk.f32.gmra.mxu0 %vm352_vm0, %v313_v30 }
 0x10b   : > { %v6399_v24 = vpop.permute.xlu2 %2294 }
 0x10c   : > { %10912 = vst [vmem:[#allocation5_spill] sm:$0xff] %v6399_v24 }
 0x10f   : > { %2162 = vrot.lane.b32.xlu1 %v863_v16, %s10818_s16 }
 0x110   : > { %1707 = vrot.lane.b32.xlu0 %v905_v19, %s10884_s17 }
 0x111   : > { %1739 = vrot.lane.b32.xlu2 %v913_v21, %s6098_s10  ;;  %5816 = vmatmul.msk.f32.gmra.mxu0 %vm352_vm0, %v314_v42 }
 0x112   : > { %v6409_v27 = vpop.permute.xlu0 %1543 }
 0x113   : > { %10913 = vst [vmem:[#allocation6_spill] sm:$0xff] %v6409_v27  ;;  %v6411_v28 = vpop.permute.xlu2 %1109 }
 0x114   : > { %10914 = vst [vmem:[#allocation7_spill] sm:$0xff] %v6411_v28 }
 0x117   : > { %1093 = vrot.lane.b32.xlu1 %v906_v29, %s6099_s19 }
 0x118   : > { %2310 = vrot.lane.b32.xlu0 %v905_v19, %s10851_s29  ;;  %v598_v19 = vpop.f32.mrf.mxu0 }
 0x119   : > { %v6419_v32 = vpop.permute.xlu1 %1141  ;;  %2342 = vrot.lane.b32.xlu2 %v913_v21, %s6099_s19  ;;  %767 = vst.msk [vmem:[#allocation2 + $0x60] sm:$0xff] %vm754_vm1, %v598_v19  ;;  %5817 = vmatmul.msk.f32.gmra.mxu0 %vm352_vm0, %v315_v54 }
 0x11a   : > { %10915 = vst [vmem:[#allocation8_spill] sm:$0xff] %v6419_v32  ;;  %v6423_v33 = vpop.permute.xlu0 %2146 }
 0x11b   : > { %10916 = vst [vmem:[#allocation9_spill] sm:$0xff] %v6423_v33  ;;  %v6425_v34 = vpop.permute.xlu2 %1725 }
 0x11c   : > { %10917 = vst [vmem:[#allocation10_spill] sm:$0xff] %v6425_v34 }
 0x11f   : > { %1709 = vrot.lane.b32.xlu1 %v906_v29, %s10884_s17 }
 0x120   : > { %1125 = vrot.lane.b32.xlu0 %v914_v35, %s6096_s30 }
 0x121   : > { %v6433_v39 = vpop.permute.xlu1 %1757  ;;  %1157 = vrot.lane.b32.xlu2 %v922_v36, %s10818_s16  ;;  %5818 = vmatmul.msk.f32.gmra.mxu0 %vm352_vm0, %v316_v63 }
 0x122   : > { %10918 = vst [vmem:[#allocation11_spill] sm:$0xff] %v6433_v39  ;;  %v6437_v40 = vpop.permute.xlu0 %1077 }
 0x123   : > { %10919 = vst [vmem:[#allocation12_spill] sm:$0xff] %v6437_v40  ;;  %v6439_v41 = vpop.permute.xlu2 %2328 }
 0x124   : > { %10920 = vst [vmem:[#allocation13_spill] sm:$0xff] %v6439_v41  ;;  %v322_v41 = vld [vmem:[%s10795_s1 + $0x130] sm:$0xff] }
 0x127   : > { %2312 = vrot.lane.b32.xlu1 %v906_v29, %s10851_s29  ;;  %v601_v29 = vpop.f32.mrf.mxu0 }
 0x128   : > { %1741 = vrot.lane.b32.xlu0 %v914_v35, %s6098_s10  ;;  %768 = vst.msk [vmem:[#allocation2 + $0x68] sm:$0xff] %vm754_vm1, %v601_v29  ;;  %v318_v29 = vld [vmem:[%s10795_s1 + $0x110] sm:$0xff] }
 0x129   : > { %v6448_v45 = vpop.permute.xlu1 %2360  ;;  %1773 = vrot.lane.b32.xlu2 %v922_v36, %s6094_s26  ;;  %5819 = vmatmul.msk.f32.gmra.mxu0 %vm352_vm0, %v317_v12  ;;  %v320_v12 = vld [vmem:[%s10795_s1 + $0x120] sm:$0xff] }
 0x12a   : > { %10921 = vst [vmem:[#allocation14_spill] sm:$0xff] %v6448_v45  ;;  %v6452_v46 = vpop.permute.xlu0 %1693 }
 0x12b   : > { %10922 = vst [vmem:[#allocation15_spill] sm:$0xff] %v6452_v46  ;;  %v6454_v47 = vpop.permute.xlu2 %1151 }
 0x12f   : > { %1135 = vrot.lane.b32.xlu1 %v915_v48, %s6094_s26  ;;  %v604_v38 = vpop.f32.mrf.mxu0 }
 0x130   : > { %2344 = vrot.lane.b32.xlu0 %v914_v35, %s6099_s19  ;;  %769 = vst.msk [vmem:[#allocation2 + $0x70] sm:$0xff] %vm754_vm1, %v604_v38 }
 0x131   : > { %v6461_v51 = vpop.permute.xlu1 %1545  ;;  %2164 = vrot.lane.b32.xlu2 %v1480_v49, %s10818_s16  ;;  %5820 = vmatmul.msk.f32.gmra.mxu0 %vm352_vm0, %v318_v29 }
 0x132   : > { %10923 = vst [vmem:[#allocation16_spill] sm:$0xff] %v6461_v51  ;;  %v6465_v52 = vpop.permute.xlu0 %2296 }
 0x133   : > { %10924 = vst [vmem:[#allocation17_spill] sm:$0xff] %v6465_v52  ;;  %v6467_v53 = vpop.permute.xlu2 %1767 }
 0x134   : > { %10925 = vst [vmem:[#allocation18_spill] sm:$0xff] %v6467_v53 }
 0x137   : > { %1751 = vrot.lane.b32.xlu1 %v915_v48, %s6096_s30  ;;  %v873_v42 = vld [vmem:[#allocation2 + $0x70] sm:$0xff] }
 0x138   : > { %929 = vrot.lane.b32.xlu0 %v1480_v49, %s6100_s27  ;;  %v607_v49 = vpop.f32.mrf.mxu0 }
 0x139   : > { %v6477_v59 = vpop.permute.xlu1 %2148  ;;  %1103 = vrot.lane.b32.xlu2 %v907_v55, %s6098_s10  ;;  %770 = vst.msk [vmem:[#allocation2 + $0x78] sm:$0xff] %vm754_vm1, %v607_v49 }
 0x13a   : > { %10926 = vst [vmem:[#allocation19_spill] sm:$0xff] %v6477_v59  ;;  %v6481_v60 = vpop.permute.xlu0 %1119 }
 0x13b   : > { %v6483_v61 = vpop.permute.xlu2 %1547 }
 0x13c   : > { %10927 = vst [vmem:[#allocation20_spill] sm:$0xff] %v6483_v61 }
 0x13f   : > { %2354 = vrot.lane.b32.xlu1 %v915_v48, %s6098_s10 }
 0x140   : > { %2166 = vrot.lane.b32.xlu0 %v1481_v62, %s10818_s16  ;;  %v610_v58 = vpop.f32.mrf.mxu0 }
 0x141   : > { %v6491_v1 = vpop.permute.xlu1 %1087  ;;  %1719 = vrot.lane.b32.xlu2 %v907_v55, %s6099_s19  ;;  %771 = vst.msk [vmem:[#allocation2 + $0x80] sm:$0xff] %vm754_vm1, %v610_v58 }
 0x142   : > { %v6495_v2 = vpop.permute.xlu0 %1735 }
 0x143   : > { %10928 = vst [vmem:[#allocation21_spill] sm:$0xff] %v6495_v2  ;;  %v6497_v3 = vpop.permute.xlu2 %2150 }
 0x144   : > { %10929 = vst [vmem:[#allocation22_spill] sm:$0xff] %v6497_v3 }
 0x147   : > { %931 = vrot.lane.b32.xlu1 %v1481_v62, %s6100_s27  ;;  %v869_v62 = vld [vmem:[#allocation2 + $0x50] sm:$0xff] }
 0x148   : > { %1105 = vrot.lane.b32.xlu0 %v908_v4, %s6098_s10 }
 0x149   : > { %v6505_v7 = vpop.permute.xlu1 %1703  ;;  %2322 = vrot.lane.b32.xlu2 %v907_v55, %s10884_s17 }
 0x14a   : > { %10930 = vst [vmem:[#allocation23_spill] sm:$0xff] %v6505_v7  ;;  %v6509_v8 = vpop.permute.xlu0 %2338 }
 0x14b   : > { %10931 = vst [vmem:[#allocation24_spill] sm:$0xff] %v6509_v8  ;;  %v6511_v9 = vpop.permute.xlu2 %1089 }
 0x14c   : > { %10932 = vst [vmem:[#allocation25_spill] sm:$0xff] %v6511_v9  ;;  %v7077_v9 = vld [vmem:[#allocation2 + $0x1e8] sm:$0xff] }
 0x14d   : > { %11024 = vst [vmem:[#allocation117_spill] sm:$0xff] %v7077_v9 }
 0x14f   : > { %933 = vrot.lane.b32.xlu1 %v866_v10, %s6100_s27 }
 0x150   : > { %1721 = vrot.lane.b32.xlu0 %v908_v4, %s6099_s19 }
 0x151   : > { %v6519_v15 = vpop.permute.xlu1 %2306  ;;  %1137 = vrot.lane.b32.xlu2 %v916_v11, %s6094_s26 }
 0x152   : > { %10933 = vst [vmem:[#allocation26_spill] sm:$0xff] %v6519_v15  ;;  %v6523_v16 = vpop.permute.xlu0 %1153 }
 0x153   : > { %10934 = vst [vmem:[#allocation27_spill] sm:$0xff] %v6523_v16  ;;  %v6525_v17 = vpop.permute.xlu2 %1705 }
 0x154   : > { %10935 = vst [vmem:[#allocation28_spill] sm:$0xff] %v6525_v17 }
 0x157   : > { %2168 = vrot.lane.b32.xlu1 %v866_v10, %s10818_s16  ;;  %v613_v10 = vpop.f32.mrf.mxu0 }
 0x158   : > { %2324 = vrot.lane.b32.xlu0 %v908_v4, %s10884_s17  ;;  %772 = vst.msk [vmem:[#allocation2 + $0x88] sm:$0xff] %vm754_vm1, %v613_v10  ;;  %v874_v10 = vld [vmem:[#allocation2 + $0x78] sm:$0xff] }
 0x159   : > { %v6533_v21 = vpop.permute.xlu1 %1121  ;;  %1753 = vrot.lane.b32.xlu2 %v916_v11, %s6096_s30 }
 0x15a   : > { %10936 = vst [vmem:[#allocation29_spill] sm:$0xff] %v6533_v21  ;;  %v6537_v22 = vpop.permute.xlu0 %1769 }
 0x15b   : > { %10937 = vst [vmem:[#allocation30_spill] sm:$0xff] %v6537_v22  ;;  %v6539_v23 = vpop.permute.xlu2 %2308 }
 0x15c   : > { %10938 = vst [vmem:[#allocation31_spill] sm:$0xff] %v6539_v23 }
 0x15f   : > { %1107 = vrot.lane.b32.xlu1 %v909_v25, %s6098_s10  ;;  %v6674_v45 = vld [vmem:[#allocation2 + $0x88] sm:$0xff] }
 0x160   : > { %1139 = vrot.lane.b32.xlu0 %v917_v26, %s6094_s26 }
 0x161   : > { %v6547_v31 = vpop.permute.xlu1 %1737  ;;  %2356 = vrot.lane.b32.xlu2 %v916_v11, %s6098_s10  ;;  %v871_v11 = vld [vmem:[#allocation2 + $0x60] sm:$0xff] }
 0x162   : > { %10939 = vst [vmem:[#allocation32_spill] sm:$0xff] %v6547_v31  ;;  %v6551_v35 = vpop.permute.xlu0 %1549 }
 0x163   : > { %10940 = vst [vmem:[#allocation33_spill] sm:$0xff] %v6551_v35  ;;  %v6553_v36 = vpop.permute.xlu2 %1123 }
 0x164   : > { %10941 = vst [vmem:[#allocation34_spill] sm:$0xff] %v6553_v36 }
 0x167   : > { %1559 = vrot.lane.b32.xlu1 %v1483_v37, %s6100_s27 }
 0x168   : > { %1755 = vrot.lane.b32.xlu0 %v917_v26, %s6096_s30 }
 0x169   : > { %v6561_v43 = vpop.permute.xlu1 %2340  ;;  %943 = vrot.lane.b32.xlu2 %v1483_v37, %s6101_s14 }
 0x16a   : > { %10942 = vst [vmem:[#allocation35_spill] sm:$0xff] %v6561_v43  ;;  %v6565_v44 = vpop.permute.xlu0 %2152 }
 0x16b   : > { %10943 = vst [vmem:[#allocation36_spill] sm:$0xff] %v6565_v44  ;;  %v6567_v48 = vpop.permute.xlu2 %1739 }
 0x16c   : > { %10944 = vst [vmem:[#allocation37_spill] sm:$0xff] %v6567_v48 }
 0x16f   : > { %1723 = vrot.lane.b32.xlu1 %v909_v25, %s6099_s19 }
 0x170   : > { %2358 = vrot.lane.b32.xlu0 %v917_v26, %s6098_s10  ;;  %v872_v26 = vld [vmem:[#allocation2 + $0x68] sm:$0xff] }
 0x171   : > { %v6575_v55 = vpop.permute.xlu1 %1155  ;;  %945 = vrot.lane.b32.xlu2 %v868_v50, %s6101_s14 }
 0x172   : > { %10945 = vst [vmem:[#allocation38_spill] sm:$0xff] %v6575_v55  ;;  %v6579_v56 = vpop.permute.xlu0 %927 }
 0x173   : > { %v6581_v57 = vpop.permute.xlu2 %2342 }
 0x174   : > { %10946 = vst [vmem:[#allocation39_spill] sm:$0xff] %v6581_v57 }
 0x177   : > { %2326 = vrot.lane.b32.xlu1 %v909_v25, %s10884_s17  ;;  %v616_v25 = vpop.f32.mrf.mxu0 }
 0x178   : > { %947 = vrot.lane.b32.xlu0 %v869_v62, %s6101_s14  ;;  %773 = vst.msk [vmem:[#allocation2 + $0x90] sm:$0xff] %vm754_vm1, %v616_v25 }
 0x179   : > { %v6589_v0 = vpop.permute.xlu1 %1771  ;;  %1561 = vrot.lane.b32.xlu2 %v868_v50, %s6100_s27  ;;  %v319_v50 = vld [vmem:[%s10795_s1 + $0x118] sm:$0xff] }
 0x17a   : > { %10947 = vst [vmem:[#allocation40_spill] sm:$0xff] %v6589_v0  ;;  %v6593_v4 = vpop.permute.xlu0 %1091  ;;  %5821 = vmatmul.msk.f32.gmra.mxu0 %vm352_vm0, %v319_v50  ;;  %v6658_v50 = vld [vmem:[#allocation2 + $0x80] sm:$0xff] }
 0x17b   : > { %10948 = vst [vmem:[#allocation41_spill] sm:$0xff] %v6593_v4  ;;  %v6595_v5 = vpop.permute.xlu2 %1157  ;;  %v7079_v4 = vld [vmem:[#allocation2 + $0x1f8] sm:$0xff] }
 0x17c   : > { %10949 = vst [vmem:[#allocation42_spill] sm:$0xff] %v6595_v5 }
 0x17d   : > { %11025 = vst [vmem:[#allocation118_spill] sm:$0xff] %v7079_v4 }
 0x17f   : > { %949 = vrot.lane.b32.xlu1 %v6597_v6, %s6101_s14  ;;  %v619_v49 = vpop.f32.mrf.mxu0 }
 0x180   : > { %1563 = vrot.lane.b32.xlu0 %v869_v62, %s6100_s27  ;;  %774 = vst.msk [vmem:[#allocation2 + $0x98] sm:$0xff] %vm754_vm1, %v619_v49 }
 0x181   : > { %v6606_v13 = vpop.permute.xlu1 %2162  ;;  %959 = vrot.lane.b32.xlu2 %v871_v11, %s6102_s9 }
 0x182   : > { %10950 = vst [vmem:[#allocation43_spill] sm:$0xff] %v6606_v13  ;;  %v6610_v19 = vpop.permute.xlu0 %1707  ;;  %5822 = vmatmul.msk.f32.gmra.mxu0 %vm352_vm0, %v320_v12 }
 0x183   : > { %10951 = vst [vmem:[#allocation44_spill] sm:$0xff] %v6610_v19  ;;  %v6612_v20 = vpop.permute.xlu2 %1773 }
 0x184   : > { %10952 = vst [vmem:[#allocation45_spill] sm:$0xff] %v6612_v20 }
 0x187   : > { %1565 = vrot.lane.b32.xlu1 %v6597_v6, %s6100_s27  ;;  %v622_v63 = vpop.f32.mrf.mxu0  ;;  %v6713_v24 = vld [vmem:[#allocation2 + $0x98] sm:$0xff] }
 0x188   : > { %961 = vrot.lane.b32.xlu0 %v872_v26, %s6102_s9  ;;  %775 = vst.msk [vmem:[#allocation2 + $0xa0] sm:$0xff] %vm754_vm1, %v622_v63 }
 0x189   : > { %v6621_v30 = vpop.permute.xlu1 %1093  ;;  %1575 = vrot.lane.b32.xlu2 %v871_v11, %s6101_s14 }
 0x18a   : > { %10953 = vst [vmem:[#allocation46_spill] sm:$0xff] %v6621_v30  ;;  %v6625_v37 = vpop.permute.xlu0 %2310 }
 0x18b   : > { %10954 = vst [vmem:[#allocation47_spill] sm:$0xff] %v6625_v37  ;;  %v6627_v38 = vpop.permute.xlu2 %2164 }
 0x18c   : > { %10955 = vst [vmem:[#allocation48_spill] sm:$0xff] %v6627_v38 }
 0x18f   : > { %963 = vrot.lane.b32.xlu1 %v873_v42, %s6102_s9  ;;  %v625_v49 = vpop.f32.mrf.mxu0  ;;  %v6730_v23 = vld [vmem:[#allocation2 + $0xa0] sm:$0xff] }
 0x190   : > { %1577 = vrot.lane.b32.xlu0 %v872_v26, %s6101_s14  ;;  %776 = vst.msk [vmem:[#allocation2 + $0xa8] sm:$0xff] %vm754_vm1, %v625_v49 }
 0x191   : > { %v6635_v54 = vpop.permute.xlu1 %1709  ;;  %2178 = vrot.lane.b32.xlu2 %v871_v11, %s6100_s27 }
 0x192   : > { %10956 = vst [vmem:[#allocation49_spill] sm:$0xff] %v6635_v54  ;;  %v6639_v58 = vpop.permute.xlu0 %1125 }
 0x193   : > { %10957 = vst [vmem:[#allocation50_spill] sm:$0xff] %v6639_v58  ;;  %v6641_v62 = vpop.permute.xlu2 %1103 }
 0x197   : > { %1579 = vrot.lane.b32.xlu1 %v873_v42, %s6101_s14  ;;  %v628_v49 = vpop.f32.mrf.mxu0 }
 0x198   : > { %2180 = vrot.lane.b32.xlu0 %v872_v26, %s6100_s27  ;;  %v321_v26 = vld [vmem:[%s10795_s1 + $0x128] sm:$0xff]  ;;  %777 = vst.msk [vmem:[#allocation2 + $0xb0] sm:$0xff] %vm754_vm1, %v628_v49  ;;  %v6697_v49 = vld [vmem:[#allocation2 + $0x90] sm:$0xff] }
 0x199   : > { %v6649_v25 = vpop.permute.xlu1 %2312  ;;  %965 = vrot.lane.b32.xlu2 %v874_v10, %s6102_s9  ;;  %5823 = vmatmul.msk.f32.gmra.mxu0 %vm352_vm0, %v321_v26 }
 0x19a   : > { %10958 = vst [vmem:[#allocation51_spill] sm:$0xff] %v6649_v25  ;;  %v6653_v11 = vpop.permute.xlu0 %1741 }
 0x19b   : > { %10959 = vst [vmem:[#allocation52_spill] sm:$0xff] %v6653_v11  ;;  %v6655_v29 = vpop.permute.xlu2 %1719 }
 0x19c   : > { %10960 = vst [vmem:[#allocation53_spill] sm:$0xff] %v6655_v29 }
 0x19f   : > { %2182 = vrot.lane.b32.xlu1 %v873_v42, %s6100_s27  ;;  %v631_v57 = vpop.f32.mrf.mxu0  ;;  %v6766_v15 = vld [vmem:[#allocation2 + $0xb0] sm:$0xff] }
 0x1a0   : > { %975 = vrot.lane.b32.xlu0 %v6658_v50, %s10894_s25  ;;  %778 = vst.msk [vmem:[#allocation2 + $0xb8] sm:$0xff] %vm754_vm1, %v631_v57 }
 0x1a1   : > { %v6666_v63 = vpop.permute.xlu1 %1135  ;;  %1581 = vrot.lane.b32.xlu2 %v874_v10, %s6101_s14  ;;  %5824 = vmatmul.msk.f32.gmra.mxu0 %vm352_vm0, %v322_v41 }
 0x1a2   : > { %v6670_v12 = vpop.permute.xlu0 %2344 }
 0x1a3   : > { %10961 = vst [vmem:[#allocation54_spill] sm:$0xff] %v6670_v12  ;;  %v6672_v42 = vpop.permute.xlu2 %2322 }
 0x1a4   : > { %10962 = vst [vmem:[#allocation55_spill] sm:$0xff] %v6672_v42  ;;  %v325_v42 = vld [vmem:[%s10795_s1 + $0x148] sm:$0xff] }
 0x1a7   : > { %977 = vrot.lane.b32.xlu1 %v6674_v45, %s10894_s25  ;;  %v634_v57 = vpop.f32.mrf.mxu0  ;;  %v6779_v11 = vld [vmem:[#allocation2 + $0xb8] sm:$0xff] }
 0x1a8   : > { %1591 = vrot.lane.b32.xlu0 %v6658_v50, %s6102_s9  ;;  %779 = vst.msk [vmem:[#allocation2 + $0xc0] sm:$0xff] %vm754_vm1, %v634_v57 }
 0x1a9   : > { %v6684_v26 = vpop.permute.xlu1 %1751  ;;  %2184 = vrot.lane.b32.xlu2 %v874_v10, %s6100_s27  ;;  %v323_v10 = vld [vmem:[%s10795_s1 + $0x138] sm:$0xff] }
 0x1aa   : > { %10963 = vst [vmem:[#allocation56_spill] sm:$0xff] %v6684_v26  ;;  %v6688_v12 = vpop.permute.xlu0 %929  ;;  %5825 = vmatmul.msk.f32.gmra.mxu0 %vm352_vm0, %v323_v10  ;;  %v324_v10 = vld [vmem:[%s10795_s1 + $0x140] sm:$0xff] }
 0x1ab   : > { %v6690_v25 = vpop.permute.xlu2 %1137 }
 0x1ac   : > { %10964 = vst [vmem:[#allocation57_spill] sm:$0xff] %v6690_v25  ;;  %v7045_v25 = vld [vmem:[#allocation2 + $0x1f0] sm:$0xff] }
 0x1ad   : > { %11017 = vst [vmem:[#allocation110_spill] sm:$0xff] %v7045_v25 }
 0x1af   : > { %1593 = vrot.lane.b32.xlu1 %v6674_v45, %s6102_s9  ;;  %v637_v57 = vpop.f32.mrf.mxu0 }
 0x1b0   : > { %2194 = vrot.lane.b32.xlu0 %v6658_v50, %s6101_s14  ;;  %780 = vst.msk [vmem:[#allocation2 + $0xc8] sm:$0xff] %vm754_vm1, %v637_v57  ;;  %v6750_v57 = vld [vmem:[#allocation2 + $0xa8] sm:$0xff] }
 0x1b1   : > { %v6699_v52 = vpop.permute.xlu1 %2354  ;;  %979 = vrot.lane.b32.xlu2 %v6697_v49, %s10894_s25 }
 0x1b2   : > { %10965 = vst [vmem:[#allocation58_spill] sm:$0xff] %v6699_v52  ;;  %v6703_v41 = vpop.permute.xlu0 %2166  ;;  %5826 = vmatmul.msk.f32.gmra.mxu0 %vm352_vm0, %v324_v10 }
 0x1b3   : > { %10966 = vst [vmem:[#allocation59_spill] sm:$0xff] %v6703_v41  ;;  %v6708_v37 = vpop.permute.xlu2 %1753 }
 0x1b4   : > { %10967 = vst [vmem:[#allocation60_spill] sm:$0xff] %v6708_v37 }
 0x1b7   : > { %2196 = vrot.lane.b32.xlu1 %v6674_v45, %s6101_s14  ;;  %v640_v20 = vpop.f32.mrf.mxu0 }
 0x1b8   : > { %981 = vrot.lane.b32.xlu0 %v6713_v24, %s10894_s25  ;;  %781 = vst.msk [vmem:[#allocation2 + $0xd0] sm:$0xff] %vm754_vm1, %v640_v20 }
 0x1b9   : > { %v6718_v43 = vpop.permute.xlu1 %931  ;;  %1595 = vrot.lane.b32.xlu2 %v6697_v49, %s6102_s9 }
 0x1ba   : > { %v6722_v44 = vpop.permute.xlu0 %1105  ;;  %5827 = vmatmul.msk.f32.gmra.mxu0 %vm352_vm0, %v325_v42 }
 0x1bb   : > { %10968 = vst [vmem:[#allocation61_spill] sm:$0xff] %v6722_v44  ;;  %v6727_v52 = vpop.permute.xlu2 %2356 }
 0x1bc   : > { %10969 = vst [vmem:[#allocation62_spill] sm:$0xff] %v6727_v52 }
 0x1bf   : > { %991 = vrot.lane.b32.xlu1 %v6730_v23, %s6104_s28  ;;  %v643_v20 = vpop.f32.mrf.mxu0  ;;  %v6824_v33 = vld [vmem:[#allocation2 + $0xd0] sm:$0xff] }
 0x1c0   : > { %1597 = vrot.lane.b32.xlu0 %v6713_v24, %s6102_s9  ;;  %782 = vst.msk [vmem:[#allocation2 + $0xd8] sm:$0xff] %vm754_vm1, %v643_v20 }
 0x1c1   : > { %v6737_v8 = vpop.permute.xlu1 %933  ;;  %2198 = vrot.lane.b32.xlu2 %v6697_v49, %s6101_s14 }
 0x1c2   : > { %v6741_v52 = vpop.permute.xlu0 %1721 }
 0x1c3   : > { %10970 = vst [vmem:[#allocation63_spill] sm:$0xff] %v6741_v52  ;;  %v6743_v10 = vpop.permute.xlu2 %943 }
 0x1c7   : > { %1607 = vrot.lane.b32.xlu1 %v6730_v23, %s10894_s25  ;;  %v646_v0 = vpop.f32.mrf.mxu0 }
 0x1c8   : > { %2200 = vrot.lane.b32.xlu0 %v6713_v24, %s6101_s14  ;;  %783 = vst.msk [vmem:[#allocation2 + $0xe0] sm:$0xff] %vm754_vm1, %v646_v0  ;;  %v6799_v0 = vld [vmem:[#allocation2 + $0xc0] sm:$0xff] }
 0x1c9   : > { %v6755_v3 = vpop.permute.xlu1 %2168  ;;  %993 = vrot.lane.b32.xlu2 %v6750_v57, %s6104_s28 }
 0x1ca   : > { %10971 = vst [vmem:[#allocation64_spill] sm:$0xff] %v6755_v3  ;;  %v6760_v41 = vpop.permute.xlu0 %2324 }
 0x1cb   : > { %10972 = vst [vmem:[#allocation65_spill] sm:$0xff] %v6760_v41  ;;  %v6762_v39 = vpop.permute.xlu2 %945 }
 0x1cf   : > { %2210 = vrot.lane.b32.xlu1 %v6730_v23, %s6102_s9  ;;  %v649_v38 = vpop.f32.mrf.mxu0  ;;  %v6856_v52 = vld [vmem:[#allocation2 + $0xe0] sm:$0xff] }
 0x1d0   : > { %995 = vrot.lane.b32.xlu0 %v6766_v15, %s6104_s28  ;;  %784 = vst.msk [vmem:[#allocation2 + $0xe8] sm:$0xff] %vm754_vm1, %v649_v38  ;;  %v6811_v38 = vld [vmem:[#allocation2 + $0xc8] sm:$0xff] }
 0x1d1   : > { %v6771_v3 = vpop.permute.xlu1 %1107  ;;  %1609 = vrot.lane.b32.xlu2 %v6750_v57, %s10894_s25 }
 0x1d2   : > { %10973 = vst [vmem:[#allocation66_spill] sm:$0xff] %v6771_v3  ;;  %v6775_v42 = vpop.permute.xlu0 %1139 }
 0x1d3   : > { %10974 = vst [vmem:[#allocation67_spill] sm:$0xff] %v6775_v42  ;;  %v6777_v41 = vpop.permute.xlu2 %1561 }
 0x1d4   : > { %10975 = vst [vmem:[#allocation68_spill] sm:$0xff] %v6777_v41 }
 0x1d7   : > { %997 = vrot.lane.b32.xlu1 %v6779_v11, %s6104_s28  ;;  %v652_v46 = vpop.f32.mrf.mxu0 }
 0x1d8   : > { %1611 = vrot.lane.b32.xlu0 %v6766_v15, %s10894_s25  ;;  %785 = vst.msk [vmem:[#allocation2 + $0xf0] sm:$0xff] %vm754_vm1, %v652_v46 }
 0x1d9   : > { %v6786_v20 = vpop.permute.xlu1 %1559  ;;  %2212 = vrot.lane.b32.xlu2 %v6750_v57, %s6102_s9 }
 0x1da   : > { %10976 = vst [vmem:[#allocation69_spill] sm:$0xff] %v6786_v20  ;;  %v6790_v34 = vpop.permute.xlu0 %1755 }
 0x1db   : > { %10977 = vst [vmem:[#allocation70_spill] sm:$0xff] %v6790_v34  ;;  %v6792_v59 = vpop.permute.xlu2 %959 }
 0x1df   : > { %1613 = vrot.lane.b32.xlu1 %v6779_v11, %s10894_s25  ;;  %v655_v13 = vpop.f32.mrf.mxu0 }
 0x1e0   : > { %2214 = vrot.lane.b32.xlu0 %v6766_v15, %s6102_s9  ;;  %786 = vst.msk [vmem:[#allocation2 + $0xf8] sm:$0xff] %vm754_vm1, %v655_v13  ;;  %v6844_v13 = vld [vmem:[#allocation2 + $0xd8] sm:$0xff] }
 0x1e1   : > { %v6801_v54 = vpop.permute.xlu1 %1723  ;;  %1007 = vrot.lane.b32.xlu2 %v6799_v0, %s6105_s12 }
 0x1e2   : > { %10978 = vst [vmem:[#allocation71_spill] sm:$0xff] %v6801_v54  ;;  %v6805_v34 = vpop.permute.xlu0 %2358 }
 0x1e3   : > { %10979 = vst [vmem:[#allocation72_spill] sm:$0xff] %v6805_v34  ;;  %v6807_v48 = vpop.permute.xlu2 %1575 }
 0x1e4   : > { %10980 = vst [vmem:[#allocation73_spill] sm:$0xff] %v6807_v48 }
 0x1e7   : > { %2216 = vrot.lane.b32.xlu1 %v6779_v11, %s6102_s9 }
 0x1e8   : > { %1009 = vrot.lane.b32.xlu0 %v6811_v38, %s6105_s12 }
 0x1e9   : > { %v6816_v22 = vpop.permute.xlu1 %2326  ;;  %1623 = vrot.lane.b32.xlu2 %v6799_v0, %s6104_s28 }
 0x1ea   : > { %10981 = vst [vmem:[#allocation74_spill] sm:$0xff] %v6816_v22  ;;  %v6820_v54 = vpop.permute.xlu0 %947 }
 0x1eb   : > { %v6822_v34 = vpop.permute.xlu2 %2178 }
 0x1ec   : > { %10982 = vst [vmem:[#allocation75_spill] sm:$0xff] %v6822_v34  ;;  %v658_v34 = vpop.f32.mrf.mxu0 }
 0x1ed   : > { %787 = vst.msk [vmem:[#allocation2 + $0x100] sm:$0xff] %vm754_vm1, %v658_v34 }
 0x1ef   : > { %1011 = vrot.lane.b32.xlu1 %v6824_v33, %s6105_s12 }
 0x1f0   : > { %1625 = vrot.lane.b32.xlu0 %v6811_v38, %s6104_s28 }
 0x1f1   : > { %v6831_v46 = vpop.permute.xlu1 %949  ;;  %2226 = vrot.lane.b32.xlu2 %v6799_v0, %s10894_s25 }
 0x1f2   : > { %v6835_v22 = vpop.permute.xlu0 %1563 }
 0x1f3   : > { %10983 = vst [vmem:[#allocation76_spill] sm:$0xff] %v6835_v22  ;;  %v6837_v37 = vpop.permute.xlu2 %965  ;;  %v6901_v22 = vld [vmem:[#allocation2 + $0xf8] sm:$0xff] }
 0x1f4   : > { %v661_v53 = vpop.f32.mrf.mxu0 }
 0x1f5   : > { %788 = vst.msk [vmem:[#allocation2 + $0x108] sm:$0xff] %vm754_vm1, %v661_v53 }
 0x1f7   : > { %1627 = vrot.lane.b32.xlu1 %v6824_v33, %s6104_s28 }
 0x1f8   : > { %2228 = vrot.lane.b32.xlu0 %v6811_v38, %s10894_s25 }
 0x1f9   : > { %v6846_v19 = vpop.permute.xlu1 %1565  ;;  %1013 = vrot.lane.b32.xlu2 %v6844_v13, %s6105_s12 }
 0x1fa   : > { %10984 = vst [vmem:[#allocation77_spill] sm:$0xff] %v6846_v19  ;;  %v6850_v31 = vpop.permute.xlu0 %961  ;;  %v6869_v19 = vld [vmem:[#allocation2 + $0xe8] sm:$0xff] }
 0x1fb   : > { %v6852_v18 = vpop.permute.xlu2 %1581 }
 0x1fc   : > { %10985 = vst [vmem:[#allocation78_spill] sm:$0xff] %v6852_v18  ;;  %v664_v17 = vpop.f32.mrf.mxu0 }
 0x1fd   : > { %789 = vst.msk [vmem:[#allocation2 + $0x110] sm:$0xff] %vm754_vm1, %v664_v17  ;;  %v6889_v17 = vld [vmem:[#allocation2 + $0xf0] sm:$0xff] }
 0x1ff   : > { %2230 = vrot.lane.b32.xlu1 %v6824_v33, %s10894_s25 }
 0x200   : > { %1023 = vrot.lane.b32.xlu0 %v6856_v52, %s6106_s13 }
 0x201   : > { %v6861_v34 = vpop.permute.xlu1 %963  ;;  %1629 = vrot.lane.b32.xlu2 %v6844_v13, %s6104_s28 }
 0x202   : > { %v6865_v26 = vpop.permute.xlu0 %1577 }
 0x203   : > { %10986 = vst [vmem:[#allocation79_spill] sm:$0xff] %v6865_v26  ;;  %v6867_v18 = vpop.permute.xlu2 %2184 }
 0x204   : > { %10987 = vst [vmem:[#allocation80_spill] sm:$0xff] %v6867_v18  ;;  %v667_v18 = vpop.f32.mrf.mxu0  ;;  %v6946_v41 = vld [vmem:[#allocation2 + $0x110] sm:$0xff] }
 0x205   : > { %790 = vst.msk [vmem:[#allocation2 + $0x118] sm:$0xff] %vm754_vm1, %v667_v18 }
 0x207   : > { %1025 = vrot.lane.b32.xlu1 %v6869_v19, %s6106_s13 }
 0x208   : > { %1639 = vrot.lane.b32.xlu0 %v6856_v52, %s6105_s12 }
 0x209   : > { %v6876_v53 = vpop.permute.xlu1 %1579  ;;  %2232 = vrot.lane.b32.xlu2 %v6844_v13, %s10894_s25 }
 0x20a   : > { %10988 = vst [vmem:[#allocation81_spill] sm:$0xff] %v6876_v53  ;;  %v6880_v35 = vpop.permute.xlu0 %2180 }
 0x20b   : > { %10989 = vst [vmem:[#allocation82_spill] sm:$0xff] %v6880_v35  ;;  %v6882_v2 = vpop.permute.xlu2 %979 }
 0x20c   : > { %v670_v29 = vpop.f32.mrf.mxu0 }
 0x20d   : > { %791 = vst.msk [vmem:[#allocation2 + $0x120] sm:$0xff] %vm754_vm1, %v670_v29 }
 0x20f   : > { %1641 = vrot.lane.b32.xlu1 %v6869_v19, %s6105_s12 }
 0x210   : > { %2242 = vrot.lane.b32.xlu0 %v6856_v52, %s6104_s28 }
 0x211   : > { %v6891_v5 = vpop.permute.xlu1 %2182  ;;  %1027 = vrot.lane.b32.xlu2 %v6889_v17, %s6106_s13 }
 0x212   : > { %10990 = vst [vmem:[#allocation83_spill] sm:$0xff] %v6891_v5  ;;  %v6895_v53 = vpop.permute.xlu0 %975 }
 0x213   : > { %v6897_v35 = vpop.permute.xlu2 %1595 }
 0x214   : > { %10991 = vst [vmem:[#allocation84_spill] sm:$0xff] %v6897_v35  ;;  %v6914_v35 = vld [vmem:[#allocation2 + $0x100] sm:$0xff] }
 0x216   : > { %v673_v32 = vpop.f32.mrf.mxu0 }
 0x217   : > { %2244 = vrot.lane.b32.xlu1 %v6869_v19, %s6104_s28  ;;  %792 = vst.msk [vmem:[#allocation2 + $0x128] sm:$0xff] %vm754_vm1, %v673_v32  ;;  %v6934_v32 = vld [vmem:[#allocation2 + $0x108] sm:$0xff] }
 0x218   : > { %1029 = vrot.lane.b32.xlu0 %v6901_v22, %s6106_s13 }
 0x219   : > { %v6906_v18 = vpop.permute.xlu1 %977  ;;  %1643 = vrot.lane.b32.xlu2 %v6889_v17, %s6105_s12 }
 0x21a   : > { %v6910_v5 = vpop.permute.xlu0 %1591 }
 0x21b   : > { %10992 = vst [vmem:[#allocation85_spill] sm:$0xff] %v6910_v5  ;;  %v6912_v61 = vpop.permute.xlu2 %2198 }
 0x21c   : > { %10993 = vst [vmem:[#allocation86_spill] sm:$0xff] %v6912_v61 }
 0x21e   : > { %v676_v61 = vpop.f32.mrf.mxu0  ;;  %v6990_v5 = vld [vmem:[#allocation2 + $0x128] sm:$0xff] }
 0x21f   : > { %1039 = vrot.lane.b32.xlu1 %v6914_v35, %s10886_s7  ;;  %793 = vst.msk [vmem:[#allocation2 + $0x130] sm:$0xff] %vm754_vm1, %v676_v61 }
 0x220   : > { %1645 = vrot.lane.b32.xlu0 %v6901_v22, %s6105_s12 }
 0x221   : > { %v6921_v29 = vpop.permute.xlu1 %1593  ;;  %2246 = vrot.lane.b32.xlu2 %v6889_v17, %s6104_s28 }
 0x222   : > { %10994 = vst [vmem:[#allocation87_spill] sm:$0xff] %v6921_v29  ;;  %v6925_v7 = vpop.permute.xlu0 %2194 }
 0x223   : > { %10995 = vst [vmem:[#allocation88_spill] sm:$0xff] %v6925_v7  ;;  %v6927_v58 = vpop.permute.xlu2 %993 }
 0x227   : > { %1655 = vrot.lane.b32.xlu1 %v6914_v35, %s6106_s13  ;;  %v679_v61 = vpop.f32.mrf.mxu0 }
 0x228   : > { %2248 = vrot.lane.b32.xlu0 %v6901_v22, %s6104_s28  ;;  %794 = vst.msk [vmem:[#allocation2 + $0x138] sm:$0xff] %vm754_vm1, %v679_v61 }
 0x229   : > { %v6936_v26 = vpop.permute.xlu1 %2196  ;;  %1041 = vrot.lane.b32.xlu2 %v6934_v32, %s10886_s7 }
 0x22a   : > { %10996 = vst [vmem:[#allocation89_spill] sm:$0xff] %v6936_v26  ;;  %v6940_v29 = vpop.permute.xlu0 %981 }
 0x22b   : > { %10997 = vst [vmem:[#allocation90_spill] sm:$0xff] %v6940_v29  ;;  %v6942_v7 = vpop.permute.xlu2 %1609  ;;  %v7241_v29 = vld [vmem:[%s10797_s3 + $0x38] sm:$0xff] }
 0x22c   : > { %10998 = vst [vmem:[#allocation91_spill] sm:$0xff] %v6942_v7  ;;  %v6959_v7 = vld [vmem:[#allocation2 + $0x118] sm:$0xff] }
 0x22f   : > { %2258 = vrot.lane.b32.xlu1 %v6914_v35, %s6105_s12  ;;  %v682_v28 = vpop.f32.mrf.mxu0 }
 0x230   : > { %1043 = vrot.lane.b32.xlu0 %v6946_v41, %s10886_s7  ;;  %795 = vst.msk [vmem:[#allocation2 + $0x140] sm:$0xff] %vm754_vm1, %v682_v28 }
 0x231   : > { %v6950_v55 = vpop.permute.xlu1 %991  ;;  %1657 = vrot.lane.b32.xlu2 %v6934_v32, %s6106_s13 }
 0x232   : > { %v6955_v26 = vpop.permute.xlu0 %1597 }
 0x233   : > { %10999 = vst [vmem:[#allocation92_spill] sm:$0xff] %v6955_v26  ;;  %v6957_v51 = vpop.permute.xlu2 %2212 }
 0x234   : > { %11000 = vst [vmem:[#allocation93_spill] sm:$0xff] %v6957_v51  ;;  %v6978_v51 = vld [vmem:[#allocation2 + $0x120] sm:$0xff] }
 0x237   : > { %1045 = vrot.lane.b32.xlu1 %v6959_v7, %s10886_s7 }
 0x238   : > { %1659 = vrot.lane.b32.xlu0 %v6946_v41, %s6106_s13 }
 0x239   : > { %v6965_v42 = vpop.permute.xlu1 %1607  ;;  %2260 = vrot.lane.b32.xlu2 %v6934_v32, %s6105_s12 }
 0x23a   : > { %11001 = vst [vmem:[#allocation94_spill] sm:$0xff] %v6965_v42  ;;  %v6970_v61 = vpop.permute.xlu0 %2200 }
 0x23b   : > { %11002 = vst [vmem:[#allocation95_spill] sm:$0xff] %v6970_v61  ;;  %v6972_v26 = vpop.permute.xlu2 %1007  ;;  %v685_v61 = vpop.f32.mrf.mxu0 }
 0x23c   : > { %796 = vst.msk [vmem:[#allocation2 + $0x148] sm:$0xff] %vm754_vm1, %v685_v61 }
 0x23f   : > { %1661 = vrot.lane.b32.xlu1 %v6959_v7, %s6106_s13 }
 0x240   : > { %2262 = vrot.lane.b32.xlu0 %v6946_v41, %s6105_s12 }
 0x241   : > { %v6980_v30 = vpop.permute.xlu1 %2210  ;;  %1055 = vrot.lane.b32.xlu2 %v6978_v51, %s10851_s29 }
 0x242   : > { %11003 = vst [vmem:[#allocation96_spill] sm:$0xff] %v6980_v30  ;;  %v6984_v42 = vpop.permute.xlu0 %995 }
 0x243   : > { %v6986_v28 = vpop.permute.xlu2 %1623 }
 0x244   : > { %11004 = vst [vmem:[#allocation97_spill] sm:$0xff] %v6986_v28  ;;  %v7003_v28 = vld [vmem:[#allocation2 + $0x130] sm:$0xff] }
 0x245   : > { %11008 = vst [vmem:[#allocation101_spill] sm:$0xff] %v7003_v28 }
 0x247   : > { %2264 = vrot.lane.b32.xlu1 %v6959_v7, %s6105_s12 }
 0x248   : > { %1057 = vrot.lane.b32.xlu0 %v6990_v5, %s10851_s29 }
 0x249   : > { %v6995_v36 = vpop.permute.xlu1 %997  ;;  %1671 = vrot.lane.b32.xlu2 %v6978_v51, %s10886_s7 }
 0x24a   : > { %11005 = vst [vmem:[#allocation98_spill] sm:$0xff] %v6995_v36  ;;  %v6999_v30 = vpop.permute.xlu0 %1611  ;;  %v7095_v36 = vld [vmem:[#allocation2 + $0x10] sm:$0xff] }
 0x24b   : > { %11006 = vst [vmem:[#allocation99_spill] sm:$0xff] %v6999_v30  ;;  %v7001_v48 = vpop.permute.xlu2 %2226  ;;  %v7017_v30 = vld [vmem:[#allocation2 + $0x138] sm:$0xff] }
 0x24c   : > { %11007 = vst [vmem:[#allocation100_spill] sm:$0xff] %v7001_v48 }
 0x24d   : > { %11030 = vst [vmem:[#allocation123_spill] sm:$0xff] %v7095_v36 }
 0x24f   : > { %1059 = vrot.lane.b32.xlu1 %v7003_v28, %s10851_s29 }
 0x250   : > { %1673 = vrot.lane.b32.xlu0 %v6990_v5, %s10886_s7 }
 0x251   : > { %v7009_v61 = vpop.permute.xlu1 %1613  ;;  %2274 = vrot.lane.b32.xlu2 %v6978_v51, %s6106_s13 }
 0x252   : > { %11009 = vst [vmem:[#allocation102_spill] sm:$0xff] %v7009_v61  ;;  %v7013_v40 = vpop.permute.xlu0 %2214 }
 0x253   : > { %11010 = vst [vmem:[#allocation103_spill] sm:$0xff] %v7013_v40  ;;  %v7015_v20 = vpop.permute.xlu2 %1013  ;;  %v7031_v40 = vld [vmem:[#allocation2 + $0x140] sm:$0xff] }
 0x254   : > { %11011 = vst [vmem:[#allocation104_spill] sm:$0xff] %v7015_v20 }
 0x255   : > { %11014 = vst [vmem:[#allocation107_spill] sm:$0xff] %v7031_v40 }
 0x257   : > { %1675 = vrot.lane.b32.xlu1 %v7003_v28, %s10886_s7 }
 0x258   : > { %2276 = vrot.lane.b32.xlu0 %v6990_v5, %s6106_s13 }
 0x259   : > { %v7023_v48 = vpop.permute.xlu1 %2216  ;;  %1061 = vrot.lane.b32.xlu2 %v7017_v30, %s10851_s29 }
 0x25a   : > { %11012 = vst [vmem:[#allocation105_spill] sm:$0xff] %v7023_v48  ;;  %v7027_v61 = vpop.permute.xlu0 %1009 }
 0x25b   : > { %v7029_v16 = vpop.permute.xlu2 %1629 }
 0x25c   : > { %11013 = vst [vmem:[#allocation106_spill] sm:$0xff] %v7029_v16 }
 0x25f   : > { %2278 = vrot.lane.b32.xlu1 %v7003_v28, %s6106_s13 }
 0x260   : > { %1071 = vrot.lane.b32.xlu0 %v7031_v40, %s10884_s17 }
 0x261   : > { %v7037_v27 = vpop.permute.xlu1 %1011  ;;  %1677 = vrot.lane.b32.xlu2 %v7017_v30, %s10886_s7 }
 0x262   : > { %v7041_v48 = vpop.permute.xlu0 %1625 }
 0x263   : > { %11015 = vst [vmem:[#allocation108_spill] sm:$0xff] %v7041_v48  ;;  %v7043_v3 = vpop.permute.xlu2 %2232  ;;  %v7059_v48 = vld [vmem:[#allocation2 + $0x148] sm:$0xff] }
 0x264   : > { %11016 = vst [vmem:[#allocation109_spill] sm:$0xff] %v7043_v3  ;;  %v7063_v3 = vld [vmem:[#allocation2 + $0x1e0] sm:$0xff] }
 0x265   : > { %11020 = vst [vmem:[#allocation113_spill] sm:$0xff] %v7059_v48 }
 0x266   : > { %11021 = vst [vmem:[#allocation114_spill] sm:$0xff] %v7063_v3 }
 0x267   : > { %2374 = vrot.lane.b32.xlu1 %v7045_v25, %s6096_s30 }
 0x268   : > { %1687 = vrot.lane.b32.xlu0 %v7031_v40, %s10851_s29 }
 0x269   : > { %v7051_v16 = vpop.permute.xlu1 %1627  ;;  %2280 = vrot.lane.b32.xlu2 %v7017_v30, %s6106_s13 }
 0x26a   : > { %11018 = vst [vmem:[#allocation111_spill] sm:$0xff] %v7051_v16  ;;  %v7055_v21 = vpop.permute.xlu0 %2228 }
 0x26b   : > { %11019 = vst [vmem:[#allocation112_spill] sm:$0xff] %v7055_v21  ;;  %v7057_v44 = vpop.permute.xlu2 %1027 }
 0x26f   : > { %1073 = vrot.lane.b32.xlu1 %v7059_v48, %s10884_s17 }
 0x270   : > { %2290 = vrot.lane.b32.xlu0 %v7031_v40, %s10886_s7  ;;  %v7113_v40 = vld [vmem:[#allocation2 + $0x28] sm:$0xff] }
 0x271   : > { %v7067_v25 = vpop.permute.xlu1 %2230  ;;  %2370 = vrot.lane.b32.xlu2 %v7063_v3, %s6096_s30  ;;  %11036 = vst [vmem:[#allocation129_spill] sm:$0xff] %v7113_v40 }
 0x272   : > { %11022 = vst [vmem:[#allocation115_spill] sm:$0xff] %v7067_v25  ;;  %v7071_v16 = vpop.permute.xlu0 %1023 }
 0x273   : > { %v7073_v21 = vpop.permute.xlu2 %1643 }
 0x274   : > { %11023 = vst [vmem:[#allocation116_spill] sm:$0xff] %v7073_v21  ;;  %v7093_v21 = vld [vmem:[#allocation2] sm:$0xff] }
 0x275   : > { %11029 = vst [vmem:[#allocation122_spill] sm:$0xff] %v7093_v21 }
 0x277   : > { %1689 = vrot.lane.b32.xlu1 %v7059_v48, %s10851_s29 }
 0x278   : > { %2372 = vrot.lane.b32.xlu0 %v7077_v9, %s6096_s30 }
 0x279   : > { %v7083_v20 = vpop.permute.xlu1 %1025  ;;  %2376 = vrot.lane.b32.xlu2 %v7079_v4, %s6096_s30 }
 0x27a   : > { %11026 = vst [vmem:[#allocation119_spill] sm:$0xff] %v7083_v20  ;;  %v7087_v25 = vpop.permute.xlu0 %1639 }
 0x27b   : > { %11027 = vst [vmem:[#allocation120_spill] sm:$0xff] %v7087_v25  ;;  %v7089_v3 = vpop.permute.xlu2 %2246 }
 0x27c   : > { %11028 = vst [vmem:[#allocation121_spill] sm:$0xff] %v7089_v3  ;;  %v7107_v3 = vld [vmem:[#allocation2 + $0x8] sm:$0xff] }
 0x27d   : > { %11034 = vst [vmem:[#allocation127_spill] sm:$0xff] %v7107_v3 }
 0x27f   : > { %2292 = vrot.lane.b32.xlu1 %v7059_v48, %s10886_s7  ;;  %v7111_v48 = vld [vmem:[#allocation2 + $0x18] sm:$0xff] }
 0x280   : > { %2749 = vrot.lane.b32.xlu0 %v7093_v21, %s6096_s30  ;;  %11035 = vst [vmem:[#allocation128_spill] sm:$0xff] %v7111_v48 }
 0x281   : > { %v7099_v9 = vpop.permute.xlu1 %1641  ;;  %2753 = vrot.lane.b32.xlu2 %v7095_v36, %s6096_s30 }
 0x282   : > { %11031 = vst [vmem:[#allocation124_spill] sm:$0xff] %v7099_v9  ;;  %v7103_v4 = vpop.permute.xlu0 %2242  ;;  %v7125_v9 = vld [vmem:[#allocation2 + $0x20] sm:$0xff] }
 0x283   : > { %11032 = vst [vmem:[#allocation125_spill] sm:$0xff] %v7103_v4  ;;  %v7105_v25 = vpop.permute.xlu2 %1041 }
 0x284   : > { %11033 = vst [vmem:[#allocation126_spill] sm:$0xff] %v7105_v25 }
 0x285   : > { %11040 = vst [vmem:[#allocation133_spill] sm:$0xff] %v7125_v9 }
 0x287   : > { %2751 = vrot.lane.b32.xlu1 %v7107_v3, %s6096_s30  ;;  %v7129_v3 = vld [vmem:[#allocation2 + $0x30] sm:$0xff] }
 0x288   : > { %2755 = vrot.lane.b32.xlu0 %v7111_v48, %s6096_s30  ;;  %11041 = vst [vmem:[#allocation134_spill] sm:$0xff] %v7129_v3 }
 0x289   : > { %v7117_v21 = vpop.permute.xlu1 %2244  ;;  %2767 = vrot.lane.b32.xlu2 %v7113_v40, %s6094_s26 }
 0x28a   : > { %11037 = vst [vmem:[#allocation130_spill] sm:$0xff] %v7117_v21  ;;  %v7121_v36 = vpop.permute.xlu0 %1029 }
 0x28b   : > { %11038 = vst [vmem:[#allocation131_spill] sm:$0xff] %v7121_v36  ;;  %v7123_v4 = vpop.permute.xlu2 %1657  ;;  %v7201_v36 = vld [vmem:[%s10797_s3 + $0x58] sm:$0xff] }
 0x28c   : > { %11039 = vst [vmem:[#allocation132_spill] sm:$0xff] %v7123_v4  ;;  %v7143_v4 = vld [vmem:[#allocation2 + $0x38] sm:$0xff] }
 0x28d   : > { %11045 = vst [vmem:[#allocation138_spill] sm:$0xff] %v7143_v4 }
 0x28f   : > { %2765 = vrot.lane.b32.xlu1 %v7125_v9, %s6094_s26  ;;  %v7147_v9 = vld [vmem:[#allocation2 + $0x48] sm:$0xff] }
 0x290   : > { %2769 = vrot.lane.b32.xlu0 %v7129_v3, %s6094_s26  ;;  %11046 = vst [vmem:[#allocation139_spill] sm:$0xff] %v7147_v9 }
 0x291   : > { %v7135_v48 = vpop.permute.xlu1 %1039  ;;  %2781 = vrot.lane.b32.xlu2 %v7131_v14, %s10818_s16 }
 0x292   : > { %v7139_v40 = vpop.permute.xlu0 %1645 }
 0x293   : > { %11043 = vst [vmem:[#allocation136_spill] sm:$0xff] %v7139_v40  ;;  %v7141_v21 = vpop.permute.xlu2 %2260 }
 0x294   : > { %11044 = vst [vmem:[#allocation137_spill] sm:$0xff] %v7141_v21  ;;  %v7160_v21 = vld [vmem:[%s10797_s3 + $0x78] sm:$0xff] }
 0x295   : > { %1236 = vmatpush.msrb.mxu1 %v7160_v21  ;;  %1273 = vmatpush.msrb.mxu2 %v7160_v21 }
 0x297   : > { %2771 = vrot.lane.b32.xlu1 %v7143_v4, %s6094_s26  ;;  %v7178_v4 = vld [vmem:[%s10797_s3 + $0x68] sm:$0xff] }
 0x298   : > { %2783 = vrot.lane.b32.xlu0 %v7147_v9, %s10818_s16  ;;  %v7169_v9 = vld [vmem:[%s10797_s3 + $0x70] sm:$0xff] }
 0x299   : > { %v7151_v3 = vpop.permute.xlu1 %1655  ;;  %2787 = vrot.lane.b32.xlu2 %v6597_v6, %s10818_s16  ;;  %1237 = vmatpush.msrb.mxu1 %v7169_v9  ;;  %v7173_v6 = vld [vmem:[#allocation2 + $0x50] sm:$0xff] }
 0x29a   : > { %11047 = vst [vmem:[#allocation140_spill] sm:$0xff] %v7151_v3  ;;  %v7155_v14 = vpop.permute.xlu0 %2248  ;;  %1274 = vmatpush.msrb.mxu2 %v7169_v9 }
 0x29b   : > { %11048 = vst [vmem:[#allocation141_spill] sm:$0xff] %v7155_v14  ;;  %v7162_v40 = vpop.permute.xlu2 %1055  ;;  %1238 = vmatpush.msrb.mxu1 %v7178_v4  ;;  %v7186_v14 = vld [vmem:[%s10797_s3 + $0x60] sm:$0xff] }
 0x29c   : > { %11049 = vst [vmem:[#allocation142_spill] sm:$0xff] %v7173_v6  ;;  %1275 = vmatpush.msrb.mxu2 %v7178_v4 }
 0x29d   : > { %1239 = vmatpush.msrb.mxu1 %v7186_v14 }
 0x29e   : > { %1276 = vmatpush.msrb.mxu2 %v7186_v14 }
 0x29f   : > { %2785 = vrot.lane.b32.xlu1 %v7173_v6, %s10818_s16  ;;  %1240 = vmatpush.msrb.mxu1 %v7201_v36  ;;  %s5784_s16 = sshll.u32 %s6082_s21, 5 }
 0x2a0   : > { %2797 = vrot.lane.b32.xlu0 %v6658_v50, %s6100_s27  ;;  %v7210_v50 = vld [vmem:[%s10797_s3 + $0x50] sm:$0xff]  ;;  %1277 = vmatpush.msrb.mxu2 %v7201_v36  ;;  %p276_p5 = scmp.lt.s32.totalorder %s5784_s16, 63 }
 0x2a1   : > { %v7191_v3 = vpop.permute.xlu1 %2258  ;;  %2801 = vrot.lane.b32.xlu2 %v6697_v49, %s6100_s27  ;;  %1241 = vmatpush.msrb.mxu1 %v7210_v50  ;;  %v7217_v49 = vld [vmem:[%s10797_s3 + $0x48] sm:$0xff] }
 0x2a2   : > { %11050 = vst [vmem:[#allocation143_spill] sm:$0xff] %v7191_v3  ;;  %v7196_v6 = vpop.permute.xlu0 %1043  ;;  %1278 = vmatpush.msrb.mxu2 %v7210_v50  ;;  %v7226_v3 = vld [vmem:[%s10797_s3 + $0x40] sm:$0xff]  ;;  %s11465_s16 = smov (!%p276_p5, %s5784_s16), 63 }
 0x2a3   : > { %v7204_v25 = vpop.permute.xlu2 %1671  ;;  %1242 = vmatpush.msrb.mxu1 %v7217_v49  ;;  %s5785_s18 = sshll.u32 %s11465_s16, 3  ;;  %s11381_s16 = smov 80  }
 0x2a4   : > { %11051 = vst [vmem:[#allocation144_spill] sm:$0xff] %v7204_v25  ;;  %1279 = vmatpush.msrb.mxu2 %v7217_v49  ;;  %s9315_s15 = scalar_lea.vmem %s10800_s6, %s5785_s18 }
 0x2a5   : > { %1243 = vmatpush.msrb.mxu1 %v7226_v3 }
 0x2a6   : > { %1280 = vmatpush.msrb.mxu2 %v7226_v3 }
 0x2a7   : > { %2799 = vrot.lane.b32.xlu1 %v6674_v45, %s6100_s27  ;;  %1244 = vmatpush.msrb.mxu1 %v7241_v29 }
 0x2a8   : > { %2803 = vrot.lane.b32.xlu0 %v6713_v24, %s6100_s27  ;;  %v7250_v24 = vld [vmem:[%s10797_s3 + $0x30] sm:$0xff]  ;;  %1281 = vmatpush.msrb.mxu2 %v7241_v29 }
 0x2a9   : > { %v7231_v25 = vpop.permute.xlu1 %1045  ;;  %2815 = vrot.lane.b32.xlu2 %v6750_v57, %s6101_s14  ;;  %v7255_v57 = vld [vmem:[%s10797_s3 + $0x28] sm:$0xff]  ;;  %1245 = vmatpush.msrb.mxu1 %v7250_v24 }
 0x2aa   : > { %11052 = vst [vmem:[#allocation145_spill] sm:$0xff] %v7231_v25  ;;  %v7236_v45 = vpop.permute.xlu0 %1659  ;;  %1282 = vmatpush.msrb.mxu2 %v7250_v24  ;;  %v7281_v25 = vld [vmem:[%s10797_s3 + $0x18] sm:$0xff] }
 0x2ab   : > { %11053 = vst [vmem:[#allocation146_spill] sm:$0xff] %v7236_v45  ;;  %v7244_v28 = vpop.permute.xlu2 %2274  ;;  %1246 = vmatpush.msrb.mxu1 %v7255_v57 }
 0x2ac   : > { %11054 = vst [vmem:[#allocation147_spill] sm:$0xff] %v7244_v28  ;;  %v7266_v28 = vld [vmem:[%s10797_s3 + $0x20] sm:$0xff]  ;;  %1283 = vmatpush.msrb.mxu2 %v7255_v57 }
 0x2ad   : > { %1247 = vmatpush.msrb.mxu1 %v7266_v28 }
 0x2ae   : > { %1284 = vmatpush.msrb.mxu2 %v7266_v28 }
 0x2af   : > { %2813 = vrot.lane.b32.xlu1 %v6730_v23, %s6101_s14  ;;  %1248 = vmatpush.msrb.mxu1 %v7281_v25 }
 0x2b0   : > { %2817 = vrot.lane.b32.xlu0 %v6766_v15, %s6101_s14  ;;  %v7290_v15 = vld [vmem:[%s10797_s3 + $0x10] sm:$0xff]  ;;  %1285 = vmatpush.msrb.mxu2 %v7281_v25 }
 0x2b1   : > { %v7271_v45 = vpop.permute.xlu1 %1661  ;;  %2829 = vrot.lane.b32.xlu2 %v6799_v0, %s6102_s9  ;;  %1249 = vmatpush.msrb.mxu1 %v7290_v15  ;;  %v7297_v0 = vld [vmem:[%s10797_s3 + $0x8] sm:$0xff] }
 0x2b2   : > { %11055 = vst [vmem:[#allocation148_spill] sm:$0xff] %v7271_v45  ;;  %v7276_v23 = vpop.permute.xlu0 %2262  ;;  %1286 = vmatpush.msrb.mxu2 %v7290_v15 }
 0x2b3   : > { %11056 = vst [vmem:[#allocation149_spill] sm:$0xff] %v7276_v23  ;;  %v7284_v20 = vpop.permute.xlu2 %1061  ;;  %1250 = vmatpush.msrb.mxu1 %v7297_v0  ;;  %v7306_v23 = vld [vmem:[%s10797_s3] sm:$0xff] }
 0x2b4   : > { %11057 = vst [vmem:[#allocation150_spill] sm:$0xff] %v7284_v20  ;;  %1287 = vmatpush.msrb.mxu2 %v7297_v0 }
 0x2b5   : > { %1251 = vmatpush.msrb.mxu1 %v7306_v23 }
 0x2b6   : > { %1288 = vmatpush.msrb.mxu2 %v7306_v23 }
 0x2b7   : > { %2819 = vrot.lane.b32.xlu1 %v6779_v11, %s6101_s14  ;;  %1839 = vmatpush.msra.mxu1 %v7160_v21 }
 0x2b8   : > { %2831 = vrot.lane.b32.xlu0 %v6811_v38, %s6102_s9  ;;  %1876 = vmatpush.msra.mxu2 %v7160_v21 }
 0x2b9   : > { %v7311_v45 = vpop.permute.xlu1 %2264  ;;  %2835 = vrot.lane.b32.xlu2 %v6844_v13, %s6102_s9  ;;  %1840 = vmatpush.msra.mxu1 %v7169_v9 }
 0x2ba   : > { %11058 = vst [vmem:[#allocation151_spill] sm:$0xff] %v7311_v45  ;;  %v7316_v11 = vpop.permute.xlu0 %1057  ;;  %1877 = vmatpush.msra.mxu2 %v7169_v9 }
 0x2bb   : > { %v7320_v20 = vpop.permute.xlu2 %1677  ;;  %1841 = vmatpush.msra.mxu1 %v7178_v4 }
 0x2bc   : > { %1878 = vmatpush.msra.mxu2 %v7178_v4 }
 0x2bd   : > { %1842 = vmatpush.msra.mxu1 %v7186_v14 }
 0x2be   : > { %1879 = vmatpush.msra.mxu2 %v7186_v14 }
 0x2bf   : > { %2833 = vrot.lane.b32.xlu1 %v6824_v33, %s6102_s9  ;;  %1843 = vmatpush.msra.mxu1 %v7201_v36 }
 0x2c0   : > { %2845 = vrot.lane.b32.xlu0 %v6856_v52, %s10894_s25  ;;  %1880 = vmatpush.msra.mxu2 %v7201_v36  ;;  %v5970_v52 = vld [vmem:[#allocation2] sm:$0xff] }
 0x2c1   : > { %v7332_v38 = vpop.permute.xlu1 %1059  ;;  %2849 = vrot.lane.b32.xlu2 %v6889_v17, %s10894_s25  ;;  %1844 = vmatpush.msra.mxu1 %v7210_v50 }
 0x2c2   : > { %v7337_v13 = vpop.permute.xlu0 %1673  ;;  %1881 = vmatpush.msra.mxu2 %v7210_v50 }
 0x2c3   : > { %v7340_v45 = vpop.permute.xlu2 %2280  ;;  %1845 = vmatpush.msra.mxu1 %v7217_v49 }
 0x2c4   : > { %11059 = vst [vmem:[#allocation152_spill] sm:$0xff] %v7340_v45  ;;  %1882 = vmatpush.msra.mxu2 %v7217_v49 }
 0x2c5   : > { %1846 = vmatpush.msra.mxu1 %v7226_v3 }
 0x2c6   : > { %1883 = vmatpush.msra.mxu2 %v7226_v3 }
 0x2c7   : > { %2847 = vrot.lane.b32.xlu1 %v6869_v19, %s10894_s25  ;;  %v1164_v19 = vsel %vm1163_vm2, %v5970_v52, %v6579_v56  ;;  %1847 = vmatpush.msra.mxu1 %v7241_v29 }
 0x2c8   : > { %2851 = vrot.lane.b32.xlu0 %v6901_v22, %s10894_s25  ;;  %v1169_v22 = vsel %vm10883_vm4, %v1164_v19, %v6743_v10  ;;  %1884 = vmatpush.msra.mxu2 %v7241_v29 }
 0x2c9   : > { %v7352_v33 = vpop.permute.xlu1 %1675  ;;  %2863 = vrot.lane.b32.xlu2 %v6934_v32, %s6104_s28  ;;  %v1174_v32 = vsel %vm1173_vm3, %v1169_v22, %v6792_v59  ;;  %1848 = vmatpush.msra.mxu1 %v7250_v24 }
 0x2ca   : > { %v7359_v17 = vpop.permute.xlu0 %2276  ;;  %v1178_v56 = vsel %vm352_vm0, %v1174_v32, %v6895_v53  ;;  %1885 = vmatpush.msra.mxu2 %v7250_v24 }
 0x2cb   : > { %v7364_v45 = vpop.permute.xlu2 %2370  ;;  %v1183_v52 = vsel %vm1182_vm6, %v1178_v56, %v6950_v55  ;;  %1849 = vmatpush.msra.mxu1 %v7255_v57 }
 0x2cc   : > { %v1188_v10 = vsel %vm1187_vm5, %v1183_v52, %v6972_v26  ;;  %1886 = vmatpush.msra.mxu2 %v7255_v57 }
 0x2cd   : > { %v1193_v59 = vsel %vm1192_vm7, %v1188_v10, %v7071_v16  ;;  %1850 = vmatpush.msra.mxu1 %v7266_v28 }
 0x2ce   : > { %v1197_v55 = vsel %vm754_vm1, %v1193_v59, %v7135_v48  ;;  %1887 = vmatpush.msra.mxu2 %v7266_v28  ;;  %v5971_v48 = vld [vmem:[#allocation2 + $0x10] sm:$0xff] }
 0x2cf   : > { %2861 = vrot.lane.b32.xlu1 %v6914_v35, %s6104_s28  ;;  %v1202_v35 = vsel %vm1201_vm8, %v1197_v55, %v7162_v40  ;;  %1851 = vmatpush.msra.mxu1 %v7281_v25  ;;  %v1166_v40 = vsel %vm1163_vm2, %v5971_v48, %v6718_v43  ;;  %v11062_v55 = vld [vmem:[#allocation90_spill] sm:$0xff] }
 0x2d0   : > { %2865 = vrot.lane.b32.xlu0 %v6946_v41, %s6104_s28  ;;  %1888 = vmatpush.msra.mxu2 %v7281_v25  ;;  %v1171_v22 = vsel %vm10883_vm4, %v1166_v40, %v6820_v54 }
 0x2d1   : > { %v7388_v53 = vpop.permute.xlu1 %2278  ;;  %2877 = vrot.lane.b32.xlu2 %v6978_v51, %s6105_s12  ;;  %1852 = vmatpush.msra.mxu1 %v7290_v15 }
 0x2d2   : > { %v1072_v16 = vpop.permute.xlu0 %1071  ;;  %1889 = vmatpush.msra.mxu2 %v7290_v15 }
 0x2d3   : > { %v7396_v26 = vpop.permute.xlu2 %2376  ;;  %v1207_v41 = vsel %vm1206_vm9, %v1202_v35, %v1072_v16  ;;  %1853 = vmatpush.msra.mxu1 %v7297_v0  ;;  %v11063_v35 = vld [vmem:[#allocation126_spill] sm:$0xff]  ;;  %v11064_v16 = vld [vmem:[#allocation3_spill] sm:$0xff] }
 0x2d4   : > { %v1212_v51 = vsel %vm1211_vm10, %v1207_v41, %v6491_v1  ;;  %v1176_v1 = vsel %vm1173_vm3, %v1171_v22, %v6861_v34  ;;  %1890 = vmatpush.msra.mxu2 %v7297_v0  ;;  %v7480_v41 = vld [vmem:[#allocation2 + $0x150] sm:$0xff]  ;;  %v11067_v22 = vld [vmem:[#allocation104_spill] sm:$0xff] }
 0x2d5   : > { %v1217_v19 = vsel %vm10909_vm11, %v1212_v51, %v6641_v62  ;;  %v1180_v54 = vsel %vm352_vm0, %v1176_v1, %v6882_v2  ;;  %1854 = vmatpush.msra.mxu1 %v7306_v23  ;;  %v5972_v62 = vld [vmem:[#allocation2 + $0x8] sm:$0xff]  ;;  %v11065_v51 = vld [vmem:[#allocation107_spill] sm:$0xff] }
 0x2d6   : > { %v1222_v32 = vsel %vm1221_vm12, %v1217_v19, %v6481_v60  ;;  %1891 = vmatpush.msra.mxu2 %v7306_v23 }
 0x2d7   : > { %2867 = vrot.lane.b32.xlu1 %v6959_v7, %s6104_s28  ;;  %v1227_v43 = vsel %vm10872_vm13, %v1222_v32, %v6666_v63  ;;  %v1165_v7 = vsel %vm1163_vm2, %v5972_v62, %v6688_v12  ;;  %v1185_v63 = vsel %vm1182_vm6, %v1180_v54, %v6984_v42  ;;  %v5973_v12 = vld [vmem:[#allocation2 + $0x18] sm:$0xff]  ;;  %v11068_v54 = vld [vmem:[#allocation131_spill] sm:$0xff] }
 0x2d8   : > { %2879 = vrot.lane.b32.xlu0 %v6990_v5, %s6105_s12  ;;  %v7426_v60 = vsel %vm10871_vm14, %v1227_v43, %v6454_v47  ;;  %v1170_v47 = vsel %vm10883_vm4, %v1165_v7, %v6762_v39  ;;  %v1190_v2 = vsel %vm1187_vm5, %v1185_v63, %v7037_v27  ;;  %v1167_v42 = vsel %vm1163_vm2, %v5973_v12, %v6737_v8  ;;  %v11069_v7 = vld [vmem:[#allocation41_spill] sm:$0xff] }
 0x2d9   : > { %v7433_v34 = vpop.permute.xlu1 %2374  ;;  %2883 = vrot.lane.b32.xlu2 %v7017_v30, %s6105_s12  ;;  %1252 = vmatmul.f32.vlgmr.msrb.gmra.mxu1 %v7426_v60  ;;  %v1175_v30 = vsel %vm1173_vm3, %v1170_v47, %v6850_v31  ;;  %v1195_v56 = vsel %vm1192_vm7, %v1190_v2, %v7057_v44  ;;  %v1172_v27 = vsel %vm10883_vm4, %v1167_v42, %v6831_v46  ;;  %v11071_v12 = vld [vmem:[#allocation145_spill] sm:$0xff] }
 0x2da   : > { %v7442_v5 = vpop.permute.xlu0 %1687  ;;  %2442 = vmatpush.msrb.mxu1 %v7160_v21  ;;  %v1179_v52 = vsel %vm352_vm0, %v1175_v30, %v6906_v18  ;;  %v1199_v10 = vsel %vm754_vm1, %v1195_v56, %v7196_v6  ;;  %v1177_v46 = vsel %vm1173_vm3, %v1172_v27, %v6837_v37  ;;  %v11060_v18 = vld [vmem:[#allocation119_spill] sm:$0xff]  ;;  %v11061_v6 = vld [vmem:[#allocation101_spill] sm:$0xff]  ;;  %v11066_v37 = vld [vmem:[#allocation98_spill] sm:$0xff] }
 0x2db   : > { %v7452_v39 = vpop.permute.xlu2 %2753  ;;  %v1184_v8 = vsel %vm1182_vm6, %v1179_v52, %v6927_v58  ;;  %v1204_v31 = vsel %vm1201_vm8, %v1199_v10, %v7332_v38  ;;  %v1181_v58 = vsel %vm352_vm0, %v1177_v46, %v11062_v55  ;;  %v11072_v30 = vld [vmem:[#allocation61_spill] sm:$0xff]  ;;  %v11073_v27 = vld [vmem:[#allocation150_spill] sm:$0xff] }
 0x2dc   : > { %2443 = vmatpush.msrb.mxu1 %v7169_v9  ;;  %v1189_v44 = vsel %vm1187_vm5, %v1184_v8, %v7027_v61  ;;  %v1209_v61 = vsel %vm1206_vm9, %v1204_v31, %v11064_v16  ;;  %v1186_v48 = vsel %vm1182_vm6, %v1181_v58, %v11066_v37  ;;  %v11074_v10 = vld [vmem:[#allocation29_spill] sm:$0xff]  ;;  %v11076_v46 = vld [vmem:[#allocation66_spill] sm:$0xff]  ;;  %v11081_v37 = vld [vmem:[#allocation12_spill] sm:$0xff] }
 0x2dd   : > { %v1194_v59 = vsel %vm1192_vm7, %v1189_v44, %v11060_v18  ;;  %v1191_v32 = vsel %vm1187_vm5, %v1186_v48, %v11067_v22  ;;  %v1214_v63 = vsel %vm1211_vm10, %v1209_v61, %v11069_v7  ;;  %v11075_v31 = vld [vmem:[#allocation57_spill] sm:$0xff]  ;;  %v7527_v16 = vld [vmem:[#allocation2 + $0x158] sm:$0xff] }
 0x2de   : > { %2444 = vmatpush.msrb.mxu1 %v7178_v4  ;;  %v1198_v38 = vsel %vm754_vm1, %v1194_v59, %v11063_v35  ;;  %v1196_v62 = vsel %vm1192_vm7, %v1191_v32, %v11068_v54  ;;  %v1219_v18 = vsel %vm10909_vm11, %v1214_v63, %v11076_v46  ;;  %v5974_v59 = vld [vmem:[#allocation2 + $0x20] sm:$0xff]  ;;  %v11078_v58 = vld [vmem:[#allocation113_spill] sm:$0xff] }
 0x2df   : > { %2881 = vrot.lane.b32.xlu1 %v11061_v6, %s6105_s12  ;;  %v1203_v40 = vsel %vm1201_vm8, %v1198_v38, %v7316_v11  ;;  %v11070_v11 = vld [vmem:[#allocation25_spill] sm:$0xff]  ;;  %v1200_v42 = vsel %vm754_vm1, %v1196_v62, %v11071_v12  ;;  %v11077_v6 = vld [vmem:[#allocation6_spill] sm:$0xff]  ;;  %v11079_v35 = vld [vmem:[#allocation27_spill] sm:$0xff] }
 0x2e0   : > { %2893 = vrot.lane.b32.xlu0 %v11065_v51, %s6106_s13  ;;  %2445 = vmatpush.msrb.mxu1 %v7186_v14  ;;  %v1205_v52 = vsel %vm1201_vm8, %v1200_v42, %v11073_v27  ;;  %v1779_v55 = vsel %vm1163_vm2, %v11077_v6, %v5974_v59  ;;  %v11080_v61 = vld [vmem:[#allocation69_spill] sm:$0xff]  ;;  %v11087_v12 = vld [vmem:[#allocation46_spill] sm:$0xff]  ;;  %v11093_v59 = vld [vmem:[#allocation7_spill] sm:$0xff] }
 0x2e1   : > { %2897 = vrot.lane.b32.xlu2 %v7480_v41, %s6106_s13  ;;  %v1074_v19 = vpop.permute.xlu1 %1073  ;;  %v1783_v51 = vsel %vm10883_vm4, %v1779_v55, %v11080_v61  ;;  %v1210_v48 = vsel %vm1206_vm9, %v1205_v52, %v11081_v37  ;;  %v11085_v62 = vld [vmem:[#allocation85_spill] sm:$0xff]  ;;  %v11089_v52 = vld [vmem:[#allocation67_spill] sm:$0xff]  ;;  %v5975_v55 = vld [vmem:[#allocation2 + $0x28] sm:$0xff] }
 0x2e2   : > { %v1208_v1 = vsel %vm1206_vm9, %v1203_v40, %v1074_v19  ;;  %v7494_v43 = vpop.permute.xlu0 %2290  ;;  %2446 = vmatpush.msrb.mxu1 %v7201_v36  ;;  %v7534_v40 = vld [vmem:[#allocation2 + $0x168] sm:$0xff]  ;;  %v11083_v19 = vld [vmem:[#allocation73_spill] sm:$0xff]  ;;  %v1215_v42 = vsel %vm1211_vm10, %v1210_v48, %v11087_v12  ;;  %v11096_v37 = vld [vmem:[#allocation38_spill] sm:$0xff] }
 0x2e3   : > { %v1213_v47 = vsel %vm1211_vm10, %v1208_v1, %v11070_v11  ;;  %v7503_v2 = vpop.permute.xlu2 %2767  ;;  %11082 = vst [vmem:[#allocation119_spill] sm:$0xff] %v7534_v40  ;;  %v1787_v22 = vsel %vm1173_vm3, %v1783_v51, %v11083_v19  ;;  %v11084_v1 = vld [vmem:[#allocation34_spill] sm:$0xff]  ;;  %v1220_v6 = vsel %vm10909_vm11, %v1215_v42, %v11093_v59  ;;  %v11095_v61 = vld [vmem:[#allocation144_spill] sm:$0xff]  ;;  %v7579_v19 = vld [vmem:[#allocation2 + $0x170] sm:$0xff] }
 0x2e4   : > { %v1218_v56 = vsel %vm10909_vm11, %v1213_v47, %v11072_v30  ;;  %2447 = vmatpush.msrb.mxu1 %v7210_v50  ;;  %v1224_v54 = vsel %vm1221_vm12, %v1219_v18, %v11084_v1  ;;  %v1791_v7 = vsel %vm352_vm0, %v1787_v22, %v11085_v62  ;;  %v11086_v11 = vld [vmem:[#allocation94_spill] sm:$0xff]  ;;  %v7565_v18 = vld [vmem:[#allocation2 + $0x160] sm:$0xff]  ;;  %11097 = vst [vmem:[#allocation90_spill] sm:$0xff] %v7579_v19  ;;  %v11098_v22 = vld [vmem:[#allocation68_spill] sm:$0xff] }
 0x2e5   : > { %v1223_v8 = vsel %vm1221_vm12, %v1218_v56, %v11074_v10  ;;  %v1795_v47 = vsel %vm1182_vm6, %v1791_v7, %v11086_v11  ;;  %v11088_v56 = vld [vmem:[#allocation97_spill] sm:$0xff]  ;;  %v1229_v10 = vsel %vm10872_vm13, %v1224_v54, %v11089_v52  ;;  %11092 = vst [vmem:[#allocation101_spill] sm:$0xff] %v7565_v18  ;;  %v7587_v62 = vld [vmem:[#allocation2 + $0x180] sm:$0xff]  ;;  %v11101_v12 = vld [vmem:[#allocation50_spill] sm:$0xff] }
 0x2e6   : > { %v1228_v44 = vsel %vm10872_vm13, %v1223_v8, %v11075_v31  ;;  %2448 = vmatpush.msrb.mxu1 %v7217_v49  ;;  %v1799_v27 = vsel %vm1187_vm5, %v1795_v47, %v11088_v56  ;;  %v11090_v8 = vld [vmem:[#allocation120_spill] sm:$0xff]  ;;  %v7577_v48 = vsel %vm10871_vm14, %v1229_v10, %v11096_v37  ;;  %11099 = vst [vmem:[#allocation126_spill] sm:$0xff] %v7587_v62  ;;  %v11100_v7 = vld [vmem:[#allocation79_spill] sm:$0xff] }
 0x2e7   : > { %2895 = vrot.lane.b32.xlu1 %v11078_v58, %s6106_s13  ;;  %v7525_v38 = vsel %vm10871_vm14, %v1228_v44, %v11079_v35  ;;  %v1803_v31 = vsel %vm1192_vm7, %v1799_v27, %v11090_v8  ;;  %v11091_v44 = vld [vmem:[#allocation140_spill] sm:$0xff]  ;;  %v1225_v42 = vsel %vm1221_vm12, %v1220_v6, %v11101_v12  ;;  %v11103_v52 = vld [vmem:[#allocation91_spill] sm:$0xff] }
 0x2e8   : > { %1255 = vmatmul.f32.gmra.mxu1 %v7525_v38  ;;  %2899 = vrot.lane.b32.xlu0 %v7527_v16, %s6106_s13  ;;  %v1807_v46 = vsel %vm754_vm1, %v1803_v31, %v11091_v44  ;;  %v11094_v58 = vld [vmem:[#allocation16_spill] sm:$0xff]  ;;  %v11104_v8 = vld [vmem:[#allocation23_spill] sm:$0xff] }
 0x2e9   : > { %2911 = vrot.lane.b32.xlu2 %v7534_v40, %s10886_s7  ;;  %v1690_v32 = vpop.permute.xlu1 %1689  ;;  %2449 = vmatpush.msrb.mxu1 %v7226_v3  ;;  %v1780_v35 = vsel %vm1163_vm2, %v11094_v58, %v5975_v55  ;;  %v1811_v51 = vsel %vm1201_vm8, %v1807_v46, %v11095_v61  ;;  %v11105_v46 = vld [vmem:[#allocation108_spill] sm:$0xff]  ;;  %v5976_v58 = vld [vmem:[#allocation2 + $0x30] sm:$0xff]  ;;  %v7836_v40 = vld [vmem:[#allocation2 + $0x1d8] sm:$0xff] }
 0x2ea   : > { %v7547_v63 = vpop.permute.xlu0 %2372  ;;  %v1784_v1 = vsel %vm10883_vm4, %v1780_v35, %v11098_v22  ;;  %v1815_v54 = vsel %vm1206_vm9, %v1811_v51, %v7442_v5  ;;  %v11102_v5 = vld [vmem:[#allocation87_spill] sm:$0xff]  ;;  %v11106_v6 = vld [vmem:[#allocation8_spill] sm:$0xff]  ;;  %11180 = vst [vmem:[#allocation66_spill] sm:$0xff] %v7836_v40 }
 0x2eb   : > { %v7553_v30 = vpop.permute.xlu2 %2781  ;;  %2450 = vmatpush.msrb.mxu1 %v7241_v29  ;;  %v1788_v11 = vsel %vm1173_vm3, %v1784_v1, %v11100_v7  ;;  %v1819_v31 = vsel %vm1211_vm10, %v1815_v54, %v11104_v8  ;;  %v1230_v55 = vsel %vm10872_vm13, %v1225_v42, %v11106_v6  ;;  %v11107_v35 = vld [vmem:[#allocation20_spill] sm:$0xff]  ;;  %v11113_v42 = vld [vmem:[#allocation81_spill] sm:$0xff] }
 0x2ec   : > { %v1792_v56 = vsel %vm352_vm0, %v1788_v11, %v11102_v5  ;;  %v1781_v61 = vsel %vm1163_vm2, %v11107_v35, %v5976_v58  ;;  %v11108_v51 = vld [vmem:[#allocation124_spill] sm:$0xff]  ;;  %v11111_v11 = vld [vmem:[#allocation53_spill] sm:$0xff]  ;;  %v7626_v5 = vld [vmem:[#allocation2 + $0x178] sm:$0xff] }
 0x2ed   : > { %2451 = vmatpush.msrb.mxu1 %v7250_v24  ;;  %v1796_v10 = vsel %vm1182_vm6, %v1792_v56, %v11103_v52  ;;  %v11109_v22 = vld [vmem:[#allocation76_spill] sm:$0xff]  ;;  %v1823_v12 = vsel %vm10909_vm11, %v1819_v31, %v11111_v11  ;;  %11112 = vst [vmem:[#allocation3_spill] sm:$0xff] %v7626_v5  ;;  %v2732_v58 = vld [vmem:[#allocation2 + $0x198] sm:$0xff] }
 0x2ee   : > { %v1800_v59 = vsel %vm1187_vm5, %v1796_v10, %v11105_v46  ;;  %v1785_v1 = vsel %vm10883_vm4, %v1781_v61, %v11109_v22  ;;  %v11110_v54 = vld [vmem:[#allocation132_spill] sm:$0xff]  ;;  %v11114_v10 = vld [vmem:[#allocation42_spill] sm:$0xff]  ;;  %v11118_v61 = vld [vmem:[#allocation21_spill] sm:$0xff] }
 0x2ef   : > { %2909 = vrot.lane.b32.xlu1 %v7565_v18, %s10886_s7  ;;  %2452 = vmatpush.msrb.mxu1 %v7255_v57  ;;  %v1804_v37 = vsel %vm1192_vm7, %v1800_v59, %v11108_v51  ;;  %v1789_v56 = vsel %vm1173_vm3, %v1785_v1, %v11113_v42  ;;  %v7636_v8 = vsel %vm10871_vm14, %v1230_v55, %v11114_v10  ;;  %v7638_v46 = vld [vmem:[#allocation2 + $0x188] sm:$0xff]  ;;  %v5977_v1 = vld [vmem:[#allocation2 + $0x38] sm:$0xff]  ;;  %v11175_v18 = vld [vmem:[#allocation59_spill] sm:$0xff] }
 0x2f0   : > { %1258 = vmatmul.f32.gmra.mxu1 %v7577_v48  ;;  %2913 = vrot.lane.b32.xlu0 %v7579_v19, %s10886_s7  ;;  %v1808_v7 = vsel %vm754_vm1, %v1804_v37, %v11110_v54  ;;  %11115 = vst [vmem:[#allocation107_spill] sm:$0xff] %v7638_v46  ;;  %v11116_v31 = vld [vmem:[#allocation84_spill] sm:$0xff]  ;;  %v1827_v51 = vsel %vm1221_vm12, %v1823_v12, %v11118_v61  ;;  %v11119_v37 = vld [vmem:[#allocation111_spill] sm:$0xff]  ;;  %v11120_v54 = vld [vmem:[#allocation33_spill] sm:$0xff] }
 0x2f1   : > { %2925 = vrot.lane.b32.xlu2 %v7587_v62, %s10851_s29  ;;  %v7595_v47 = vpop.permute.xlu1 %2292  ;;  %2453 = vmatpush.msrb.mxu1 %v7266_v28  ;;  %v1812_v52 = vsel %vm1201_vm8, %v1808_v7, %v7337_v13  ;;  %v1793_v59 = vsel %vm352_vm0, %v1789_v56, %v11116_v31  ;;  %v11117_v13 = vld [vmem:[#allocation99_spill] sm:$0xff]  ;;  %v1782_v7 = vsel %vm1163_vm2, %v11120_v54, %v5977_v1  ;;  %v11121_v11 = vld [vmem:[#allocation116_spill] sm:$0xff]  ;;  %v11123_v12 = vld [vmem:[#allocation77_spill] sm:$0xff] }
 0x2f2   : > { %v7602_v27 = vpop.permute.xlu0 %2749  ;;  %v1816_v6 = vsel %vm1206_vm9, %v1812_v52, %v1690_v32  ;;  %v1797_v35 = vsel %vm1182_vm6, %v1793_v59, %v11117_v13  ;;  %v11122_v56 = vld [vmem:[#allocation28_spill] sm:$0xff]  ;;  %v1786_v31 = vsel %vm10883_vm4, %v1782_v7, %v11123_v12  ;;  %v11124_v59 = vld [vmem:[#allocation146_spill] sm:$0xff]  ;;  %v7677_v1 = vld [vmem:[#allocation2 + $0x190] sm:$0xff] }
 0x2f3   : > { %v7608_v44 = vpop.permute.xlu2 %2787  ;;  %2454 = vmatpush.msrb.mxu1 %v7281_v25  ;;  %v1801_v32 = vsel %vm1187_vm5, %v1797_v35, %v11119_v37  ;;  %v1820_v52 = vsel %vm1211_vm10, %v1816_v6, %v11122_v56  ;;  %v11125_v13 = vld [vmem:[#allocation56_spill] sm:$0xff]  ;;  %v11126_v37 = vld [vmem:[#allocation63_spill] sm:$0xff]  ;;  %11127 = vst [vmem:[#allocation98_spill] sm:$0xff] %v7677_v1  ;;  %v11128_v6 = vld [vmem:[#allocation78_spill] sm:$0xff] }
 0x2f4   : > { %v1805_v42 = vsel %vm1192_vm7, %v1801_v32, %v11121_v11  ;;  %v1831_v35 = vsel %vm10872_vm13, %v1827_v51, %v11125_v13  ;;  %v1824_v32 = vsel %vm10909_vm11, %v1820_v52, %v11126_v37  ;;  %v1790_v54 = vsel %vm1173_vm3, %v1786_v31, %v11128_v6  ;;  %v11129_v7 = vld [vmem:[#allocation18_spill] sm:$0xff]  ;;  %v11131_v51 = vld [vmem:[#allocation92_spill] sm:$0xff]  ;;  %v7694_v12 = vld [vmem:[#allocation2 + $0x1b0] sm:$0xff] }
 0x2f5   : > { %2455 = vmatpush.msrb.mxu1 %v7290_v15  ;;  %v7685_v11 = vsel %vm10871_vm14, %v1831_v35, %v11129_v7  ;;  %v11132_v56 = vld [vmem:[#allocation4_spill] sm:$0xff]  ;;  %11133 = vst [vmem:[#allocation131_spill] sm:$0xff] %v7694_v12  ;;  %v11134_v31 = vld [vmem:[#allocation102_spill] sm:$0xff]  ;;  %v11158_v62 = vld [vmem:[#allocation125_spill] sm:$0xff] }
 0x2f6   : > { %v11135_v13 = vld [vmem:[#allocation32_spill] sm:$0xff]  ;;  %v11161_v19 = vld [vmem:[#allocation10_spill] sm:$0xff] }
 0x2f7   : > { %2915 = vrot.lane.b32.xlu1 %v7626_v5, %s10886_s7  ;;  %2456 = vmatpush.msrb.mxu1 %v7297_v0  ;;  %v1828_v35 = vsel %vm1221_vm12, %v1824_v32, %v11135_v13  ;;  %v11140_v13 = vld [vmem:[#allocation60_spill] sm:$0xff] }
 0x2f8   : > { %1261 = vmatmul.f32.gmra.mxu1 %v7636_v8  ;;  %2927 = vrot.lane.b32.xlu0 %v7638_v46, %s10851_s29  ;;  %v11156_v5 = vld [vmem:[#allocation48_spill] sm:$0xff] }
 0x2f9   : > { %2931 = vrot.lane.b32.xlu2 %v2732_v58, %s10851_s29  ;;  %v7650_v55 = vpop.permute.xlu1 %2751  ;;  %2457 = vmatpush.msrb.mxu1 %v7306_v23  ;;  %v1809_v58 = vsel %vm754_vm1, %v1805_v42, %v11124_v59  ;;  %v7687_v42 = vld [vmem:[#allocation2 + $0x1a0] sm:$0xff] }
 0x2fa   : > { %v7657_v22 = vpop.permute.xlu0 %2755  ;;  %v1813_v61 = vsel %vm1201_vm8, %v1809_v58, %v7352_v33  ;;  %11130 = vst [vmem:[#allocation104_spill] sm:$0xff] %v7687_v42  ;;  %v1794_v33 = vsel %vm352_vm0, %v1790_v54, %v11131_v51  ;;  %v11137_v54 = vld [vmem:[#allocation136_spill] sm:$0xff] }
 0x2fb   : > { %v7665_v10 = vpop.permute.xlu2 %2801  ;;  %v1817_v52 = vsel %vm1206_vm9, %v1813_v61, %v11132_v56  ;;  %v1798_v59 = vsel %vm1182_vm6, %v1794_v33, %v11134_v31  ;;  %v11136_v61 = vld [vmem:[#allocation106_spill] sm:$0xff]  ;;  %v11138_v51 = vld [vmem:[#allocation44_spill] sm:$0xff] }
 0x2fc   : > { %v1802_v37 = vsel %vm1187_vm5, %v1798_v59, %v11136_v61  ;;  %v1821_v33 = vsel %vm1211_vm10, %v1817_v52, %v11138_v51  ;;  %v11139_v31 = vld [vmem:[#allocation148_spill] sm:$0xff]  ;;  %v11142_v59 = vld [vmem:[#allocation9_spill] sm:$0xff] }
 0x2fd   : > { %v1806_v7 = vsel %vm1192_vm7, %v1802_v37, %v11137_v54  ;;  %v7728_v52 = vld [vmem:[#allocation2 + $0x1a8] sm:$0xff]  ;;  %v11144_v54 = vld [vmem:[#allocation71_spill] sm:$0xff] }
 0x2fe   : > { %v1810_v32 = vsel %vm754_vm1, %v1806_v7, %v11139_v31  ;;  %11143 = vst [vmem:[#allocation41_spill] sm:$0xff] %v7728_v52  ;;  %v1825_v51 = vsel %vm10909_vm11, %v1821_v33, %v11144_v54  ;;  %v11145_v7 = vld [vmem:[#allocation30_spill] sm:$0xff]  ;;  %v7745_v33 = vld [vmem:[#allocation2 + $0x1c8] sm:$0xff] }
 0x2ff   : > { %2929 = vrot.lane.b32.xlu1 %v7677_v1, %s10851_s29  ;;  %v1832_v1 = vsel %vm10872_vm13, %v1828_v35, %v11140_v13  ;;  %v1814_v37 = vsel %vm1201_vm8, %v1810_v32, %v7320_v20  ;;  %v7738_v31 = vld [vmem:[#allocation2 + $0x1b8] sm:$0xff]  ;;  %v11147_v32 = vld [vmem:[#allocation15_spill] sm:$0xff]  ;;  %11148 = vst [vmem:[#allocation145_spill] sm:$0xff] %v7745_v33 }
 0x300   : > { %1855 = vmatmul.f32.vlgmr.msra.gmra.mxu1 %v7685_v11  ;;  %2941 = vrot.lane.b32.xlu0 %v7687_v42, %s10884_s17  ;;  %v7736_v35 = vsel %vm10871_vm14, %v1832_v1, %v11145_v7  ;;  %11146 = vst [vmem:[#allocation25_spill] sm:$0xff] %v7738_v31  ;;  %v1818_v13 = vsel %vm1206_vm9, %v1814_v37, %v11147_v32  ;;  %v11150_v7 = vld [vmem:[#allocation37_spill] sm:$0xff]  ;;  %v11151_v37 = vld [vmem:[#allocation88_spill] sm:$0xff] }
 0x301   : > { %2945 = vrot.lane.b32.xlu2 %v7694_v12, %s10884_s17  ;;  %v7702_v58 = vpop.permute.xlu1 %2765  ;;  %3045 = vmatpush.msra.mxu1 %v7160_v21  ;;  %v11141_v12 = vld [vmem:[#allocation43_spill] sm:$0xff]  ;;  %v11153_v42 = vld [vmem:[#allocation49_spill] sm:$0xff] }
 0x302   : > { %v7709_v6 = vpop.permute.xlu0 %2769  ;;  %v2382_v61 = vsel %vm1163_vm2, %v11142_v59, %v11141_v12  ;;  %v5978_v12 = vld [vmem:[#allocation2 + $0x40] sm:$0xff] }
 0x303   : > { %v7715_v56 = vpop.permute.xlu2 %2815  ;;  %3046 = vmatpush.msra.mxu1 %v7169_v9  ;;  %v2386_v20 = vsel %vm10883_vm4, %v2382_v61, %v5978_v12  ;;  %v11149_v59 = vld [vmem:[#allocation75_spill] sm:$0xff]  ;;  %v1829_v61 = vsel %vm1221_vm12, %v1825_v51, %v11150_v7  ;;  %v11155_v7 = vld [vmem:[#allocation70_spill] sm:$0xff] }
 0x304   : > { %v2390_v1 = vsel %vm1173_vm3, %v2386_v20, %v11149_v59  ;;  %v1822_v20 = vsel %vm1211_vm10, %v1818_v13, %v11153_v42  ;;  %v1833_v46 = vsel %vm10872_vm13, %v1829_v61, %v11155_v7  ;;  %v11159_v42 = vld [vmem:[#allocation143_spill] sm:$0xff] }
 0x305   : > { %3047 = vmatpush.msra.mxu1 %v7178_v4  ;;  %v2394_v12 = vsel %vm352_vm0, %v2390_v1, %v11151_v37  ;;  %v11157_v1 = vld [vmem:[#allocation19_spill] sm:$0xff] }
 0x306   : > { %v2383_v37 = vsel %vm1163_vm2, %v11157_v1, %v11156_v5  ;;  %v11163_v5 = vld [vmem:[#allocation40_spill] sm:$0xff] }
 0x307   : > { %2943 = vrot.lane.b32.xlu1 %v7728_v52, %s10884_s17  ;;  %3048 = vmatpush.msra.mxu1 %v7186_v14  ;;  %v11152_v52 = vld [vmem:[#allocation96_spill] sm:$0xff]  ;;  %v7791_v7 = vsel %vm10871_vm14, %v1833_v46, %v11163_v5  ;;  %v11167_v46 = vld [vmem:[#allocation114_spill] sm:$0xff]  ;;  %v11170_v5 = vld [vmem:[#allocation93_spill] sm:$0xff] }
 0x308   : > { %1858 = vmatmul.f32.gmra.mxu1 %v7736_v35  ;;  %2947 = vrot.lane.b32.xlu0 %v7738_v31, %s10884_s17  ;;  %v2398_v31 = vsel %vm1182_vm6, %v2394_v12, %v11152_v52  ;;  %v7781_v12 = vld [vmem:[#allocation2 + $0x1c0] sm:$0xff]  ;;  %11164 = vst [vmem:[#allocation150_spill] sm:$0xff] %v7791_v7 }
 0x309   : > { %2959 = vrot.lane.b32.xlu2 %v7745_v33, %s6099_s19  ;;  %v7753_v54 = vpop.permute.xlu1 %2771  ;;  %3049 = vmatpush.msra.mxu1 %v7201_v36  ;;  %v11154_v33 = vld [vmem:[#allocation100_spill] sm:$0xff]  ;;  %11160 = vst [vmem:[#allocation61_spill] sm:$0xff] %v7781_v12 }
 0x30a   : > { %v7760_v32 = vpop.permute.xlu0 %2783  ;;  %v2402_v51 = vsel %vm1187_vm5, %v2398_v31, %v11154_v33  ;;  %v1826_v31 = vsel %vm10909_vm11, %v1822_v20, %v11161_v19  ;;  %v11162_v33 = vld [vmem:[#allocation147_spill] sm:$0xff]  ;;  %v11166_v20 = vld [vmem:[#allocation82_spill] sm:$0xff] }
 0x30b   : > { %v7766_v59 = vpop.permute.xlu2 %2829  ;;  %3050 = vmatpush.msra.mxu1 %v7210_v50  ;;  %v2406_v52 = vsel %vm1192_vm7, %v2402_v51, %v11158_v62  ;;  %v7793_v62 = vld [vmem:[#allocation2 + $0x1d0] sm:$0xff]  ;;  %v5979_v51 = vld [vmem:[#allocation2 + $0x48] sm:$0xff] }
 0x30c   : > { %v2410_v13 = vsel %vm754_vm1, %v2406_v52, %v11159_v42  ;;  %11165 = vst [vmem:[#allocation29_spill] sm:$0xff] %v7793_v62  ;;  %v2387_v1 = vsel %vm10883_vm4, %v2383_v37, %v5979_v51  ;;  %v11169_v37 = vld [vmem:[#allocation89_spill] sm:$0xff] }
 0x30d   : > { %3051 = vmatpush.msra.mxu1 %v7217_v49  ;;  %v2414_v61 = vsel %vm1201_vm8, %v2410_v13, %v11162_v33  ;;  %v2391_v52 = vsel %vm1173_vm3, %v2387_v1, %v11166_v20  ;;  %v11168_v13 = vld [vmem:[#allocation52_spill] sm:$0xff] }
 0x30e   : > { %v2418_v19 = vsel %vm1206_vm9, %v2414_v61, %v7494_v43  ;;  %v1830_v33 = vsel %vm1221_vm12, %v1826_v31, %v11168_v13  ;;  %v2395_v43 = vsel %vm352_vm0, %v2391_v52, %v11169_v37  ;;  %v11174_v13 = vld [vmem:[#allocation11_spill] sm:$0xff]  ;;  %v11176_v52 = vld [vmem:[#allocation22_spill] sm:$0xff] }
 0x30f   : > { %2957 = vrot.lane.b32.xlu1 %v7781_v12, %s6099_s19  ;;  %3052 = vmatpush.msra.mxu1 %v7226_v3  ;;  %v2399_v51 = vsel %vm1182_vm6, %v2395_v43, %v11170_v5  ;;  %v1834_v12 = vsel %vm10872_vm13, %v1830_v33, %v11174_v13  ;;  %v2384_v37 = vsel %vm1163_vm2, %v11176_v52, %v11175_v18  ;;  %v11179_v5 = vld [vmem:[#allocation55_spill] sm:$0xff]  ;;  %v11181_v18 = vld [vmem:[#allocation45_spill] sm:$0xff]  ;;  %v11185_v52 = vld [vmem:[#allocation118_spill] sm:$0xff] }
 0x310   : > { %1861 = vmatmul.f32.gmra.mxu1 %v7791_v7  ;;  %2961 = vrot.lane.b32.xlu0 %v7793_v62, %s6099_s19  ;;  %v11171_v62 = vld [vmem:[#allocation26_spill] sm:$0xff] }
 0x311   : > { %2973 = vrot.lane.b32.xlu2 %v11167_v46, %s6098_s10  ;;  %v7806_v42 = vpop.permute.xlu1 %2785  ;;  %3053 = vmatpush.msra.mxu1 %v7241_v29  ;;  %v2422_v1 = vsel %vm1211_vm10, %v2418_v19, %v11171_v62  ;;  %v11173_v46 = vld [vmem:[#allocation112_spill] sm:$0xff]  ;;  %v11177_v7 = vld [vmem:[#allocation130_spill] sm:$0xff]  ;;  %v11178_v62 = vld [vmem:[#allocation137_spill] sm:$0xff] }
 0x312   : > { %v7813_v61 = vpop.permute.xlu0 %2797  ;;  %v2403_v31 = vsel %vm1187_vm5, %v2399_v51, %v11173_v46  ;;  %v7844_v51 = vsel %vm10871_vm14, %v1834_v12, %v11181_v18  ;;  %v11189_v18 = vld [vmem:[#allocation31_spill] sm:$0xff] }
 0x313   : > { %v7819_v20 = vpop.permute.xlu2 %2835  ;;  %3054 = vmatpush.msra.mxu1 %v7250_v24  ;;  %v2407_v43 = vsel %vm1192_vm7, %v2403_v31, %v11177_v7  ;;  %11182 = vst [vmem:[#allocation6_spill] sm:$0xff] %v7844_v51  ;;  %v5980_v7 = vld [vmem:[#allocation2 + $0x50] sm:$0xff] }
 0x314   : > { %11172 = vst [vmem:[#allocation57_spill] sm:$0xff] %v7819_v20  ;;  %v2411_v19 = vsel %vm754_vm1, %v2407_v43, %v11178_v62  ;;  %v2426_v20 = vsel %vm10909_vm11, %v2422_v1, %v11179_v5  ;;  %v2388_v46 = vsel %vm10883_vm4, %v2384_v37, %v5980_v7  ;;  %v11183_v31 = vld [vmem:[#allocation117_spill] sm:$0xff]  ;;  %v11186_v43 = vld [vmem:[#allocation24_spill] sm:$0xff]  ;;  %v11187_v37 = vld [vmem:[#allocation86_spill] sm:$0xff] }
 0x315   : > { %3055 = vmatpush.msra.mxu1 %v7255_v57  ;;  %v2415_v33 = vsel %vm1201_vm8, %v2411_v19, %v7359_v17  ;;  %v11184_v17 = vld [vmem:[#allocation83_spill] sm:$0xff]  ;;  %v2430_v62 = vsel %vm1221_vm12, %v2426_v20, %v11186_v43  ;;  %v11192_v43 = vld [vmem:[#allocation64_spill] sm:$0xff] }
 0x316   : > { %v2419_v1 = vsel %vm1206_vm9, %v2415_v33, %v7595_v47  ;;  %v2392_v13 = vsel %vm1173_vm3, %v2388_v46, %v11184_v17  ;;  %v11188_v5 = vld [vmem:[#allocation103_spill] sm:$0xff]  ;;  %v11191_v17 = vld [vmem:[#allocation58_spill] sm:$0xff] }
 0x317   : > { %2963 = vrot.lane.b32.xlu1 %v7836_v40, %s6099_s19  ;;  %3056 = vmatpush.msra.mxu1 %v7266_v28  ;;  %v2396_v47 = vsel %vm352_vm0, %v2392_v13, %v11187_v37  ;;  %v2423_v7 = vsel %vm1211_vm10, %v2419_v1, %v11189_v18  ;;  %v11193_v13 = vld [vmem:[#allocation36_spill] sm:$0xff]  ;;  %v11194_v40 = vld [vmem:[#allocation121_spill] sm:$0xff] }
 0x318   : > { %1864 = vmatmul.f32.gmra.mxu1 %v7844_v51  ;;  %2975 = vrot.lane.b32.xlu0 %v11183_v31, %s6098_s10  ;;  %v2400_v33 = vsel %vm1182_vm6, %v2396_v47, %v11188_v5  ;;  %v11190_v31 = vld [vmem:[#allocation115_spill] sm:$0xff]  ;;  %v2385_v37 = vsel %vm1163_vm2, %v11193_v13, %v11192_v43  ;;  %v11195_v1 = vld [vmem:[#allocation149_spill] sm:$0xff] }
 0x319   : > { %2979 = vrot.lane.b32.xlu2 %v11185_v52, %s6098_s10  ;;  %v7857_v12 = vpop.permute.xlu1 %2799  ;;  %3057 = vmatpush.msra.mxu1 %v7281_v25  ;;  %v2404_v20 = vsel %vm1187_vm5, %v2400_v33, %v11190_v31  ;;  %v2434_v52 = vsel %vm10872_vm13, %v2430_v62, %v11191_v17  ;;  %v11196_v18 = vld [vmem:[#allocation65_spill] sm:$0xff]  ;;  %v11197_v62 = vld [vmem:[#allocation110_spill] sm:$0xff]  ;;  %v11201_v43 = vld [vmem:[#allocation123_spill] sm:$0xff] }
 0x31a   : > { %v7864_v19 = vpop.permute.xlu0 %2803  ;;  %v2408_v47 = vsel %vm1192_vm7, %v2404_v20, %v11194_v40  ;;  %v2427_v51 = vsel %vm10909_vm11, %v2423_v7, %v11196_v18  ;;  %v7893_v31 = vsel %vm10871_vm14, %v2434_v52, %v7364_v45  ;;  %v5981_v40 = vld [vmem:[#allocation2 + $0x58] sm:$0xff]  ;;  %v11200_v7 = vld [vmem:[#allocation80_spill] sm:$0xff]  ;;  %v11202_v45 = vld [vmem:[#allocation35_spill] sm:$0xff] }
 0x31b   : > { %v7870_v46 = vpop.permute.xlu2 %2849  ;;  %3058 = vmatpush.msra.mxu1 %v7290_v15  ;;  %v2412_v5 = vsel %vm754_vm1, %v2408_v47, %v11195_v1  ;;  %11198 = vst [vmem:[#allocation113_spill] sm:$0xff] %v7893_v31  ;;  %v2389_v20 = vsel %vm10883_vm4, %v2385_v37, %v5981_v40  ;;  %v11199_v17 = vld [vmem:[#allocation122_spill] sm:$0xff]  ;;  %v2431_v52 = vsel %vm1221_vm12, %v2427_v51, %v11202_v45  ;;  %v11203_v47 = vld [vmem:[#allocation95_spill] sm:$0xff]  ;;  %v11204_v1 = vld [vmem:[#allocation5_spill] sm:$0xff] }
 0x31c   : > { %v2416_v33 = vsel %vm1201_vm8, %v2412_v5, %v7388_v53  ;;  %v2393_v53 = vsel %vm1173_vm3, %v2389_v20, %v11200_v7  ;;  %v11207_v7 = vld [vmem:[#allocation62_spill] sm:$0xff]  ;;  %v11209_v45 = vld [vmem:[#allocation47_spill] sm:$0xff] }
 0x31d   : > { %3059 = vmatpush.msra.mxu1 %v7297_v0  ;;  %v2397_v37 = vsel %vm352_vm0, %v2393_v53, %v11203_v47  ;;  %v2420_v5 = vsel %vm1206_vm9, %v2416_v33, %v11204_v1  ;;  %v11210_v47 = vld [vmem:[#allocation151_spill] sm:$0xff]  ;;  %v11211_v1 = vld [vmem:[#allocation152_spill] sm:$0xff] }
 0x31e   : > { %v2424_v33 = vsel %vm1211_vm10, %v2420_v5, %v11209_v45  ;;  %v11214_v5 = vld [vmem:[#allocation128_spill] sm:$0xff] }
 0x31f   : > { %2977 = vrot.lane.b32.xlu1 %v11197_v62, %s6098_s10  ;;  %3060 = vmatpush.msra.mxu1 %v7306_v23  ;;  %v11205_v62 = vld [vmem:[#allocation105_spill] sm:$0xff] }
 0x320   : > { %2458 = vmatmul.f32.vlgmr.msrb.gmra.mxu1 %v7893_v31  ;;  %3352 = vrot.lane.b32.xlu0 %v11199_v17, %s6098_s10  ;;  %v2401_v40 = vsel %vm1182_vm6, %v2397_v37, %v11205_v62  ;;  %v11206_v17 = vld [vmem:[#allocation109_spill] sm:$0xff]  ;;  %v11212_v31 = vld [vmem:[#allocation127_spill] sm:$0xff] }
 0x321   : > { %3356 = vrot.lane.b32.xlu2 %v11201_v43, %s6098_s10  ;;  %v7904_v13 = vpop.permute.xlu1 %2813  ;;  %3648 = vmatpush.msrb.mxu1 %v7160_v21  ;;  %v2405_v51 = vsel %vm1187_vm5, %v2401_v40, %v11206_v17  ;;  %v2435_v21 = vsel %vm10872_vm13, %v2431_v52, %v11207_v7  ;;  %v11208_v43 = vld [vmem:[#allocation141_spill] sm:$0xff] }
 0x322   : > { %v7913_v18 = vpop.permute.xlu0 %2817  ;;  %v2409_v53 = vsel %vm1192_vm7, %v2405_v51, %v11208_v43  ;;  %v7937_v52 = vsel %vm10871_vm14, %v2435_v21, %v7547_v63  ;;  %v11216_v17 = vld [vmem:[#allocation129_spill] sm:$0xff]  ;;  %v11218_v21 = vld [vmem:[#allocation39_spill] sm:$0xff] }
 0x323   : > { %v7917_v20 = vpop.permute.xlu2 %2863  ;;  %3649 = vmatpush.msrb.mxu1 %v7169_v9  ;;  %v2413_v37 = vsel %vm754_vm1, %v2409_v53, %v11210_v47  ;;  %11213 = vst [vmem:[#allocation27_spill] sm:$0xff] %v7937_v52  ;;  %v11219_v53 = vld [vmem:[#allocation51_spill] sm:$0xff] }
 0x324   : > { %v2417_v62 = vsel %vm1201_vm8, %v2413_v37, %v11211_v1  ;;  %v11221_v37 = vld [vmem:[#allocation133_spill] sm:$0xff] }
 0x325   : > { %3650 = vmatpush.msrb.mxu1 %v7178_v4  ;;  %v11215_v4 = vld [vmem:[#allocation74_spill] sm:$0xff] }
 0x326   : > { %v2428_v40 = vsel %vm10909_vm11, %v2424_v33, %v11215_v4  ;;  %v11220_v33 = vld [vmem:[#allocation72_spill] sm:$0xff] }
 0x327   : > { %3354 = vrot.lane.b32.xlu1 %v11212_v31, %s6098_s10  ;;  %3651 = vmatpush.msrb.mxu1 %v7186_v14  ;;  %v11217_v31 = vld [vmem:[#allocation17_spill] sm:$0xff]  ;;  %v2432_v43 = vsel %vm1221_vm12, %v2428_v40, %v11218_v21  ;;  %v11225_v40 = vld [vmem:[#allocation135_spill] sm:$0xff]  ;;  %v11228_v21 = vld [vmem:[#allocation14_spill] sm:$0xff] }
 0x328   : > { %2461 = vmatmul.f32.gmra.mxu1 %v7937_v52  ;;  %3358 = vrot.lane.b32.xlu0 %v11214_v5, %s6098_s10  ;;  %v2421_v63 = vsel %vm1206_vm9, %v2417_v62, %v11217_v31  ;;  %v2436_v47 = vsel %vm10872_vm13, %v2432_v43, %v11220_v33  ;;  %v11223_v62 = vld [vmem:[#allocation134_spill] sm:$0xff]  ;;  %v11224_v5 = vld [vmem:[#allocation13_spill] sm:$0xff] }
 0x329   : > { %3370 = vrot.lane.b32.xlu2 %v11216_v17, %s6096_s30  ;;  %v7947_v51 = vpop.permute.xlu1 %2819  ;;  %3652 = vmatpush.msrb.mxu1 %v7201_v36  ;;  %v2425_v45 = vsel %vm1211_vm10, %v2421_v63, %v11219_v53  ;;  %v7968_v1 = vsel %vm10871_vm14, %v2436_v47, %v7433_v34  ;;  %v11229_v53 = vld [vmem:[#allocation138_spill] sm:$0xff]  ;;  %v11231_v47 = vld [vmem:[#allocation139_spill] sm:$0xff] }
 0x32a   : > { %v7952_v7 = vpop.permute.xlu0 %2831  ;;  %11222 = vst [vmem:[#allocation69_spill] sm:$0xff] %v7968_v1  ;;  %v2429_v4 = vsel %vm10909_vm11, %v2425_v45, %v11224_v5  ;;  %v3295_v33 = vld [vmem:[#allocation2 + $0x58] sm:$0xff]  ;;  %v8016_v5 = vld [vmem:[#allocation2 + $0x70] sm:$0xff] }
 0x32b   : > { %v7954_v14 = vpop.permute.xlu2 %2877  ;;  %3653 = vmatpush.msrb.mxu1 %v7210_v50 }
 0x32d   : > { %3654 = vmatpush.msrb.mxu1 %v7217_v49 }
 0x32f   : > { %3368 = vrot.lane.b32.xlu1 %v11221_v37, %s6096_s30  ;;  %3655 = vmatpush.msrb.mxu1 %v7226_v3  ;;  %v11227_v3 = vld [vmem:[#allocation54_spill] sm:$0xff] }
 0x330   : > { %2464 = vmatmul.f32.gmra.mxu1 %v7968_v1  ;;  %3372 = vrot.lane.b32.xlu0 %v11223_v62, %s6096_s30  ;;  %v2433_v63 = vsel %vm1221_vm12, %v2429_v4, %v11227_v3  ;;  %v8028_v4 = vld [vmem:[#allocation2 + $0x68] sm:$0xff]  ;;  %v3307_v1 = vld [vmem:[#allocation2 + $0xb8] sm:$0xff] }
 0x331   : > { %3384 = vrot.lane.b32.xlu2 %v11225_v40, %s6094_s26  ;;  %v7978_v17 = vpop.permute.xlu1 %2833  ;;  %3656 = vmatpush.msrb.mxu1 %v7241_v29  ;;  %v2437_v43 = vsel %vm10872_vm13, %v2433_v63, %v11228_v21  ;;  %v8030_v40 = vld [vmem:[#allocation2 + $0x78] sm:$0xff] }
 0x332   : > { %v7981_v31 = vpop.permute.xlu0 %2845  ;;  %v7995_v45 = vsel %vm10871_vm14, %v2437_v43, %v7396_v26  ;;  %v11233_v26 = vld [vmem:[#allocation142_spill] sm:$0xff]  ;;  %v3304_v43 = vld [vmem:[#allocation2 + $0xa0] sm:$0xff] }
 0x333   : > { %v7983_v34 = vpop.permute.xlu2 %2883  ;;  %3657 = vmatpush.msrb.mxu1 %v7250_v24  ;;  %11230 = vst [vmem:[#allocation73_spill] sm:$0xff] %v7995_v45 }
 0x334   : > { %11226 = vst [vmem:[#allocation12_spill] sm:$0xff] %v7983_v34  ;;  %v3311_v34 = vld [vmem:[#allocation2 + $0xd8] sm:$0xff] }
 0x335   : > { %3658 = vmatpush.msrb.mxu1 %v7255_v57 }
 0x337   : > { %3374 = vrot.lane.b32.xlu1 %v11229_v53, %s6096_s30  ;;  %3659 = vmatpush.msrb.mxu1 %v7266_v28  ;;  %v8011_v28 = vld [vmem:[#allocation2 + $0x60] sm:$0xff]  ;;  %v3306_v53 = vld [vmem:[#allocation2 + $0xb0] sm:$0xff] }
 0x338   : > { %2467 = vmatmul.f32.gmra.mxu1 %v7995_v45  ;;  %3386 = vrot.lane.b32.xlu0 %v11231_v47, %s6094_s26 }
 0x339   : > { %3390 = vrot.lane.b32.xlu2 %v3295_v33, %s6094_s26  ;;  %v8002_v57 = vpop.permute.xlu1 %2847  ;;  %3660 = vmatpush.msrb.mxu1 %v7281_v25  ;;  %v8044_v33 = vld [vmem:[#allocation2 + $0xc0] sm:$0xff] }
 0x33a   : > { %v8005_v37 = vpop.permute.xlu0 %2851  ;;  %11236 = vst [vmem:[#allocation94_spill] sm:$0xff] %v8044_v33 }
 0x33b   : > { %11232 = vst [vmem:[#allocation34_spill] sm:$0xff] %v8005_v37  ;;  %v8007_v62 = vpop.permute.xlu2 %2897  ;;  %3661 = vmatpush.msrb.mxu1 %v7290_v15 }
 0x33d   : > { %3662 = vmatpush.msrb.mxu1 %v7297_v0 }
 0x33f   : > { %3388 = vrot.lane.b32.xlu1 %v11233_v26, %s6094_s26  ;;  %3663 = vmatpush.msrb.mxu1 %v7306_v23  ;;  %v3305_v23 = vld [vmem:[#allocation2 + $0xa8] sm:$0xff] }
 0x340   : > { %3400 = vrot.lane.b32.xlu0 %v8011_v28, %s11234_s8 }
 0x341   : > { %3404 = vrot.lane.b32.xlu2 %v8016_v5, %s11234_s8  ;;  %v8022_v25 = vpop.permute.xlu1 %2861 }
 0x342   : > { %v8024_v15 = vpop.permute.xlu0 %2865 }
 0x343   : > { %v8026_v0 = vpop.permute.xlu2 %2911 }
 0x347   : > { %3402 = vrot.lane.b32.xlu1 %v8028_v4, %s11234_s8 }
 0x348   : > { %3406 = vrot.lane.b32.xlu0 %v8030_v40, %s11234_s8 }
 0x349   : > { %3418 = vrot.lane.b32.xlu2 %v3305_v23, %s6100_s27  ;;  %v8037_v3 = vpop.permute.xlu1 %2867 }
 0x34a   : > { %11235 = vst [vmem:[#allocation85_spill] sm:$0xff] %v8037_v3  ;;  %v8039_v63 = vpop.permute.xlu0 %2879 }
 0x34b   : > { %v8041_v21 = vpop.permute.xlu2 %2925 }
 0x34f   : > { %3416 = vrot.lane.b32.xlu1 %v3304_v43, %s6100_s27  ;;  %v8059_v43 = vld [vmem:[#allocation2 + $0xc8] sm:$0xff] }
 0x350   : > { %3420 = vrot.lane.b32.xlu0 %v3306_v53, %s6100_s27  ;;  %11239 = vst [vmem:[#allocation67_spill] sm:$0xff] %v8059_v43 }
 0x351   : > { %3432 = vrot.lane.b32.xlu2 %v8044_v33, %s6101_s14  ;;  %v8049_v47 = vpop.permute.xlu1 %2881 }
 0x352   : > { %v8051_v26 = vpop.permute.xlu0 %2893 }
 0x353   : > { %v8053_v23 = vpop.permute.xlu2 %2931 }
 0x354   : > { %11237 = vst [vmem:[#allocation46_spill] sm:$0xff] %v8053_v23 }
 0x356   : > { %v1253_v45 = vpop.f32.mrf.mxu1 }
 0x357   : > { %v8056_v52 = vsub.f32 %v7426_v60, %v1253_v45  ;;  %3422 = vrot.lane.b32.xlu1 %v3307_v1, %s6100_s27  ;;  %v8075_v60 = vld [vmem:[%s10797_s3 + $0x78] sm:$0xff]  ;;  %v3310_v1 = vld [vmem:[#allocation2 + $0xd0] sm:$0xff] }
 0x358   : > { %3434 = vrot.lane.b32.xlu0 %v8059_v43, %s6101_s14  ;;  %v3314_v45 = vld [vmem:[#allocation2 + $0xf0] sm:$0xff] }
 0x359   : > { %11238 = vst [vmem:[#allocation97_spill] sm:$0xff] %v8056_v52  ;;  %v1269_v53 = vmul.f32 %v8056_v52, %v8056_v52  ;;  %3438 = vrot.lane.b32.xlu2 %v3311_v34, %s6101_s14  ;;  %v8066_v33 = vpop.permute.xlu1 %2895  ;;  %v8080_v34 = vld [vmem:[#allocation2 + $0xe0] sm:$0xff] }
 0x35a   : > { %v8068_v23 = vpop.permute.xlu0 %2899  ;;  %11242 = vst [vmem:[#allocation7_spill] sm:$0xff] %v8080_v34 }
 0x35b   : > { %11240 = vst [vmem:[#allocation120_spill] sm:$0xff] %v8068_v23  ;;  %v8070_v3 = vpop.permute.xlu2 %2945  ;;  %1289 = vmatmul.f32.vlgmr.msrb.gmra.mxu2 %v1269_v53  ;;  %v8087_v53 = vld [vmem:[%s10797_s3 + $0x68] sm:$0xff] }
 0x35c   : > { %11241 = vst [vmem:[#allocation140_spill] sm:$0xff] %v8070_v3  ;;  %2479 = vmatpush.msrb.mxu2 %v8075_v60  ;;  %v3315_v3 = vld [vmem:[#allocation2 + $0xf8] sm:$0xff] }
 0x35e   : > { %2480 = vmatpush.msrb.mxu2 %v7169_v9 }
 0x35f   : > { %3436 = vrot.lane.b32.xlu1 %v3310_v1, %s6101_s14  ;;  %v8098_v1 = vld [vmem:[%s10797_s3 + $0x60] sm:$0xff] }
 0x360   : > { %3448 = vrot.lane.b32.xlu0 %v8080_v34, %s6102_s9  ;;  %2481 = vmatpush.msrb.mxu2 %v8087_v53 }
 0x361   : > { %3452 = vrot.lane.b32.xlu2 %v3314_v45, %s6102_s9  ;;  %v8091_v52 = vpop.permute.xlu1 %2909  ;;  %v8107_v45 = vld [vmem:[#allocation2 + $0xe8] sm:$0xff] }
 0x362   : > { %v8093_v9 = vpop.permute.xlu0 %2913  ;;  %2482 = vmatpush.msrb.mxu2 %v8098_v1  ;;  %11245 = vst [vmem:[#allocation38_spill] sm:$0xff] %v8107_v45 }
 0x363   : > { %11243 = vst [vmem:[#allocation16_spill] sm:$0xff] %v8093_v9  ;;  %v8101_v43 = vpop.permute.xlu2 %2959  ;;  %v8112_v9 = vld [vmem:[#allocation2 + $0x108] sm:$0xff] }
 0x364   : > { %2483 = vmatpush.msrb.mxu2 %v7201_v36  ;;  %11246 = vst [vmem:[#allocation68_spill] sm:$0xff] %v8112_v9 }
 0x365   : > { %v1256_v34 = vpop.f32.mrf.mxu1 }
 0x366   : > { %v8105_v23 = vsub.f32 %v7525_v38, %v1256_v34  ;;  %2484 = vmatpush.msrb.mxu2 %v7210_v50  ;;  %v2985_v38 = vsel %vm1163_vm2, %v7602_v27, %v7702_v58  ;;  %v3318_v27 = vld [vmem:[#allocation2 + $0x110] sm:$0xff]  ;;  %v8146_v58 = vld [vmem:[#allocation2 + $0x120] sm:$0xff] }
 0x367   : > { %3450 = vrot.lane.b32.xlu1 %v8107_v45, %s6102_s9  ;;  %11248 = vst [vmem:[#allocation50_spill] sm:$0xff] %v8146_v58  ;;  %v8175_v45 = vld [vmem:[%s10797_s3 + $0x20] sm:$0xff] }
 0x368   : > { %11244 = vst [vmem:[#allocation144_spill] sm:$0xff] %v8105_v23  ;;  %3454 = vrot.lane.b32.xlu0 %v3315_v3, %s6102_s9  ;;  %v1270_v37 = vmul.f32 %v8105_v23, %v8105_v23  ;;  %2485 = vmatpush.msrb.mxu2 %v7217_v49  ;;  %v8132_v3 = vld [vmem:[%s10797_s3 + $0x40] sm:$0xff] }
 0x369   : > { %3466 = vrot.lane.b32.xlu2 %v8112_v9, %s10894_s25  ;;  %v8120_v36 = vpop.permute.xlu1 %2915  ;;  %v8141_v9 = vld [vmem:[#allocation2 + $0x100] sm:$0xff] }
 0x36a   : > { %1292 = vmatmul.f32.gmra.mxu2 %v1270_v37  ;;  %v8122_v50 = vpop.permute.xlu0 %2927  ;;  %v2989_v37 = vsel %vm10883_vm4, %v2985_v38, %v7553_v30  ;;  %v8160_v38 = vld [vmem:[%s10797_s3 + $0x28] sm:$0xff] }
 0x36b   : > { %v8127_v34 = vpop.permute.xlu2 %2973  ;;  %2486 = vmatpush.msrb.mxu2 %v8132_v3  ;;  %v2993_v30 = vsel %vm1173_vm3, %v2989_v37, %v8011_v28  ;;  %v2986_v37 = vsel %vm1163_vm2, %v7650_v55, %v7503_v2  ;;  %v8183_v2 = vld [vmem:[%s10797_s3 + $0x18] sm:$0xff] }
 0x36d   : > { %v1259_v49 = vpop.f32.mrf.mxu1  ;;  %2487 = vmatpush.msrb.mxu2 %v7241_v29 }
 0x36e   : > { %v8139_v23 = vsub.f32 %v7577_v48, %v1259_v49 }
 0x36f   : > { %3464 = vrot.lane.b32.xlu1 %v8141_v9, %s10894_s25  ;;  %2488 = vmatpush.msrb.mxu2 %v7250_v24  ;;  %v2997_v24 = vsel %vm352_vm0, %v2993_v30, %v7813_v61  ;;  %v2990_v61 = vsel %vm10883_vm4, %v2986_v37, %v7760_v32  ;;  %v3319_v30 = vld [vmem:[#allocation2 + $0x118] sm:$0xff]  ;;  %v8196_v37 = vld [vmem:[#allocation2 + $0x128] sm:$0xff] }
 0x370   : > { %11247 = vst [vmem:[#allocation79_spill] sm:$0xff] %v8139_v23  ;;  %3468 = vrot.lane.b32.xlu0 %v3318_v27, %s10894_s25  ;;  %v1271_v29 = vmul.f32 %v8139_v23, %v8139_v23  ;;  %v3001_v27 = vsel %vm1182_vm6, %v2997_v24, %v7904_v13  ;;  %v2994_v24 = vsel %vm1173_vm3, %v2990_v61, %v8028_v4 }
 0x371   : > { %3480 = vrot.lane.b32.xlu2 %v8146_v58, %s6104_s28  ;;  %v8155_v48 = vpop.permute.xlu1 %2929  ;;  %2489 = vmatpush.msrb.mxu2 %v8160_v38  ;;  %v3005_v55 = vsel %vm1187_vm5, %v3001_v27, %v7766_v59  ;;  %v8201_v58 = vld [vmem:[%s10797_s3 + $0x10] sm:$0xff]  ;;  %v3323_v27 = vld [vmem:[#allocation2 + $0x138] sm:$0xff] }
 0x372   : > { %1295 = vmatmul.f32.gmra.mxu2 %v1271_v29  ;;  %v2942_v49 = vpop.permute.xlu0 %2941  ;;  %v3009_v32 = vsel %vm1192_vm7, %v3005_v55, %v7981_v31 }
 0x373   : > { %v8170_v23 = vpop.permute.xlu2 %2979  ;;  %2490 = vmatpush.msrb.mxu2 %v8175_v45  ;;  %v3013_v59 = vsel %vm754_vm1, %v3009_v32, %v8022_v25  ;;  %v2987_v25 = vsel %vm1163_vm2, %v7452_v39, %v7709_v6  ;;  %v8233_v32 = vld [vmem:[%s10797_s3] sm:$0xff] }
 0x375   : > { %v1262_v29 = vpop.f32.mrf.mxu1  ;;  %2491 = vmatpush.msrb.mxu2 %v8183_v2 }
 0x376   : > { %v8189_v13 = vsub.f32 %v7636_v8, %v1262_v29  ;;  %v2998_v8 = vsel %vm352_vm0, %v2994_v24, %v7857_v12  ;;  %v8216_v29 = vld [vmem:[%s10797_s3 + $0x8] sm:$0xff] }
 0x377   : > { %3470 = vrot.lane.b32.xlu1 %v3319_v30, %s10894_s25  ;;  %2492 = vmatpush.msrb.mxu2 %v8201_v58  ;;  %v3002_v55 = vsel %vm1182_vm6, %v2998_v8, %v7715_v56  ;;  %v3017_v30 = vsel %vm1201_vm8, %v3013_v59, %v7954_v14 }
 0x378   : > { %3482 = vrot.lane.b32.xlu0 %v8196_v37, %s6104_s28  ;;  %v1272_v31 = vmul.f32 %v8189_v13, %v8189_v13  ;;  %v3006_v39 = vsel %vm1187_vm5, %v3002_v55, %v7952_v7  ;;  %v3021_v6 = vsel %vm1206_vm9, %v3017_v30, %v8051_v26  ;;  %v8252_v7 = vld [vmem:[#allocation2 + $0x140] sm:$0xff] }
 0x379   : > { %3486 = vrot.lane.b32.xlu2 %v3323_v27, %s6104_s28  ;;  %v2944_v61 = vpop.permute.xlu1 %2943  ;;  %2493 = vmatpush.msrb.mxu2 %v8216_v29  ;;  %v2991_v27 = vsel %vm10883_vm4, %v2987_v25, %v7806_v42  ;;  %v3010_v56 = vsel %vm1192_vm7, %v3006_v39, %v8002_v57  ;;  %v3025_v14 = vsel %vm1211_vm10, %v3021_v6, %v8091_v52 }
 0x37a   : > { %1298 = vmatmul.f32.gmra.mxu2 %v1272_v31  ;;  %v8219_v12 = vpop.permute.xlu0 %2947  ;;  %v3322_v31 = vld [vmem:[#allocation2 + $0x130] sm:$0xff]  ;;  %v2995_v42 = vsel %vm1173_vm3, %v2991_v27, %v8016_v5  ;;  %v3014_v26 = vsel %vm754_vm1, %v3010_v56, %v7917_v20  ;;  %v3029_v57 = vsel %vm10909_vm11, %v3025_v14, %v8041_v21  ;;  %v11251_v56 = vld [vmem:[#allocation119_spill] sm:$0xff] }
 0x37b   : > { %v8228_v24 = vpop.permute.xlu2 %3356  ;;  %2494 = vmatpush.msrb.mxu2 %v8233_v32  ;;  %v3018_v5 = vsel %vm1201_vm8, %v3014_v26, %v8039_v63  ;;  %v3033_v25 = vsel %vm1221_vm12, %v3029_v57, %v2942_v49  ;;  %v2999_v21 = vsel %vm352_vm0, %v2995_v42, %v7665_v10  ;;  %v8296_v49 = vld [vmem:[%s10797_s3 + $0x70] sm:$0xff]  ;;  %v11253_v42 = vld [vmem:[#allocation34_spill] sm:$0xff]  ;;  %v11254_v57 = vld [vmem:[#allocation16_spill] sm:$0xff] }
 0x37c   : > { %v3022_v55 = vsel %vm1206_vm9, %v3018_v5, %v8066_v33  ;;  %v8357_v5 = vld [vmem:[%s10797_s3 + $0x50] sm:$0xff] }
 0x37d   : > { %v1856_v8 = vpop.f32.mrf.mxu1  ;;  %v3026_v33 = vsel %vm1211_vm10, %v3022_v55, %v8026_v0  ;;  %11255 = vst [vmem:[#allocation23_spill] sm:$0xff] %v8357_v5 }
 0x37e   : > { %v8247_v59 = vsub.f32 %v7685_v11, %v1856_v8  ;;  %v2988_v11 = vsel %vm1163_vm2, %v7657_v22, %v7753_v54  ;;  %v3003_v22 = vsel %vm1182_vm6, %v2999_v21, %v7913_v18  ;;  %v11252_v8 = vld [vmem:[#allocation57_spill] sm:$0xff]  ;;  %v11257_v21 = vld [vmem:[#allocation150_spill] sm:$0xff] }
 0x37f   : > { %3484 = vrot.lane.b32.xlu1 %v3322_v31, %s6104_s28  ;;  %v2992_v10 = vsel %vm10883_vm4, %v2988_v11, %v7608_v44  ;;  %v3007_v63 = vsel %vm1187_vm5, %v3003_v22, %v7978_v17  ;;  %v3030_v44 = vsel %vm10909_vm11, %v3026_v33, %v8122_v50  ;;  %v8373_v22 = vld [vmem:[%s10797_s3 + $0x48] sm:$0xff] }
 0x380   : > { %11249 = vst [vmem:[#allocation87_spill] sm:$0xff] %v8247_v59  ;;  %v1872_v52 = vmul.f32 %v8247_v59, %v8247_v59  ;;  %3496 = vrot.lane.b32.xlu0 %v8252_v7, %s6105_s12  ;;  %v2996_v0 = vsel %vm1173_vm3, %v2992_v10, %v8030_v40  ;;  %v3011_v39 = vsel %vm1192_vm7, %v3007_v63, %v7870_v46  ;;  %v11261_v10 = vld [vmem:[#allocation90_spill] sm:$0xff] }
 0x381   : > { %3500 = vrot.lane.b32.xlu2 %v7480_v41, %s6105_s12  ;;  %v2958_v20 = vpop.permute.xlu1 %2957  ;;  %v3034_v6 = vsel %vm1221_vm12, %v3030_v44, %v2944_v61  ;;  %v3000_v50 = vsel %vm352_vm0, %v2996_v0, %v7864_v19  ;;  %11260 = vst [vmem:[#allocation8_spill] sm:$0xff] %v8373_v22  ;;  %v11264_v0 = vld [vmem:[#allocation126_spill] sm:$0xff] }
 0x382   : > { %v3037_v30 = vsel %vm10872_vm13, %v3033_v25, %v2958_v20  ;;  %1892 = vmatmul.f32.vlgmr.msra.gmra.mxu2 %v1872_v52  ;;  %v8275_v27 = vpop.permute.xlu0 %2961  ;;  %v3004_v46 = vsel %vm1182_vm6, %v3000_v50, %v7947_v51  ;;  %v11256_v25 = vld [vmem:[#allocation85_spill] sm:$0xff] }
 0x383   : > { %v8279_v54 = vpop.permute.xlu2 %3370  ;;  %v8283_v41 = vsel %vm10871_vm14, %v3037_v30, %v8127_v34  ;;  %3082 = vmatpush.msra.mxu2 %v8075_v60  ;;  %v8305_v34 = vld [vmem:[#allocation2 + $0x148] sm:$0xff]  ;;  %v3008_v31 = vsel %vm1187_vm5, %v3004_v46, %v11252_v8  ;;  %v11259_v30 = vld [vmem:[#allocation101_spill] sm:$0xff] }
 0x384   : > { %3061 = vmatmul.f32.vlgmr.msra.gmra.mxu1 %v8283_v41  ;;  %v3012_v26 = vsel %vm1192_vm7, %v3008_v31, %v11253_v42  ;;  %v11270_v31 = vld [vmem:[#allocation6_spill] sm:$0xff] }
 0x385   : > { %v1859_v18 = vpop.f32.mrf.mxu1  ;;  %3083 = vmatpush.msra.mxu2 %v8296_v49  ;;  %4251 = vmatpush.msra.mxu1 %v8075_v60 }
 0x386   : > { %v8303_v17 = vsub.f32 %v7736_v35, %v1859_v18  ;;  %v3015_v35 = vsel %vm754_vm1, %v3011_v39, %v8024_v15  ;;  %v11263_v18 = vld [vmem:[#allocation140_spill] sm:$0xff] }
 0x387   : > { %3498 = vrot.lane.b32.xlu1 %v8305_v34, %s6105_s12  ;;  %3084 = vmatpush.msra.mxu2 %v8087_v53  ;;  %v3019_v61 = vsel %vm1201_vm8, %v3015_v35, %v8049_v47  ;;  %v8342_v47 = vld [vmem:[%s10797_s3 + $0x58] sm:$0xff] }
 0x388   : > { %11250 = vst [vmem:[#allocation91_spill] sm:$0xff] %v8303_v17  ;;  %3502 = vrot.lane.b32.xlu0 %v7527_v16, %s6105_s12  ;;  %v1873_v40 = vmul.f32 %v8303_v17, %v8303_v17  ;;  %4252 = vmatpush.msra.mxu1 %v8296_v49  ;;  %v3038_v16 = vsel %vm10872_vm13, %v3034_v6, %v8101_v43  ;;  %v11265_v6 = vld [vmem:[#allocation120_spill] sm:$0xff] }
 0x389   : > { %3514 = vrot.lane.b32.xlu2 %v11251_v56, %s6106_s13  ;;  %v2964_v19 = vpop.permute.xlu1 %2963  ;;  %3085 = vmatpush.msra.mxu2 %v8098_v1  ;;  %v3023_v43 = vsel %vm1206_vm9, %v3019_v61, %v8007_v62  ;;  %v3016_v62 = vsel %vm754_vm1, %v3012_v26, %v11256_v25  ;;  %v11272_v26 = vld [vmem:[#allocation3_spill] sm:$0xff]  ;;  %v11274_v25 = vld [vmem:[#allocation61_spill] sm:$0xff]  ;;  %v3896_v17 = vld [vmem:[#allocation2 + $0x48] sm:$0xff] }
 0x38a   : > { %1895 = vmatmul.f32.gmra.mxu2 %v1873_v40  ;;  %v2976_v15 = vpop.permute.xlu0 %2975  ;;  %4253 = vmatpush.msra.mxu1 %v8087_v53  ;;  %v3027_v52 = vsel %vm1211_vm10, %v3023_v43, %v11254_v57 }
 0x38b   : > { %v8334_v14 = vpop.permute.xlu2 %3384  ;;  %v8337_v51 = vsel %vm10871_vm14, %v3038_v16, %v2976_v15  ;;  %3086 = vmatpush.msra.mxu2 %v8342_v47  ;;  %v3031_v20 = vsel %vm10909_vm11, %v3027_v52, %v8155_v48  ;;  %v11262_v48 = vld [vmem:[#allocation12_spill] sm:$0xff]  ;;  %v8405_v15 = vld [vmem:[%s10797_s3 + $0x38] sm:$0xff]  ;;  %v8412_v16 = vld [vmem:[%s10797_s3 + $0x30] sm:$0xff] }
 0x38c   : > { %3064 = vmatmul.f32.gmra.mxu1 %v8337_v51  ;;  %v3020_v33 = vsel %vm1201_vm8, %v3016_v62, %v11262_v48  ;;  %v3035_v44 = vsel %vm1221_vm12, %v3031_v20, %v11263_v18  ;;  %11267 = vst [vmem:[#allocation124_spill] sm:$0xff] %v8405_v15  ;;  %v11273_v52 = vld [vmem:[#allocation107_spill] sm:$0xff] }
 0x38d   : > { %v1862_v11 = vpop.f32.mrf.mxu1  ;;  %3087 = vmatpush.msra.mxu2 %v8357_v5  ;;  %4254 = vmatpush.msra.mxu1 %v8098_v1  ;;  %v3024_v50 = vsel %vm1206_vm9, %v3020_v33, %v11265_v6  ;;  %v3039_v35 = vsel %vm10872_vm13, %v3035_v44, %v8275_v27  ;;  %11268 = vst [vmem:[#allocation76_spill] sm:$0xff] %v8412_v16  ;;  %v8455_v48 = vld [vmem:[#allocation2 + $0x1e0] sm:$0xff]  ;;  %v11280_v33 = vld [vmem:[#allocation145_spill] sm:$0xff] }
 0x38e   : > { %v8366_v55 = vsub.f32 %v11257_v21, %v1862_v11  ;;  %v3028_v46 = vsel %vm1211_vm10, %v3024_v50, %v8120_v36  ;;  %v11269_v36 = vld [vmem:[#allocation46_spill] sm:$0xff]  ;;  %v11281_v6 = vld [vmem:[#allocation27_spill] sm:$0xff] }
 0x38f   : > { %3512 = vrot.lane.b32.xlu1 %v11259_v30, %s6106_s13  ;;  %3088 = vmatpush.msra.mxu2 %v8373_v22  ;;  %v3032_v8 = vsel %vm10909_vm11, %v3028_v46, %v11269_v36  ;;  %v11277_v30 = vld [vmem:[#allocation113_spill] sm:$0xff]  ;;  %v8482_v46 = vld [vmem:[#allocation2 + $0x1e8] sm:$0xff]  ;;  %v11285_v36 = vld [vmem:[#allocation131_spill] sm:$0xff] }
 0x390   : > { %11258 = vst [vmem:[#allocation108_spill] sm:$0xff] %v8366_v55  ;;  %3516 = vrot.lane.b32.xlu0 %v11261_v10, %s6106_s13  ;;  %v1874_v63 = vmul.f32 %v8366_v55, %v8366_v55  ;;  %4255 = vmatpush.msra.mxu1 %v8342_v47  ;;  %v3036_v42 = vsel %vm1221_vm12, %v3032_v8, %v8219_v12  ;;  %v11307_v55 = vld [vmem:[#allocation7_spill] sm:$0xff] }
 0x391   : > { %3528 = vrot.lane.b32.xlu2 %v11264_v0, %s10886_s7  ;;  %v2978_v39 = vpop.permute.xlu1 %2977  ;;  %3089 = vmatpush.msra.mxu2 %v8132_v3  ;;  %v3040_v57 = vsel %vm10872_vm13, %v3036_v42, %v2964_v19  ;;  %11284 = vst [vmem:[#allocation99_spill] sm:$0xff] %v8482_v46 }
 0x392   : > { %1898 = vmatmul.f32.gmra.mxu2 %v1874_v63  ;;  %v8392_v40 = vpop.permute.xlu0 %3352  ;;  %4256 = vmatpush.msra.mxu1 %v8357_v5  ;;  %v8400_v56 = vsel %vm10871_vm14, %v3039_v35, %v2978_v39  ;;  %v8444_v20 = vsel %vm10871_vm14, %v3040_v57, %v8170_v23  ;;  %v11279_v63 = vld [vmem:[#allocation104_spill] sm:$0xff]  ;;  %v11283_v35 = vld [vmem:[#allocation41_spill] sm:$0xff] }
 0x393   : > { %v8397_v61 = vpop.permute.xlu2 %3390  ;;  %3090 = vmatpush.msra.mxu2 %v8405_v15  ;;  %11276 = vst [vmem:[#allocation81_spill] sm:$0xff] %v8444_v20  ;;  %v11287_v57 = vld [vmem:[#allocation69_spill] sm:$0xff] }
 0x394   : > { %11266 = vst [vmem:[#allocation20_spill] sm:$0xff] %v8397_v61  ;;  %3067 = vmatmul.f32.gmra.mxu1 %v8400_v56 }
 0x395   : > { %v1865_v27 = vpop.f32.mrf.mxu1  ;;  %3091 = vmatpush.msra.mxu2 %v8412_v16  ;;  %4257 = vmatpush.msra.mxu1 %v8373_v22 }
 0x396   : > { %v8419_v43 = vsub.f32 %v11270_v31, %v1865_v27 }
 0x397   : > { %3518 = vrot.lane.b32.xlu1 %v11272_v26, %s6106_s13  ;;  %3092 = vmatpush.msra.mxu2 %v8160_v38 }
 0x398   : > { %11271 = vst [vmem:[#allocation132_spill] sm:$0xff] %v8419_v43  ;;  %3530 = vrot.lane.b32.xlu0 %v11273_v52, %s10886_s7  ;;  %v1875_v11 = vmul.f32 %v8419_v43, %v8419_v43  ;;  %4258 = vmatpush.msra.mxu1 %v8132_v3 }
 0x399   : > { %3560 = vrot.lane.b32.xlu2 %v11274_v25, %s10884_s17  ;;  %v8434_v62 = vpop.permute.xlu1 %3354  ;;  %3093 = vmatpush.msra.mxu2 %v8175_v45  ;;  %v3887_v25 = vld [vmem:[#allocation2] sm:$0xff] }
 0x39a   : > { %1901 = vmatmul.f32.gmra.mxu2 %v1875_v11  ;;  %v8437_v12 = vpop.permute.xlu0 %3358  ;;  %4259 = vmatpush.msra.mxu1 %v8405_v15  ;;  %v11289_v11 = vld [vmem:[#allocation98_spill] sm:$0xff] }
 0x39b   : > { %11275 = vst [vmem:[#allocation53_spill] sm:$0xff] %v8437_v12  ;;  %v8440_v19 = vpop.permute.xlu2 %3404  ;;  %3094 = vmatpush.msra.mxu2 %v8183_v2 }
 0x39c   : > { %3070 = vmatmul.f32.gmra.mxu1 %v8444_v20 }
 0x39d   : > { %v2459_v21 = vpop.f32.mrf.mxu1  ;;  %3095 = vmatpush.msra.mxu2 %v8201_v58  ;;  %4260 = vmatpush.msra.mxu1 %v8412_v16 }
 0x39e   : > { %v8451_v10 = vsub.f32 %v11277_v30, %v2459_v21  ;;  %v11290_v21 = vld [vmem:[#allocation29_spill] sm:$0xff] }
 0x39f   : > { %3544 = vrot.lane.b32.xlu1 %v11279_v63, %s10851_s29  ;;  %3096 = vmatpush.msra.mxu2 %v8216_v29 }
 0x3a0   : > { %11278 = vst [vmem:[#allocation42_spill] sm:$0xff] %v8451_v10  ;;  %v2475_v23 = vmul.f32 %v8451_v10, %v8451_v10  ;;  %3576 = vrot.lane.b32.xlu0 %v8455_v48, %s6099_s19  ;;  %4261 = vmatpush.msra.mxu1 %v8160_v38  ;;  %v8627_v10 = vld [vmem:[%s10796_s2 + $0x28] sm:$0xff] }
 0x3a1   : > { %3562 = vrot.lane.b32.xlu2 %v11280_v33, %s10884_s17  ;;  %v8465_v18 = vpop.permute.xlu1 %3368  ;;  %3097 = vmatpush.msra.mxu2 %v8233_v32 }
 0x3a2   : > { %2495 = vmatmul.f32.vlgmr.msrb.gmra.mxu2 %v2475_v23  ;;  %v8468_v44 = vpop.permute.xlu0 %3372  ;;  %4262 = vmatpush.msra.mxu1 %v8175_v45 }
 0x3a3   : > { %v8471_v0 = vpop.permute.xlu2 %3418  ;;  %3685 = vmatpush.msrb.mxu2 %v8075_v60 }
 0x3a4   : > { %4263 = vmatpush.msra.mxu1 %v8183_v2 }
 0x3a5   : > { %v2462_v39 = vpop.f32.mrf.mxu1  ;;  %3686 = vmatpush.msrb.mxu2 %v8296_v49 }
 0x3a6   : > { %v8477_v50 = vsub.f32 %v11281_v6, %v2462_v39  ;;  %4264 = vmatpush.msra.mxu1 %v8201_v58  ;;  %v8523_v39 = vld [vmem:[%s10796_s2 + $0x78] sm:$0xff] }
 0x3a7   : > { %3546 = vrot.lane.b32.xlu1 %v11283_v35, %s10851_s29  ;;  %3687 = vmatpush.msrb.mxu2 %v8087_v53  ;;  %11292 = vst [vmem:[#allocation116_spill] sm:$0xff] %v8523_v39  ;;  %v11293_v35 = vld [vmem:[#allocation73_spill] sm:$0xff] }
 0x3a8   : > { %11282 = vst [vmem:[#allocation84_spill] sm:$0xff] %v8477_v50  ;;  %3578 = vrot.lane.b32.xlu0 %v8482_v46, %s6099_s19  ;;  %v2476_v27 = vmul.f32 %v8477_v50, %v8477_v50  ;;  %4265 = vmatpush.msra.mxu1 %v8216_v29 }
 0x3a9   : > { %3548 = vrot.lane.b32.xlu2 %v11285_v36, %s10851_s29  ;;  %v8492_v8 = vpop.permute.xlu1 %3374  ;;  %3688 = vmatpush.msrb.mxu2 %v8098_v1  ;;  %v3891_v36 = vld [vmem:[#allocation2 + $0x20] sm:$0xff] }
 0x3aa   : > { %11286 = vst [vmem:[#allocation21_spill] sm:$0xff] %v8492_v8  ;;  %2498 = vmatmul.f32.gmra.mxu2 %v2476_v27  ;;  %v8495_v31 = vpop.permute.xlu0 %3386  ;;  %4266 = vmatpush.msra.mxu1 %v8233_v32 }
 0x3ab   : > { %v8498_v42 = vpop.permute.xlu2 %3432  ;;  %3689 = vmatpush.msrb.mxu2 %v8342_v47  ;;  %1346 = vmatpush.msrb.mxu3 %v8523_v39 }
 0x3ad   : > { %v2465_v26 = vpop.f32.mrf.mxu1  ;;  %3690 = vmatpush.msrb.mxu2 %v8357_v5  ;;  %v3935_v5 = vld [vmem:[#allocation2 + $0x180] sm:$0xff] }
 0x3ae   : > { %v8503_v52 = vsub.f32 %v11287_v57, %v2465_v26  ;;  %v8535_v26 = vld [vmem:[%s10796_s2 + $0x70] sm:$0xff] }
 0x3af   : > { %3532 = vrot.lane.b32.xlu1 %v11289_v11, %s10886_s7  ;;  %3691 = vmatpush.msrb.mxu2 %v8373_v22  ;;  %11295 = vst [vmem:[#allocation77_spill] sm:$0xff] %v8535_v26 }
 0x3b0   : > { %11288 = vst [vmem:[#allocation111_spill] sm:$0xff] %v8503_v52  ;;  %3564 = vrot.lane.b32.xlu0 %v11290_v21, %s10884_s17  ;;  %v2477_v30 = vmul.f32 %v8503_v52, %v8503_v52  ;;  %1347 = vmatpush.msrb.mxu3 %v8535_v26 }
 0x3b1   : > { %3955 = vrot.lane.b32.xlu2 %v3887_v25, %s6099_s19  ;;  %v8513_v63 = vpop.permute.xlu1 %3388  ;;  %3692 = vmatpush.msrb.mxu2 %v8132_v3  ;;  %v3346_v3 = vld [vmem:[#allocation2 + $0x1f0] sm:$0xff] }
 0x3b2   : > { %2501 = vmatmul.f32.gmra.mxu2 %v2477_v30  ;;  %v8516_v23 = vpop.permute.xlu0 %3400  ;;  %v8568_v30 = vld [vmem:[%s10796_s2 + $0x58] sm:$0xff] }
 0x3b3   : > { %v8518_v33 = vpop.permute.xlu2 %3438  ;;  %3693 = vmatpush.msrb.mxu2 %v8405_v15  ;;  %11299 = vst [vmem:[#allocation78_spill] sm:$0xff] %v8568_v30  ;;  %v3931_v15 = vld [vmem:[#allocation2 + $0x160] sm:$0xff] }
 0x3b4   : > { %11291 = vst [vmem:[#allocation33_spill] sm:$0xff] %v8518_v33  ;;  %v11306_v33 = vld [vmem:[#allocation94_spill] sm:$0xff] }
 0x3b5   : > { %v2468_v6 = vpop.f32.mrf.mxu1  ;;  %3694 = vmatpush.msrb.mxu2 %v8412_v16 }
 0x3b6   : > { %v8529_v27 = vsub.f32 %v11293_v35, %v2468_v6  ;;  %v5998_v6 = vld [vmem:[#allocation2 + $0x198] sm:$0xff] }
 0x3b7   : > { %3580 = vrot.lane.b32.xlu1 %v3346_v3, %s6099_s19  ;;  %3695 = vmatpush.msrb.mxu2 %v8160_v38  ;;  %v8552_v38 = vld [vmem:[%s10796_s2 + $0x68] sm:$0xff] }
 0x3b8   : > { %11294 = vst [vmem:[#allocation28_spill] sm:$0xff] %v8529_v27  ;;  %3971 = vrot.lane.b32.xlu0 %v3891_v36, %s6098_s10  ;;  %v2478_v57 = vmul.f32 %v8529_v27, %v8529_v27  ;;  %1348 = vmatpush.msrb.mxu3 %v8552_v38  ;;  %v8589_v36 = vld [vmem:[%s10796_s2 + $0x48] sm:$0xff]  ;;  %v8616_v27 = vld [vmem:[%s10796_s2 + $0x30] sm:$0xff] }
 0x3b9   : > { %4003 = vrot.lane.b32.xlu2 %v8011_v28, %s6094_s26  ;;  %v8544_v11 = vpop.permute.xlu1 %3402  ;;  %3696 = vmatpush.msrb.mxu2 %v8175_v45  ;;  %11297 = vst [vmem:[#allocation56_spill] sm:$0xff] %v8552_v38  ;;  %v8560_v28 = vld [vmem:[%s10796_s2 + $0x60] sm:$0xff] }
 0x3ba   : > { %2504 = vmatmul.f32.gmra.mxu2 %v2478_v57  ;;  %v8547_v25 = vpop.permute.xlu0 %3406  ;;  %1349 = vmatpush.msrb.mxu3 %v8560_v28  ;;  %v3895_v45 = vld [vmem:[#allocation2 + $0x40] sm:$0xff] }
 0x3bb   : > { %11296 = vst [vmem:[#allocation146_spill] sm:$0xff] %v8547_v25  ;;  %v8554_v21 = vpop.permute.xlu2 %3452  ;;  %3697 = vmatpush.msrb.mxu2 %v8183_v2  ;;  %v8576_v2 = vld [vmem:[%s10796_s2 + $0x50] sm:$0xff] }
 0x3bc   : > { %11298 = vst [vmem:[#allocation63_spill] sm:$0xff] %v8554_v21  ;;  %1350 = vmatpush.msrb.mxu3 %v8568_v30  ;;  %v8651_v25 = vld [vmem:[%s10796_s2 + $0x10] sm:$0xff] }
 0x3bd   : > { %3698 = vmatpush.msrb.mxu2 %v8201_v58  ;;  %11300 = vst [vmem:[#allocation18_spill] sm:$0xff] %v8576_v2  ;;  %v11301_v58 = vld [vmem:[#allocation25_spill] sm:$0xff] }
 0x3be   : > { %1351 = vmatpush.msrb.mxu3 %v8576_v2 }
 0x3bf   : > { %3987 = vrot.lane.b32.xlu1 %v3895_v45, %s6096_s30  ;;  %3699 = vmatpush.msrb.mxu2 %v8216_v29  ;;  %v8598_v29 = vld [vmem:[%s10796_s2 + $0x40] sm:$0xff] }
 0x3c0   : > { %3534 = vrot.lane.b32.xlu0 %v5998_v6, %s10886_s7  ;;  %1352 = vmatpush.msrb.mxu3 %v8589_v36  ;;  %v8601_v45 = vld [vmem:[#allocation2 + $0x80] sm:$0xff]  ;;  %v8606_v6 = vld [vmem:[%s10796_s2 + $0x38] sm:$0xff] }
 0x3c1   : > { %3550 = vrot.lane.b32.xlu2 %v11301_v58, %s10851_s29  ;;  %v8581_v35 = vpop.permute.xlu1 %3416  ;;  %3700 = vmatpush.msrb.mxu2 %v8233_v32  ;;  %v3347_v32 = vld [vmem:[#allocation2 + $0x1f8] sm:$0xff]  ;;  %s11321_s29 = smov 72  }
 0x3c2   : > { %v8584_v3 = vpop.permute.xlu0 %3420  ;;  %1353 = vmatpush.msrb.mxu3 %v8598_v29  ;;  %v11304_v58 = vld [vmem:[#allocation66_spill] sm:$0xff] }
 0x3c3   : > { %11302 = vst [vmem:[#allocation92_spill] sm:$0xff] %v8584_v3  ;;  %v8592_v57 = vpop.permute.xlu2 %3466 }
 0x3c4   : > { %11303 = vst [vmem:[#allocation4_spill] sm:$0xff] %v8592_v57  ;;  %1354 = vmatpush.msrb.mxu3 %v8606_v6 }
 0x3c6   : > { %1355 = vmatpush.msrb.mxu3 %v8616_v27 }
 0x3c7   : > { %4019 = vrot.lane.b32.xlu1 %v8601_v45, %s11234_s8 }
 0x3c8   : > { %3566 = vrot.lane.b32.xlu0 %v11304_v58, %s10884_s17  ;;  %1356 = vmatpush.msrb.mxu3 %v8627_v10  ;;  %v8635_v58 = vld [vmem:[%s10796_s2 + $0x20] sm:$0xff] }
 0x3c9   : > { %3582 = vrot.lane.b32.xlu2 %v3347_v32, %s6099_s19  ;;  %v8619_v52 = vpop.permute.xlu1 %3422  ;;  %v8641_v32 = vld [vmem:[%s10796_s2 + $0x18] sm:$0xff] }
 0x3ca   : > { %11305 = vst [vmem:[#allocation102_spill] sm:$0xff] %v8619_v52  ;;  %v8622_v50 = vpop.permute.xlu0 %3434  ;;  %1357 = vmatpush.msrb.mxu3 %v8635_v58  ;;  %v3888_v52 = vld [vmem:[#allocation2 + $0x8] sm:$0xff] }
 0x3cb   : > { %v8629_v43 = vpop.permute.xlu2 %3480 }
 0x3cc   : > { %1358 = vmatpush.msrb.mxu3 %v8641_v32 }
 0x3ce   : > { %1359 = vmatpush.msrb.mxu3 %v8651_v25 }
 0x3cf   : > { %4035 = vrot.lane.b32.xlu1 %v11306_v33, %s6100_s27  ;;  %v8662_v33 = vld [vmem:[%s10796_s2 + $0x8] sm:$0xff] }
 0x3d0   : > { %4051 = vrot.lane.b32.xlu0 %v11307_v55, %s6101_s14  ;;  %1360 = vmatpush.msrb.mxu3 %v8662_v33  ;;  %v8670_v55 = vld [vmem:[%s10796_s2] sm:$0xff] }
 0x3d1   : > { %3957 = vrot.lane.b32.xlu2 %v3888_v52, %s6099_s19  ;;  %v8654_v61 = vpop.permute.xlu1 %3436  ;;  %v3892_v52 = vld [vmem:[#allocation2 + $0x28] sm:$0xff] }
 0x3d2   : > { %11308 = vst [vmem:[#allocation32_spill] sm:$0xff] %v8654_v61  ;;  %v8657_v12 = vpop.permute.xlu0 %3448  ;;  %1361 = vmatpush.msrb.mxu3 %v8670_v55 }
 0x3d3   : > { %v8664_v8 = vpop.permute.xlu2 %3486 }
 0x3d4   : > { %11309 = vst [vmem:[#allocation106_spill] sm:$0xff] %v8664_v8  ;;  %1949 = vmatpush.msra.mxu3 %v8523_v39 }
 0x3d6   : > { %1950 = vmatpush.msra.mxu3 %v8535_v26 }
 0x3d7   : > { %4067 = vrot.lane.b32.xlu1 %v8141_v9, %s6102_s9 }
 0x3d8   : > { %3973 = vrot.lane.b32.xlu0 %v3892_v52, %s6098_s10  ;;  %1951 = vmatpush.msra.mxu3 %v8552_v38  ;;  %v11312_v52 = vld [vmem:[#allocation50_spill] sm:$0xff] }
 0x3d9   : > { %3989 = vrot.lane.b32.xlu2 %v3896_v17, %s6096_s30  ;;  %v8679_v8 = vpop.permute.xlu1 %3450 }
 0x3da   : > { %v8681_v16 = vpop.permute.xlu0 %3454  ;;  %1952 = vmatpush.msra.mxu3 %v8560_v28 }
 0x3db   : > { %11310 = vst [vmem:[#allocation136_spill] sm:$0xff] %v8681_v16  ;;  %v8684_v46 = vpop.permute.xlu2 %3500 }
 0x3dc   : > { %11311 = vst [vmem:[#allocation44_spill] sm:$0xff] %v8684_v46  ;;  %1953 = vmatpush.msra.mxu3 %v8568_v30 }
 0x3de   : > { %v1290_v21 = vpop.f32.mrf.mxu2  ;;  %1954 = vmatpush.msra.mxu3 %v8576_v2 }
 0x3df   : > { %v1291_v9 = vadd.f32 1e-05, %v1290_v21  ;;  %4083 = vrot.lane.b32.xlu1 %v11312_v52, %s10894_s25  ;;  %v8703_v52 = vld [vmem:[#allocation2 + $0x88] sm:$0xff] }
 0x3e0   : > { %4099 = vrot.lane.b32.xlu0 %v8252_v7, %s6104_s28  ;;  %1955 = vmatpush.msra.mxu3 %v8589_v36 }
 0x3e1   : > { %5906 = vrsqrt.f32 %v1291_v9  ;;  %4115 = vrot.lane.b32.xlu2 %v3931_v15, %s6105_s12  ;;  %v8694_v17 = vpop.permute.xlu1 %3464  ;;  %v3939_v15 = vld [vmem:[#allocation2 + $0x1a0] sm:$0xff]  ;;  %vm1308_vm14 = vweird.f32 %v1291_v9 }
 0x3e2   : > { %v8696_v16 = vpop.permute.xlu0 %3468  ;;  %1956 = vmatpush.msra.mxu3 %v8598_v29 }
 0x3e3   : > { %11313 = vst [vmem:[#allocation148_spill] sm:$0xff] %v8696_v16  ;;  %v8699_v46 = vpop.permute.xlu2 %3514 }
 0x3e4   : > { %11314 = vst [vmem:[#allocation60_spill] sm:$0xff] %v8699_v46  ;;  %1957 = vmatpush.msra.mxu3 %v8606_v6 }
 0x3e6   : > { %1958 = vmatpush.msra.mxu3 %v8616_v27 }
 0x3e7   : > { %v5907_v21 = vpop.eup %5906  ;;  %4005 = vrot.lane.b32.xlu1 %v8028_v4, %s6094_s26 }
 0x3e8   : > { %v1303_v7 = vmul.f32 %v5907_v21, %v1291_v9  ;;  %4021 = vrot.lane.b32.xlu0 %v8703_v52, %s11234_s8  ;;  %1959 = vmatpush.msra.mxu3 %v8627_v10  ;;  %vm1309_vm15 = vweird.f32 %v5907_v21  ;;  %v11320_v9 = vld [vmem:[#allocation97_spill] sm:$0xff] }
 0x3e9   : > { %4147 = vrot.lane.b32.xlu2 %v3939_v15, %s10886_s7  ;;  %v8711_v16 = vpop.permute.xlu1 %3470  ;;  %vm1310_vm13 = vmor %vm1308_vm14, %vm1309_vm15 }
 0x3ea   : > { %11315 = vst [vmem:[#allocation43_spill] sm:$0xff] %v8711_v16  ;;  %v1304_v59 = vmul.f32 %v5907_v21, %v1303_v7  ;;  %v8713_v20 = vpop.permute.xlu0 %3482  ;;  %1960 = vmatpush.msra.mxu3 %v8635_v58  ;;  %v11317_v7 = vld [vmem:[#allocation67_spill] sm:$0xff] }
 0x3eb   : > { %11316 = vst [vmem:[#allocation9_spill] sm:$0xff] %v8713_v20  ;;  %v8716_v46 = vpop.permute.xlu2 %3528 }
 0x3ec   : > { %v1305_v61 = vmul.f32 0.5, %v1304_v59  ;;  %1961 = vmatpush.msra.mxu3 %v8641_v32  ;;  %v11318_v59 = vld [vmem:[#allocation38_spill] sm:$0xff] }
 0x3ed   : > { %v1293_v4 = vpop.f32.mrf.mxu2 }
 0x3ee   : > { %v1306_v22 = vsub.f32 1.5, %v1305_v61  ;;  %v1294_v3 = vadd.f32 1e-05, %v1293_v4  ;;  %1962 = vmatpush.msra.mxu3 %v8651_v25 }
 0x3ef   : > { %4131 = vrot.lane.b32.xlu1 %v3935_v5, %s6106_s13 }
 0x3f0   : > { %5908 = vrsqrt.f32 %v1294_v3  ;;  %4037 = vrot.lane.b32.xlu0 %v11317_v7, %s6100_s27  ;;  %v1307_v15 = vmul.f32 %v5907_v21, %v1306_v22  ;;  %1963 = vmatpush.msra.mxu3 %v8662_v33  ;;  %vm1318_vm14 = vweird.f32 %v1294_v3 }
 0x3f1   : > { %4053 = vrot.lane.b32.xlu2 %v11318_v59, %s6101_s14  ;;  %v8726_v16 = vpop.permute.xlu1 %3484  ;;  %v3943_v59 = vld [vmem:[#allocation2 + $0x1c0] sm:$0xff] }
 0x3f2   : > { %11319 = vst [vmem:[#allocation71_spill] sm:$0xff] %v8726_v16  ;;  %v8728_v61 = vpop.permute.xlu0 %3496  ;;  %v1311_v4 = vsel %vm1310_vm13, %v5907_v21, %v1307_v15  ;;  %1964 = vmatpush.msra.mxu3 %v8670_v55  ;;  %v3889_v21 = vld [vmem:[#allocation2 + $0x10] sm:$0xff] }
 0x3f3   : > { %v8731_v5 = vpop.permute.xlu2 %3560  ;;  %v1342_v20 = vmul.f32 %v1311_v4, %v11320_v9 }
 0x3f5   : > { %v1296_v22 = vpop.f32.mrf.mxu2  ;;  %1362 = vmatmul.f32.vlgmr.msrb.gmra.mxu3 %v1342_v20 }
 0x3f6   : > { %v5909_v7 = vpop.eup %5908  ;;  %v8735_v57 = vadd.f32 1e-05, %v1296_v22  ;;  %2552 = vmatpush.msrb.mxu3 %v8523_v39  ;;  %v3893_v39 = vld [vmem:[#allocation2 + $0x30] sm:$0xff] }
 0x3f7   : > { %v1313_v16 = vmul.f32 %v5909_v7, %v1294_v3  ;;  %4163 = vrot.lane.b32.xlu1 %v3943_v59, %s11321_s29  ;;  %v3588_v59 = vsel %vm1163_vm2, %v8392_v40, %v8465_v18  ;;  %vm1319_vm13 = vweird.f32 %v5909_v7 }
 0x3f8   : > { %5910 = vrsqrt.f32 %v8735_v57  ;;  %4179 = vrot.lane.b32.xlu0 %v8455_v48, %s10884_s17  ;;  %2553 = vmatpush.msrb.mxu3 %v8535_v26  ;;  %vm1320_vm15 = vmor %vm1318_vm14, %vm1319_vm13  ;;  %vm1328_vm14 = vweird.f32 %v8735_v57 }
 0x3f9   : > { %v1314_v15 = vmul.f32 %v5909_v7, %v1313_v16  ;;  %3959 = vrot.lane.b32.xlu2 %v3889_v21, %s6099_s19  ;;  %v8744_v20 = vpop.permute.xlu1 %3498 }
 0x3fa   : > { %v8746_v4 = vpop.permute.xlu0 %3502  ;;  %2554 = vmatpush.msrb.mxu3 %v8552_v38  ;;  %v11323_v38 = vld [vmem:[#allocation68_spill] sm:$0xff] }
 0x3fb   : > { %11322 = vst [vmem:[#allocation30_spill] sm:$0xff] %v8746_v4  ;;  %v1315_v9 = vmul.f32 0.5, %v1314_v15  ;;  %v8749_v22 = vpop.permute.xlu2 %3562  ;;  %v3592_v4 = vsel %vm10883_vm4, %v3588_v59, %v8334_v14 }
 0x3fc   : > { %2555 = vmatpush.msrb.mxu3 %v8560_v28  ;;  %v3596_v18 = vsel %vm1173_vm3, %v3592_v4, %v8516_v23  ;;  %v11324_v23 = vld [vmem:[#allocation144_spill] sm:$0xff] }
 0x3fd   : > { %v1299_v48 = vpop.f32.mrf.mxu2  ;;  %v1316_v26 = vsub.f32 1.5, %v1315_v9  ;;  %v3897_v9 = vld [vmem:[#allocation2 + $0x50] sm:$0xff] }
 0x3fe   : > { %v5911_v16 = vpop.eup %5910  ;;  %v8755_v21 = vadd.f32 1e-05, %v1299_v48  ;;  %2556 = vmatpush.msrb.mxu3 %v8568_v30 }
 0x3ff   : > { %v1323_v15 = vmul.f32 %v5911_v16, %v8735_v57  ;;  %4069 = vrot.lane.b32.xlu1 %v11323_v38, %s6102_s9  ;;  %v1317_v40 = vmul.f32 %v5909_v7, %v1316_v26  ;;  %vm1329_vm13 = vweird.f32 %v5911_v16 }
 0x400   : > { %5912 = vrsqrt.f32 %v8755_v21  ;;  %3975 = vrot.lane.b32.xlu0 %v3893_v39, %s6098_s10  ;;  %2557 = vmatpush.msrb.mxu3 %v8576_v2  ;;  %v3600_v39 = vsel %vm352_vm0, %v3596_v18, %v8601_v45 }
 0x401   : > { %v1324_v14 = vmul.f32 %v5911_v16, %v1323_v15  ;;  %3991 = vrot.lane.b32.xlu2 %v3897_v9, %s6096_s30  ;;  %v3062_v59 = vpop.f32.mrf.mxu1  ;;  %v3513_v48 = vpop.permute.xlu1 %3512  ;;  %v1321_v38 = vsel %vm1320_vm15, %v5909_v7, %v1317_v40  ;;  %v3604_v15 = vsel %vm1182_vm6, %v3600_v39, %v8581_v35  ;;  %vm1330_vm15 = vmor %vm1328_vm14, %vm1329_vm13  ;;  %vm1338_vm14 = vweird.f32 %v8755_v21 }
 0x402   : > { %v8770_v26 = vsub.f32 %v8283_v41, %v3062_v59  ;;  %v8772_v3 = vpop.permute.xlu0 %3516  ;;  %v1343_v4 = vmul.f32 %v1321_v38, %v11324_v23  ;;  %2558 = vmatpush.msrb.mxu3 %v8589_v36  ;;  %v3589_v41 = vsel %vm1163_vm2, %v8434_v62, %v8279_v54  ;;  %v3608_v35 = vsel %vm1187_vm5, %v3604_v15, %v8498_v42  ;;  %v3932_v42 = vld [vmem:[#allocation2 + $0x168] sm:$0xff]  ;;  %v11325_v23 = vld [vmem:[#allocation79_spill] sm:$0xff] }
 0x403   : > { %v1325_v30 = vmul.f32 0.5, %v1324_v14  ;;  %v8778_v2 = vpop.permute.xlu2 %3548  ;;  %v3593_v18 = vsel %vm10883_vm4, %v3589_v41, %v8495_v31  ;;  %v3612_v31 = vsel %vm1192_vm7, %v3608_v35, %v8657_v12 }
 0x404   : > { %v3078_v7 = vmul.f32 %v8770_v26, %v8770_v26  ;;  %1365 = vmatmul.f32.gmra.mxu3 %v1343_v4  ;;  %v3597_v62 = vsel %vm1173_vm3, %v3593_v18, %v8544_v11  ;;  %v3302_v18 = vld [vmem:[#allocation2 + $0x90] sm:$0xff] }
 0x405   : > { %v1893_v40 = vpop.f32.mrf.mxu2  ;;  %v1326_v9 = vsub.f32 1.5, %v1325_v30  ;;  %2559 = vmatpush.msrb.mxu3 %v8598_v29 }
 0x406   : > { %v8788_v45 = vpop.eup %5912  ;;  %v8792_v14 = vadd.f32 1e-05, %v1893_v40  ;;  %3098 = vmatmul.f32.vlgmr.msra.gmra.mxu2 %v3078_v7 }
 0x407   : > { %v1333_v59 = vmul.f32 %v8788_v45, %v8755_v21  ;;  %4085 = vrot.lane.b32.xlu1 %v8196_v37, %s10894_s25  ;;  %v1327_v54 = vmul.f32 %v5911_v16, %v1326_v9  ;;  %2560 = vmatpush.msrb.mxu3 %v8606_v6  ;;  %v3616_v37 = vsel %vm754_vm1, %v3612_v31, %v8694_v17  ;;  %vm1339_vm13 = vweird.f32 %v8788_v45 }
 0x408   : > { %5914 = vrsqrt.f32 %v8792_v14  ;;  %4101 = vrot.lane.b32.xlu0 %v8305_v34, %s6104_s28  ;;  %4288 = vmatpush.msra.mxu2 %v8075_v60  ;;  %v3601_v17 = vsel %vm352_vm0, %v3597_v62, %v8703_v52 }
 0x409   : > { %v1334_v30 = vmul.f32 %v8788_v45, %v1333_v59  ;;  %4117 = vrot.lane.b32.xlu2 %v3932_v42, %s6105_s12  ;;  %v8815_v11 = vpop.permute.xlu1 %3518  ;;  %v3065_v12 = vpop.f32.mrf.mxu1  ;;  %v1331_v57 = vsel %vm1330_vm15, %v5911_v16, %v1327_v54  ;;  %2561 = vmatpush.msrb.mxu3 %v8616_v27  ;;  %v3620_v16 = vsel %vm1201_vm8, %v3616_v37, %v8629_v43  ;;  %vm1340_vm15 = vmor %vm1338_vm14, %vm1339_vm13  ;;  %vm11327_vm13 = vcmask 916480  }
 0x40a   : > { %v8819_v38 = vsub.f32 %v8337_v51, %v3065_v12  ;;  %v8821_v34 = vpop.permute.xlu0 %3530  ;;  %v1344_v60 = vmul.f32 %v1331_v57, %v11325_v23  ;;  %4289 = vmatpush.msra.mxu2 %v8296_v49  ;;  %v3624_v15 = vsel %vm1206_vm9, %v3620_v16, %v8728_v61  ;;  %v3590_v43 = vsel %vm1163_vm2, %v8228_v24, %v8468_v44  ;;  %v3901_v61 = vld [vmem:[#allocation2 + $0x70] sm:$0xff] }
 0x40b   : > { %v1335_v4 = vmul.f32 0.5, %v1334_v30  ;;  %v8827_v39 = vpop.permute.xlu2 %3955  ;;  %2562 = vmatpush.msrb.mxu3 %v8627_v10  ;;  %v3605_v40 = vsel %vm1182_vm6, %v3601_v17, %v8471_v0  ;;  %v3594_v44 = vsel %vm10883_vm4, %v3590_v43, %v8513_v63  ;;  %vm11329_vm14 = vcmask 982016  }
 0x40c   : > { %1368 = vmatmul.f32.gmra.mxu3 %v1344_v60  ;;  %v3079_v51 = vmul.f32 %v8819_v38, %v8819_v38  ;;  %4290 = vmatpush.msra.mxu2 %v8087_v53  ;;  %v3628_v53 = vsel %vm1211_vm10, %v3624_v15, %v3513_v48  ;;  %v3609_v35 = vsel %vm1187_vm5, %v3605_v40, %v8622_v50  ;;  %v3940_v50 = vld [vmem:[#allocation2 + $0x1a8] sm:$0xff]  ;;  %v11330_v60 = vld [vmem:[#allocation23_spill] sm:$0xff] }
 0x40d   : > { %v1896_v7 = vpop.f32.mrf.mxu2  ;;  %v1336_v41 = vsub.f32 1.5, %v1335_v4  ;;  %2563 = vmatpush.msrb.mxu3 %v8635_v58  ;;  %v3613_v0 = vsel %vm1192_vm7, %v3609_v35, %v8679_v8  ;;  %v3632_v63 = vsel %vm10909_vm11, %v3628_v53, %v8716_v46  ;;  %v3598_v37 = vsel %vm1173_vm3, %v3594_v44, %v8440_v19  ;;  %v11326_v46 = vld [vmem:[#allocation4_spill] sm:$0xff] }
 0x40e   : > { %v8839_v52 = vpop.eup %5914  ;;  %v8847_v9 = vadd.f32 1e-05, %v1896_v7  ;;  %3101 = vmatmul.f32.gmra.mxu2 %v3079_v51  ;;  %v3617_v30 = vsel %vm754_vm1, %v3613_v0, %v11326_v46  ;;  %v3602_v51 = vsel %vm352_vm0, %v3598_v37, %v3302_v18  ;;  %v3936_v7 = vld [vmem:[#allocation2 + $0x188] sm:$0xff]  ;;  %v3917_v0 = vld [vmem:[#allocation2 + $0xf0] sm:$0xff] }
 0x40f   : > { %v1906_v59 = vmul.f32 %v8839_v52, %v8792_v14  ;;  %4007 = vrot.lane.b32.xlu1 %v3901_v61, %s6094_s26  ;;  %v1337_v24 = vmul.f32 %v8788_v45, %v1336_v41  ;;  %2564 = vmatpush.msrb.mxu3 %v8641_v32  ;;  %v11331_v41 = vld [vmem:[#allocation92_spill] sm:$0xff]  ;;  %v3913_v61 = vld [vmem:[#allocation2 + $0xd0] sm:$0xff] }
 0x410   : > { %5916 = vrsqrt.f32 %v8847_v9  ;;  %4023 = vrot.lane.b32.xlu0 %v3302_v18, %s11234_s8  ;;  %4291 = vmatpush.msra.mxu2 %v8098_v1  ;;  %v3606_v43 = vsel %vm1182_vm6, %v3602_v51, %v11331_v41  ;;  %v11332_v18 = vld [vmem:[#allocation8_spill] sm:$0xff] }
 0x411   : > { %v1907_v21 = vmul.f32 %v8839_v52, %v1906_v59  ;;  %4149 = vrot.lane.b32.xlu2 %v3940_v50, %s10886_s7  ;;  %v3545_v48 = vpop.permute.xlu1 %3544  ;;  %v3068_v54 = vpop.f32.mrf.mxu1  ;;  %v1341_v8 = vsel %vm1340_vm15, %v8788_v45, %v1337_v24  ;;  %2565 = vmatpush.msrb.mxu3 %v8651_v25  ;;  %vm1912_vm15 = vweird.f32 %v8839_v52  ;;  %v11333_v35 = vld [vmem:[#allocation32_spill] sm:$0xff] }
 0x412   : > { %v3636_v62 = vsel %vm1221_vm12, %v3632_v63, %v3545_v48  ;;  %v8874_v31 = vsub.f32 %v8400_v56, %v3068_v54  ;;  %v3577_v42 = vpop.permute.xlu0 %3576  ;;  %v1345_v1 = vmul.f32 %v1341_v8, %v8189_v13  ;;  %4292 = vmatpush.msra.mxu2 %v8342_v47  ;;  %v11328_v56 = vld [vmem:[#allocation9_spill] sm:$0xff]  ;;  %v3610_v59 = vsel %vm1187_vm5, %v3606_v43, %v11333_v35  ;;  %v11336_v44 = vld [vmem:[#allocation60_spill] sm:$0xff]  ;;  %v8942_v8 = vld [vmem:[%s10797_s3 + $0x40] sm:$0xff] }
 0x413   : > { %v1908_v12 = vmul.f32 0.5, %v1907_v21  ;;  %v8882_v45 = vpop.permute.xlu2 %4003  ;;  %v3640_v57 = vsel %vm11327_vm13, %v3636_v62, %v8731_v5  ;;  %2566 = vmatpush.msrb.mxu3 %v8662_v33  ;;  %v3621_v23 = vsel %vm1201_vm8, %v3617_v30, %v11328_v56  ;;  %vm1911_vm13 = vweird.f32 %v8792_v14  ;;  %v8953_v46 = vld [vmem:[%s10797_s3 + $0x68] sm:$0xff]  ;;  %v11341_v56 = vld [vmem:[#allocation63_spill] sm:$0xff] }
 0x414   : > { %v8890_v13 = vsel %vm11329_vm14, %v3640_v57, %v3577_v42  ;;  %1371 = vmatmul.f32.gmra.mxu3 %v1345_v1  ;;  %v3080_v19 = vmul.f32 %v8874_v31, %v8874_v31  ;;  %4293 = vmatpush.msra.mxu2 %v11330_v60  ;;  %v3625_v17 = vsel %vm1206_vm9, %v3621_v23, %v8744_v20  ;;  %v8908_v20 = vld [vmem:[%s10797_s3 + $0x78] sm:$0xff]  ;;  %vm8923_vm14 = vmor %vm1911_vm13, %vm1912_vm15  ;;  %v11338_v1 = vld [vmem:[#allocation87_spill] sm:$0xff]  ;;  %vm11339_vm15 = vcmask 916480  }
 0x415   : > { %v1909_v4 = vsub.f32 1.5, %v1908_v12  ;;  %v1899_v5 = vpop.f32.mrf.mxu2  ;;  %3664 = vmatmul.f32.vlgmr.msrb.gmra.mxu1 %v8890_v13  ;;  %2567 = vmatpush.msrb.mxu3 %v8670_v55  ;;  %v3629_v14 = vsel %vm1211_vm10, %v3625_v17, %v11336_v44  ;;  %v11340_v57 = vld [vmem:[#allocation124_spill] sm:$0xff]  ;;  %v3614_v23 = vsel %vm1192_vm7, %v3610_v59, %v11341_v56  ;;  %vm11342_vm13 = vcmask 982016   ;;  %v11346_v44 = vld [vmem:[#allocation77_spill] sm:$0xff] }
 0x416   : > { %v8900_v16 = vpop.eup %5916  ;;  %v8903_v15 = vadd.f32 1e-05, %v1899_v5  ;;  %3104 = vmatmul.f32.gmra.mxu2 %v3080_v19  ;;  %4854 = vmatpush.msrb.mxu1 %v8908_v20  ;;  %v3633_v50 = vsel %vm10909_vm11, %v3629_v14, %v8821_v34  ;;  %v11337_v34 = vld [vmem:[#allocation81_spill] sm:$0xff]  ;;  %v11344_v41 = vld [vmem:[#allocation116_spill] sm:$0xff]  ;;  %v3890_v14 = vld [vmem:[#allocation2 + $0x18] sm:$0xff] }
 0x417   : > { %v1910_v40 = vmul.f32 %v8839_v52, %v1909_v4  ;;  %v1916_v53 = vmul.f32 %v8900_v16, %v8847_v9  ;;  %4133 = vrot.lane.b32.xlu1 %v3936_v7, %s6106_s13  ;;  %4294 = vmatpush.msra.mxu2 %v11332_v18  ;;  %v8971_v4 = vld [vmem:[%s10797_s3 + $0x60] sm:$0xff]  ;;  %v3944_v35 = vld [vmem:[#allocation2 + $0x1c8] sm:$0xff]  ;;  %v11353_v56 = vld [vmem:[#allocation53_spill] sm:$0xff] }
 0x418   : > { %5918 = vrsqrt.f32 %v8903_v15  ;;  %4039 = vrot.lane.b32.xlu0 %v3913_v61, %s6100_s27  ;;  %4855 = vmatpush.msrb.mxu1 %v8296_v49 }
 0x419   : > { %v1917_v21 = vmul.f32 %v8900_v16, %v1916_v53  ;;  %4055 = vrot.lane.b32.xlu2 %v3917_v0, %s6101_s14  ;;  %v3547_v63 = vpop.permute.xlu1 %3546  ;;  %v3071_v48 = vpop.f32.mrf.mxu1  ;;  %v1914_v54 = vsel %vm8923_vm14, %v8839_v52, %v1910_v40  ;;  %4295 = vmatpush.msra.mxu2 %v8942_v8  ;;  %vm1922_vm14 = vweird.f32 %v8900_v16  ;;  %v11345_v40 = vld [vmem:[#allocation71_spill] sm:$0xff] }
 0x41a   : > { %v3637_v49 = vsel %vm1221_vm12, %v3633_v50, %v3547_v63  ;;  %v8947_v62 = vsub.f32 %v11337_v34, %v3071_v48  ;;  %v3579_v42 = vpop.permute.xlu0 %3578  ;;  %v1945_v37 = vmul.f32 %v1914_v54, %v11338_v1  ;;  %4856 = vmatpush.msrb.mxu1 %v8953_v46  ;;  %v11347_v0 = vld [vmem:[#allocation99_spill] sm:$0xff]  ;;  %v11349_v50 = vld [vmem:[#allocation44_spill] sm:$0xff] }
 0x41b   : > { %v1918_v52 = vmul.f32 0.5, %v1917_v21  ;;  %v8956_v30 = vpop.permute.xlu2 %3550  ;;  %v3641_v12 = vsel %vm11339_vm15, %v3637_v49, %v8749_v22  ;;  %4296 = vmatpush.msra.mxu2 %v11340_v57  ;;  %v11343_v22 = vld [vmem:[#allocation148_spill] sm:$0xff]  ;;  %vm1921_vm15 = vweird.f32 %v8847_v9 }
 0x41c   : > { %1965 = vmatmul.f32.vlgmr.msra.gmra.mxu3 %v1945_v37  ;;  %v8964_v19 = vsel %vm11342_vm13, %v3641_v12, %v3579_v42  ;;  %v3081_v17 = vmul.f32 %v8947_v62, %v8947_v62  ;;  %4857 = vmatpush.msrb.mxu1 %v8971_v4  ;;  %v3618_v5 = vsel %vm754_vm1, %v3614_v23, %v11343_v22  ;;  %vm1923_vm13 = vmor %vm1921_vm15, %vm1922_vm14  ;;  %v11350_v54 = vld [vmem:[#allocation56_spill] sm:$0xff]  ;;  %v11351_v42 = vld [vmem:[#allocation91_spill] sm:$0xff]  ;;  %vm1931_vm15 = vweird.f32 %v8903_v15 }
 0x41d   : > { %v1902_v51 = vpop.f32.mrf.mxu2  ;;  %3667 = vmatmul.f32.gmra.mxu1 %v8964_v19  ;;  %v1919_v7 = vsub.f32 1.5, %v1918_v52  ;;  %3155 = vmatpush.msra.mxu3 %v11344_v41  ;;  %v3622_v53 = vsel %vm1201_vm8, %v3618_v5, %v11345_v40  ;;  %v9010_v37 = vld [vmem:[%s10797_s3 + $0x28] sm:$0xff]  ;;  %v11354_v5 = vld [vmem:[#allocation78_spill] sm:$0xff] }
 0x41e   : > { %v8979_v43 = vpop.eup %5918  ;;  %v8983_v61 = vadd.f32 1e-05, %v1902_v51  ;;  %3107 = vmatmul.f32.gmra.mxu2 %v3081_v17  ;;  %4858 = vmatpush.msrb.mxu1 %v8342_v47  ;;  %v11348_v47 = vld [vmem:[#allocation76_spill] sm:$0xff]  ;;  %v3626_v21 = vsel %vm1206_vm9, %v3622_v53, %v11349_v50  ;;  %v9024_v17 = vld [vmem:[%s10797_s3 + $0x20] sm:$0xff]  ;;  %v3921_v53 = vld [vmem:[#allocation2 + $0x110] sm:$0xff] }
 0x41f   : > { %v1926_v59 = vmul.f32 %v8979_v43, %v8903_v15  ;;  %4165 = vrot.lane.b32.xlu1 %v3944_v35, %s11321_s29  ;;  %v1920_v24 = vmul.f32 %v8900_v16, %v1919_v7  ;;  %3156 = vmatpush.msra.mxu3 %v11346_v44  ;;  %v3630_v49 = vsel %vm1211_vm10, %v3626_v21, %v8772_v3  ;;  %v11352_v3 = vld [vmem:[#allocation21_spill] sm:$0xff]  ;;  %vm1932_vm14 = vweird.f32 %v8979_v43  ;;  %v9039_v35 = vld [vmem:[%s10797_s3 + $0x18] sm:$0xff] }
 0x420   : > { %5920 = vrsqrt.f32 %v8983_v61  ;;  %4181 = vrot.lane.b32.xlu0 %v11347_v0, %s10884_s17  ;;  %4297 = vmatpush.msra.mxu2 %v11348_v47  ;;  %v3591_v23 = vsel %vm1163_vm2, %v11353_v56, %v11352_v3  ;;  %v11356_v0 = vld [vmem:[#allocation18_spill] sm:$0xff]  ;;  %v11360_v3 = vld [vmem:[#allocation108_spill] sm:$0xff] }
 0x421   : > { %v1927_v63 = vmul.f32 %v8979_v43, %v1926_v59  ;;  %3961 = vrot.lane.b32.xlu2 %v3890_v14, %s6099_s19  ;;  %v3533_v9 = vpop.permute.xlu1 %3532  ;;  %v1924_v48 = vsel %vm1923_vm13, %v8900_v16, %v1920_v24  ;;  %3157 = vmatpush.msra.mxu3 %v11350_v54  ;;  %v11355_v59 = vld [vmem:[#allocation20_spill] sm:$0xff]  ;;  %v3894_v14 = vld [vmem:[#allocation2 + $0x38] sm:$0xff]  ;;  %vm1933_vm13 = vmor %vm1931_vm15, %vm1932_vm14  ;;  %vm11359_vm14 = vcmask 982016   ;;  %vm1941_vm15 = vweird.f32 %v8983_v61 }
 0x422   : > { %v3565_v34 = vpop.permute.xlu0 %3564  ;;  %v1946_v1 = vmul.f32 %v1924_v48, %v11351_v42  ;;  %4298 = vmatpush.msra.mxu2 %v9010_v37  ;;  %4859 = vmatpush.msrb.mxu1 %v11330_v60  ;;  %v3634_v16 = vsel %vm10909_vm11, %v3630_v49, %v3533_v9  ;;  %v3595_v24 = vsel %vm10883_vm4, %v3591_v23, %v11355_v59  ;;  %v11357_v50 = vld [vmem:[#allocation146_spill] sm:$0xff]  ;;  %v9059_v9 = vld [vmem:[%s10797_s3 + $0x10] sm:$0xff]  ;;  %vm11358_vm4 = vcmask 916480  }
 0x423   : > { %v1928_v52 = vmul.f32 0.5, %v1927_v63  ;;  %v9015_v12 = vpop.permute.xlu2 %3582  ;;  %3158 = vmatpush.msra.mxu3 %v8560_v28  ;;  %v3638_v7 = vsel %vm1221_vm12, %v3634_v16, %v8778_v2  ;;  %v3599_v21 = vsel %vm1173_vm3, %v3595_v24, %v11357_v50  ;;  %v3898_v63 = vld [vmem:[#allocation2 + $0x58] sm:$0xff]  ;;  %v11362_v50 = vld [vmem:[#allocation33_spill] sm:$0xff] }
 0x424   : > { %1968 = vmatmul.f32.gmra.mxu3 %v1946_v1  ;;  %4299 = vmatpush.msra.mxu2 %v9024_v17  ;;  %v3642_v48 = vsel %vm11358_vm4, %v3638_v7, %v3565_v34  ;;  %v9067_v1 = vld [vmem:[#allocation2 + $0x98] sm:$0xff]  ;;  %v9078_v34 = vld [vmem:[%s10797_s3 + $0x8] sm:$0xff] }
 0x425   : > { %v2496_v60 = vpop.f32.mrf.mxu2  ;;  %v1929_v22 = vsub.f32 1.5, %v1928_v52  ;;  %3159 = vmatpush.msra.mxu3 %v11354_v5  ;;  %4860 = vmatpush.msrb.mxu1 %v11332_v18 }
 0x426   : > { %v9030_v51 = vpop.eup %5920  ;;  %v9034_v40 = vadd.f32 1e-05, %v2496_v60  ;;  %4300 = vmatpush.msra.mxu2 %v9039_v35 }
 0x427   : > { %v1936_v18 = vmul.f32 %v9030_v51, %v8983_v61  ;;  %4071 = vrot.lane.b32.xlu1 %v3921_v53, %s6102_s9  ;;  %v1930_v2 = vmul.f32 %v8979_v43, %v1929_v22  ;;  %3160 = vmatpush.msra.mxu3 %v11356_v0  ;;  %v11361_v22 = vld [vmem:[#allocation102_spill] sm:$0xff]  ;;  %v9093_v53 = vld [vmem:[%s10797_s3] sm:$0xff]  ;;  %vm1942_vm4 = vweird.f32 %v9030_v51 }
 0x428   : > { %5922 = vrsqrt.f32 %v9034_v40  ;;  %3977 = vrot.lane.b32.xlu0 %v3894_v14, %s6098_s10  ;;  %4301 = vmatpush.msra.mxu2 %v9059_v9 }
 0x429   : > { %v1937_v15 = vmul.f32 %v9030_v51, %v1936_v18  ;;  %3993 = vrot.lane.b32.xlu2 %v3898_v63, %s6096_s30  ;;  %v3581_v49 = vpop.permute.xlu1 %3580  ;;  %v1934_v42 = vsel %vm1933_vm13, %v8979_v43, %v1930_v2  ;;  %3161 = vmatpush.msra.mxu3 %v8589_v36  ;;  %v3603_v43 = vsel %vm352_vm0, %v3599_v21, %v9067_v1  ;;  %v3925_v2 = vld [vmem:[#allocation2 + $0x130] sm:$0xff]  ;;  %vm1943_vm13 = vmor %vm1941_vm15, %vm1942_vm4  ;;  %vm2514_vm4 = vweird.f32 %v9034_v40 }
 0x42a   : > { %v9069_v52 = vpop.permute.xlu0 %3971  ;;  %v9072_v16 = vsel %vm11359_vm14, %v3642_v48, %v3581_v49  ;;  %v1947_v56 = vmul.f32 %v1934_v42, %v11360_v3  ;;  %4302 = vmatpush.msra.mxu2 %v9078_v34  ;;  %4861 = vmatpush.msrb.mxu1 %v8942_v8  ;;  %v3607_v7 = vsel %vm1182_vm6, %v3603_v43, %v11361_v22  ;;  %v11363_v49 = vld [vmem:[#allocation136_spill] sm:$0xff]  ;;  %v3933_v42 = vld [vmem:[#allocation2 + $0x170] sm:$0xff]  ;;  %v11364_v3 = vld [vmem:[#allocation43_spill] sm:$0xff] }
 0x42b   : > { %v1938_v23 = vmul.f32 0.5, %v1937_v15  ;;  %v9084_v60 = vpop.permute.xlu2 %3957  ;;  %3670 = vmatmul.f32.gmra.mxu1 %v9072_v16  ;;  %3162 = vmatpush.msra.mxu3 %v8598_v29  ;;  %v3611_v21 = vsel %vm1187_vm5, %v3607_v7, %v11362_v50  ;;  %v3929_v15 = vld [vmem:[#allocation2 + $0x150] sm:$0xff]  ;;  %v11365_v7 = vld [vmem:[#allocation132_spill] sm:$0xff] }
 0x42c   : > { %1971 = vmatmul.f32.gmra.mxu3 %v1947_v56  ;;  %4303 = vmatpush.msra.mxu2 %v9093_v53 }
 0x42d   : > { %v2499_v59 = vpop.f32.mrf.mxu2  ;;  %v1939_v24 = vsub.f32 1.5, %v1938_v23  ;;  %3163 = vmatpush.msra.mxu3 %v8606_v6  ;;  %4862 = vmatpush.msrb.mxu1 %v11340_v57  ;;  %v3615_v57 = vsel %vm1192_vm7, %v3611_v21, %v11363_v49  ;;  %v11367_v21 = vld [vmem:[#allocation30_spill] sm:$0xff] }
 0x42e   : > { %v5923_v18 = vpop.eup %5922  ;;  %v9099_v14 = vadd.f32 1e-05, %v2499_v59  ;;  %v3619_v56 = vsel %vm754_vm1, %v3615_v57, %v11364_v3 }
 0x42f   : > { %v2509_v63 = vmul.f32 %v5923_v18, %v9034_v40  ;;  %4087 = vrot.lane.b32.xlu1 %v3925_v2, %s10894_s25  ;;  %v1940_v48 = vmul.f32 %v9030_v51, %v1939_v24  ;;  %3164 = vmatpush.msra.mxu3 %v8616_v27  ;;  %vm2515_vm14 = vweird.f32 %v5923_v18 }
 0x430   : > { %5924 = vrsqrt.f32 %v9099_v14  ;;  %4103 = vrot.lane.b32.xlu0 %v3929_v15, %s6104_s28  ;;  %4863 = vmatpush.msrb.mxu1 %v11348_v47  ;;  %v11366_v47 = vld [vmem:[#allocation106_spill] sm:$0xff]  ;;  %vm2516_vm15 = vmor %vm2514_vm4, %vm2515_vm14  ;;  %vm11370_vm14 = vcmask 982016  }
 0x431   : > { %v2510_v43 = vmul.f32 %v5923_v18, %v2509_v63  ;;  %4119 = vrot.lane.b32.xlu2 %v3933_v42, %s6105_s12  ;;  %v9118_v61 = vpop.permute.xlu1 %3987  ;;  %v1944_v23 = vsel %vm1943_vm13, %v9030_v51, %v1940_v48  ;;  %3165 = vmatpush.msra.mxu3 %v8627_v10  ;;  %v3623_v50 = vsel %vm1201_vm8, %v3619_v56, %v11366_v47  ;;  %v3902_v42 = vld [vmem:[#allocation2 + $0x78] sm:$0xff]  ;;  %vm11369_vm13 = vcmask 916480  }
 0x432   : > { %v3535_v22 = vpop.permute.xlu0 %3534  ;;  %v1948_v59 = vmul.f32 %v1944_v23, %v11365_v7  ;;  %4864 = vmatpush.msrb.mxu1 %v9010_v37  ;;  %v3627_v51 = vsel %vm1206_vm9, %v3623_v50, %v11367_v21 }
 0x433   : > { %v2511_v24 = vmul.f32 0.5, %v2510_v43  ;;  %v9124_v2 = vpop.permute.xlu2 %3989  ;;  %3166 = vmatpush.msra.mxu3 %v8635_v58  ;;  %v3631_v49 = vsel %vm1211_vm10, %v3627_v51, %v8815_v11  ;;  %v3941_v11 = vld [vmem:[#allocation2 + $0x1b0] sm:$0xff] }
 0x434   : > { %1974 = vmatmul.f32.gmra.mxu3 %v1948_v59  ;;  %4865 = vmatpush.msrb.mxu1 %v9024_v17  ;;  %v3635_v43 = vsel %vm10909_vm11, %v3631_v49, %v3535_v22  ;;  %v3937_v49 = vld [vmem:[#allocation2 + $0x190] sm:$0xff] }
 0x435   : > { %v2512_v63 = vsub.f32 1.5, %v2511_v24  ;;  %v2502_v15 = vpop.f32.mrf.mxu2  ;;  %3167 = vmatpush.msra.mxu3 %v8641_v32  ;;  %v3639_v59 = vsel %vm1221_vm12, %v3635_v43, %v8956_v30  ;;  %v11368_v24 = vld [vmem:[#allocation42_spill] sm:$0xff] }
 0x436   : > { %v5925_v48 = vpop.eup %5924  ;;  %v9135_v57 = vadd.f32 1e-05, %v2502_v15  ;;  %4866 = vmatpush.msrb.mxu1 %v9039_v35 }
 0x437   : > { %v2513_v3 = vmul.f32 %v5923_v18, %v2512_v63  ;;  %v2519_v56 = vmul.f32 %v5925_v48, %v9099_v14  ;;  %4009 = vrot.lane.b32.xlu1 %v3902_v42, %s6094_s26  ;;  %3168 = vmatpush.msra.mxu3 %v8651_v25  ;;  %vm2525_vm4 = vweird.f32 %v5925_v48 }
 0x438   : > { %5926 = vrsqrt.f32 %v9135_v57  ;;  %4025 = vrot.lane.b32.xlu0 %v9067_v1, %s11234_s8  ;;  %4867 = vmatpush.msrb.mxu1 %v9059_v9 }
 0x439   : > { %v2517_v23 = vsel %vm2516_vm15, %v5923_v18, %v2513_v3  ;;  %v2520_v7 = vmul.f32 %v5925_v48, %v2519_v56  ;;  %4151 = vrot.lane.b32.xlu2 %v3941_v11, %s10886_s7  ;;  %v9148_v40 = vpop.permute.xlu1 %4019  ;;  %3169 = vmatpush.msra.mxu3 %v8662_v33  ;;  %vm2524_vm15 = vweird.f32 %v9099_v14  ;;  %v3918_v56 = vld [vmem:[#allocation2 + $0xf8] sm:$0xff] }
 0x43a   : > { %v3567_v22 = vpop.permute.xlu0 %3566  ;;  %v2548_v47 = vmul.f32 %v2517_v23, %v11368_v24  ;;  %4868 = vmatpush.msrb.mxu1 %v9078_v34  ;;  %v11371_v23 = vld [vmem:[#allocation84_spill] sm:$0xff] }
 0x43b   : > { %v2521_v50 = vmul.f32 0.5, %v2520_v7  ;;  %v9155_v1 = vpop.permute.xlu2 %4115  ;;  %v3643_v18 = vsel %vm11369_vm13, %v3639_v59, %v3567_v22  ;;  %3170 = vmatpush.msra.mxu3 %v8670_v55  ;;  %vm2526_vm13 = vmor %vm2524_vm15, %vm2525_vm4  ;;  %vm2534_vm4 = vweird.f32 %v9135_v57 }
 0x43c   : > { %2568 = vmatmul.f32.vlgmr.msrb.gmra.mxu3 %v2548_v47  ;;  %v9161_v21 = vsel %vm11370_vm14, %v3643_v18, %v9015_v12  ;;  %4869 = vmatpush.msrb.mxu1 %v9093_v53  ;;  %v3914_v12 = vld [vmem:[#allocation2 + $0xd8] sm:$0xff]  ;;  %v3945_v47 = vld [vmem:[#allocation2 + $0x1d0] sm:$0xff] }
 0x43d   : > { %v2522_v51 = vsub.f32 1.5, %v2521_v50  ;;  %v2505_v30 = vpop.f32.mrf.mxu2  ;;  %3673 = vmatmul.f32.gmra.mxu1 %v9161_v21  ;;  %3758 = vmatpush.msrb.mxu3 %v11344_v41  ;;  %v3926_v50 = vld [vmem:[#allocation2 + $0x138] sm:$0xff]  ;;  %v6009_v18 = vld [vmem:[#allocation2 + $0x1f0] sm:$0xff] }
 0x43e   : > { %v5927_v63 = vpop.eup %5926  ;;  %v2506_v15 = vadd.f32 1e-05, %v2505_v30 }
 0x43f   : > { %v2529_v42 = vmul.f32 %v5927_v63, %v9135_v57  ;;  %4135 = vrot.lane.b32.xlu1 %v3937_v49, %s6106_s13  ;;  %v2523_v3 = vmul.f32 %v5925_v48, %v2522_v51  ;;  %3759 = vmatpush.msrb.mxu3 %v11346_v44  ;;  %vm2535_vm14 = vweird.f32 %v5927_v63  ;;  %v11372_v57 = vld [vmem:[#allocation111_spill] sm:$0xff] }
 0x440   : > { %5928 = vrsqrt.f32 %v2506_v15  ;;  %4041 = vrot.lane.b32.xlu0 %v3914_v12, %s6100_s27  ;;  %vm2536_vm15 = vmor %vm2534_vm4, %vm2535_vm14  ;;  %vm2544_vm14 = vweird.f32 %v2506_v15 }
 0x441   : > { %v2530_v43 = vmul.f32 %v5927_v63, %v2529_v42  ;;  %4057 = vrot.lane.b32.xlu2 %v3918_v56, %s6101_s14  ;;  %v9172_v41 = vpop.permute.xlu1 %4035  ;;  %v2527_v11 = vsel %vm2526_vm13, %v5925_v48, %v2523_v3  ;;  %3760 = vmatpush.msrb.mxu3 %v11350_v54  ;;  %v3922_v3 = vld [vmem:[#allocation2 + $0x118] sm:$0xff] }
 0x442   : > { %v9175_v14 = vpop.permute.xlu0 %4051  ;;  %v2549_v7 = vmul.f32 %v2527_v11, %v11371_v23  ;;  %v3930_v56 = vld [vmem:[#allocation2 + $0x158] sm:$0xff]  ;;  %v11374_v23 = vld [vmem:[#allocation28_spill] sm:$0xff] }
 0x443   : > { %v2531_v22 = vmul.f32 0.5, %v2530_v43  ;;  %v9178_v59 = vpop.permute.xlu2 %4147  ;;  %3761 = vmatpush.msrb.mxu3 %v8560_v28 }
 0x444   : > { %2571 = vmatmul.f32.gmra.mxu3 %v2549_v7 }
 0x445   : > { %v2532_v44 = vsub.f32 1.5, %v2531_v22  ;;  %3762 = vmatpush.msrb.mxu3 %v11354_v5  ;;  %v3907_v22 = vld [vmem:[#allocation2 + $0xa0] sm:$0xff] }
 0x446   : > { %v5929_v24 = vpop.eup %5928 }
 0x447   : > { %v2539_v48 = vmul.f32 %v5929_v24, %v2506_v15  ;;  %4167 = vrot.lane.b32.xlu1 %v3945_v47, %s11321_s29  ;;  %v2533_v54 = vmul.f32 %v5927_v63, %v2532_v44  ;;  %3763 = vmatpush.msrb.mxu3 %v11356_v0  ;;  %vm2545_vm13 = vweird.f32 %v5929_v24  ;;  %v4502_v44 = vld [vmem:[#allocation2 + $0x60] sm:$0xff] }
 0x448   : > { %4183 = vrot.lane.b32.xlu0 %v6009_v18, %s10884_s17  ;;  %vm2546_vm4 = vmor %vm2544_vm14, %vm2545_vm13  ;;  %vm11375_vm13 = vcmask 916480   ;;  %vm11376_vm14 = vcmask 982016  }
 0x449   : > { %v2540_v28 = vmul.f32 %v5929_v24, %v2539_v48  ;;  %4089 = vrot.lane.b32.xlu2 %v3926_v50, %s10894_s25  ;;  %v4068_v51 = vpop.permute.xlu1 %4067  ;;  %v2537_v5 = vsel %vm2536_vm15, %v5927_v63, %v2533_v54  ;;  %3764 = vmatpush.msrb.mxu3 %v8589_v36  ;;  %v4490_v63 = vld [vmem:[#allocation2] sm:$0xff]  ;;  %vm11373_vm15 = vcmask 130048   ;;  %v3934_v48 = vld [vmem:[#allocation2 + $0x178] sm:$0xff] }
 0x44a   : > { %v9188_v30 = vpop.permute.xlu0 %3973  ;;  %v2550_v49 = vmul.f32 %v2537_v5, %v11372_v57  ;;  %v3942_v50 = vld [vmem:[#allocation2 + $0x1b8] sm:$0xff]  ;;  %v4506_v5 = vld [vmem:[#allocation2 + $0x80] sm:$0xff] }
 0x44b   : > { %v2541_v42 = vmul.f32 0.5, %v2540_v28  ;;  %v9191_v12 = vpop.permute.xlu2 %4053  ;;  %3765 = vmatpush.msrb.mxu3 %v8598_v29  ;;  %v4191_v29 = vsel %vm1163_vm2, %v8827_v39, %v9069_v52  ;;  %v3950_v57 = vld [vmem:[#allocation2 + $0x1f8] sm:$0xff] }
 0x44c   : > { %2574 = vmatmul.f32.gmra.mxu3 %v2550_v49  ;;  %v4195_v15 = vsel %vm11373_vm15, %v4191_v29, %v9118_v61  ;;  %v4498_v61 = vld [vmem:[#allocation2 + $0x40] sm:$0xff]  ;;  %v4491_v29 = vld [vmem:[#allocation2 + $0x8] sm:$0xff] }
 0x44d   : > { %v2542_v0 = vsub.f32 1.5, %v2541_v42  ;;  %3766 = vmatpush.msrb.mxu3 %v8606_v6  ;;  %v4199_v39 = vsel %vm1173_vm3, %v4195_v15, %v8882_v45 }
 0x44e   : > { %v4203_v52 = vsel %vm352_vm0, %v4199_v39, %v9148_v40  ;;  %v4192_v39 = vsel %vm1163_vm2, %v9084_v60, %v9188_v30 }
 0x44f   : > { %4073 = vrot.lane.b32.xlu1 %v3922_v3, %s6102_s9  ;;  %v2543_v36 = vmul.f32 %v5929_v24, %v2542_v0  ;;  %3767 = vmatpush.msrb.mxu3 %v8616_v27 }
 0x450   : > { %4558 = vrot.lane.b32.xlu0 %v4490_v63, %s10884_s17 }
 0x451   : > { %4105 = vrot.lane.b32.xlu2 %v3930_v56, %s6104_s28  ;;  %v4084_v43 = vpop.permute.xlu1 %4083  ;;  %v2547_v6 = vsel %vm2546_vm4, %v5929_v24, %v2543_v36  ;;  %3768 = vmatpush.msrb.mxu3 %v8627_v10  ;;  %v4494_v10 = vld [vmem:[#allocation2 + $0x20] sm:$0xff]  ;;  %v3946_v36 = vld [vmem:[#allocation2 + $0x1d8] sm:$0xff]  ;;  %vm11377_vm4 = vmmov %vm11373_vm15 }
 0x452   : > { %v4100_v11 = vpop.permute.xlu0 %4099  ;;  %v2551_v27 = vmul.f32 %v2547_v6, %v11374_v23  ;;  %v4518_v56 = vld [vmem:[#allocation2 + $0xe0] sm:$0xff]  ;;  %v9283_v23 = vld [vmem:[%s10797_s3 + $0x58] sm:$0xff]  ;;  %vm11378_vm15 = vmmov %vm11375_vm13 }
 0x453   : > { %v9206_v7 = vpop.permute.xlu2 %3959  ;;  %3769 = vmatpush.msrb.mxu3 %v8635_v58  ;;  %v4207_v58 = vsel %vm1182_vm6, %v4203_v52, %v3907_v22  ;;  %v9293_v52 = vld [vmem:[%s10799_s5] ss:$0 sm:$0xff] }
 0x454   : > { %2577 = vmatmul.f32.gmra.mxu3 %v2551_v27  ;;  %v4522_v27 = vld [vmem:[#allocation2 + $0x100] sm:$0xff] }
 0x455   : > { %3770 = vmatpush.msrb.mxu3 %v8641_v32  ;;  %v4211_v32 = vsel %vm1187_vm5, %v4207_v58, %v9172_v41  ;;  %v9307_v58 = vld [vmem:[%s10797_s3 + $0x48] sm:$0xff] }
 0x457   : > { %4574 = vrot.lane.b32.xlu1 %v4494_v10, %s6099_s19  ;;  %3771 = vmatpush.msrb.mxu3 %v8651_v25  ;;  %v4215_v25 = vsel %vm1192_vm7, %v4211_v32, %v9175_v14  ;;  %v4495_v10 = vld [vmem:[#allocation2 + $0x28] sm:$0xff]  ;;  %v4196_v32 = vsel %vm11377_vm4, %v4192_v39, %v9124_v2 }
 0x458   : > { %4590 = vrot.lane.b32.xlu0 %v4498_v61, %s6098_s10  ;;  %v4219_v47 = vsel %vm754_vm1, %v4215_v25, %v4068_v51  ;;  %v9298_v61 = vld [vmem:[%s10797_s3 + $0x50] sm:$0xff]  ;;  %v4503_v39 = vld [vmem:[#allocation2 + $0x68] sm:$0xff] }
 0x459   : > { %4606 = vrot.lane.b32.xlu2 %v4502_v44, %s6096_s30  ;;  %v9219_v45 = vpop.permute.xlu1 %4005  ;;  %3772 = vmatpush.msrb.mxu3 %v8662_v33  ;;  %v4223_v54 = vsel %vm1201_vm8, %v4219_v47, %v4084_v43  ;;  %v3938_v33 = vld [vmem:[#allocation2 + $0x198] sm:$0xff] }
 0x45a   : > { %v9224_v40 = vpop.permute.xlu0 %4021  ;;  %v4227_v18 = vsel %vm1206_vm9, %v4223_v54, %v4100_v11  ;;  %v9278_v11 = vld [vmem:[%s10798_s4] ss:$0 sm:$0xff]  ;;  %v4200_v47 = vsel %vm1173_vm3, %v4196_v32, %v9219_v45 }
 0x45b   : > { %v9226_v24 = vpop.permute.xlu2 %3991  ;;  %3773 = vmatpush.msrb.mxu3 %v8670_v55  ;;  %v4231_v28 = vsel %vm1211_vm10, %v4227_v18, %v9155_v1  ;;  %v4204_v45 = vsel %vm352_vm0, %v4200_v47, %v9224_v40  ;;  %v4534_v40 = vld [vmem:[#allocation2 + $0x160] sm:$0xff] }
 0x45f   : > { %4121 = vrot.lane.b32.xlu1 %v3934_v48, %s6105_s12 }
 0x460   : > { %4137 = vrot.lane.b32.xlu0 %v3938_v33, %s6106_s13 }
 0x461   : > { %4153 = vrot.lane.b32.xlu2 %v3942_v50, %s10886_s7  ;;  %v4132_v41 = vpop.permute.xlu1 %4131  ;;  %s11380_s7 = smov 64  }
 0x462   : > { %v9237_v55 = vpop.permute.xlu0 %4037  ;;  %v4235_v51 = vsel %vm10909_vm11, %v4231_v28, %v4132_v41  ;;  %v9327_v41 = vld [vmem:[%s10797_s3 + $0x38] sm:$0xff]  ;;  %v4526_v28 = vld [vmem:[#allocation2 + $0x120] sm:$0xff] }
 0x463   : > { %v9239_v14 = vpop.permute.xlu2 %4117  ;;  %v4239_v49 = vsel %vm1221_vm12, %v4235_v51, %v9178_v59  ;;  %v9262_v59 = vld [vmem:[%s10797_s3 + $0x70] sm:$0xff] }
 0x467   : > { %4622 = vrot.lane.b32.xlu1 %v4506_v5, %s6094_s26  ;;  %v9337_v5 = vld [vmem:[%s10797_s3 + $0x30] sm:$0xff] }
 0x468   : > { %4638 = vrot.lane.b32.xlu0 %v3907_v22, %s11234_s8  ;;  %v4499_v22 = vld [vmem:[#allocation2 + $0x48] sm:$0xff] }
 0x469   : > { %4185 = vrot.lane.b32.xlu2 %v3950_v57, %s10884_s17  ;;  %v4164_v42 = vpop.permute.xlu1 %4163  ;;  %v3908_v57 = vld [vmem:[#allocation2 + $0xa8] sm:$0xff] }
 0x46a   : > { %v4243_v0 = vsel %vm11375_vm13, %v4239_v49, %v4164_v42  ;;  %v4180_v3 = vpop.permute.xlu0 %4179  ;;  %v4208_v42 = vsel %vm1182_vm6, %v4204_v45, %v3908_v57  ;;  %vm11379_vm13 = vmmov %vm11376_vm14 }
 0x46b   : > { %v9250_v63 = vpop.permute.xlu2 %4149  ;;  %v9253_v1 = vsel %vm11376_vm14, %v4243_v0, %v4180_v3 }
 0x46c   : > { %4267 = vmatmul.f32.vlgmr.msra.gmra.mxu1 %v9253_v1 }
 0x46d   : > { %5457 = vmatpush.msra.mxu1 %v8908_v20 }
 0x46f   : > { %4169 = vrot.lane.b32.xlu1 %v3946_v36, %s11321_s29  ;;  %5458 = vmatpush.msra.mxu1 %v9262_v59  ;;  %v4212_v36 = vsel %vm1187_vm5, %v4208_v42, %v9237_v55 }
 0x470   : > { %4654 = vrot.lane.b32.xlu0 %v4518_v56, %s6100_s27 }
 0x471   : > { %4560 = vrot.lane.b32.xlu2 %v4491_v29, %s10884_s17  ;;  %v9267_v43 = vpop.permute.xlu1 %4069  ;;  %5459 = vmatpush.msra.mxu1 %v8953_v46 }
 0x472   : > { %v9270_v6 = vpop.permute.xlu0 %3975 }
 0x473   : > { %v9272_v15 = vpop.permute.xlu2 %4055  ;;  %5460 = vmatpush.msra.mxu1 %v8971_v4 }
 0x475   : > { %5461 = vmatpush.msra.mxu1 %v9283_v23 }
 0x477   : > { %4670 = vrot.lane.b32.xlu1 %v4522_v27, %s6101_s14  ;;  %5462 = vmatpush.msra.mxu1 %v9298_v61  ;;  %v4216_v27 = vsel %vm1192_vm7, %v4212_v36, %v9191_v12 }
 0x478   : > { %v1363_v44 = vpop.f32.mrf.mxu3  ;;  %4576 = vrot.lane.b32.xlu0 %v4495_v10, %s6099_s19 }
 0x479   : > { %4592 = vrot.lane.b32.xlu2 %v4499_v22, %s6098_s10  ;;  %v1375_v60 = vmul.f32 %v9278_v11, %v1363_v44  ;;  %v4086_v30 = vpop.permute.xlu1 %4085  ;;  %5463 = vmatpush.msra.mxu1 %v9307_v58  ;;  %v4507_v22 = vld [vmem:[#allocation2 + $0x88] sm:$0xff] }
 0x47a   : > { %v4102_v25 = vpop.permute.xlu0 %4101 }
 0x47b   : > { %v1379_v48 = vadd.f32 %v9293_v52, %v1375_v60  ;;  %v9320_v54 = vpop.permute.xlu2 %3961  ;;  %5464 = vmatpush.msra.mxu1 %v8942_v8  ;;  %v4530_v8 = vld [vmem:[#allocation2 + $0x140] sm:$0xff] }
 0x47d   : > { %v1387_v33 = vrot.slane %v1379_v48, 1  ;;  %v1388_v50 = vrot.slane %v1379_v48, 2  ;;  %v1389_v2 = vrot.slane %v1379_v48, 3  ;;  %1443 = vst [vmem:[%s9315_s15] sm:$0x1] %v1379_v48  ;;  %5465 = vmatpush.msra.mxu1 %v9327_v41  ;;  %v1390_v18 = vrot.slane %v1379_v48, 4 }
 0x47e   : > { %v1391_v51 = vrot.slane %v1379_v48, 5  ;;  %v1392_v49 = vrot.slane %v1379_v48, 6  ;;  %v1393_v0 = vrot.slane %v1379_v48, 7 }
 0x47f   : > { %1444 = vst [vmem:[%s9315_s15 + $0x8] sm:$0x1] %v1387_v33  ;;  %4686 = vrot.lane.b32.xlu1 %v4526_v28, %s6102_s9  ;;  %5466 = vmatpush.msra.mxu1 %v9337_v5 }
 0x480   : > { %1445 = vst [vmem:[%s9315_s15 + $0x10] sm:$0x1] %v1388_v50  ;;  %4702 = vrot.lane.b32.xlu0 %v4530_v8, %s10894_s25  ;;  %v4519_v8 = vld [vmem:[#allocation2 + $0xe8] sm:$0xff] }
 0x481   : > { %1446 = vst [vmem:[%s9315_s15 + $0x18] sm:$0x1] %v1389_v2  ;;  %4718 = vrot.lane.b32.xlu2 %v4534_v40, %s6104_s28  ;;  %v9345_v3 = vpop.permute.xlu1 %4007  ;;  %5467 = vmatpush.msra.mxu1 %v9010_v37  ;;  %v4220_v37 = vsel %vm754_vm1, %v4216_v27, %v9267_v43  ;;  %v4538_v2 = vld [vmem:[#allocation2 + $0x180] sm:$0xff] }
 0x482   : > { %1447 = vst [vmem:[%s9315_s15 + $0x20] sm:$0x1] %v1390_v18  ;;  %v9351_v56 = vpop.permute.xlu0 %4023  ;;  %v4224_v55 = vsel %vm1201_vm8, %v4220_v37, %v4086_v30  ;;  %v4542_v18 = vld [vmem:[#allocation2 + $0x1a0] sm:$0xff] }
 0x483   : > { %1448 = vst [vmem:[%s9315_s15 + $0x28] sm:$0x1] %v1391_v51  ;;  %v9354_v29 = vpop.permute.xlu2 %3993  ;;  %5468 = vmatpush.msra.mxu1 %v9024_v17  ;;  %v4228_v43 = vsel %vm1206_vm9, %v4224_v55, %v4102_v25 }
 0x484   : > { %1449 = vst [vmem:[%s9315_s15 + $0x30] sm:$0x1] %v1392_v49 }
 0x485   : > { %1450 = vst [vmem:[%s9315_s15 + $0x38] sm:$0x1] %v1393_v0  ;;  %5469 = vmatpush.msra.mxu1 %v9039_v35 }
 0x487   : > { %v1366_v10 = vpop.f32.mrf.mxu3  ;;  %4608 = vrot.lane.b32.xlu1 %v4503_v39, %s6096_s30  ;;  %5470 = vmatpush.msra.mxu1 %v9059_v9 }
 0x488   : > { %v1376_v17 = vmul.f32 %v9278_v11, %v1366_v10  ;;  %4624 = vrot.lane.b32.xlu0 %v4507_v22, %s6094_s26 }
 0x489   : > { %4640 = vrot.lane.b32.xlu2 %v3908_v57, %s11234_s8  ;;  %v3099_v35 = vpop.f32.mrf.mxu2  ;;  %v4134_v12 = vpop.permute.xlu1 %4133  ;;  %5471 = vmatpush.msra.mxu1 %v9078_v34  ;;  %v4232_v34 = vsel %vm1211_vm10, %v4228_v43, %v9239_v14 }
 0x48a   : > { %v1380_v44 = vadd.f32 %v9293_v52, %v1376_v17  ;;  %v9373_v60 = vadd.f32 1e-05, %v3099_v35  ;;  %v9375_v9 = vpop.permute.xlu0 %4039  ;;  %v4236_v50 = vsel %vm10909_vm11, %v4232_v34, %v4134_v12 }
 0x48b   : > { %v9377_v30 = vpop.permute.xlu2 %4119  ;;  %5472 = vmatpush.msra.mxu1 %v9093_v53  ;;  %v4240_v14 = vsel %vm1221_vm12, %v4236_v50, %v9250_v63 }
 0x48c   : > { %v1394_v32 = vrot.slane %v1380_v44, 1  ;;  %v1395_v47 = vrot.slane %v1380_v44, 2  ;;  %v1396_v48 = vrot.slane %v1380_v44, 3  ;;  %1451 = vst [vmem:[%s9315_s15 + $0x40] sm:$0x1] %v1380_v44  ;;  %v1397_v33 = vrot.slane %v1380_v44, 4 }
 0x48d   : > { %5930 = vrsqrt.f32 %v9373_v60  ;;  %v1398_v25 = vrot.slane %v1380_v44, 5  ;;  %v1399_v45 = vrot.slane %v1380_v44, 6  ;;  %v1400_v28 = vrot.slane %v1380_v44, 7  ;;  %v4546_v44 = vld [vmem:[#allocation2 + $0x1c0] sm:$0xff] }
 0x48e   : > { %1452 = vst [vmem:[%s9315_s15 + $0x48] sm:$0x1] %v1394_v32  ;;  %vm3117_vm4 = vweird.f32 %v9373_v60 }
 0x48f   : > { %1453 = vst [vmem:[%s9315_s15 + $0x50] sm:$0x1] %v1395_v47  ;;  %v1369_v53 = vpop.f32.mrf.mxu3  ;;  %4734 = vrot.lane.b32.xlu1 %v4538_v2, %s6105_s12  ;;  %v4492_v2 = vld [vmem:[#allocation2 + $0x10] sm:$0xff] }
 0x490   : > { %1454 = vst [vmem:[%s9315_s15 + $0x58] sm:$0x1] %v1396_v48  ;;  %v1377_v51 = vmul.f32 %v9278_v11, %v1369_v53  ;;  %4750 = vrot.lane.b32.xlu0 %v4542_v18, %s6106_s13 }
 0x491   : > { %1455 = vst [vmem:[%s9315_s15 + $0x60] sm:$0x1] %v1397_v33  ;;  %4656 = vrot.lane.b32.xlu2 %v4519_v8, %s6100_s27  ;;  %v4166_v57 = vpop.permute.xlu1 %4165  ;;  %v3102_v49 = vpop.f32.mrf.mxu2  ;;  %v4550_v33 = vld [vmem:[#allocation2 + $0x1e0] sm:$0xff] }
 0x492   : > { %1456 = vst [vmem:[%s9315_s15 + $0x68] sm:$0x1] %v1398_v25  ;;  %v1381_v40 = vadd.f32 %v9293_v52, %v1377_v51  ;;  %v4244_v42 = vsel %vm11378_vm15, %v4240_v14, %v4166_v57  ;;  %v9398_v0 = vadd.f32 1e-05, %v3102_v49  ;;  %v3665_v36 = vpop.f32.mrf.mxu1  ;;  %v4182_v27 = vpop.permute.xlu0 %4181 }
 0x493   : > { %v9400_v37 = vpop.eup %5930  ;;  %1457 = vst [vmem:[%s9315_s15 + $0x70] sm:$0x1] %v1399_v45  ;;  %v9404_v39 = vsub.f32 %v8890_v13, %v3665_v36  ;;  %v9406_v63 = vpop.permute.xlu2 %4151  ;;  %v9409_v55 = vsel %vm11379_vm13, %v4244_v42, %v4182_v27  ;;  %vm11384_vm13 = vcmask 130048  }
 0x494   : > { %1458 = vst [vmem:[%s9315_s15 + $0x78] sm:$0x1] %v1400_v28  ;;  %v3112_v10 = vmul.f32 %v9400_v37, %v9373_v60  ;;  %v1401_v22 = vrot.slane %v1381_v40, 1  ;;  %v1402_v17 = vrot.slane %v1381_v40, 2  ;;  %4270 = vmatmul.f32.gmra.mxu1 %v9409_v55  ;;  %v1403_v35 = vrot.slane %v1381_v40, 3 }
 0x495   : > { %v1404_v12 = vrot.slane %v1381_v40, 4  ;;  %1459 = vst [vmem:[%s9315_s15 + $0x80] sm:$0x1] %v1381_v40  ;;  %v1405_v43 = vrot.slane %v1381_v40, 5  ;;  %5932 = vrsqrt.f32 %v9398_v0  ;;  %v1406_v32 = vrot.slane %v1381_v40, 6 }
 0x496   : > { %v3113_v13 = vmul.f32 %v9400_v37, %v3112_v10  ;;  %1460 = vst [vmem:[%s9315_s15 + $0x88] sm:$0x1] %v1401_v22  ;;  %v3681_v47 = vmul.f32 %v9404_v39, %v9404_v39  ;;  %v1407_v25 = vrot.slane %v1381_v40, 7  ;;  %vm3118_vm14 = vweird.f32 %v9400_v37 }
 0x497   : > { %1461 = vst [vmem:[%s9315_s15 + $0x90] sm:$0x1] %v1402_v17  ;;  %v1372_v48 = vpop.f32.mrf.mxu3  ;;  %4766 = vrot.lane.b32.xlu1 %v4546_v44, %s11380_s7  ;;  %vm9452_vm15 = vmor %vm3117_vm4, %vm3118_vm14  ;;  %v4193_v22 = vsel %vm1163_vm2, %v9206_v7, %v9270_v6  ;;  %vm3127_vm4 = vweird.f32 %v9398_v0 }
 0x498   : > { %v3114_v34 = vmul.f32 0.5, %v3113_v13  ;;  %1462 = vst [vmem:[%s9315_s15 + $0x98] sm:$0x1] %v1403_v35  ;;  %v1378_v50 = vmul.f32 %v9278_v11, %v1372_v48  ;;  %4782 = vrot.lane.b32.xlu0 %v4550_v33, %s11321_s29  ;;  %3701 = vmatmul.f32.vlgmr.msrb.gmra.mxu2 %v3681_v47  ;;  %v4523_v35 = vld [vmem:[#allocation2 + $0x108] sm:$0xff]  ;;  %v4500_v48 = vld [vmem:[#allocation2 + $0x50] sm:$0xff] }
 0x499   : > { %1463 = vst [vmem:[%s9315_s15 + $0xa0] sm:$0x1] %v1404_v12  ;;  %4562 = vrot.lane.b32.xlu2 %v4492_v2, %s11381_s16  ;;  %v9428_v45 = vpop.permute.xlu1 %4071  ;;  %v3105_v53 = vpop.f32.mrf.mxu2  ;;  %4891 = vmatpush.msrb.mxu2 %v8908_v20  ;;  %v4527_v20 = vld [vmem:[#allocation2 + $0x128] sm:$0xff] }
 0x49a   : > { %v3115_v18 = vsub.f32 1.5, %v3114_v34  ;;  %1464 = vst [vmem:[%s9315_s15 + $0xa8] sm:$0x1] %v1405_v43  ;;  %v1382_v28 = vadd.f32 %v9293_v52, %v1378_v50  ;;  %v9433_v51 = vadd.f32 1e-05, %v3105_v53  ;;  %v3668_v8 = vpop.f32.mrf.mxu1  ;;  %v9435_v14 = vpop.permute.xlu0 %3977  ;;  %v4496_v43 = vld [vmem:[#allocation2 + $0x30] sm:$0xff] }
 0x49b   : > { %1465 = vst [vmem:[%s9315_s15 + $0xb0] sm:$0x1] %v1406_v32  ;;  %v9441_v57 = vsub.f32 %v8964_v19, %v3668_v8  ;;  %v9443_v49 = vpop.permute.xlu2 %4057  ;;  %v9445_v40 = vpop.eup %5932  ;;  %4892 = vmatpush.msrb.mxu2 %v9262_v59  ;;  %v9497_v50 = vld [vmem:[%s10796_s2 + $0x78] sm:$0xff] }
 0x49c   : > { %v3116_v42 = vmul.f32 %v9400_v37, %v3115_v18  ;;  %1466 = vst [vmem:[%s9315_s15 + $0xb8] sm:$0x1] %v1407_v25  ;;  %v1408_v36 = vrot.slane %v1382_v28, 1  ;;  %v1409_v27 = vrot.slane %v1382_v28, 2  ;;  %v1410_v10 = vrot.slane %v1382_v28, 3 }
 0x49d   : > { %v3122_v19 = vmul.f32 %v9445_v40, %v9398_v0  ;;  %v1411_v60 = vrot.slane %v1382_v28, 4  ;;  %1467 = vst [vmem:[%s9315_s15 + $0xc0] sm:$0x1] %v1382_v28  ;;  %v1412_v17 = vrot.slane %v1382_v28, 5  ;;  %5934 = vrsqrt.f32 %v9433_v51  ;;  %4893 = vmatpush.msrb.mxu2 %v8953_v46 }
 0x49e   : > { %v3120_v59 = vsel %vm9452_vm15, %v9400_v37, %v3116_v42  ;;  %1468 = vst [vmem:[%s9315_s15 + $0xc8] sm:$0x1] %v1408_v36  ;;  %v1413_v13 = vrot.slane %v1382_v28, 6  ;;  %v3682_v7 = vmul.f32 %v9441_v57, %v9441_v57  ;;  %v1414_v44 = vrot.slane %v1382_v28, 7  ;;  %v9514_v42 = vld [vmem:[%s10796_s2 + $0x70] sm:$0xff] }
 0x49f   : > { %v3123_v12 = vmul.f32 %v9445_v40, %v3122_v19  ;;  %1469 = vst [vmem:[%s9315_s15 + $0xd0] sm:$0x1] %v1409_v27  ;;  %v1966_v6 = vpop.f32.mrf.mxu3  ;;  %4672 = vrot.lane.b32.xlu1 %v4523_v35, %s6101_s14  ;;  %v3151_v37 = vmul.f32 %v3120_v59, %v8770_v26  ;;  %4894 = vmatpush.msrb.mxu2 %v8971_v4  ;;  %vm3128_vm14 = vweird.f32 %v9445_v40  ;;  %v9533_v19 = vld [vmem:[%s10796_s2 + $0x68] sm:$0xff] }
 0x4a0   : > { %1470 = vst [vmem:[%s9315_s15 + $0xd8] sm:$0x1] %v1410_v10  ;;  %v1978_v32 = vmul.f32 %v9278_v11, %v1966_v6  ;;  %4578 = vrot.lane.b32.xlu0 %v4496_v43, %s6099_s19  ;;  %v4197_v46 = vsel %vm11384_vm13, %v4193_v22, %v9226_v24  ;;  %3704 = vmatmul.f32.gmra.mxu2 %v3682_v7  ;;  %v4531_v22 = vld [vmem:[#allocation2 + $0x148] sm:$0xff]  ;;  %vm9542_vm15 = vmor %vm3127_vm4, %vm3128_vm14  ;;  %v9559_v6 = vld [vmem:[%s10796_s2 + $0x60] sm:$0xff]  ;;  %vm3137_vm14 = vweird.f32 %v9433_v51 }
 0x4a1   : > { %v3124_v47 = vmul.f32 0.5, %v3123_v12  ;;  %1471 = vst [vmem:[%s9315_s15 + $0xe0] sm:$0x1] %v1411_v60  ;;  %3171 = vmatmul.f32.vlgmr.msra.gmra.mxu3 %v3151_v37  ;;  %v9481_v26 = vpop.permute.xlu1 %4087  ;;  %v3108_v33 = vpop.f32.mrf.mxu2  ;;  %v4201_v34 = vsel %vm1173_vm3, %v4197_v46, %v9345_v3  ;;  %4594 = vrot.lane.b32.xlu2 %v4500_v48, %s6098_s10  ;;  %v9574_v46 = vld [vmem:[%s10797_s3 + $0x40] sm:$0xff]  ;;  %v9589_v48 = vld [vmem:[%s10796_s2 + $0x58] sm:$0xff] }
 0x4a2   : > { %1472 = vst [vmem:[%s9315_s15 + $0xe8] sm:$0x1] %v1412_v17  ;;  %v9487_v25 = vadd.f32 %v9293_v52, %v1978_v32  ;;  %v9490_v4 = vadd.f32 1e-05, %v3108_v33  ;;  %v9492_v24 = vpop.permute.xlu0 %4103  ;;  %4361 = vmatpush.msra.mxu3 %v9497_v50  ;;  %4895 = vmatpush.msrb.mxu2 %v9283_v23  ;;  %v4205_v23 = vsel %vm352_vm0, %v4201_v34, %v9351_v56  ;;  %v9547_v17 = vld [vmem:[#allocation2 + $0xb0] sm:$0xff] }
 0x4a3   : > { %v3125_v2 = vsub.f32 1.5, %v3124_v47  ;;  %1473 = vst [vmem:[%s9315_s15 + $0xf0] sm:$0x1] %v1413_v13  ;;  %v9501_v3 = vpop.permute.xlu2 %4089  ;;  %v9504_v53 = vpop.eup %5934 }
 0x4a4   : > { %1474 = vst [vmem:[%s9315_s15 + $0xf8] sm:$0x1] %v1414_v44  ;;  %v1990_v18 = vrot.slane %v9487_v25, 1  ;;  %v1991_v28 = vrot.slane %v9487_v25, 2  ;;  %v1992_v8 = vrot.slane %v9487_v25, 3  ;;  %4362 = vmatpush.msra.mxu3 %v9514_v42  ;;  %v3132_v36 = vmul.f32 %v9504_v53, %v9433_v51  ;;  %4896 = vmatpush.msrb.mxu2 %v9298_v61  ;;  %v4535_v44 = vld [vmem:[#allocation2 + $0x168] sm:$0xff] }
 0x4a5   : > { %v1993_v27 = vrot.slane %v9487_v25, 4  ;;  %2046 = vst [vmem:[%s9315_s15 + $0x1] sm:$0x1] %v9487_v25  ;;  %v1994_v10 = vrot.slane %v9487_v25, 5  ;;  %5936 = vrsqrt.f32 %v9490_v4  ;;  %v3126_v56 = vmul.f32 %v9445_v40, %v3125_v2 }
 0x4a6   : > { %2047 = vst [vmem:[%s9315_s15 + $0x9] sm:$0x1] %v1990_v18  ;;  %4363 = vmatpush.msra.mxu3 %v9533_v19  ;;  %v3133_v61 = vmul.f32 %v9504_v53, %v3132_v36  ;;  %v1995_v0 = vrot.slane %v9487_v25, 6  ;;  %4897 = vmatpush.msrb.mxu2 %v9307_v58  ;;  %v1996_v35 = vrot.slane %v9487_v25, 7  ;;  %v4209_v58 = vsel %vm1182_vm6, %v4205_v23, %v9547_v17 }
 0x4a7   : > { %2048 = vst [vmem:[%s9315_s15 + $0x11] sm:$0x1] %v1991_v28  ;;  %v1969_v60 = vpop.f32.mrf.mxu3  ;;  %4688 = vrot.lane.b32.xlu1 %v4527_v20, %s6102_s9  ;;  %v3130_v7 = vsel %vm9542_vm15, %v9445_v40, %v3126_v56  ;;  %v4213_v47 = vsel %vm1187_vm5, %v4209_v58, %v9375_v9  ;;  %vm3138_vm13 = vweird.f32 %v9504_v53  ;;  %v4504_v20 = vld [vmem:[#allocation2 + $0x70] sm:$0xff]  ;;  %v9627_v56 = vld [vmem:[%s10796_s2 + $0x48] sm:$0xff] }
 0x4a8   : > { %2049 = vst [vmem:[%s9315_s15 + $0x19] sm:$0x1] %v1992_v8  ;;  %v1979_v12 = vmul.f32 %v9278_v11, %v1969_v60  ;;  %v3671_v13 = vpop.f32.mrf.mxu1  ;;  %4704 = vrot.lane.b32.xlu0 %v4531_v22, %s10894_s25  ;;  %4364 = vmatpush.msra.mxu3 %v9559_v6  ;;  %v3134_v37 = vmul.f32 0.5, %v3133_v61  ;;  %v3152_v32 = vmul.f32 %v3130_v7, %v8819_v38  ;;  %v9608_v8 = vld [vmem:[%s10796_s2 + $0x50] sm:$0xff]  ;;  %vm3139_vm4 = vmor %vm3137_vm14, %vm3138_vm13  ;;  %v9657_v7 = vld [vmem:[%s10797_s3 + $0x28] sm:$0xff]  ;;  %vm3147_vm13 = vweird.f32 %v9490_v4 }
 0x4a9   : > { %2050 = vst [vmem:[%s9315_s15 + $0x21] sm:$0x1] %v1993_v27  ;;  %v9566_v43 = vsub.f32 %v9072_v16, %v3671_v13  ;;  %v9569_v40 = vpop.permute.xlu1 %4009  ;;  %4898 = vmatpush.msrb.mxu2 %v9574_v46  ;;  %4720 = vrot.lane.b32.xlu2 %v4535_v44, %s6104_s28  ;;  %v4508_v22 = vld [vmem:[#allocation2 + $0x90] sm:$0xff] }
 0x4aa   : > { %2051 = vst [vmem:[%s9315_s15 + $0x29] sm:$0x1] %v1994_v10  ;;  %v9581_v16 = vadd.f32 %v9293_v52, %v1979_v12  ;;  %v9584_v38 = vpop.permute.xlu0 %4025  ;;  %4365 = vmatpush.msra.mxu3 %v9589_v48  ;;  %v3135_v33 = vsub.f32 1.5, %v3134_v37  ;;  %v9673_v37 = vld [vmem:[%s10796_s2 + $0x38] sm:$0xff] }
 0x4ab   : > { %2052 = vst [vmem:[%s9315_s15 + $0x31] sm:$0x1] %v1995_v0  ;;  %v3683_v9 = vmul.f32 %v9566_v43, %v9566_v43  ;;  %3174 = vmatmul.f32.gmra.mxu3 %v3152_v32  ;;  %v9595_v34 = vpop.permute.xlu2 %4105  ;;  %4899 = vmatpush.msrb.mxu2 %v9327_v41  ;;  %v9598_v25 = vpop.eup %5936  ;;  %v4217_v41 = vsel %vm1192_vm7, %v4213_v47, %v9272_v15 }
 0x4ac   : > { %2053 = vst [vmem:[%s9315_s15 + $0x39] sm:$0x1] %v1996_v35  ;;  %v1997_v2 = vrot.slane %v9581_v16, 1  ;;  %v1998_v18 = vrot.slane %v9581_v16, 2  ;;  %v1999_v28 = vrot.slane %v9581_v16, 3  ;;  %4366 = vmatpush.msra.mxu3 %v9608_v8  ;;  %v3142_v23 = vmul.f32 %v9598_v25, %v9490_v4  ;;  %v9649_v35 = vld [vmem:[%s10796_s2 + $0x40] sm:$0xff] }
 0x4ad   : > { %v2000_v36 = vrot.slane %v9581_v16, 4  ;;  %2054 = vst [vmem:[%s9315_s15 + $0x41] sm:$0x1] %v9581_v16  ;;  %3707 = vmatmul.f32.gmra.mxu2 %v3683_v9  ;;  %v4221_v27 = vsel %vm754_vm1, %v4217_v41, %v9428_v45  ;;  %v2001_v10 = vrot.slane %v9581_v16, 5  ;;  %v3136_v15 = vmul.f32 %v9504_v53, %v3135_v33  ;;  %v9693_v33 = vld [vmem:[%s10796_s2 + $0x30] sm:$0xff] }
 0x4ae   : > { %2055 = vst [vmem:[%s9315_s15 + $0x49] sm:$0x1] %v1997_v2  ;;  %4367 = vmatpush.msra.mxu3 %v9627_v56  ;;  %4900 = vmatpush.msrb.mxu2 %v9337_v5  ;;  %v4225_v45 = vsel %vm1201_vm8, %v4221_v27, %v9481_v26  ;;  %v3143_v61 = vmul.f32 %v9598_v25, %v3142_v23  ;;  %v2002_v0 = vrot.slane %v9581_v16, 6  ;;  %v2003_v5 = vrot.slane %v9581_v16, 7  ;;  %v4539_v23 = vld [vmem:[#allocation2 + $0x188] sm:$0xff] }
 0x4af   : > { %2056 = vst [vmem:[%s9315_s15 + $0x51] sm:$0x1] %v1998_v18  ;;  %v1972_v60 = vpop.f32.mrf.mxu3  ;;  %4610 = vrot.lane.b32.xlu1 %v4504_v20, %s6096_s30  ;;  %v3140_v59 = vsel %vm3139_vm4, %v9504_v53, %v3136_v15  ;;  %v4229_v53 = vsel %vm1206_vm9, %v4225_v45, %v9492_v24  ;;  %vm3148_vm15 = vweird.f32 %v9598_v25  ;;  %v9727_v15 = vld [vmem:[%s10797_s3 + $0x10] sm:$0xff]  ;;  %vm11387_vm4 = vcmask 916480  }
 0x4b0   : > { %2057 = vst [vmem:[%s9315_s15 + $0x59] sm:$0x1] %v1999_v28  ;;  %v1980_v26 = vmul.f32 %v9278_v11, %v1972_v60  ;;  %4626 = vrot.lane.b32.xlu0 %v4508_v22, %s6094_s26  ;;  %4368 = vmatpush.msra.mxu3 %v9649_v35  ;;  %v3144_v51 = vmul.f32 0.5, %v3143_v61  ;;  %v3153_v12 = vmul.f32 %v3140_v59, %v8874_v31  ;;  %v9706_v28 = vld [vmem:[%s10797_s3 + $0x18] sm:$0xff]  ;;  %vm3149_vm14 = vmor %vm3147_vm13, %vm3148_vm15  ;;  %v4520_v60 = vld [vmem:[#allocation2 + $0xf0] sm:$0xff]  ;;  %vm11388_vm15 = vcmask 982016  }
 0x4b1   : > { %2058 = vst [vmem:[%s9315_s15 + $0x61] sm:$0x1] %v2000_v36  ;;  %v4136_v13 = vpop.permute.xlu1 %4135  ;;  %4901 = vmatpush.msrb.mxu2 %v9657_v7  ;;  %4642 = vrot.lane.b32.xlu2 %v9547_v17, %s11234_s8  ;;  %v9683_v17 = vld [vmem:[%s10797_s3 + $0x20] sm:$0xff]  ;;  %v4233_v2 = vsel %vm1211_vm10, %v4229_v53, %v9377_v30  ;;  %v9717_v30 = vld [vmem:[%s10796_s2 + $0x28] sm:$0xff]  ;;  %vm11389_vm13 = vcmask 130048  }
 0x4b2   : > { %2059 = vst [vmem:[%s9315_s15 + $0x69] sm:$0x1] %v2001_v10  ;;  %v9664_v58 = vadd.f32 %v9293_v52, %v1980_v26  ;;  %v9668_v31 = vpop.permute.xlu0 %4041  ;;  %4369 = vmatpush.msra.mxu3 %v9673_v37  ;;  %v3145_v44 = vsub.f32 1.5, %v3144_v51  ;;  %v4237_v4 = vsel %vm10909_vm11, %v4233_v2, %v4136_v13  ;;  %v4543_v10 = vld [vmem:[#allocation2 + $0x1a8] sm:$0xff] }
 0x4b3   : > { %2060 = vst [vmem:[%s9315_s15 + $0x71] sm:$0x1] %v2002_v0  ;;  %3177 = vmatmul.f32.gmra.mxu3 %v3153_v12  ;;  %v9677_v24 = vpop.permute.xlu2 %4606  ;;  %4902 = vmatpush.msrb.mxu2 %v9683_v17  ;;  %v4241_v22 = vsel %vm1221_vm12, %v4237_v4, %v9406_v63  ;;  %v9747_v26 = vld [vmem:[%s10797_s3 + $0x8] sm:$0xff]  ;;  %v9757_v63 = vld [vmem:[%s10796_s2 + $0x18] sm:$0xff] }
 0x4b4   : > { %2061 = vst [vmem:[%s9315_s15 + $0x79] sm:$0x1] %v2003_v5  ;;  %v2004_v32 = vrot.slane %v9664_v58, 1  ;;  %v2005_v47 = vrot.slane %v9664_v58, 2  ;;  %v2006_v16 = vrot.slane %v9664_v58, 3  ;;  %4370 = vmatpush.msra.mxu3 %v9693_v33  ;;  %v2007_v9 = vrot.slane %v9664_v58, 4 }
 0x4b5   : > { %2062 = vst [vmem:[%s9315_s15 + $0x81] sm:$0x1] %v9664_v58  ;;  %v3146_v18 = vmul.f32 %v9598_v25, %v3145_v44  ;;  %4903 = vmatpush.msrb.mxu2 %v9706_v28  ;;  %v2008_v41 = vrot.slane %v9664_v58, 5  ;;  %v2009_v36 = vrot.slane %v9664_v58, 6  ;;  %v2010_v45 = vrot.slane %v9664_v58, 7  ;;  %v9772_v44 = vld [vmem:[%s10797_s3] sm:$0xff] }
 0x4b6   : > { %2063 = vst [vmem:[%s9315_s15 + $0x89] sm:$0x1] %v2004_v32  ;;  %4371 = vmatpush.msra.mxu3 %v9717_v30  ;;  %v9792_v4 = vld [vmem:[%s10796_s2 + $0x8] sm:$0xff] }
 0x4b7   : > { %2064 = vst [vmem:[%s9315_s15 + $0x91] sm:$0x1] %v2005_v47  ;;  %v1975_v27 = vpop.f32.mrf.mxu3  ;;  %4736 = vrot.lane.b32.xlu1 %v4539_v23, %s6105_s12  ;;  %v3150_v20 = vsel %vm3149_vm14, %v9598_v25, %v3146_v18  ;;  %4904 = vmatpush.msrb.mxu2 %v9727_v15  ;;  %v9738_v25 = vld [vmem:[%s10796_s2 + $0x20] sm:$0xff]  ;;  %vm11396_vm14 = vmmov %vm11387_vm4 }
 0x4b8   : > { %2065 = vst [vmem:[%s9315_s15 + $0x99] sm:$0x1] %v2006_v16  ;;  %v1981_v61 = vmul.f32 %v9278_v11, %v1975_v27  ;;  %4752 = vrot.lane.b32.xlu0 %v4543_v10, %s6106_s13  ;;  %v3154_v0 = vmul.f32 %v3150_v20, %v8947_v62  ;;  %4372 = vmatpush.msra.mxu3 %v9738_v25  ;;  %v9798_v27 = vld [vmem:[#allocation2 + $0x1e8] sm:$0xff] }
 0x4b9   : > { %2066 = vst [vmem:[%s9315_s15 + $0xa1] sm:$0x1] %v2007_v9  ;;  %v4168_v5 = vpop.permute.xlu1 %4167  ;;  %4905 = vmatpush.msrb.mxu2 %v9747_v26  ;;  %4658 = vrot.lane.b32.xlu2 %v4520_v60, %s6100_s27 }
 0x4ba   : > { %2067 = vst [vmem:[%s9315_s15 + $0xa9] sm:$0x1] %v2008_v41  ;;  %v1985_v62 = vadd.f32 %v9293_v52, %v1981_v61  ;;  %v4245_v59 = vsel %vm11387_vm4, %v4241_v22, %v4168_v5  ;;  %v4184_v51 = vpop.permute.xlu0 %4183  ;;  %v3674_v12 = vpop.f32.mrf.mxu1  ;;  %4373 = vmatpush.msra.mxu3 %v9757_v63  ;;  %v9787_v41 = vld [vmem:[#allocation2 + $0x1c8] sm:$0xff]  ;;  %v9811_v61 = vld [vmem:[#allocation2 + $0x18] sm:$0xff]  ;;  %vm11397_vm4 = vmmov %vm11388_vm15 }
 0x4bb   : > { %2068 = vst [vmem:[%s9315_s15 + $0xb1] sm:$0x1] %v2009_v36  ;;  %3180 = vmatmul.f32.gmra.mxu3 %v3154_v0  ;;  %v9761_v13 = vpop.permute.xlu2 %4153  ;;  %v9764_v53 = vsub.f32 %v9161_v21, %v3674_v12  ;;  %v9767_v58 = vsel %vm11388_vm15, %v4245_v59, %v4184_v51  ;;  %4906 = vmatpush.msrb.mxu2 %v9772_v44  ;;  %v9780_v21 = vld [vmem:[%s10796_s2 + $0x10] sm:$0xff]  ;;  %vm11404_vm15 = vmmov %vm11389_vm13 }
 0x4bc   : > { %2069 = vst [vmem:[%s9315_s15 + $0xb9] sm:$0x1] %v2010_v45  ;;  %v2011_v32 = vrot.slane %v1985_v62, 1  ;;  %v2012_v47 = vrot.slane %v1985_v62, 2  ;;  %v2013_v16 = vrot.slane %v1985_v62, 3  ;;  %4273 = vmatmul.f32.gmra.mxu1 %v9767_v58  ;;  %4374 = vmatpush.msra.mxu3 %v9780_v21  ;;  %v2014_v9 = vrot.slane %v1985_v62, 4 }
 0x4bd   : > { %2070 = vst [vmem:[%s9315_s15 + $0xc1] sm:$0x1] %v1985_v62  ;;  %v3684_v2 = vmul.f32 %v9764_v53, %v9764_v53  ;;  %v2015_v18 = vrot.slane %v1985_v62, 5  ;;  %v2016_v23 = vrot.slane %v1985_v62, 6  ;;  %v2017_v10 = vrot.slane %v1985_v62, 7  ;;  %v9807_v45 = vld [vmem:[%s10796_s2] sm:$0xff] }
 0x4be   : > { %2071 = vst [vmem:[%s9315_s15 + $0xc9] sm:$0x1] %v2011_v32  ;;  %4375 = vmatpush.msra.mxu3 %v9792_v4  ;;  %v4194_v12 = vsel %vm1163_vm2, %v9320_v54, %v9435_v14 }
 0x4bf   : > { %2072 = vst [vmem:[%s9315_s15 + $0xd1] sm:$0x1] %v2012_v47  ;;  %v2569_v36 = vpop.f32.mrf.mxu3  ;;  %4768 = vrot.lane.b32.xlu1 %v9787_v41, %s11380_s7  ;;  %3710 = vmatmul.f32.gmra.mxu2 %v3684_v2  ;;  %v4198_v54 = vsel %vm11389_vm13, %v4194_v12, %v9354_v29  ;;  %vm11408_vm13 = vmmov %vm11396_vm14 }
 0x4c0   : > { %2073 = vst [vmem:[%s9315_s15 + $0xd9] sm:$0x1] %v2013_v16  ;;  %v2581_v20 = vmul.f32 %v9278_v11, %v2569_v36  ;;  %4784 = vrot.lane.b32.xlu0 %v9798_v27, %s11321_s29  ;;  %4376 = vmatpush.msra.mxu3 %v9807_v45  ;;  %v9830_v16 = vld [vmem:[#allocation2 + $0x110] sm:$0xff]  ;;  %v4202_v36 = vsel %vm1173_vm3, %v4198_v54, %v9569_v40 }
 0x4c1   : > { %2074 = vst [vmem:[%s9315_s15 + $0xe1] sm:$0x1] %v2014_v9  ;;  %v9813_v0 = vpop.permute.xlu1 %4073  ;;  %4564 = vrot.lane.b32.xlu2 %v9811_v61, %s11381_s16  ;;  %v4206_v40 = vsel %vm352_vm0, %v4202_v36, %v9584_v38  ;;  %v9864_v54 = vld [vmem:[#allocation2 + $0x130] sm:$0xff] }
 0x4c2   : > { %2075 = vst [vmem:[%s9315_s15 + $0xe9] sm:$0x1] %v2015_v18  ;;  %v2585_v60 = vadd.f32 %v9293_v52, %v2581_v20  ;;  %v9819_v22 = vpop.permute.xlu0 %4558  ;;  %v9835_v18 = vld [vmem:[#allocation2 + $0x38] sm:$0xff]  ;;  %v9870_v38 = vld [vmem:[#allocation2 + $0x150] sm:$0xff] }
 0x4c3   : > { %2076 = vst [vmem:[%s9315_s15 + $0xf1] sm:$0x1] %v2016_v23  ;;  %v9822_v5 = vpop.permute.xlu2 %4185 }
 0x4c4   : > { %2077 = vst [vmem:[%s9315_s15 + $0xf9] sm:$0x1] %v2017_v10  ;;  %v2593_v62 = vrot.slane %v2585_v60, 1  ;;  %v2594_v59 = vrot.slane %v2585_v60, 2  ;;  %v2595_v51 = vrot.slane %v2585_v60, 3  ;;  %v2596_v32 = vrot.slane %v2585_v60, 4 }
 0x4c5   : > { %2649 = vst [vmem:[%s9315_s15 + $0x2] sm:$0x1] %v2585_v60  ;;  %v2597_v47 = vrot.slane %v2585_v60, 5  ;;  %v2598_v9 = vrot.slane %v2585_v60, 6  ;;  %v2599_v14 = vrot.slane %v2585_v60, 7  ;;  %v9846_v10 = vld [vmem:[#allocation2 + $0x58] sm:$0xff] }
 0x4c6   : > { %2650 = vst [vmem:[%s9315_s15 + $0xa] sm:$0x1] %v2593_v62 }
 0x4c7   : > { %2651 = vst [vmem:[%s9315_s15 + $0x12] sm:$0x1] %v2594_v59  ;;  %v2572_v2 = vpop.f32.mrf.mxu3  ;;  %4674 = vrot.lane.b32.xlu1 %v9830_v16, %s6101_s14 }
 0x4c8   : > { %2652 = vst [vmem:[%s9315_s15 + $0x1a] sm:$0x1] %v2595_v51  ;;  %v2582_v23 = vmul.f32 %v9278_v11, %v2572_v2  ;;  %4580 = vrot.lane.b32.xlu0 %v9835_v18, %s6099_s19 }
 0x4c9   : > { %2653 = vst [vmem:[%s9315_s15 + $0x22] sm:$0x1] %v2596_v32  ;;  %v9848_v20 = vpop.permute.xlu1 %4574  ;;  %4596 = vrot.lane.b32.xlu2 %v9846_v10, %s6098_s10 }
 0x4ca   : > { %11390 = vst [vmem:[#allocation15_spill] sm:$0xff] %v9846_v10  ;;  %v2586_v29 = vadd.f32 %v9293_v52, %v2582_v23  ;;  %v9854_v60 = vpop.permute.xlu0 %4590 }
 0x4cb   : > { %2654 = vst [vmem:[%s9315_s15 + $0x2a] sm:$0x1] %v2597_v47  ;;  %v9857_v62 = vpop.permute.xlu2 %4560  ;;  %v3910_v47 = vld [vmem:[#allocation2 + $0xb8] sm:$0xff] }
 0x4cc   : > { %2655 = vst [vmem:[%s9315_s15 + $0x32] sm:$0x1] %v2598_v9  ;;  %v2600_v59 = vrot.slane %v2586_v29, 1  ;;  %v2601_v51 = vrot.slane %v2586_v29, 2  ;;  %v2602_v12 = vrot.slane %v2586_v29, 3  ;;  %v2603_v32 = vrot.slane %v2586_v29, 4 }
 0x4cd   : > { %2656 = vst [vmem:[%s9315_s15 + $0x3a] sm:$0x1] %v2599_v14  ;;  %v2604_v2 = vrot.slane %v2586_v29, 5  ;;  %v4210_v9 = vsel %vm1182_vm6, %v4206_v40, %v3910_v47  ;;  %v2605_v23 = vrot.slane %v2586_v29, 6  ;;  %v2606_v36 = vrot.slane %v2586_v29, 7  ;;  %v9879_v40 = vld [vmem:[#allocation2 + $0x170] sm:$0xff] }
 0x4ce   : > { %2657 = vst [vmem:[%s9315_s15 + $0x42] sm:$0x1] %v2586_v29  ;;  %v4214_v14 = vsel %vm1187_vm5, %v4210_v9, %v9668_v31 }
 0x4cf   : > { %2658 = vst [vmem:[%s9315_s15 + $0x4a] sm:$0x1] %v2600_v59  ;;  %v2575_v10 = vpop.f32.mrf.mxu3  ;;  %4690 = vrot.lane.b32.xlu1 %v9864_v54, %s6102_s9 }
 0x4d0   : > { %11391 = vst [vmem:[#allocation75_spill] sm:$0xff] %v9864_v54  ;;  %v2583_v59 = vmul.f32 %v9278_v11, %v2575_v10  ;;  %4706 = vrot.lane.b32.xlu0 %v9870_v38, %s10894_s25  ;;  %v4218_v10 = vsel %vm1192_vm7, %v4214_v14, %v9443_v49  ;;  %v9902_v14 = vld [vmem:[#allocation2 + $0x98] sm:$0xff] }
 0x4d1   : > { %2659 = vst [vmem:[%s9315_s15 + $0x52] sm:$0x1] %v2601_v51  ;;  %v4122_v51 = vpop.permute.xlu1 %4121  ;;  %4722 = vrot.lane.b32.xlu2 %v9879_v40, %s6104_s28 }
 0x4d2   : > { %11392 = vst [vmem:[#allocation37_spill] sm:$0xff] %v9870_v38  ;;  %v2587_v54 = vadd.f32 %v9293_v52, %v2583_v59  ;;  %v4138_v31 = vpop.permute.xlu0 %4137  ;;  %v9895_v38 = vld [vmem:[#allocation2 + $0x78] sm:$0xff] }
 0x4d3   : > { %2660 = vst [vmem:[%s9315_s15 + $0x5a] sm:$0x1] %v2602_v12  ;;  %v9888_v29 = vpop.permute.xlu2 %4592  ;;  %v4222_v12 = vsel %vm754_vm1, %v4218_v10, %v9813_v0 }
 0x4d4   : > { %2661 = vst [vmem:[%s9315_s15 + $0x62] sm:$0x1] %v2603_v32  ;;  %v2607_v32 = vrot.slane %v2587_v54, 1  ;;  %v2609_v9 = vrot.slane %v2587_v54, 3  ;;  %v2610_v59 = vrot.slane %v2587_v54, 4  ;;  %v4226_v49 = vsel %vm1201_vm8, %v4222_v12, %v9501_v3 }
 0x4d5   : > { %11393 = vst [vmem:[#allocation88_spill] sm:$0xff] %v9879_v40  ;;  %v2611_v40 = vrot.slane %v2587_v54, 5  ;;  %v4230_v12 = vsel %vm1206_vm9, %v4226_v49, %v9595_v34 }
 0x4d6   : > { %2662 = vst [vmem:[%s9315_s15 + $0x6a] sm:$0x1] %v2604_v2  ;;  %v2608_v2 = vrot.slane %v2587_v54, 2 }
 0x4d7   : > { %2663 = vst [vmem:[%s9315_s15 + $0x72] sm:$0x1] %v2605_v23  ;;  %v2612_v23 = vrot.slane %v2587_v54, 6  ;;  %v2578_v0 = vpop.f32.mrf.mxu3  ;;  %4612 = vrot.lane.b32.xlu1 %v9895_v38, %s6096_s30 }
 0x4d8   : > { %2664 = vst [vmem:[%s9315_s15 + $0x7a] sm:$0x1] %v2606_v36  ;;  %v2613_v36 = vrot.slane %v2587_v54, 7  ;;  %v2584_v10 = vmul.f32 %v9278_v11, %v2578_v0  ;;  %4628 = vrot.lane.b32.xlu0 %v9902_v14, %s6094_s26  ;;  %v4234_v11 = vsel %vm1211_vm10, %v4230_v12, %v4122_v51  ;;  %v9931_v51 = vld [vmem:[#allocation2 + $0x1b0] sm:$0xff] }
 0x4d9   : > { %2665 = vst [vmem:[%s9315_s15 + $0x82] sm:$0x1] %v2587_v54  ;;  %v9909_v3 = vpop.permute.xlu1 %4622  ;;  %4644 = vrot.lane.b32.xlu2 %v3910_v47, %s11234_s8  ;;  %v9926_v47 = vld [vmem:[#allocation2 + $0x190] sm:$0xff] }
 0x4da   : > { %2666 = vst [vmem:[%s9315_s15 + $0x8a] sm:$0x1] %v2607_v32  ;;  %v2588_v32 = vadd.f32 %v9293_v52, %v2584_v10  ;;  %v9916_v54 = vpop.permute.xlu0 %4638  ;;  %v4238_v52 = vsel %vm10909_vm11, %v4234_v11, %v4138_v31  ;;  %v4521_v31 = vld [vmem:[#allocation2 + $0xf8] sm:$0xff] }
 0x4db   : > { %2667 = vst [vmem:[%s9315_s15 + $0x92] sm:$0x1] %v2608_v2  ;;  %v9920_v2 = vpop.permute.xlu2 %4718 }
 0x4dc   : > { %2668 = vst [vmem:[%s9315_s15 + $0x9a] sm:$0x1] %v2609_v9  ;;  %v2614_v9 = vrot.slane %v2588_v32, 1  ;;  %v2617_v0 = vrot.slane %v2588_v32, 4  ;;  %v2618_v34 = vrot.slane %v2588_v32, 5  ;;  %v2619_v49 = vrot.slane %v2588_v32, 6 }
 0x4dd   : > { %2669 = vst [vmem:[%s9315_s15 + $0xa2] sm:$0x1] %v2610_v59  ;;  %v2616_v59 = vrot.slane %v2588_v32, 3 }
 0x4de   : > { %2670 = vst [vmem:[%s9315_s15 + $0xaa] sm:$0x1] %v2611_v40  ;;  %v2615_v40 = vrot.slane %v2588_v32, 2 }
 0x4df   : > { %2671 = vst [vmem:[%s9315_s15 + $0xb2] sm:$0x1] %v2612_v23  ;;  %4738 = vrot.lane.b32.xlu1 %v9926_v47, %s6105_s12  ;;  %v2620_v23 = vrot.slane %v2588_v32, 7 }
 0x4e0   : > { %2672 = vst [vmem:[%s9315_s15 + $0xba] sm:$0x1] %v2613_v36  ;;  %4754 = vrot.lane.b32.xlu0 %v9931_v51, %s6106_s13  ;;  %v4242_v36 = vsel %vm1221_vm12, %v4238_v52, %v9761_v13  ;;  %v9955_v13 = vld [vmem:[#allocation2 + $0x1f0] sm:$0xff] }
 0x4e1   : > { %2673 = vst [vmem:[%s9315_s15 + $0xc2] sm:$0x1] %v2588_v32  ;;  %v4170_v10 = vpop.permute.xlu1 %4169  ;;  %4660 = vrot.lane.b32.xlu2 %v4521_v31, %s6100_s27  ;;  %v9972_v31 = vld [vmem:[#allocation2 + $0x118] sm:$0xff] }
 0x4e2   : > { %2674 = vst [vmem:[%s9315_s15 + $0xca] sm:$0x1] %v2614_v9  ;;  %v4246_v12 = vsel %vm11396_vm14, %v4242_v36, %v4170_v10  ;;  %v4655_v11 = vpop.permute.xlu0 %4654  ;;  %v4794_v36 = vsel %vm1163_vm2, %v9819_v22, %v9848_v20  ;;  %v5093_v10 = vld [vmem:[#allocation2] sm:$0xff]  ;;  %vm11409_vm14 = vmmov %vm11397_vm4 }
 0x4e3   : > { %11394 = vst [vmem:[#allocation96_spill] sm:$0xff] %v9926_v47  ;;  %v9943_v9 = vpop.permute.xlu2 %4640  ;;  %v9947_v32 = vsel %vm11397_vm4, %v4246_v12, %v9822_v5  ;;  %v9983_v12 = vld [vmem:[#allocation2 + $0x158] sm:$0xff]  ;;  %v4798_v22 = vsel %vm11404_vm15, %v4794_v36, %v9854_v60  ;;  %v5097_v36 = vld [vmem:[#allocation2 + $0x20] sm:$0xff]  ;;  %vm11414_vm4 = vmmov %vm11404_vm15 }
 0x4e4   : > { %2675 = vst [vmem:[%s9315_s15 + $0xd2] sm:$0x1] %v2615_v40  ;;  %4276 = vmatmul.f32.gmra.mxu1 %v9947_v32  ;;  %v9951_v40 = vld [vmem:[#allocation2 + $0x1d0] sm:$0xff]  ;;  %v5141_v47 = vld [vmem:[#allocation2 + $0x180] sm:$0xff] }
 0x4e5   : > { %11395 = vst [vmem:[#allocation49_spill] sm:$0xff] %v9931_v51 }
 0x4e6   : > { %2676 = vst [vmem:[%s9315_s15 + $0xda] sm:$0x1] %v2616_v59  ;;  %v9959_v59 = vld [vmem:[#allocation2 + $0x138] sm:$0xff] }
 0x4e7   : > { %2677 = vst [vmem:[%s9315_s15 + $0xe2] sm:$0x1] %v2617_v0  ;;  %4770 = vrot.lane.b32.xlu1 %v9951_v40, %s11380_s7 }
 0x4e8   : > { %2678 = vst [vmem:[%s9315_s15 + $0xea] sm:$0x1] %v2618_v34  ;;  %4786 = vrot.lane.b32.xlu0 %v9955_v13, %s11321_s29 }
 0x4e9   : > { %2679 = vst [vmem:[%s9315_s15 + $0xf2] sm:$0x1] %v2619_v49  ;;  %v4671_v0 = vpop.permute.xlu1 %4670  ;;  %v4268_v52 = vpop.f32.mrf.mxu1  ;;  %4692 = vrot.lane.b32.xlu2 %v9959_v59, %s6102_s9 }
 0x4ea   : > { %2680 = vst [vmem:[%s9315_s15 + $0xfa] sm:$0x1] %v2620_v23  ;;  %v9964_v5 = vsub.f32 %v9253_v1, %v4268_v52  ;;  %v9966_v34 = vpop.permute.xlu0 %4576  ;;  %v6039_v1 = vld [vmem:[%s10797_s3 + $0x78] sm:$0xff] }
 0x4eb   : > { %11398 = vst [vmem:[#allocation100_spill] sm:$0xff] %v9951_v40  ;;  %v9968_v49 = vpop.permute.xlu2 %4656 }
 0x4ec   : > { %11399 = vst [vmem:[#allocation70_spill] sm:$0xff] %v9955_v13  ;;  %v4284_v23 = vmul.f32 %v9964_v5, %v9964_v5  ;;  %v10033_v13 = vld [vmem:[#allocation2 + $0x198] sm:$0xff] }
 0x4ed   : > { %11400 = vst [vmem:[#allocation48_spill] sm:$0xff] %v9959_v59  ;;  %v6043_v59 = vld [vmem:[%s10797_s3 + $0x58] sm:$0xff] }
 0x4ee   : > { %11401 = vst [vmem:[#allocation19_spill] sm:$0xff] %v9964_v5  ;;  %4304 = vmatmul.f32.vlgmr.msra.gmra.mxu2 %v4284_v23  ;;  %v6040_v23 = vld [vmem:[%s10797_s3 + $0x70] sm:$0xff] }
 0x4ef   : > { %11402 = vst [vmem:[#allocation125_spill] sm:$0xff] %v9972_v31  ;;  %4676 = vrot.lane.b32.xlu1 %v9972_v31, %s6101_s14  ;;  %5494 = vmatpush.msra.mxu2 %v6039_v1  ;;  %v4802_v1 = vsel %vm1173_vm3, %v4798_v22, %v9677_v24  ;;  %v5105_v22 = vld [vmem:[#allocation2 + $0x60] sm:$0xff] }
 0x4f0   : > { %5161 = vrot.lane.b32.xlu0 %v5093_v10, %s11321_s29  ;;  %11403 = vst [vmem:[#allocation143_spill] sm:$0xff] %v9983_v12  ;;  %v6041_v10 = vld [vmem:[%s10797_s3 + $0x68] sm:$0xff]  ;;  %v4806_v60 = vsel %vm352_vm0, %v4802_v1, %v9909_v3  ;;  %v6044_v3 = vld [vmem:[%s10797_s3 + $0x50] sm:$0xff] }
 0x4f1   : > { %v4687_v52 = vpop.permute.xlu1 %4686  ;;  %5495 = vmatpush.msra.mxu2 %v6040_v23  ;;  %4708 = vrot.lane.b32.xlu2 %v9983_v12, %s10894_s25  ;;  %v6042_v23 = vld [vmem:[%s10797_s3 + $0x60] sm:$0xff]  ;;  %v4810_v24 = vsel %vm1182_vm6, %v4806_v60, %v9916_v54  ;;  %11406 = vst [vmem:[#allocation147_spill] sm:$0xff] %v10033_v13  ;;  %s11415_s25 = smov 32  }
 0x4f2   : > { %v4703_v20 = vpop.permute.xlu0 %4702  ;;  %v5101_v12 = vld [vmem:[#allocation2 + $0x40] sm:$0xff] }
 0x4f3   : > { %v9992_v31 = vpop.permute.xlu2 %4562  ;;  %5496 = vmatpush.msra.mxu2 %v6041_v10 }
 0x4f5   : > { %5497 = vmatpush.msra.mxu2 %v6042_v23  ;;  %v4514_v23 = vld [vmem:[#allocation2 + $0xc0] sm:$0xff] }
 0x4f6   : > { %v4814_v54 = vsel %vm1187_vm5, %v4810_v24, %v4514_v23  ;;  %v6046_v24 = vld [vmem:[%s10797_s3 + $0x38] sm:$0xff] }
 0x4f7   : > { %5177 = vrot.lane.b32.xlu1 %v5097_v36, %s11381_s16  ;;  %5498 = vmatpush.msra.mxu2 %v6043_v59  ;;  %v6045_v59 = vld [vmem:[%s10797_s3 + $0x48] sm:$0xff]  ;;  %v4818_v60 = vsel %vm1192_vm7, %v4814_v54, %v4655_v11 }
 0x4f8   : > { %5193 = vrot.lane.b32.xlu0 %v5101_v12, %s6099_s19  ;;  %v4822_v36 = vsel %vm754_vm1, %v4818_v60, %v4671_v0  ;;  %v6047_v0 = vld [vmem:[%s10797_s3 + $0x30] sm:$0xff] }
 0x4f9   : > { %v10011_v10 = vpop.permute.xlu1 %4608  ;;  %5499 = vmatpush.msra.mxu2 %v6044_v3  ;;  %5209 = vrot.lane.b32.xlu2 %v5105_v22, %s6098_s10  ;;  %v10028_v3 = vld [vmem:[#allocation2 + $0x178] sm:$0xff]  ;;  %v4826_v22 = vsel %vm1201_vm8, %v4822_v36, %v4687_v52 }
 0x4fa   : > { %v10017_v1 = vpop.permute.xlu0 %4624  ;;  %11405 = vst [vmem:[#allocation10_spill] sm:$0xff] %v10028_v3  ;;  %v4830_v52 = vsel %vm1206_vm9, %v4826_v22, %v4703_v20 }
 0x4fb   : > { %5500 = vmatpush.msra.mxu2 %v6045_v59  ;;  %v10023_v12 = vpop.permute.xlu2 %4594  ;;  %v4834_v60 = vsel %vm1211_vm10, %v4830_v52, %v9920_v2 }
 0x4fd   : > { %5501 = vmatpush.msra.mxu2 %v9574_v46  ;;  %v10040_v46 = vld [vmem:[#allocation2 + $0x1b8] sm:$0xff] }
 0x4fe   : > { %11407 = vst [vmem:[#allocation40_spill] sm:$0xff] %v10040_v46 }
 0x4ff   : > { %4724 = vrot.lane.b32.xlu1 %v10028_v3, %s6104_s28  ;;  %5502 = vmatpush.msra.mxu2 %v6046_v24  ;;  %v5109_v24 = vld [vmem:[#allocation2 + $0x80] sm:$0xff] }
 0x500   : > { %4740 = vrot.lane.b32.xlu0 %v10033_v13, %s6105_s12 }
 0x501   : > { %v4735_v11 = vpop.permute.xlu1 %4734  ;;  %5503 = vmatpush.msra.mxu2 %v6047_v0  ;;  %4756 = vrot.lane.b32.xlu2 %v10040_v46, %s6106_s13  ;;  %v5113_v0 = vld [vmem:[#allocation2 + $0xa0] sm:$0xff] }
 0x502   : > { %v4751_v59 = vpop.permute.xlu0 %4750  ;;  %v4838_v36 = vsel %vm10909_vm11, %v4834_v60, %v4735_v11 }
 0x503   : > { %5504 = vmatpush.msra.mxu2 %v9657_v7  ;;  %v10049_v54 = vpop.permute.xlu2 %4720  ;;  %v4842_v20 = vsel %vm1221_vm12, %v4838_v36, %v4751_v59 }
 0x505   : > { %5505 = vmatpush.msra.mxu2 %v9683_v17 }
 0x507   : > { %5225 = vrot.lane.b32.xlu1 %v5109_v24, %s6096_s30  ;;  %5506 = vmatpush.msra.mxu2 %v9706_v28  ;;  %v10070_v28 = vld [vmem:[#allocation2 + $0x1d8] sm:$0xff] }
 0x508   : > { %5241 = vrot.lane.b32.xlu0 %v5113_v0, %s6094_s26  ;;  %11411 = vst [vmem:[#allocation114_spill] sm:$0xff] %v10070_v28  ;;  %v5125_v0 = vld [vmem:[#allocation2 + $0x100] sm:$0xff] }
 0x509   : > { %v4767_v7 = vpop.permute.xlu1 %4766  ;;  %5507 = vmatpush.msra.mxu2 %v9727_v15  ;;  %5257 = vrot.lane.b32.xlu2 %v4514_v23, %s11234_s8  ;;  %v10074_v15 = vld [vmem:[#allocation2 + $0x1f8] sm:$0xff]  ;;  %v5094_v23 = vld [vmem:[#allocation2 + $0x8] sm:$0xff] }
 0x50a   : > { %v4846_v2 = vsel %vm11408_vm13, %v4842_v20, %v4767_v7  ;;  %v4783_v17 = vpop.permute.xlu0 %4782  ;;  %11412 = vst [vmem:[#allocation52_spill] sm:$0xff] %v10074_v15 }
 0x50b   : > { %v10063_v22 = vsel %vm11409_vm14, %v4846_v2, %v4783_v17  ;;  %5508 = vmatpush.msra.mxu2 %v9747_v26  ;;  %v10066_v11 = vpop.permute.xlu2 %4642  ;;  %v5102_v2 = vld [vmem:[#allocation2 + $0x48] sm:$0xff] }
 0x50c   : > { %11410 = vst [vmem:[#allocation82_spill] sm:$0xff] %v10063_v22  ;;  %4870 = vmatmul.f32.vlgmr.msrb.gmra.mxu1 %v10063_v22 }
 0x50d   : > { %5509 = vmatpush.msra.mxu2 %v9772_v44  ;;  %v4795_v44 = vsel %vm1163_vm2, %v9857_v62, %v9966_v34 }
 0x50e   : > { %v4799_v20 = vsel %vm11414_vm4, %v4795_v44, %v9888_v29  ;;  %vm11416_vm4 = vcmask 916480  }
 0x50f   : > { %4772 = vrot.lane.b32.xlu1 %v10070_v28, %s11380_s7  ;;  %v4803_v7 = vsel %vm1173_vm3, %v4799_v20, %v10011_v10  ;;  %v5133_v10 = vld [vmem:[#allocation2 + $0x140] sm:$0xff] }
 0x510   : > { %4788 = vrot.lane.b32.xlu0 %v10074_v15, %s11321_s29  ;;  %v4807_v17 = vsel %vm352_vm0, %v4803_v7, %v10017_v1  ;;  %v5137_v1 = vld [vmem:[#allocation2 + $0x160] sm:$0xff] }
 0x511   : > { %v4673_v52 = vpop.permute.xlu1 %4672  ;;  %v4271_v59 = vpop.f32.mrf.mxu1  ;;  %5163 = vrot.lane.b32.xlu2 %v5094_v23, %s11321_s29  ;;  %v4811_v44 = vsel %vm1182_vm6, %v4807_v17, %v9943_v9 }
 0x512   : > { %v10080_v26 = vsub.f32 %v9409_v55, %v4271_v59  ;;  %v10082_v60 = vpop.permute.xlu0 %4578  ;;  %v5098_v55 = vld [vmem:[#allocation2 + $0x28] sm:$0xff] }
 0x513   : > { %v10089_v24 = vpop.permute.xlu2 %4658 }
 0x514   : > { %11413 = vst [vmem:[#allocation89_spill] sm:$0xff] %v10080_v26  ;;  %v4285_v36 = vmul.f32 %v10080_v26, %v10080_v26 }
 0x516   : > { %4307 = vmatmul.f32.gmra.mxu2 %v4285_v36  ;;  %v5129_v36 = vld [vmem:[#allocation2 + $0x120] sm:$0xff] }
 0x517   : > { %5273 = vrot.lane.b32.xlu1 %v5125_v0, %s6100_s27  ;;  %v10105_v0 = vld [vmem:[#allocation2 + $0xc8] sm:$0xff] }
 0x518   : > { %5179 = vrot.lane.b32.xlu0 %v5098_v55, %s11381_s16  ;;  %v4815_v20 = vsel %vm1187_vm5, %v4811_v44, %v10105_v0 }
 0x519   : > { %v4689_v62 = vpop.permute.xlu1 %4688  ;;  %5195 = vrot.lane.b32.xlu2 %v5102_v2, %s6099_s19  ;;  %v4819_v9 = vsel %vm1192_vm7, %v4815_v20, %v9968_v49  ;;  %v5106_v49 = vld [vmem:[#allocation2 + $0x68] sm:$0xff] }
 0x51a   : > { %v4705_v34 = vpop.permute.xlu0 %4704 }
 0x51b   : > { %v3702_v23 = vpop.f32.mrf.mxu2  ;;  %v10100_v59 = vpop.permute.xlu2 %4564 }
 0x51c   : > { %v3703_v29 = vadd.f32 1e-05, %v3702_v23 }
 0x51e   : > { %5938 = vrsqrt.f32 %v3703_v29  ;;  %vm3720_vm13 = vweird.f32 %v3703_v29 }
 0x51f   : > { %5289 = vrot.lane.b32.xlu1 %v5129_v36, %s6101_s14  ;;  %v4823_v36 = vsel %vm754_vm1, %v4819_v9, %v4673_v52  ;;  %v5110_v52 = vld [vmem:[#allocation2 + $0x88] sm:$0xff] }
 0x520   : > { %5305 = vrot.lane.b32.xlu0 %v5133_v10, %s6102_s9  ;;  %v4827_v44 = vsel %vm1201_vm8, %v4823_v36, %v4689_v62  ;;  %v10134_v62 = vld [vmem:[%s10799_s5] ss:$0 sm:$0xff] }
 0x521   : > { %v10110_v55 = vpop.permute.xlu1 %4610  ;;  %5321 = vrot.lane.b32.xlu2 %v5137_v1, %s11415_s25  ;;  %v10126_v1 = vld [vmem:[%s10798_s4] ss:$0 sm:$0xff] }
 0x522   : > { %v10113_v7 = vpop.permute.xlu0 %4626 }
 0x523   : > { %v3705_v2 = vpop.f32.mrf.mxu2  ;;  %v10117_v17 = vpop.permute.xlu2 %4596 }
 0x524   : > { %v5939_v23 = vpop.eup %5938  ;;  %v10120_v10 = vadd.f32 1e-05, %v3705_v2  ;;  %v3172_v26 = vpop.f32.mrf.mxu3  ;;  %v5114_v2 = vld [vmem:[#allocation2 + $0xa8] sm:$0xff] }
 0x525   : > { %v3715_v28 = vmul.f32 %v5939_v23, %v3703_v29  ;;  %v3184_v15 = vmul.f32 %v10126_v1, %v3172_v26  ;;  %v4831_v26 = vsel %vm1206_vm9, %v4827_v44, %v4705_v34  ;;  %vm3721_vm15 = vweird.f32 %v5939_v23 }
 0x526   : > { %5940 = vrsqrt.f32 %v10120_v10  ;;  %vm3722_vm14 = vmor %vm3720_vm13, %vm3721_vm15  ;;  %vm11417_vm13 = vcmask 982016  }
 0x527   : > { %5211 = vrot.lane.b32.xlu1 %v5106_v49, %s6098_s10  ;;  %v3716_v20 = vmul.f32 %v5939_v23, %v3715_v28  ;;  %v3188_v9 = vadd.f32 %v10134_v62, %v3184_v15 }
 0x528   : > { %5227 = vrot.lane.b32.xlu0 %v5110_v52, %s6096_s30 }
 0x529   : > { %v4737_v36 = vpop.permute.xlu1 %4736  ;;  %v3717_v46 = vmul.f32 0.5, %v3716_v20  ;;  %v3196_v3 = vrot.slane %v3188_v9, 1  ;;  %v3197_v49 = vrot.slane %v3188_v9, 2  ;;  %v3198_v13 = vrot.slane %v3188_v9, 3  ;;  %3252 = vst [vmem:[%s9315_s15 + $0x3] sm:$0x1] %v3188_v9  ;;  %5243 = vrot.lane.b32.xlu2 %v5114_v2, %s6094_s26 }
 0x52a   : > { %v4753_v28 = vpop.permute.xlu0 %4752  ;;  %v3199_v22 = vrot.slane %v3188_v9, 4  ;;  %v3200_v15 = vrot.slane %v3188_v9, 5  ;;  %v3201_v44 = vrot.slane %v3188_v9, 6  ;;  %v4835_v20 = vsel %vm1211_vm10, %v4831_v26, %v10049_v54  ;;  %v5145_v54 = vld [vmem:[#allocation2 + $0x1a0] sm:$0xff] }
 0x52b   : > { %v3718_v5 = vsub.f32 1.5, %v3717_v46  ;;  %3253 = vst [vmem:[%s9315_s15 + $0xb] sm:$0x1] %v3196_v3  ;;  %v10142_v52 = vpop.permute.xlu2 %4722  ;;  %v3202_v46 = vrot.slane %v3188_v9, 7  ;;  %v4839_v3 = vsel %vm10909_vm11, %v4835_v20, %v4737_v36 }
 0x52c   : > { %v10144_v34 = vpop.eup %5940  ;;  %3254 = vst [vmem:[%s9315_s15 + $0x13] sm:$0x1] %v3197_v49 }
 0x52d   : > { %v3719_v2 = vmul.f32 %v5939_v23, %v3718_v5  ;;  %v3725_v40 = vmul.f32 %v10144_v34, %v10120_v10  ;;  %3255 = vst [vmem:[%s9315_s15 + $0x1b] sm:$0x1] %v3198_v13  ;;  %v4843_v13 = vsel %vm1221_vm12, %v4839_v3, %v4753_v28  ;;  %vm3731_vm15 = vweird.f32 %v10144_v34 }
 0x52e   : > { %v3175_v51 = vpop.f32.mrf.mxu3  ;;  %3256 = vst [vmem:[%s9315_s15 + $0x23] sm:$0x1] %v3199_v22 }
 0x52f   : > { %v3185_v29 = vmul.f32 %v10126_v1, %v3175_v51  ;;  %5337 = vrot.lane.b32.xlu1 %v5141_v47, %s6104_s28  ;;  %v3723_v5 = vsel %vm3722_vm14, %v5939_v23, %v3719_v2  ;;  %v3726_v26 = vmul.f32 %v10144_v34, %v3725_v40  ;;  %3257 = vst [vmem:[%s9315_s15 + $0x2b] sm:$0x1] %v3200_v15  ;;  %v5149_v51 = vld [vmem:[#allocation2 + $0x1c0] sm:$0xff]  ;;  %vm3730_vm14 = vweird.f32 %v10120_v10 }
 0x530   : > { %v3708_v49 = vpop.f32.mrf.mxu2  ;;  %5353 = vrot.lane.b32.xlu0 %v5145_v54, %s6105_s12  ;;  %3258 = vst [vmem:[%s9315_s15 + $0x33] sm:$0x1] %v3201_v44  ;;  %v3754_v36 = vmul.f32 %v3723_v5, %v9404_v39 }
 0x531   : > { %v3189_v9 = vadd.f32 %v10134_v62, %v3185_v29  ;;  %v10163_v22 = vadd.f32 1e-05, %v3708_v49  ;;  %v4769_v47 = vpop.permute.xlu1 %4768  ;;  %v3727_v20 = vmul.f32 0.5, %v3726_v26  ;;  %3259 = vst [vmem:[%s9315_s15 + $0x3b] sm:$0x1] %v3202_v46  ;;  %5369 = vrot.lane.b32.xlu2 %v5149_v51, %s6106_s13 }
 0x532   : > { %v4847_v40 = vsel %vm11416_vm4, %v4843_v13, %v4769_v47  ;;  %v4785_v23 = vpop.permute.xlu0 %4784  ;;  %3774 = vmatmul.f32.vlgmr.msrb.gmra.mxu3 %v3754_v36  ;;  %v5153_v13 = vld [vmem:[#allocation2 + $0x1e0] sm:$0xff]  ;;  %vm3732_vm4 = vmor %vm3730_vm14, %vm3731_vm15  ;;  %vm11418_vm15 = vcmask 130048  }
 0x533   : > { %v3203_v15 = vrot.slane %v3189_v9, 1  ;;  %v3204_v44 = vrot.slane %v3189_v9, 2  ;;  %v3205_v28 = vrot.slane %v3189_v9, 3  ;;  %3260 = vst [vmem:[%s9315_s15 + $0x43] sm:$0x1] %v3189_v9  ;;  %v3728_v2 = vsub.f32 1.5, %v3727_v20  ;;  %v10170_v29 = vpop.permute.xlu2 %4644  ;;  %4964 = vmatpush.msrb.mxu3 %v9497_v50 }
 0x534   : > { %v3206_v3 = vrot.slane %v3189_v9, 4  ;;  %v3207_v39 = vrot.slane %v3189_v9, 5  ;;  %5942 = vrsqrt.f32 %v10163_v22  ;;  %v10177_v46 = vsel %vm11417_vm13, %v4847_v40, %v4785_v23 }
 0x535   : > { %3261 = vst [vmem:[%s9315_s15 + $0x4b] sm:$0x1] %v3203_v15  ;;  %v3208_v54 = vrot.slane %v3189_v9, 6  ;;  %4873 = vmatmul.f32.gmra.mxu1 %v10177_v46  ;;  %v3729_v26 = vmul.f32 %v10144_v34, %v3728_v2  ;;  %4965 = vmatpush.msrb.mxu3 %v9514_v42  ;;  %v3209_v50 = vrot.slane %v3189_v9, 7  ;;  %v5095_v9 = vld [vmem:[#allocation2 + $0x10] sm:$0xff]  ;;  %vm3740_vm14 = vweird.f32 %v10163_v22 }
 0x536   : > { %3262 = vst [vmem:[%s9315_s15 + $0x53] sm:$0x1] %v3204_v44  ;;  %v3178_v5 = vpop.f32.mrf.mxu3 }
 0x537   : > { %3263 = vst [vmem:[%s9315_s15 + $0x5b] sm:$0x1] %v3205_v28  ;;  %v3186_v49 = vmul.f32 %v10126_v1, %v3178_v5  ;;  %5259 = vrot.lane.b32.xlu1 %v10105_v0, %s11234_s8  ;;  %v3733_v10 = vsel %vm3732_vm4, %v10144_v34, %v3729_v26  ;;  %4966 = vmatpush.msrb.mxu3 %v9533_v19 }
 0x538   : > { %3264 = vst [vmem:[%s9315_s15 + $0x63] sm:$0x1] %v3206_v3  ;;  %5385 = vrot.lane.b32.xlu0 %v5153_v13, %s11380_s7  ;;  %v3755_v51 = vmul.f32 %v3733_v10, %v9441_v57 }
 0x539   : > { %3265 = vst [vmem:[%s9315_s15 + $0x6b] sm:$0x1] %v3207_v39  ;;  %v3190_v42 = vadd.f32 %v10134_v62, %v3186_v49  ;;  %v10197_v0 = vpop.permute.xlu1 %4674  ;;  %v4274_v36 = vpop.f32.mrf.mxu1  ;;  %5165 = vrot.lane.b32.xlu2 %v5095_v9, %s11321_s29  ;;  %4967 = vmatpush.msrb.mxu3 %v9559_v6  ;;  %v4796_v6 = vsel %vm1163_vm2, %v9992_v31, %v10082_v60  ;;  %v5099_v60 = vld [vmem:[#allocation2 + $0x30] sm:$0xff] }
 0x53a   : > { %3266 = vst [vmem:[%s9315_s15 + $0x73] sm:$0x1] %v3208_v54  ;;  %v10202_v47 = vsub.f32 %v9767_v58, %v4274_v36  ;;  %v10204_v34 = vpop.permute.xlu0 %4580  ;;  %v10207_v19 = vpop.eup %5942  ;;  %3777 = vmatmul.f32.gmra.mxu3 %v3755_v51  ;;  %v5126_v54 = vld [vmem:[#allocation2 + $0x108] sm:$0xff]  ;;  %v4800_v5 = vsel %vm11418_vm15, %v4796_v6, %v10023_v12  ;;  %v5103_v49 = vld [vmem:[#allocation2 + $0x50] sm:$0xff] }
 0x53b   : > { %3267 = vst [vmem:[%s9315_s15 + $0x7b] sm:$0x1] %v3209_v50  ;;  %v3210_v57 = vrot.slane %v3190_v42, 1  ;;  %v3211_v20 = vrot.slane %v3190_v42, 2  ;;  %v3212_v40 = vrot.slane %v3190_v42, 3  ;;  %v3735_v23 = vmul.f32 %v10207_v19, %v10163_v22  ;;  %v10213_v58 = vpop.permute.xlu2 %4660  ;;  %4968 = vmatpush.msrb.mxu3 %v9589_v48  ;;  %v5134_v6 = vld [vmem:[#allocation2 + $0x148] sm:$0xff] }
 0x53c   : > { %v3213_v15 = vrot.slane %v3190_v42, 4  ;;  %3268 = vst [vmem:[%s9315_s15 + $0x83] sm:$0x1] %v3190_v42  ;;  %v3214_v44 = vrot.slane %v3190_v42, 5  ;;  %v4286_v28 = vmul.f32 %v10202_v47, %v10202_v47  ;;  %v3215_v3 = vrot.slane %v3190_v42, 6 }
 0x53d   : > { %3269 = vst [vmem:[%s9315_s15 + $0x8b] sm:$0x1] %v3210_v57  ;;  %v3736_v2 = vmul.f32 %v10207_v19, %v3735_v23  ;;  %4969 = vmatpush.msrb.mxu3 %v9608_v8  ;;  %v3216_v48 = vrot.slane %v3190_v42, 7  ;;  %v4804_v8 = vsel %vm1173_vm3, %v4800_v5, %v10110_v55  ;;  %vm3741_vm13 = vweird.f32 %v10207_v19  ;;  %v5115_v5 = vld [vmem:[#allocation2 + $0xb0] sm:$0xff] }
 0x53e   : > { %3270 = vst [vmem:[%s9315_s15 + $0x93] sm:$0x1] %v3211_v20  ;;  %v3181_v39 = vpop.f32.mrf.mxu3  ;;  %4310 = vmatmul.f32.gmra.mxu2 %v4286_v28  ;;  %v4808_v51 = vsel %vm352_vm0, %v4804_v8, %v10113_v7  ;;  %vm3742_vm4 = vmor %vm3740_vm14, %vm3741_vm13  ;;  %v5130_v7 = vld [vmem:[#allocation2 + $0x128] sm:$0xff] }
 0x53f   : > { %3271 = vst [vmem:[%s9315_s15 + $0x9b] sm:$0x1] %v3212_v40  ;;  %v3187_v31 = vmul.f32 %v10126_v1, %v3181_v39  ;;  %5275 = vrot.lane.b32.xlu1 %v5126_v54, %s6100_s27  ;;  %v3737_v26 = vmul.f32 0.5, %v3736_v2  ;;  %4970 = vmatpush.msrb.mxu3 %v9627_v56 }
 0x540   : > { %3272 = vst [vmem:[%s9315_s15 + $0xa3] sm:$0x1] %v3213_v15  ;;  %5181 = vrot.lane.b32.xlu0 %v5099_v60, %s11381_s16  ;;  %v4812_v15 = vsel %vm1182_vm6, %v4808_v51, %v10066_v11  ;;  %v5138_v11 = vld [vmem:[#allocation2 + $0x168] sm:$0xff]  ;;  %v5111_v60 = vld [vmem:[#allocation2 + $0x90] sm:$0xff] }
 0x541   : > { %3273 = vst [vmem:[%s9315_s15 + $0xab] sm:$0x1] %v3214_v44  ;;  %v3191_v50 = vadd.f32 %v10134_v62, %v3187_v31  ;;  %v4691_v13 = vpop.permute.xlu1 %4690  ;;  %v3738_v10 = vsub.f32 1.5, %v3737_v26  ;;  %5197 = vrot.lane.b32.xlu2 %v5103_v49, %s6099_s19  ;;  %4971 = vmatpush.msrb.mxu3 %v9649_v35 }
 0x542   : > { %3274 = vst [vmem:[%s9315_s15 + $0xb3] sm:$0x1] %v3215_v3  ;;  %v4707_v12 = vpop.permute.xlu0 %4706  ;;  %v3711_v42 = vpop.f32.mrf.mxu2 }
 0x543   : > { %3275 = vst [vmem:[%s9315_s15 + $0xbb] sm:$0x1] %v3216_v48  ;;  %v3217_v56 = vrot.slane %v3191_v50, 1  ;;  %v3218_v9 = vrot.slane %v3191_v50, 2  ;;  %v3219_v55 = vrot.slane %v3191_v50, 3  ;;  %v3220_v36 = vrot.slane %v3191_v50, 4  ;;  %v10245_v57 = vpop.permute.xlu2 %4692  ;;  %4972 = vmatpush.msrb.mxu3 %v9673_v37 }
 0x544   : > { %3276 = vst [vmem:[%s9315_s15 + $0xc3] sm:$0x1] %v3191_v50  ;;  %v3221_v35 = vrot.slane %v3191_v50, 5  ;;  %v3712_v20 = vadd.f32 1e-05, %v3711_v42  ;;  %v3739_v40 = vmul.f32 %v10207_v19, %v3738_v10  ;;  %v3222_v23 = vrot.slane %v3191_v50, 6 }
 0x545   : > { %3277 = vst [vmem:[%s9315_s15 + $0xcb] sm:$0x1] %v3217_v56  ;;  %4973 = vmatpush.msrb.mxu3 %v9693_v33  ;;  %v3223_v37 = vrot.slane %v3191_v50, 7  ;;  %v4516_v33 = vld [vmem:[#allocation2 + $0xd0] sm:$0xff]  ;;  %v5146_v10 = vld [vmem:[#allocation2 + $0x1a8] sm:$0xff] }
 0x546   : > { %3278 = vst [vmem:[%s9315_s15 + $0xd3] sm:$0x1] %v3218_v9  ;;  %5944 = vrsqrt.f32 %v3712_v20  ;;  %v3743_v22 = vsel %vm3742_vm4, %v10207_v19, %v3739_v40  ;;  %v4816_v2 = vsel %vm1187_vm5, %v4812_v15, %v4516_v33  ;;  %v5107_v48 = vld [vmem:[#allocation2 + $0x70] sm:$0xff]  ;;  %vm3750_vm13 = vweird.f32 %v3712_v20 }
 0x547   : > { %3279 = vst [vmem:[%s9315_s15 + $0xdb] sm:$0x1] %v3219_v55  ;;  %5291 = vrot.lane.b32.xlu1 %v5130_v7, %s6101_s14  ;;  %v3756_v44 = vmul.f32 %v3743_v22, %v9566_v43  ;;  %4974 = vmatpush.msrb.mxu3 %v9717_v30  ;;  %v4820_v30 = vsel %vm1192_vm7, %v4816_v2, %v10089_v24  ;;  %vm11419_vm4 = vcmask 916480   ;;  %v11424_v22 = vld [vmem:[#allocation37_spill] sm:$0xff] }
 0x548   : > { %3280 = vst [vmem:[%s9315_s15 + $0xe3] sm:$0x1] %v3220_v36  ;;  %5307 = vrot.lane.b32.xlu0 %v5134_v6, %s6102_s9  ;;  %v4824_v39 = vsel %vm754_vm1, %v4820_v30, %v10197_v0  ;;  %v5116_v30 = vld [vmem:[#allocation2 + $0xb8] sm:$0xff] }
 0x549   : > { %3281 = vst [vmem:[%s9315_s15 + $0xeb] sm:$0x1] %v3221_v35  ;;  %v10263_v28 = vpop.permute.xlu1 %4612  ;;  %3780 = vmatmul.f32.gmra.mxu3 %v3756_v44  ;;  %5323 = vrot.lane.b32.xlu2 %v5138_v11, %s11415_s25  ;;  %v4828_v31 = vsel %vm1201_vm8, %v4824_v39, %v4691_v13  ;;  %v5142_v13 = vld [vmem:[#allocation2 + $0x188] sm:$0xff] }
 0x54a   : > { %3282 = vst [vmem:[%s9315_s15 + $0xf3] sm:$0x1] %v3222_v23  ;;  %v10268_v19 = vpop.permute.xlu0 %4628  ;;  %4975 = vmatpush.msrb.mxu3 %v9738_v25 }
 0x54b   : > { %3283 = vst [vmem:[%s9315_s15 + $0xfb] sm:$0x1] %v3223_v37  ;;  %v10272_v43 = vpop.permute.xlu2 %4708  ;;  %v4517_v37 = vld [vmem:[#allocation2 + $0xd8] sm:$0xff] }
 0x54c   : > { %v5945_v3 = vpop.eup %5944  ;;  %4976 = vmatpush.msrb.mxu3 %v9757_v63  ;;  %v4832_v63 = vsel %vm1206_vm9, %v4828_v31, %v4707_v12 }
 0x54d   : > { %v3745_v54 = vmul.f32 %v5945_v3, %v3712_v20  ;;  %vm3751_vm15 = vweird.f32 %v5945_v3  ;;  %v4797_v20 = vsel %vm1163_vm2, %v10100_v59, %v10204_v34  ;;  %v11422_v34 = vld [vmem:[#allocation15_spill] sm:$0xff] }
 0x54e   : > { %4977 = vmatpush.msrb.mxu3 %v9780_v21  ;;  %v4836_v21 = vsel %vm1211_vm10, %v4832_v63, %v10142_v52  ;;  %vm3752_vm14 = vmor %vm3750_vm13, %vm3751_vm15  ;;  %vm11426_vm15 = vcmask 785408  }
 0x54f   : > { %5213 = vrot.lane.b32.xlu1 %v5107_v48, %s6098_s10  ;;  %v3746_v25 = vmul.f32 %v5945_v3, %v3745_v54 }
 0x550   : > { %5229 = vrot.lane.b32.xlu0 %v5111_v60, %s6096_s30  ;;  %4978 = vmatpush.msrb.mxu3 %v9792_v4 }
 0x551   : > { %v4739_v26 = vpop.permute.xlu1 %4738  ;;  %v3747_v24 = vmul.f32 0.5, %v3746_v25  ;;  %5245 = vrot.lane.b32.xlu2 %v5115_v5, %s6094_s26 }
 0x552   : > { %v4755_v0 = vpop.permute.xlu0 %4754  ;;  %4979 = vmatpush.msrb.mxu3 %v9807_v45  ;;  %v4840_v49 = vsel %vm10909_vm11, %v4836_v21, %v4739_v26  ;;  %vm11420_vm11 = vcmask 982016   ;;  %v11428_v26 = vld [vmem:[#allocation49_spill] sm:$0xff] }
 0x553   : > { %v3748_v8 = vsub.f32 1.5, %v3747_v24  ;;  %v10287_v50 = vpop.permute.xlu2 %5209  ;;  %v4844_v45 = vsel %vm1221_vm12, %v4840_v49, %v4755_v0  ;;  %v11429_v0 = vld [vmem:[#allocation100_spill] sm:$0xff] }
 0x555   : > { %v3749_v4 = vmul.f32 %v5945_v3, %v3748_v8 }
 0x557   : > { %5339 = vrot.lane.b32.xlu1 %v5142_v13, %s6104_s28  ;;  %v3753_v12 = vsel %vm3752_vm14, %v5945_v3, %v3749_v4  ;;  %vm11430_vm14 = vmmov %vm11419_vm4 }
 0x558   : > { %5355 = vrot.lane.b32.xlu0 %v5146_v10, %s6105_s12  ;;  %v3757_v56 = vmul.f32 %v3753_v12, %v9764_v53  ;;  %v11432_v12 = vld [vmem:[#allocation19_spill] sm:$0xff] }
 0x559   : > { %v4771_v42 = vpop.permute.xlu1 %4770  ;;  %5371 = vrot.lane.b32.xlu2 %v9787_v41, %s6106_s13 }
 0x55a   : > { %v4848_v52 = vsel %vm11419_vm4, %v4844_v45, %v4771_v42  ;;  %v4787_v9 = vpop.permute.xlu0 %4786  ;;  %3783 = vmatmul.f32.gmra.mxu3 %v3757_v56  ;;  %v11433_v42 = vld [vmem:[#allocation70_spill] sm:$0xff] }
 0x55b   : > { %v10300_v55 = vsel %vm11420_vm11, %v4848_v52, %v4787_v9  ;;  %v4757_v51 = vpop.permute.xlu2 %4756  ;;  %vm11421_vm11 = vcmask 130048   ;;  %v6050_v9 = vld [vmem:[%s10796_s2 + $0x78] sm:$0xff] }
 0x55c   : > { %4876 = vmatmul.f32.gmra.mxu1 %v10300_v55 }
 0x55f   : > { %5261 = vrot.lane.b32.xlu1 %v4516_v33, %s11234_s8  ;;  %v11425_v33 = vld [vmem:[#allocation88_spill] sm:$0xff] }
 0x560   : > { %5387 = vrot.lane.b32.xlu0 %v9798_v27, %s11380_s7  ;;  %v4801_v27 = vsel %vm11421_vm11, %v4797_v20, %v10117_v17  ;;  %vm11431_vm11 = vcmask 982016  }
 0x561   : > { %v4277_v36 = vpop.f32.mrf.mxu1  ;;  %v4677_v53 = vpop.permute.xlu1 %4676  ;;  %5167 = vrot.lane.b32.xlu2 %v9811_v61, %s11321_s29  ;;  %v4805_v61 = vsel %vm1173_vm3, %v4801_v27, %v10263_v28  ;;  %v6051_v27 = vld [vmem:[%s10796_s2 + $0x70] sm:$0xff] }
 0x562   : > { %v10309_v41 = vsub.f32 %v9947_v32, %v4277_v36  ;;  %v10311_v35 = vpop.permute.xlu0 %5161  ;;  %v4809_v59 = vsel %vm352_vm0, %v4805_v61, %v10268_v19  ;;  %v11435_v36 = vld [vmem:[#allocation82_spill] sm:$0xff] }
 0x563   : > { %v10318_v23 = vpop.permute.xlu2 %5257  ;;  %v4813_v15 = vsel %vm1182_vm6, %v4809_v59, %v10170_v29  ;;  %v6052_v59 = vld [vmem:[%s10796_s2 + $0x68] sm:$0xff] }
 0x564   : > { %v4287_v40 = vmul.f32 %v10309_v41, %v10309_v41 }
 0x566   : > { %4313 = vmatmul.f32.gmra.mxu2 %v4287_v40 }
 0x567   : > { %5277 = vrot.lane.b32.xlu1 %v9830_v16, %s6100_s27  ;;  %v11423_v16 = vld [vmem:[#allocation75_spill] sm:$0xff] }
 0x568   : > { %5183 = vrot.lane.b32.xlu0 %v9835_v18, %s11381_s16  ;;  %v4817_v18 = vsel %vm1187_vm5, %v4813_v15, %v4517_v37 }
 0x569   : > { %v5178_v32 = vpop.permute.xlu1 %5177  ;;  %5199 = vrot.lane.b32.xlu2 %v11422_v34, %s6099_s19  ;;  %v4821_v2 = vsel %vm1192_vm7, %v4817_v18, %v10213_v58 }
 0x56a   : > { %v10332_v7 = vpop.permute.xlu0 %5193  ;;  %v4825_v29 = vsel %vm754_vm1, %v4821_v2, %v4677_v53  ;;  %v5397_v40 = vsel %vm1163_vm2, %v10311_v35, %v5178_v32  ;;  %v11437_v35 = vld [vmem:[#allocation125_spill] sm:$0xff]  ;;  %v6053_v32 = vld [vmem:[%s10796_s2 + $0x60] sm:$0xff] }
 0x56b   : > { %v10334_v17 = vpop.permute.xlu2 %5163  ;;  %v4829_v3 = vsel %vm1201_vm8, %v4825_v29, %v10245_v57  ;;  %v6057_v2 = vld [vmem:[%s10796_s2 + $0x40] sm:$0xff] }
 0x56c   : > { %v4833_v58 = vsel %vm1206_vm9, %v4829_v3, %v10272_v43 }
 0x56f   : > { %5293 = vrot.lane.b32.xlu1 %v11423_v16, %s6101_s14 }
 0x570   : > { %5309 = vrot.lane.b32.xlu0 %v11424_v22, %s6102_s9 }
 0x571   : > { %v4725_v6 = vpop.permute.xlu1 %4724  ;;  %v4305_v44 = vpop.f32.mrf.mxu2  ;;  %5325 = vrot.lane.b32.xlu2 %v11425_v33, %s11415_s25  ;;  %v6055_v33 = vld [vmem:[%s10796_s2 + $0x50] sm:$0xff] }
 0x572   : > { %v4306_v11 = vadd.f32 1e-05, %v4305_v44  ;;  %v4741_v28 = vpop.permute.xlu0 %4740  ;;  %v4837_v31 = vsel %vm1211_vm10, %v4833_v58, %v4725_v6  ;;  %v11439_v6 = vld [vmem:[#allocation147_spill] sm:$0xff]  ;;  %v6058_v58 = vld [vmem:[%s10796_s2 + $0x38] sm:$0xff] }
 0x573   : > { %v10348_v19 = vpop.permute.xlu2 %5195 }
 0x574   : > { %5946 = vrsqrt.f32 %v4306_v11  ;;  %vm4323_vm4 = vweird.f32 %v4306_v11 }
 0x577   : > { %5215 = vrot.lane.b32.xlu1 %v9895_v38, %s6098_s10  ;;  %v4841_v38 = vsel %vm11426_vm15, %v4837_v31, %v4741_v28  ;;  %v11440_v28 = vld [vmem:[#allocation10_spill] sm:$0xff]  ;;  %v11442_v31 = vld [vmem:[#allocation52_spill] sm:$0xff] }
 0x578   : > { %5231 = vrot.lane.b32.xlu0 %v9902_v14, %s6096_s30  ;;  %v11427_v14 = vld [vmem:[#allocation96_spill] sm:$0xff]  ;;  %v4845_v43 = vsel %vm1221_vm12, %v4841_v38, %v4757_v51  ;;  %v6059_v38 = vld [vmem:[%s10796_s2 + $0x30] sm:$0xff] }
 0x579   : > { %v5226_v39 = vpop.permute.xlu1 %5225  ;;  %5247 = vrot.lane.b32.xlu2 %v5116_v30, %s6094_s26  ;;  %v11434_v51 = vld [vmem:[#allocation48_spill] sm:$0xff] }
 0x57a   : > { %v5947_v54 = vpop.eup %5946  ;;  %v5242_v48 = vpop.permute.xlu0 %5241  ;;  %v11441_v30 = vld [vmem:[#allocation40_spill] sm:$0xff] }
 0x57b   : > { %v4318_v60 = vmul.f32 %v5947_v54, %v4306_v11  ;;  %v10360_v25 = vpop.permute.xlu2 %5321  ;;  %vm4324_vm13 = vweird.f32 %v5947_v54 }
 0x57c   : > { %vm4325_vm15 = vmor %vm4323_vm4, %vm4324_vm13  ;;  %vm11436_vm13 = vcmask 130048  }
 0x57d   : > { %v4319_v57 = vmul.f32 %v5947_v54, %v4318_v60  ;;  %v5401_v34 = vsel %vm11436_vm13, %v5397_v40, %v10332_v7  ;;  %v6054_v7 = vld [vmem:[%s10796_s2 + $0x58] sm:$0xff]  ;;  %vm11446_vm13 = vcmask 982016  }
 0x57e   : > { %v5405_v16 = vsel %vm1173_vm3, %v5401_v34, %v10287_v50  ;;  %v6056_v50 = vld [vmem:[%s10796_s2 + $0x48] sm:$0xff] }
 0x57f   : > { %v4320_v5 = vmul.f32 0.5, %v4319_v57  ;;  %5341 = vrot.lane.b32.xlu1 %v11427_v14, %s6104_s28  ;;  %v5409_v22 = vsel %vm352_vm0, %v5405_v16, %v5226_v39  ;;  %v11447_v16 = vld [vmem:[#allocation89_spill] sm:$0xff] }
 0x580   : > { %5357 = vrot.lane.b32.xlu0 %v11428_v26, %s6105_s12  ;;  %v5413_v11 = vsel %vm1182_vm6, %v5409_v22, %v5242_v48  ;;  %v5121_v48 = vld [vmem:[#allocation2 + $0xe0] sm:$0xff]  ;;  %v6060_v26 = vld [vmem:[%s10796_s2 + $0x28] sm:$0xff] }
 0x581   : > { %v4321_v63 = vsub.f32 1.5, %v4320_v5  ;;  %v4773_v24 = vpop.permute.xlu1 %4772  ;;  %5373 = vrot.lane.b32.xlu2 %v11429_v0, %s6106_s13  ;;  %v5417_v29 = vsel %vm1187_vm5, %v5413_v11, %v10318_v23 }
 0x582   : > { %v4849_v8 = vsel %vm11430_vm14, %v4845_v43, %v4773_v24  ;;  %v4789_v21 = vpop.permute.xlu0 %4788  ;;  %v5421_v23 = vsel %vm1192_vm7, %v5417_v29, %v5121_v48  ;;  %v6061_v43 = vld [vmem:[%s10796_s2 + $0x20] sm:$0xff]  ;;  %vm11444_vm14 = vcmask 785408  }
 0x583   : > { %v4322_v49 = vmul.f32 %v5947_v54, %v4321_v63  ;;  %v10372_v13 = vsel %vm11431_vm11, %v4849_v8, %v4789_v21  ;;  %v10374_v4 = vpop.permute.xlu2 %5243  ;;  %v11443_v63 = vld [vmem:[#allocation114_spill] sm:$0xff]  ;;  %vm11445_vm11 = vcmask 916480  }
 0x584   : > { %4879 = vmatmul.f32.gmra.mxu1 %v10372_v13  ;;  %v6062_v8 = vld [vmem:[%s10796_s2 + $0x18] sm:$0xff] }
 0x585   : > { %v4326_v10 = vsel %vm4325_vm15, %v5947_v54, %v4322_v49 }
 0x586   : > { %v4357_v45 = vmul.f32 %v4326_v10, %v11432_v12 }
 0x587   : > { %5263 = vrot.lane.b32.xlu1 %v4517_v37, %s11234_s8  ;;  %v11438_v37 = vld [vmem:[#allocation143_spill] sm:$0xff] }
 0x588   : > { %5389 = vrot.lane.b32.xlu0 %v11433_v42, %s11380_s7  ;;  %4377 = vmatmul.f32.vlgmr.msra.gmra.mxu3 %v4357_v45  ;;  %v6063_v42 = vld [vmem:[%s10796_s2 + $0x10] sm:$0xff] }
 0x589   : > { %v5274_v56 = vpop.permute.xlu1 %5273  ;;  %v4871_v52 = vpop.f32.mrf.mxu1  ;;  %5567 = vmatpush.msra.mxu3 %v6050_v9  ;;  %5295 = vrot.lane.b32.xlu2 %v11434_v51, %s6101_s14  ;;  %v6064_v9 = vld [vmem:[%s10796_s2 + $0x8] sm:$0xff] }
 0x58a   : > { %v10387_v53 = vsub.f32 %v11435_v36, %v4871_v52  ;;  %v10389_v20 = vpop.permute.xlu0 %5179  ;;  %v5425_v5 = vsel %vm754_vm1, %v5421_v23, %v5274_v56 }
 0x58b   : > { %5568 = vmatpush.msra.mxu3 %v6051_v27  ;;  %v10403_v15 = vpop.permute.xlu2 %5369 }
 0x58c   : > { %v4887_v61 = vmul.f32 %v10387_v53, %v10387_v53 }
 0x58d   : > { %5569 = vmatpush.msra.mxu3 %v6052_v59 }
 0x58e   : > { %4907 = vmatmul.f32.vlgmr.msrb.gmra.mxu2 %v4887_v61 }
 0x58f   : > { %5279 = vrot.lane.b32.xlu1 %v11437_v35, %s6100_s27  ;;  %5570 = vmatpush.msra.mxu3 %v6053_v32 }
 0x590   : > { %5311 = vrot.lane.b32.xlu0 %v11438_v37, %s6102_s9 }
 0x591   : > { %v5290_v18 = vpop.permute.xlu1 %5289  ;;  %5571 = vmatpush.msra.mxu3 %v6054_v7  ;;  %5343 = vrot.lane.b32.xlu2 %v11439_v6, %s6104_s28 }
 0x592   : > { %v5306_v44 = vpop.permute.xlu0 %5305  ;;  %v5429_v14 = vsel %vm1201_vm8, %v5425_v5, %v5290_v18 }
 0x593   : > { %5572 = vmatpush.msra.mxu3 %v6055_v33  ;;  %v10434_v3 = vpop.permute.xlu2 %5165  ;;  %v5433_v24 = vsel %vm1206_vm9, %v5429_v14, %v5306_v44  ;;  %v5398_v44 = vsel %vm1163_vm2, %v10334_v17, %v10389_v20 }
 0x594   : > { %v5437_v45 = vsel %vm1211_vm10, %v5433_v24, %v10360_v25  ;;  %v6065_v25 = vld [vmem:[%s10796_s2] sm:$0xff] }
 0x595   : > { %5573 = vmatpush.msra.mxu3 %v6056_v50 }
 0x597   : > { %5327 = vrot.lane.b32.xlu1 %v11440_v28, %s11415_s25  ;;  %5574 = vmatpush.msra.mxu3 %v6057_v2 }
 0x598   : > { %5359 = vrot.lane.b32.xlu0 %v11441_v30, %s6105_s12 }
 0x599   : > { %v10438_v39 = vpop.permute.xlu1 %5211  ;;  %v4308_v54 = vpop.f32.mrf.mxu2  ;;  %5575 = vmatpush.msra.mxu3 %v6058_v58  ;;  %5391 = vrot.lane.b32.xlu2 %v11442_v31, %s11380_s7 }
 0x59a   : > { %v4309_v60 = vadd.f32 1e-05, %v4308_v54  ;;  %v10445_v57 = vpop.permute.xlu0 %5227 }
 0x59b   : > { %5576 = vmatpush.msra.mxu3 %v6059_v38  ;;  %v10465_v12 = vpop.permute.xlu2 %5197 }
 0x59c   : > { %5948 = vrsqrt.f32 %v4309_v60  ;;  %vm4333_vm15 = vweird.f32 %v4309_v60 }
 0x59d   : > { %5577 = vmatpush.msra.mxu3 %v6060_v26 }
 0x59f   : > { %5375 = vrot.lane.b32.xlu1 %v11443_v63, %s6106_s13  ;;  %5578 = vmatpush.msra.mxu3 %v6061_v43 }
 0x5a1   : > { %v5338_v0 = vpop.permute.xlu1 %5337  ;;  %5579 = vmatpush.msra.mxu3 %v6062_v8 }
 0x5a2   : > { %v5949_v21 = vpop.eup %5948  ;;  %v5354_v49 = vpop.permute.xlu0 %5353  ;;  %v5441_v56 = vsel %vm11444_vm14, %v5437_v45, %v5338_v0  ;;  %v5122_v0 = vld [vmem:[#allocation2 + $0xe8] sm:$0xff] }
 0x5a3   : > { %v4328_v10 = vmul.f32 %v5949_v21, %v4309_v60  ;;  %5580 = vmatpush.msra.mxu3 %v6063_v42  ;;  %v5445_v36 = vsel %vm1221_vm12, %v5441_v56, %v5354_v49  ;;  %vm4334_vm4 = vweird.f32 %v5949_v21  ;;  %v10486_v32 = vpop.permute.xlu2 %5323 }
 0x5a4   : > { %v5449_v59 = vsel %vm11445_vm11, %v5445_v36, %v10403_v15  ;;  %vm4335_vm14 = vmor %vm4333_vm15, %vm4334_vm4  ;;  %vm11448_vm4 = vcmask 130048   ;;  %vm11449_vm11 = vcmask 785408   ;;  %vm11450_vm15 = vcmask 916480  }
 0x5a5   : > { %v4329_v52 = vmul.f32 %v5949_v21, %v4328_v10  ;;  %5581 = vmatpush.msra.mxu3 %v6064_v9  ;;  %v5402_v2 = vsel %vm11448_vm4, %v5398_v44, %v10348_v19 }
 0x5a6   : > { %v5406_v17 = vsel %vm1173_vm3, %v5402_v2, %v10438_v39 }
 0x5a7   : > { %v4330_v51 = vmul.f32 0.5, %v4329_v52  ;;  %5582 = vmatpush.msra.mxu3 %v6065_v25  ;;  %v5410_v31 = vsel %vm352_vm0, %v5406_v17, %v10445_v57 }
 0x5a8   : > { %v5414_v5 = vsel %vm1182_vm6, %v5410_v31, %v10374_v4 }
 0x5a9   : > { %v4331_v40 = vsub.f32 1.5, %v4330_v51  ;;  %v5260_v27 = vpop.permute.xlu1 %5259 }
 0x5aa   : > { %v5386_v61 = vpop.permute.xlu0 %5385  ;;  %v5418_v14 = vsel %vm1187_vm5, %v5414_v5, %v5260_v27 }
 0x5ab   : > { %v10483_v34 = vsel %vm11446_vm13, %v5449_v59, %v5386_v61  ;;  %v4332_v35 = vmul.f32 %v5949_v21, %v4331_v40  ;;  %v10499_v50 = vpop.permute.xlu2 %5245  ;;  %v5422_v49 = vsel %vm1192_vm7, %v5418_v14, %v5122_v0 }
 0x5ac   : > { %5473 = vmatmul.f32.vlgmr.msra.gmra.mxu1 %v10483_v34 }
 0x5ad   : > { %v4336_v37 = vsel %vm4335_vm14, %v5949_v21, %v4332_v35  ;;  %vm11451_vm14 = vcmask 982016  }
 0x5ae   : > { %v4358_v18 = vmul.f32 %v4336_v37, %v11447_v16 }
 0x5b0   : > { %4380 = vmatmul.f32.gmra.mxu3 %v4358_v18 }
 0x5b1   : > { %v5276_v7 = vpop.permute.xlu1 %5275 }
 0x5b2   : > { %v10489_v22 = vpop.permute.xlu0 %5181  ;;  %v4874_v6 = vpop.f32.mrf.mxu1  ;;  %v5426_v45 = vsel %vm754_vm1, %v5422_v49, %v5276_v7 }
 0x5b3   : > { %v10492_v15 = vsub.f32 %v10177_v46, %v4874_v6  ;;  %v5372_v26 = vpop.permute.xlu2 %5371 }
 0x5b5   : > { %v4888_v33 = vmul.f32 %v10492_v15, %v10492_v15  ;;  %v3775_v11 = vpop.f32.mrf.mxu3 }
 0x5b6   : > { %v3787_v28 = vmul.f32 %v10126_v1, %v3775_v11 }
 0x5b7   : > { %4910 = vmatmul.f32.gmra.mxu2 %v4888_v33 }
 0x5b8   : > { %v3791_v46 = vadd.f32 %v10134_v62, %v3787_v28 }
 0x5b9   : > { %v5292_v29 = vpop.permute.xlu1 %5291 }
 0x5ba   : > { %v5308_v20 = vpop.permute.xlu0 %5307  ;;  %v3799_v30 = vrot.slane %v3791_v46, 1  ;;  %v3800_v54 = vrot.slane %v3791_v46, 2  ;;  %v3801_v58 = vrot.slane %v3791_v46, 3  ;;  %3855 = vst [vmem:[%s9315_s15 + $0x4] sm:$0x1] %v3791_v46  ;;  %v3802_v48 = vrot.slane %v3791_v46, 4 }
 0x5bb   : > { %v3803_v19 = vrot.slane %v3791_v46, 5  ;;  %v3804_v60 = vrot.slane %v3791_v46, 6  ;;  %v3805_v38 = vrot.slane %v3791_v46, 7  ;;  %v5430_v52 = vsel %vm1201_vm8, %v5426_v45, %v5292_v29  ;;  %v10538_v27 = vpop.permute.xlu2 %5167 }
 0x5bc   : > { %3856 = vst [vmem:[%s9315_s15 + $0xc] sm:$0x1] %v3799_v30  ;;  %v5434_v36 = vsel %vm1206_vm9, %v5430_v52, %v5308_v20 }
 0x5bd   : > { %3857 = vst [vmem:[%s9315_s15 + $0x14] sm:$0x1] %v3800_v54  ;;  %v3778_v23 = vpop.f32.mrf.mxu3  ;;  %v5438_v61 = vsel %vm1211_vm10, %v5434_v36, %v10486_v32 }
 0x5be   : > { %3858 = vst [vmem:[%s9315_s15 + $0x1c] sm:$0x1] %v3801_v58  ;;  %v3788_v39 = vmul.f32 %v10126_v1, %v3778_v23 }
 0x5bf   : > { %3859 = vst [vmem:[%s9315_s15 + $0x24] sm:$0x1] %v3802_v48 }
 0x5c0   : > { %3860 = vst [vmem:[%s9315_s15 + $0x2c] sm:$0x1] %v3803_v19  ;;  %v3792_v57 = vadd.f32 %v10134_v62, %v3788_v39 }
 0x5c1   : > { %v10520_v63 = vpop.permute.xlu1 %5213  ;;  %3861 = vst [vmem:[%s9315_s15 + $0x34] sm:$0x1] %v3804_v60  ;;  %v4311_v43 = vpop.f32.mrf.mxu2 }
 0x5c2   : > { %v10523_v24 = vpop.permute.xlu0 %5229  ;;  %3862 = vst [vmem:[%s9315_s15 + $0x3c] sm:$0x1] %v3805_v38  ;;  %v3806_v4 = vrot.slane %v3792_v57, 1  ;;  %v3807_v8 = vrot.slane %v3792_v57, 2  ;;  %v3808_v21 = vrot.slane %v3792_v57, 3  ;;  %v3809_v10 = vrot.slane %v3792_v57, 4 }
 0x5c3   : > { %3863 = vst [vmem:[%s9315_s15 + $0x44] sm:$0x1] %v3792_v57  ;;  %v3810_v42 = vrot.slane %v3792_v57, 5  ;;  %v4312_v56 = vadd.f32 1e-05, %v4311_v43  ;;  %v3811_v9 = vrot.slane %v3792_v57, 6  ;;  %v10554_v48 = vpop.permute.xlu2 %5199 }
 0x5c4   : > { %3864 = vst [vmem:[%s9315_s15 + $0x4c] sm:$0x1] %v3806_v4  ;;  %v3812_v51 = vrot.slane %v3792_v57, 7  ;;  %v5399_v57 = vsel %vm1163_vm2, %v10434_v3, %v10489_v22 }
 0x5c5   : > { %3865 = vst [vmem:[%s9315_s15 + $0x54] sm:$0x1] %v3807_v8  ;;  %5950 = vrsqrt.f32 %v4312_v56  ;;  %vm4343_vm4 = vweird.f32 %v4312_v56 }
 0x5c6   : > { %3866 = vst [vmem:[%s9315_s15 + $0x5c] sm:$0x1] %v3808_v21 }
 0x5c7   : > { %3867 = vst [vmem:[%s9315_s15 + $0x64] sm:$0x1] %v3809_v10 }
 0x5c8   : > { %3868 = vst [vmem:[%s9315_s15 + $0x6c] sm:$0x1] %v3810_v42 }
 0x5c9   : > { %v5340_v25 = vpop.permute.xlu1 %5339  ;;  %3869 = vst [vmem:[%s9315_s15 + $0x74] sm:$0x1] %v3811_v9 }
 0x5ca   : > { %v5356_v40 = vpop.permute.xlu0 %5355  ;;  %3870 = vst [vmem:[%s9315_s15 + $0x7c] sm:$0x1] %v3812_v51  ;;  %v5442_v35 = vsel %vm11449_vm11, %v5438_v61, %v5340_v25 }
 0x5cb   : > { %v5951_v59 = vpop.eup %5950  ;;  %v5446_v44 = vsel %vm1221_vm12, %v5442_v35, %v5356_v40  ;;  %v5326_v0 = vpop.permute.xlu2 %5325 }
 0x5cc   : > { %v3781_v37 = vpop.f32.mrf.mxu3  ;;  %v4338_v16 = vmul.f32 %v5951_v59, %v4312_v56  ;;  %v5450_v17 = vsel %vm11450_vm15, %v5446_v44, %v5372_v26  ;;  %vm4344_vm13 = vweird.f32 %v5951_v59  ;;  %vm11452_vm15 = vcmask 130048  }
 0x5cd   : > { %v3789_v18 = vmul.f32 %v10126_v1, %v3781_v37  ;;  %vm4345_vm11 = vmor %vm4343_vm4, %vm4344_vm13  ;;  %vm11453_vm13 = vcmask 785408  }
 0x5ce   : > { %v4339_v7 = vmul.f32 %v5951_v59, %v4338_v16 }
 0x5cf   : > { %v3793_v6 = vadd.f32 %v10134_v62, %v3789_v18 }
 0x5d0   : > { %v4340_v11 = vmul.f32 0.5, %v4339_v7 }
 0x5d1   : > { %v5262_v33 = vpop.permute.xlu1 %5261  ;;  %v3813_v28 = vrot.slane %v3793_v6, 1  ;;  %v3814_v2 = vrot.slane %v3793_v6, 2  ;;  %v3815_v46 = vrot.slane %v3793_v6, 3  ;;  %3871 = vst [vmem:[%s9315_s15 + $0x84] sm:$0x1] %v3793_v6  ;;  %v3816_v29 = vrot.slane %v3793_v6, 4 }
 0x5d2   : > { %v5388_v32 = vpop.permute.xlu0 %5387  ;;  %v4341_v20 = vsub.f32 1.5, %v4340_v11  ;;  %v3817_v30 = vrot.slane %v3793_v6, 5  ;;  %v3818_v58 = vrot.slane %v3793_v6, 6  ;;  %v3819_v31 = vrot.slane %v3793_v6, 7 }
 0x5d3   : > { %3872 = vst [vmem:[%s9315_s15 + $0x8c] sm:$0x1] %v3813_v28  ;;  %v10550_v54 = vsel %vm11451_vm14, %v5450_v17, %v5388_v32  ;;  %v5248_v51 = vpop.permute.xlu2 %5247  ;;  %vm11454_vm14 = vmmov %vm11452_vm15 }
 0x5d4   : > { %3873 = vst [vmem:[%s9315_s15 + $0x94] sm:$0x1] %v3814_v2  ;;  %5476 = vmatmul.f32.gmra.mxu1 %v10550_v54  ;;  %v4342_v19 = vmul.f32 %v5951_v59, %v4341_v20 }
 0x5d5   : > { %3874 = vst [vmem:[%s9315_s15 + $0x9c] sm:$0x1] %v3815_v46 }
 0x5d6   : > { %3875 = vst [vmem:[%s9315_s15 + $0xa4] sm:$0x1] %v3816_v29  ;;  %v4346_v60 = vsel %vm4345_vm11, %v5951_v59, %v4342_v19  ;;  %vm11455_vm11 = vcmask 916480  }
 0x5d7   : > { %3876 = vst [vmem:[%s9315_s15 + $0xac] sm:$0x1] %v3817_v30  ;;  %v4359_v23 = vmul.f32 %v4346_v60, %v10202_v47 }
 0x5d8   : > { %3877 = vst [vmem:[%s9315_s15 + $0xb4] sm:$0x1] %v3818_v58 }
 0x5d9   : > { %v5278_v38 = vpop.permute.xlu1 %5277  ;;  %v4877_v39 = vpop.f32.mrf.mxu1  ;;  %3878 = vst [vmem:[%s9315_s15 + $0xbc] sm:$0x1] %v3819_v31  ;;  %4383 = vmatmul.f32.gmra.mxu3 %v4359_v23 }
 0x5da   : > { %v10563_v5 = vsub.f32 %v10300_v55, %v4877_v39  ;;  %v5184_v14 = vpop.permute.xlu0 %5183  ;;  %v5403_v55 = vsel %vm11452_vm15, %v5399_v57, %v10465_v12 }
 0x5db   : > { %v5407_v4 = vsel %vm1173_vm3, %v5403_v55, %v10520_v63  ;;  %v5374_v6 = vpop.permute.xlu2 %5373 }
 0x5dc   : > { %v4889_v26 = vmul.f32 %v10563_v5, %v10563_v5 }
 0x5dd   : > { %v3784_v43 = vpop.f32.mrf.mxu3 }
 0x5de   : > { %4913 = vmatmul.f32.gmra.mxu2 %v4889_v26  ;;  %v3790_v47 = vmul.f32 %v10126_v1, %v3784_v43  ;;  %v5411_v1 = vsel %vm352_vm0, %v5407_v4, %v10523_v24  ;;  %v5123_v24 = vld [vmem:[#allocation2 + $0xf0] sm:$0xff]  ;;  %v5124_v26 = vld [vmem:[#allocation2 + $0xf8] sm:$0xff] }
 0x5e0   : > { %v3794_v8 = vadd.f32 %v10134_v62, %v3790_v47  ;;  %v5415_v62 = vsel %vm1182_vm6, %v5411_v1, %v10499_v50 }
 0x5e1   : > { %v5294_v21 = vpop.permute.xlu1 %5293  ;;  %v5419_v56 = vsel %vm1187_vm5, %v5415_v62, %v5262_v33  ;;  %v5400_v33 = vsel %vm1163_vm2, %v10538_v27, %v5184_v14 }
 0x5e2   : > { %v5310_v49 = vpop.permute.xlu0 %5309  ;;  %v3820_v3 = vrot.slane %v3794_v8, 1  ;;  %v3821_v22 = vrot.slane %v3794_v8, 2  ;;  %v3822_v10 = vrot.slane %v3794_v8, 3  ;;  %3879 = vst [vmem:[%s9315_s15 + $0xc4] sm:$0x1] %v3794_v8  ;;  %v3823_v12 = vrot.slane %v3794_v8, 4 }
 0x5e3   : > { %v3824_v45 = vrot.slane %v3794_v8, 5  ;;  %v3825_v42 = vrot.slane %v3794_v8, 6  ;;  %v3826_v63 = vrot.slane %v3794_v8, 7  ;;  %v5423_v40 = vsel %vm1192_vm7, %v5419_v56, %v5123_v24 }
 0x5e4   : > { %3880 = vst [vmem:[%s9315_s15 + $0xcc] sm:$0x1] %v3820_v3  ;;  %v5427_v61 = vsel %vm754_vm1, %v5423_v40, %v5278_v38  ;;  %v5404_v46 = vsel %vm11454_vm14, %v5400_v33, %v10554_v48  ;;  %v5296_v48 = vpop.permute.xlu2 %5295  ;;  %v10623_v3 = vld [vmem:[%s10798_s4] ss:$0 sm:$0xff] }
 0x5e5   : > { %3881 = vst [vmem:[%s9315_s15 + $0xd4] sm:$0x1] %v3821_v22  ;;  %v5431_v50 = vsel %vm1201_vm8, %v5427_v61, %v5294_v21 }
 0x5e6   : > { %3882 = vst [vmem:[%s9315_s15 + $0xdc] sm:$0x1] %v3822_v10  ;;  %v5435_v59 = vsel %vm1206_vm9, %v5431_v50, %v5310_v49 }
 0x5e7   : > { %3883 = vst [vmem:[%s9315_s15 + $0xe4] sm:$0x1] %v3823_v12  ;;  %v5439_v7 = vsel %vm1211_vm10, %v5435_v59, %v5326_v0  ;;  %v10630_v12 = vld [vmem:[%s10799_s5] ss:$0 sm:$0xff] }
 0x5e8   : > { %3884 = vst [vmem:[%s9315_s15 + $0xec] sm:$0x1] %v3824_v45 }
 0x5e9   : > { %v4314_v52 = vpop.f32.mrf.mxu2  ;;  %v5216_v9 = vpop.permute.xlu1 %5215  ;;  %3885 = vst [vmem:[%s9315_s15 + $0xf4] sm:$0x1] %v3825_v42 }
 0x5ea   : > { %v4315_v36 = vadd.f32 1e-05, %v4314_v52  ;;  %v5232_v25 = vpop.permute.xlu0 %5231  ;;  %3886 = vst [vmem:[%s9315_s15 + $0xfc] sm:$0x1] %v3826_v63  ;;  %v5408_v29 = vsel %vm1173_vm3, %v5404_v46, %v5216_v9 }
 0x5eb   : > { %v5412_v31 = vsel %vm352_vm0, %v5408_v29, %v5232_v25  ;;  %vm11457_vm0 = vcmask 785408  }
 0x5ec   : > { %5952 = vrsqrt.f32 %v4315_v36  ;;  %vm4353_vm15 = vweird.f32 %v4315_v36  ;;  %v5416_v23 = vsel %vm1182_vm6, %v5412_v31, %v5248_v51  ;;  %v5344_v4 = vpop.permute.xlu2 %5343 }
 0x5f1   : > { %v5342_v35 = vpop.permute.xlu1 %5341 }
 0x5f2   : > { %v5953_v37 = vpop.eup %5952  ;;  %v5358_v16 = vpop.permute.xlu0 %5357  ;;  %v5443_v44 = vsel %vm11453_vm13, %v5439_v7, %v5342_v35  ;;  %vm11456_vm13 = vcmask 982016  }
 0x5f3   : > { %v4348_v18 = vmul.f32 %v5953_v37, %v4315_v36  ;;  %v5447_v2 = vsel %vm1221_vm12, %v5443_v44, %v5358_v16  ;;  %vm4354_vm4 = vweird.f32 %v5953_v37  ;;  %vm11459_vm3 = vmmov %vm11456_vm13 }
 0x5f4   : > { %v5451_v30 = vsel %vm11455_vm11, %v5447_v2, %v5374_v6  ;;  %vm4355_vm2 = vmor %vm4353_vm15, %vm4354_vm4  ;;  %v5392_v24 = vpop.permute.xlu2 %5391 }
 0x5f5   : > { %v4349_v11 = vmul.f32 %v5953_v37, %v4348_v18 }
 0x5f7   : > { %v4350_v28 = vmul.f32 0.5, %v4349_v11 }
 0x5f9   : > { %v4351_v32 = vsub.f32 1.5, %v4350_v28  ;;  %v5264_v17 = vpop.permute.xlu1 %5263 }
 0x5fa   : > { %v5390_v20 = vpop.permute.xlu0 %5389  ;;  %v5420_v38 = vsel %vm1187_vm5, %v5416_v23, %v5264_v17 }
 0x5fb   : > { %v10603_v58 = vsel %vm11456_vm13, %v5451_v30, %v5390_v20  ;;  %v4352_v27 = vmul.f32 %v5953_v37, %v4351_v32  ;;  %v5424_v43 = vsel %vm1192_vm7, %v5420_v38, %v5124_v26 }
 0x5fc   : > { %5479 = vmatmul.f32.gmra.mxu1 %v10603_v58 }
 0x5fd   : > { %v4356_v19 = vsel %vm4355_vm2, %v5953_v37, %v4352_v27 }
 0x5fe   : > { %v4360_v60 = vmul.f32 %v4356_v19, %v10309_v41 }
 0x600   : > { %4386 = vmatmul.f32.gmra.mxu3 %v4360_v60 }
 0x601   : > { %v5280_v39 = vpop.permute.xlu1 %5279  ;;  %v4880_v14 = vpop.f32.mrf.mxu1 }
 0x602   : > { %v10611_v57 = vsub.f32 %v10372_v13, %v4880_v14  ;;  %v5428_v47 = vsel %vm754_vm1, %v5424_v43, %v5280_v39  ;;  %v5312_v0 = vpop.permute.xlu0 %5311  ;;  %vm11458_vm1 = vmmov %vm11455_vm11 }
 0x603   : > { %v5432_v41 = vsel %vm1201_vm8, %v5428_v47, %v5296_v48 }
 0x604   : > { %v4890_v55 = vmul.f32 %v10611_v57, %v10611_v57  ;;  %v5436_v21 = vsel %vm1206_vm9, %v5432_v41, %v5312_v0 }
 0x606   : > { %4916 = vmatmul.f32.gmra.mxu2 %v4890_v55 }
 0x609   : > { %v5328_v8 = vpop.permute.xlu1 %5327 }
 0x60a   : > { %v5440_v49 = vsel %vm1211_vm10, %v5436_v21, %v5328_v8  ;;  %v5360_v10 = vpop.permute.xlu0 %5359 }
 0x60b   : > { %v4378_v13 = vpop.f32.mrf.mxu3  ;;  %v5444_v1 = vsel %vm11457_vm0, %v5440_v49, %v5344_v4 }
 0x60c   : > { %v4390_v22 = vmul.f32 %v10623_v3, %v4378_v13  ;;  %v5448_v56 = vsel %vm1221_vm12, %v5444_v1, %v5360_v10 }
 0x60e   : > { %v4394_v45 = vadd.f32 %v10630_v12, %v4390_v22 }
 0x610   : > { %v4402_v42 = vrot.slane %v4394_v45, 1  ;;  %v4403_v62 = vrot.slane %v4394_v45, 2  ;;  %v4404_v63 = vrot.slane %v4394_v45, 3  ;;  %4458 = vst [vmem:[%s9315_s15 + $0x5] sm:$0x1] %v4394_v45  ;;  %v4405_v52 = vrot.slane %v4394_v45, 4 }
 0x611   : > { %v5376_v9 = vpop.permute.xlu1 %5375  ;;  %v4908_v51 = vpop.f32.mrf.mxu2  ;;  %v4406_v36 = vrot.slane %v4394_v45, 5  ;;  %v4407_v61 = vrot.slane %v4394_v45, 6  ;;  %v4408_v59 = vrot.slane %v4394_v45, 7 }
 0x612   : > { %4459 = vst [vmem:[%s9315_s15 + $0xd] sm:$0x1] %v4402_v42  ;;  %v5452_v25 = vsel %vm11458_vm1, %v5448_v56, %v5376_v9  ;;  %v4909_v40 = vadd.f32 1e-05, %v4908_v51 }
 0x613   : > { %4460 = vst [vmem:[%s9315_s15 + $0x15] sm:$0x1] %v4403_v62  ;;  %v10639_v50 = vsel %vm11459_vm3, %v5452_v25, %v5392_v24 }
 0x614   : > { %4461 = vst [vmem:[%s9315_s15 + $0x1d] sm:$0x1] %v4404_v63  ;;  %5954 = vrsqrt.f32 %v4909_v40  ;;  %5482 = vmatmul.f32.gmra.mxu1 %v10639_v50  ;;  %vm4926_vm6 = vweird.f32 %v4909_v40 }
 0x615   : > { %4462 = vst [vmem:[%s9315_s15 + $0x25] sm:$0x1] %v4405_v52 }
 0x616   : > { %4463 = vst [vmem:[%s9315_s15 + $0x2d] sm:$0x1] %v4406_v36 }
 0x617   : > { %4464 = vst [vmem:[%s9315_s15 + $0x35] sm:$0x1] %v4407_v61 }
 0x618   : > { %4465 = vst [vmem:[%s9315_s15 + $0x3d] sm:$0x1] %v4408_v59 }
 0x61a   : > { %v5955_v35 = vpop.eup %5954 }
 0x61b   : > { %v4921_v37 = vmul.f32 %v5955_v35, %v4909_v40  ;;  %vm4927_vm5 = vweird.f32 %v5955_v35 }
 0x61c   : > { %vm4928_vm7 = vmor %vm4926_vm6, %vm4927_vm5 }
 0x61d   : > { %v4922_v16 = vmul.f32 %v5955_v35, %v4921_v37 }
 0x61f   : > { %v4923_v18 = vmul.f32 0.5, %v4922_v16 }
 0x621   : > { %v4924_v7 = vsub.f32 1.5, %v4923_v18 }
 0x623   : > { %v4925_v6 = vmul.f32 %v5955_v35, %v4924_v7 }
 0x625   : > { %v4929_v44 = vsel %vm4928_vm7, %v5955_v35, %v4925_v6 }
 0x626   : > { %v4960_v33 = vmul.f32 %v4929_v44, %v10387_v53 }
 0x628   : > { %4980 = vmatmul.f32.vlgmr.msrb.gmra.mxu3 %v4960_v33 }
 0x629   : > { %v5474_v11 = vpop.f32.mrf.mxu1 }
 0x62a   : > { %v10649_v28 = vsub.f32 %v10483_v34, %v5474_v11 }
 0x62c   : > { %v5490_v2 = vmul.f32 %v10649_v28, %v10649_v28 }
 0x62e   : > { %5510 = vmatmul.f32.vlgmr.msra.gmra.mxu2 %v5490_v2 }
 0x633   : > { %v4381_v46 = vpop.f32.mrf.mxu3 }
 0x634   : > { %v4391_v32 = vmul.f32 %v10623_v3, %v4381_v46 }
 0x636   : > { %v4395_v29 = vadd.f32 %v10630_v12, %v4391_v32 }
 0x638   : > { %v4409_v17 = vrot.slane %v4395_v29, 1  ;;  %v4410_v53 = vrot.slane %v4395_v29, 2  ;;  %v4411_v20 = vrot.slane %v4395_v29, 3  ;;  %4466 = vst [vmem:[%s9315_s15 + $0x45] sm:$0x1] %v4395_v29  ;;  %v4412_v34 = vrot.slane %v4395_v29, 4 }
 0x639   : > { %v4413_v30 = vrot.slane %v4395_v29, 5  ;;  %v4414_v27 = vrot.slane %v4395_v29, 6  ;;  %v4415_v19 = vrot.slane %v4395_v29, 7 }
 0x63a   : > { %4467 = vst [vmem:[%s9315_s15 + $0x4d] sm:$0x1] %v4409_v17  ;;  %v4911_v31 = vpop.f32.mrf.mxu2 }
 0x63b   : > { %4468 = vst [vmem:[%s9315_s15 + $0x55] sm:$0x1] %v4410_v53  ;;  %v4912_v48 = vadd.f32 1e-05, %v4911_v31 }
 0x63c   : > { %4469 = vst [vmem:[%s9315_s15 + $0x5d] sm:$0x1] %v4411_v20 }
 0x63d   : > { %4470 = vst [vmem:[%s9315_s15 + $0x65] sm:$0x1] %v4412_v34  ;;  %5956 = vrsqrt.f32 %v4912_v48  ;;  %vm4936_vm9 = vweird.f32 %v4912_v48 }
 0x63e   : > { %4471 = vst [vmem:[%s9315_s15 + $0x6d] sm:$0x1] %v4413_v30 }
 0x63f   : > { %4472 = vst [vmem:[%s9315_s15 + $0x75] sm:$0x1] %v4414_v27 }
 0x640   : > { %4473 = vst [vmem:[%s9315_s15 + $0x7d] sm:$0x1] %v4415_v19 }
 0x643   : > { %v5957_v60 = vpop.eup %5956 }
 0x644   : > { %v4931_v23 = vmul.f32 %v5957_v60, %v4912_v48  ;;  %vm4937_vm8 = vweird.f32 %v5957_v60 }
 0x645   : > { %vm4938_vm10 = vmor %vm4936_vm9, %vm4937_vm8 }
 0x646   : > { %v4932_v38 = vmul.f32 %v5957_v60, %v4931_v23 }
 0x648   : > { %v4933_v39 = vmul.f32 0.5, %v4932_v38 }
 0x64a   : > { %v4934_v14 = vsub.f32 1.5, %v4933_v39 }
 0x64c   : > { %v4935_v26 = vmul.f32 %v5957_v60, %v4934_v14 }
 0x64e   : > { %v4939_v43 = vsel %vm4938_vm10, %v5957_v60, %v4935_v26 }
 0x64f   : > { %v4961_v47 = vmul.f32 %v4939_v43, %v10492_v15 }
 0x651   : > { %4983 = vmatmul.f32.gmra.mxu3 %v4961_v47  ;;  %v5477_v55 = vpop.f32.mrf.mxu1 }
 0x652   : > { %v10665_v0 = vsub.f32 %v10550_v54, %v5477_v55 }
 0x654   : > { %v5491_v41 = vmul.f32 %v10665_v0, %v10665_v0 }
 0x656   : > { %5513 = vmatmul.f32.gmra.mxu2 %v5491_v41 }
 0x65c   : > { %v4384_v4 = vpop.f32.mrf.mxu3 }
 0x65d   : > { %v4392_v8 = vmul.f32 %v10623_v3, %v4384_v4 }
 0x65f   : > { %v4396_v21 = vadd.f32 %v10630_v12, %v4392_v8 }
 0x661   : > { %v4914_v15 = vpop.f32.mrf.mxu2  ;;  %v4416_v13 = vrot.slane %v4396_v21, 1  ;;  %v4417_v54 = vrot.slane %v4396_v21, 2  ;;  %v4418_v22 = vrot.slane %v4396_v21, 3  ;;  %4474 = vst [vmem:[%s9315_s15 + $0x85] sm:$0x1] %v4396_v21  ;;  %v4419_v10 = vrot.slane %v4396_v21, 4 }
 0x662   : > { %v4915_v49 = vadd.f32 1e-05, %v4914_v15  ;;  %v4420_v1 = vrot.slane %v4396_v21, 5  ;;  %v4421_v45 = vrot.slane %v4396_v21, 6  ;;  %v4422_v42 = vrot.slane %v4396_v21, 7 }
 0x663   : > { %4475 = vst [vmem:[%s9315_s15 + $0x8d] sm:$0x1] %v4416_v13 }
 0x664   : > { %5958 = vrsqrt.f32 %v4915_v49  ;;  %4476 = vst [vmem:[%s9315_s15 + $0x95] sm:$0x1] %v4417_v54  ;;  %vm4946_vm14 = vweird.f32 %v4915_v49 }
 0x665   : > { %4477 = vst [vmem:[%s9315_s15 + $0x9d] sm:$0x1] %v4418_v22 }
 0x666   : > { %4478 = vst [vmem:[%s9315_s15 + $0xa5] sm:$0x1] %v4419_v10 }
 0x667   : > { %4479 = vst [vmem:[%s9315_s15 + $0xad] sm:$0x1] %v4420_v1 }
 0x668   : > { %4480 = vst [vmem:[%s9315_s15 + $0xb5] sm:$0x1] %v4421_v45 }
 0x669   : > { %4481 = vst [vmem:[%s9315_s15 + $0xbd] sm:$0x1] %v4422_v42 }
 0x66a   : > { %v5959_v62 = vpop.eup %5958 }
 0x66b   : > { %v4941_v63 = vmul.f32 %v5959_v62, %v4915_v49  ;;  %vm4947_vm12 = vweird.f32 %v5959_v62 }
 0x66c   : > { %vm4948_vm4 = vmor %vm4946_vm14, %vm4947_vm12 }
 0x66d   : > { %v4942_v56 = vmul.f32 %v5959_v62, %v4941_v63 }
 0x66f   : > { %v4943_v52 = vmul.f32 0.5, %v4942_v56 }
 0x671   : > { %v4944_v9 = vsub.f32 1.5, %v4943_v52 }
 0x673   : > { %v4945_v51 = vmul.f32 %v5959_v62, %v4944_v9 }
 0x675   : > { %v4949_v24 = vsel %vm4948_vm4, %v5959_v62, %v4945_v51 }
 0x676   : > { %v4962_v36 = vmul.f32 %v4949_v24, %v10563_v5 }
 0x678   : > { %4986 = vmatmul.f32.gmra.mxu3 %v4962_v36 }
 0x679   : > { %v5480_v25 = vpop.f32.mrf.mxu1 }
 0x67a   : > { %v10681_v40 = vsub.f32 %v10603_v58, %v5480_v25 }
 0x67c   : > { %v5492_v61 = vmul.f32 %v10681_v40, %v10681_v40 }
 0x67e   : > { %5516 = vmatmul.f32.gmra.mxu2 %v5492_v61 }
 0x683   : > { %v4387_v59 = vpop.f32.mrf.mxu3 }
 0x684   : > { %v4393_v35 = vmul.f32 %v10623_v3, %v4387_v59 }
 0x686   : > { %v4397_v37 = vadd.f32 %v10630_v12, %v4393_v35 }
 0x688   : > { %v4423_v5 = vrot.slane %v4397_v37, 1  ;;  %v4424_v16 = vrot.slane %v4397_v37, 2  ;;  %v4425_v18 = vrot.slane %v4397_v37, 3  ;;  %4482 = vst [vmem:[%s9315_s15 + $0xc5] sm:$0x1] %v4397_v37  ;;  %v4426_v58 = vrot.slane %v4397_v37, 4 }
 0x689   : > { %v4917_v7 = vpop.f32.mrf.mxu2  ;;  %v4427_v6 = vrot.slane %v4397_v37, 5  ;;  %v4428_v33 = vrot.slane %v4397_v37, 6  ;;  %v4429_v11 = vrot.slane %v4397_v37, 7 }
 0x68a   : > { %4483 = vst [vmem:[%s9315_s15 + $0xcd] sm:$0x1] %v4423_v5  ;;  %v4918_v44 = vadd.f32 1e-05, %v4917_v7 }
 0x68b   : > { %4484 = vst [vmem:[%s9315_s15 + $0xd5] sm:$0x1] %v4424_v16 }
 0x68c   : > { %4485 = vst [vmem:[%s9315_s15 + $0xdd] sm:$0x1] %v4425_v18  ;;  %5960 = vrsqrt.f32 %v4918_v44  ;;  %vm4956_vm15 = vweird.f32 %v4918_v44 }
 0x68d   : > { %4486 = vst [vmem:[%s9315_s15 + $0xe5] sm:$0x1] %v4426_v58 }
 0x68e   : > { %4487 = vst [vmem:[%s9315_s15 + $0xed] sm:$0x1] %v4427_v6 }
 0x68f   : > { %4488 = vst [vmem:[%s9315_s15 + $0xf5] sm:$0x1] %v4428_v33 }
 0x690   : > { %4489 = vst [vmem:[%s9315_s15 + $0xfd] sm:$0x1] %v4429_v11 }
 0x691   : > { %v5483_v2 = vpop.f32.mrf.mxu1 }
 0x692   : > { %v5961_v46 = vpop.eup %5960  ;;  %v10696_v32 = vsub.f32 %v10639_v50, %v5483_v2 }
 0x693   : > { %v4951_v29 = vmul.f32 %v5961_v46, %v4918_v44  ;;  %vm4957_vm11 = vweird.f32 %v5961_v46 }
 0x694   : > { %v5493_v17 = vmul.f32 %v10696_v32, %v10696_v32  ;;  %vm4958_vm13 = vmor %vm4956_vm15, %vm4957_vm11 }
 0x695   : > { %v4952_v53 = vmul.f32 %v5961_v46, %v4951_v29 }
 0x696   : > { %5519 = vmatmul.f32.gmra.mxu2 %v5493_v17 }
 0x697   : > { %v4953_v20 = vmul.f32 0.5, %v4952_v53 }
 0x699   : > { %v4954_v34 = vsub.f32 1.5, %v4953_v20 }
 0x69b   : > { %v4955_v30 = vmul.f32 %v5961_v46, %v4954_v34 }
 0x69d   : > { %v4959_v27 = vsel %vm4958_vm13, %v5961_v46, %v4955_v30 }
 0x69e   : > { %v4963_v31 = vmul.f32 %v4959_v27, %v10611_v57 }
 0x6a0   : > { %4989 = vmatmul.f32.gmra.mxu3 %v4963_v31 }
 0x6ab   : > { %v4981_v50 = vpop.f32.mrf.mxu3 }
 0x6ac   : > { %v4993_v19 = vmul.f32 %v10623_v3, %v4981_v50 }
 0x6ae   : > { %v4997_v48 = vadd.f32 %v10630_v12, %v4993_v19 }
 0x6b0   : > { %v5005_v60 = vrot.slane %v4997_v48, 1  ;;  %v5006_v23 = vrot.slane %v4997_v48, 2  ;;  %v5007_v38 = vrot.slane %v4997_v48, 3  ;;  %5061 = vst [vmem:[%s9315_s15 + $0x6] sm:$0x1] %v4997_v48  ;;  %v5008_v39 = vrot.slane %v4997_v48, 4 }
 0x6b1   : > { %v5511_v14 = vpop.f32.mrf.mxu2  ;;  %v5009_v26 = vrot.slane %v4997_v48, 5  ;;  %v5010_v43 = vrot.slane %v4997_v48, 6  ;;  %v5011_v47 = vrot.slane %v4997_v48, 7 }
 0x6b2   : > { %5062 = vst [vmem:[%s9315_s15 + $0xe] sm:$0x1] %v5005_v60  ;;  %v5512_v57 = vadd.f32 1e-05, %v5511_v14 }
 0x6b3   : > { %5063 = vst [vmem:[%s9315_s15 + $0x16] sm:$0x1] %v5006_v23 }
 0x6b4   : > { %5064 = vst [vmem:[%s9315_s15 + $0x1e] sm:$0x1] %v5007_v38  ;;  %5962 = vrsqrt.f32 %v5512_v57  ;;  %vm5529_vm0 = vweird.f32 %v5512_v57 }
 0x6b5   : > { %5065 = vst [vmem:[%s9315_s15 + $0x26] sm:$0x1] %v5008_v39 }
 0x6b6   : > { %5066 = vst [vmem:[%s9315_s15 + $0x2e] sm:$0x1] %v5009_v26 }
 0x6b7   : > { %5067 = vst [vmem:[%s9315_s15 + $0x36] sm:$0x1] %v5010_v43 }
 0x6b8   : > { %5068 = vst [vmem:[%s9315_s15 + $0x3e] sm:$0x1] %v5011_v47 }
 0x6ba   : > { %v5963_v55 = vpop.eup %5962 }
 0x6bb   : > { %v5524_v41 = vmul.f32 %v5963_v55, %v5512_v57  ;;  %vm5530_vm2 = vweird.f32 %v5963_v55 }
 0x6bc   : > { %vm5531_vm1 = vmor %vm5529_vm0, %vm5530_vm2 }
 0x6bd   : > { %v5525_v4 = vmul.f32 %v5963_v55, %v5524_v41 }
 0x6bf   : > { %v5526_v8 = vmul.f32 0.5, %v5525_v4 }
 0x6c1   : > { %v5527_v21 = vsub.f32 1.5, %v5526_v8 }
 0x6c3   : > { %v5528_v15 = vmul.f32 %v5963_v55, %v5527_v21 }
 0x6c5   : > { %v5532_v49 = vsel %vm5531_vm1, %v5963_v55, %v5528_v15 }
 0x6c6   : > { %v5563_v13 = vmul.f32 %v5532_v49, %v10649_v28 }
 0x6c8   : > { %5583 = vmatmul.f32.vlgmr.msra.gmra.mxu3 %v5563_v13 }
 0x6d4   : > { %v4984_v54 = vpop.f32.mrf.mxu3 }
 0x6d5   : > { %v4994_v22 = vmul.f32 %v10623_v3, %v4984_v54 }
 0x6d7   : > { %v4998_v10 = vadd.f32 %v10630_v12, %v4994_v22 }
 0x6d9   : > { %v5012_v1 = vrot.slane %v4998_v10, 1  ;;  %v5013_v45 = vrot.slane %v4998_v10, 2  ;;  %v5014_v42 = vrot.slane %v4998_v10, 3  ;;  %5069 = vst [vmem:[%s9315_s15 + $0x46] sm:$0x1] %v4998_v10  ;;  %v5514_v62 = vpop.f32.mrf.mxu2  ;;  %v5015_v63 = vrot.slane %v4998_v10, 4 }
 0x6da   : > { %v5515_v56 = vadd.f32 1e-05, %v5514_v62  ;;  %v5016_v52 = vrot.slane %v4998_v10, 5  ;;  %v5017_v28 = vrot.slane %v4998_v10, 6  ;;  %v5018_v9 = vrot.slane %v4998_v10, 7 }
 0x6db   : > { %5070 = vst [vmem:[%s9315_s15 + $0x4e] sm:$0x1] %v5012_v1 }
 0x6dc   : > { %5071 = vst [vmem:[%s9315_s15 + $0x56] sm:$0x1] %v5013_v45  ;;  %5964 = vrsqrt.f32 %v5515_v56  ;;  %vm5539_vm5 = vweird.f32 %v5515_v56 }
 0x6dd   : > { %5072 = vst [vmem:[%s9315_s15 + $0x5e] sm:$0x1] %v5014_v42 }
 0x6de   : > { %5073 = vst [vmem:[%s9315_s15 + $0x66] sm:$0x1] %v5015_v63 }
 0x6df   : > { %5074 = vst [vmem:[%s9315_s15 + $0x6e] sm:$0x1] %v5016_v52 }
 0x6e0   : > { %5075 = vst [vmem:[%s9315_s15 + $0x76] sm:$0x1] %v5017_v28 }
 0x6e1   : > { %5076 = vst [vmem:[%s9315_s15 + $0x7e] sm:$0x1] %v5018_v9 }
 0x6e2   : > { %v5965_v51 = vpop.eup %5964 }
 0x6e3   : > { %v5534_v24 = vmul.f32 %v5965_v51, %v5515_v56  ;;  %vm5540_vm3 = vweird.f32 %v5965_v51 }
 0x6e4   : > { %vm5541_vm6 = vmor %vm5539_vm5, %vm5540_vm3 }
 0x6e5   : > { %v5535_v36 = vmul.f32 %v5965_v51, %v5534_v24 }
 0x6e7   : > { %v5536_v25 = vmul.f32 0.5, %v5535_v36 }
 0x6e9   : > { %v5537_v61 = vsub.f32 1.5, %v5536_v25 }
 0x6eb   : > { %v5538_v59 = vmul.f32 %v5965_v51, %v5537_v61 }
 0x6ed   : > { %v5542_v35 = vsel %vm5541_vm6, %v5965_v51, %v5538_v59 }
 0x6ee   : > { %v5564_v37 = vmul.f32 %v5542_v35, %v10665_v0 }
 0x6f0   : > { %5586 = vmatmul.f32.gmra.mxu3 %v5564_v37 }
 0x6fb   : > { %v4987_v5 = vpop.f32.mrf.mxu3 }
 0x6fc   : > { %v4995_v16 = vmul.f32 %v10623_v3, %v4987_v5 }
 0x6fe   : > { %v4999_v18 = vadd.f32 %v10630_v12, %v4995_v16 }
 0x700   : > { %v5019_v58 = vrot.slane %v4999_v18, 1  ;;  %v5020_v7 = vrot.slane %v4999_v18, 2  ;;  %v5021_v6 = vrot.slane %v4999_v18, 3  ;;  %5077 = vst [vmem:[%s9315_s15 + $0x86] sm:$0x1] %v4999_v18  ;;  %v5022_v44 = vrot.slane %v4999_v18, 4 }
 0x701   : > { %v5517_v33 = vpop.f32.mrf.mxu2  ;;  %v5023_v11 = vrot.slane %v4999_v18, 5  ;;  %v5024_v2 = vrot.slane %v4999_v18, 6  ;;  %v5025_v46 = vrot.slane %v4999_v18, 7 }
 0x702   : > { %5078 = vst [vmem:[%s9315_s15 + $0x8e] sm:$0x1] %v5019_v58  ;;  %v5518_v0 = vadd.f32 1e-05, %v5517_v33 }
 0x703   : > { %5079 = vst [vmem:[%s9315_s15 + $0x96] sm:$0x1] %v5020_v7 }
 0x704   : > { %5080 = vst [vmem:[%s9315_s15 + $0x9e] sm:$0x1] %v5021_v6  ;;  %5966 = vrsqrt.f32 %v5518_v0  ;;  %vm5549_vm8 = vweird.f32 %v5518_v0 }
 0x705   : > { %5081 = vst [vmem:[%s9315_s15 + $0xa6] sm:$0x1] %v5022_v44 }
 0x706   : > { %5082 = vst [vmem:[%s9315_s15 + $0xae] sm:$0x1] %v5023_v11 }
 0x707   : > { %5083 = vst [vmem:[%s9315_s15 + $0xb6] sm:$0x1] %v5024_v2 }
 0x708   : > { %5084 = vst [vmem:[%s9315_s15 + $0xbe] sm:$0x1] %v5025_v46 }
 0x70a   : > { %v5967_v29 = vpop.eup %5966 }
 0x70b   : > { %v5544_v17 = vmul.f32 %v5967_v29, %v5518_v0  ;;  %vm5550_vm7 = vweird.f32 %v5967_v29 }
 0x70c   : > { %vm5551_vm9 = vmor %vm5549_vm8, %vm5550_vm7 }
 0x70d   : > { %v5545_v53 = vmul.f32 %v5967_v29, %v5544_v17 }
 0x70f   : > { %v5546_v20 = vmul.f32 0.5, %v5545_v53 }
 0x711   : > { %v5547_v34 = vsub.f32 1.5, %v5546_v20 }
 0x713   : > { %v5548_v30 = vmul.f32 %v5967_v29, %v5547_v34 }
 0x715   : > { %v5552_v27 = vsel %vm5551_vm9, %v5967_v29, %v5548_v30 }
 0x716   : > { %v5565_v31 = vmul.f32 %v5552_v27, %v10681_v40 }
 0x718   : > { %5589 = vmatmul.f32.gmra.mxu3 %v5565_v31 }
 0x719   : > { %v5520_v50 = vpop.f32.mrf.mxu2 }
 0x71a   : > { %v5521_v19 = vadd.f32 1e-05, %v5520_v50 }
 0x71c   : > { %5968 = vrsqrt.f32 %v5521_v19  ;;  %vm5559_vm12 = vweird.f32 %v5521_v19 }
 0x722   : > { %v5969_v48 = vpop.eup %5968 }
 0x723   : > { %v5554_v60 = vmul.f32 %v5969_v48, %v5521_v19  ;;  %v4990_v23 = vpop.f32.mrf.mxu3  ;;  %vm5560_vm10 = vweird.f32 %v5969_v48 }
 0x724   : > { %v4996_v38 = vmul.f32 %v10623_v3, %v4990_v23  ;;  %vm5561_vm14 = vmor %vm5559_vm12, %vm5560_vm10 }
 0x725   : > { %v5555_v39 = vmul.f32 %v5969_v48, %v5554_v60 }
 0x726   : > { %v5000_v14 = vadd.f32 %v10630_v12, %v4996_v38 }
 0x727   : > { %v5556_v26 = vmul.f32 0.5, %v5555_v39 }
 0x728   : > { %v5026_v57 = vrot.slane %v5000_v14, 1  ;;  %v5027_v43 = vrot.slane %v5000_v14, 2  ;;  %v5028_v40 = vrot.slane %v5000_v14, 3  ;;  %5085 = vst [vmem:[%s9315_s15 + $0xc6] sm:$0x1] %v5000_v14  ;;  %v5029_v55 = vrot.slane %v5000_v14, 4 }
 0x729   : > { %v5557_v47 = vsub.f32 1.5, %v5556_v26  ;;  %v5030_v41 = vrot.slane %v5000_v14, 5  ;;  %v5031_v8 = vrot.slane %v5000_v14, 6  ;;  %v5032_v21 = vrot.slane %v5000_v14, 7 }
 0x72a   : > { %5086 = vst [vmem:[%s9315_s15 + $0xce] sm:$0x1] %v5026_v57 }
 0x72b   : > { %v5558_v4 = vmul.f32 %v5969_v48, %v5557_v47  ;;  %5087 = vst [vmem:[%s9315_s15 + $0xd6] sm:$0x1] %v5027_v43 }
 0x72c   : > { %5088 = vst [vmem:[%s9315_s15 + $0xde] sm:$0x1] %v5028_v40 }
 0x72d   : > { %5089 = vst [vmem:[%s9315_s15 + $0xe6] sm:$0x1] %v5029_v55  ;;  %v5562_v15 = vsel %vm5561_vm14, %v5969_v48, %v5558_v4 }
 0x72e   : > { %5090 = vst [vmem:[%s9315_s15 + $0xee] sm:$0x1] %v5030_v41  ;;  %v5566_v49 = vmul.f32 %v5562_v15, %v10696_v32 }
 0x72f   : > { %5091 = vst [vmem:[%s9315_s15 + $0xf6] sm:$0x1] %v5031_v8 }
 0x730   : > { %5092 = vst [vmem:[%s9315_s15 + $0xfe] sm:$0x1] %v5032_v21  ;;  %5592 = vmatmul.f32.gmra.mxu3 %v5566_v49 }
 0x74b   : > { %v5584_v13 = vpop.f32.mrf.mxu3 }
 0x74c   : > { %v5596_v54 = vmul.f32 %v10623_v3, %v5584_v13 }
 0x74e   : > { %v5600_v22 = vadd.f32 %v10630_v12, %v5596_v54 }
 0x750   : > { %v5608_v10 = vrot.slane %v5600_v22, 1  ;;  %v5609_v1 = vrot.slane %v5600_v22, 2  ;;  %v5610_v45 = vrot.slane %v5600_v22, 3  ;;  %5664 = vst [vmem:[%s9315_s15 + $0x7] sm:$0x1] %v5600_v22  ;;  %v5611_v42 = vrot.slane %v5600_v22, 4 }
 0x751   : > { %v5612_v62 = vrot.slane %v5600_v22, 5  ;;  %v5613_v32 = vrot.slane %v5600_v22, 6  ;;  %v5614_v63 = vrot.slane %v5600_v22, 7 }
 0x752   : > { %5665 = vst [vmem:[%s9315_s15 + $0xf] sm:$0x1] %v5608_v10 }
 0x753   : > { %5666 = vst [vmem:[%s9315_s15 + $0x17] sm:$0x1] %v5609_v1 }
 0x754   : > { %5667 = vst [vmem:[%s9315_s15 + $0x1f] sm:$0x1] %v5610_v45 }
 0x755   : > { %5668 = vst [vmem:[%s9315_s15 + $0x27] sm:$0x1] %v5611_v42 }
 0x756   : > { %5669 = vst [vmem:[%s9315_s15 + $0x2f] sm:$0x1] %v5612_v62 }
 0x757   : > { %5670 = vst [vmem:[%s9315_s15 + $0x37] sm:$0x1] %v5613_v32 }
 0x758   : > { %5671 = vst [vmem:[%s9315_s15 + $0x3f] sm:$0x1] %v5614_v63 }
 0x773   : > { %v5587_v56 = vpop.f32.mrf.mxu3 }
 0x774   : > { %v5597_v52 = vmul.f32 %v10623_v3, %v5587_v56 }
 0x776   : > { %v5601_v28 = vadd.f32 %v10630_v12, %v5597_v52 }
 0x778   : > { %v5615_v9 = vrot.slane %v5601_v28, 1  ;;  %v5616_v51 = vrot.slane %v5601_v28, 2  ;;  %v5617_v24 = vrot.slane %v5601_v28, 3  ;;  %5672 = vst [vmem:[%s9315_s15 + $0x47] sm:$0x1] %v5601_v28  ;;  %v5618_v36 = vrot.slane %v5601_v28, 4 }
 0x779   : > { %v5619_v25 = vrot.slane %v5601_v28, 5  ;;  %v5620_v61 = vrot.slane %v5601_v28, 6  ;;  %v5621_v59 = vrot.slane %v5601_v28, 7 }
 0x77a   : > { %5673 = vst [vmem:[%s9315_s15 + $0x4f] sm:$0x1] %v5615_v9 }
 0x77b   : > { %5674 = vst [vmem:[%s9315_s15 + $0x57] sm:$0x1] %v5616_v51 }
 0x77c   : > { %5675 = vst [vmem:[%s9315_s15 + $0x5f] sm:$0x1] %v5617_v24 }
 0x77d   : > { %5676 = vst [vmem:[%s9315_s15 + $0x67] sm:$0x1] %v5618_v36 }
 0x77e   : > { %5677 = vst [vmem:[%s9315_s15 + $0x6f] sm:$0x1] %v5619_v25 }
 0x77f   : > { %5678 = vst [vmem:[%s9315_s15 + $0x77] sm:$0x1] %v5620_v61 }
 0x780   : > { %5679 = vst [vmem:[%s9315_s15 + $0x7f] sm:$0x1] %v5621_v59 }
 0x79b   : > { %v5590_v35 = vpop.f32.mrf.mxu3 }
 0x79c   : > { %v5598_v37 = vmul.f32 %v10623_v3, %v5590_v35 }
 0x79e   : > { %v5602_v5 = vadd.f32 %v10630_v12, %v5598_v37 }
 0x7a0   : > { %v5622_v16 = vrot.slane %v5602_v5, 1  ;;  %v5623_v18 = vrot.slane %v5602_v5, 2  ;;  %v5624_v58 = vrot.slane %v5602_v5, 3  ;;  %5680 = vst [vmem:[%s9315_s15 + $0x87] sm:$0x1] %v5602_v5  ;;  %v5625_v7 = vrot.slane %v5602_v5, 4 }
 0x7a1   : > { %v5626_v6 = vrot.slane %v5602_v5, 5  ;;  %v5627_v44 = vrot.slane %v5602_v5, 6  ;;  %v5628_v33 = vrot.slane %v5602_v5, 7 }
 0x7a2   : > { %5681 = vst [vmem:[%s9315_s15 + $0x8f] sm:$0x1] %v5622_v16 }
 0x7a3   : > { %5682 = vst [vmem:[%s9315_s15 + $0x97] sm:$0x1] %v5623_v18 }
 0x7a4   : > { %5683 = vst [vmem:[%s9315_s15 + $0x9f] sm:$0x1] %v5624_v58 }
 0x7a5   : > { %5684 = vst [vmem:[%s9315_s15 + $0xa7] sm:$0x1] %v5625_v7 }
 0x7a6   : > { %5685 = vst [vmem:[%s9315_s15 + $0xaf] sm:$0x1] %v5626_v6 }
 0x7a7   : > { %5686 = vst [vmem:[%s9315_s15 + $0xb7] sm:$0x1] %v5627_v44 }
 0x7a8   : > { %5687 = vst [vmem:[%s9315_s15 + $0xbf] sm:$0x1] %v5628_v33 }
 0x7b3   : > { %v5593_v11 = vpop.f32.mrf.mxu3 }
 0x7b4   : > { %v5599_v0 = vmul.f32 %v10623_v3, %v5593_v11 }
 0x7b6   : > { %v5603_v2 = vadd.f32 %v10630_v12, %v5599_v0 }
 0x7b8   : > { %v5629_v46 = vrot.slane %v5603_v2, 1  ;;  %v5630_v29 = vrot.slane %v5603_v2, 2  ;;  %v5631_v17 = vrot.slane %v5603_v2, 3  ;;  %5688 = vst [vmem:[%s9315_s15 + $0xc7] sm:$0x1] %v5603_v2  ;;  %v5632_v53 = vrot.slane %v5603_v2, 4 }
 0x7b9   : > { %v5633_v20 = vrot.slane %v5603_v2, 5  ;;  %v5634_v34 = vrot.slane %v5603_v2, 6  ;;  %v5635_v30 = vrot.slane %v5603_v2, 7 }
 0x7ba   : > { %5689 = vst [vmem:[%s9315_s15 + $0xcf] sm:$0x1] %v5629_v46 }
 0x7bb   : > { %5690 = vst [vmem:[%s9315_s15 + $0xd7] sm:$0x1] %v5630_v29 }
 0x7bc   : > { %5691 = vst [vmem:[%s9315_s15 + $0xdf] sm:$0x1] %v5631_v17 }
 0x7bd   : > { %5692 = vst [vmem:[%s9315_s15 + $0xe7] sm:$0x1] %v5632_v53 }
 0x7be   : > { %5693 = vst [vmem:[%s9315_s15 + $0xef] sm:$0x1] %v5633_v20 }
 0x7bf   : > { %5694 = vst [vmem:[%s9315_s15 + $0xf7] sm:$0x1] %v5634_v34 }
 0x7c0   : > { %5695 = vst [vmem:[%s9315_s15 + $0xff] sm:$0x1] %v5635_v30 }
 0x7c1 PF: > { %s16_s23 = sadd.s32 1, %s6090_s23   ;;  %s11460_s21 = smov %s6086_s22 }
 0x7c2   : > { %p13_p6 = scmp.ge.s32.totalorder %s16_s23, 4   ;;  %s11461_s22 = smov %s11463_s24 }
 0x7c4   :  { %15 = sbr.rel (!%p13_p6) target bundleno = 2 (0x2), region = 74 }

</bundles_post_ra>
